<compile_context>
chip_gen: v6e
topology: v6e:2x2x1
jax: 0.10.0
libtpu: 0.0.40
codegen_flags: <defaults>
</compile_context>

<pallas_src>
import jax
import jax.numpy as jnp
from jax import lax
from jax.experimental import pallas as pl
from jax.experimental.pallas import tpu as pltpu


def _mish(z):
    # Mish(z) = z * tanh(softplus(z)) = z * (e^2 + 2e) / (e^2 + 2e + 2), e=e^z.
    # One exp + one EUP reciprocal; the clamp keeps e^2 finite in f32 (for
    # z > 20 the ratio is 1 to within ~1e-16 anyway).
    e = jnp.exp(jnp.minimum(z, 20.0))
    n = e * (e + 2.0)
    return z * n * pl.reciprocal(n + 2.0, approx=True)


# ----------------------------------------------------------------------------
# Fused kernel: both Conv+BN+Mish branches, one batch-block per grid step.
# ----------------------------------------------------------------------------
def _ffmv1_kernel(x_ref, y_ref, w3_ref, w1_ref, s3_ref, b3_ref, s1_ref, b1_ref,
                  red_ref, up_ref):
    # x_ref   : (NB, H+2, W+2, 512) bf16  spatially zero-padded input tile
    # y_ref   : (NB*Hs*Ws, 1024)    bf16  1x1-conv input rows (lane = channels)
    # w3_ref  : (3, 3*512, 256)     bf16  3x3 weights, (kw, Cin) flattened per kh
    # w1_ref  : (1024, 512)         bf16
    # s*_ref  : (1, Cout)           f32   folded BN scale / bias (+conv bias)
    # red_ref : (NB*H*W, 256)       f32
    # up_ref  : (NB*Hs*Ws, 512)     f32   quarter-res; upsampled by XLA epilogue
    NB, Hp, Wp, Cin3 = x_ref.shape
    H, W = Hp - 2, Wp - 2
    M3 = red_ref.shape[0]                     # == NB * H * W

    # ---- 3x3 conv: 3 bf16 matmuls with K = 3*Cin (im2col over kw on lanes) --
    def dy_term(dy):
        # Three W-shifted taps read straight from the padded input ref; the
        # lane-dim concat matches the (kh, kw*Cin) flattening of w3.
        left = x_ref[:, pl.ds(dy, H), 0:W, :]
        mid = x_ref[:, pl.ds(dy, H), 1:W + 1, :]
        right = x_ref[:, pl.ds(dy, H), 2:W + 2, :]
        patch = jnp.concatenate([left, mid, right], axis=-1)   # (NB,H,W,3*Cin)
        patch = patch.reshape(M3, 3 * Cin3)
        return jnp.dot(patch, w3_ref[dy], preferred_element_type=jnp.float32)

    # Unrolled fori_loop bounds each im2col patch's live range to its own
    # iteration; the accumulator is seeded by the dy=0 matmul.
    acc = lax.fori_loop(1, 3, lambda dy, a: a + dy_term(dy), dy_term(0),
                        unroll=True)

    red_ref[...] = _mish(acc * s3_ref[0] + b3_ref[0]).astype(red_ref.dtype)

    # ---- 1x1 conv on y: single bf16 matmul, f32 accumulate/epilogue ---------
    z1 = jnp.dot(y_ref[...], w1_ref[...], preferred_element_type=jnp.float32)
    up_ref[...] = _mish(z1 * s1_ref[0] + b1_ref[0]).astype(up_ref.dtype)


# ----------------------------------------------------------------------------
# Pallas wrapper
# ----------------------------------------------------------------------------
def _ffmv1_pallas(xp, y, w3, w1, s3, b3, s1, b1, *, batch_block):
    N, Hp, Wp, Cin3 = xp.shape
    H, W = Hp - 2, Wp - 2
    _, Hs, Ws, Cin1 = y.shape
    C3 = w3.shape[-1]
    C1 = w1.shape[-1]
    NB = batch_block
    m3, m1 = NB * H * W, NB * Hs * Ws

    # Contiguous-major collapse: free at the XLA level, removes packed-dtype
    # reshapes from the kernel for the 1x1 branch and both outputs.
    y2 = y.reshape(N * Hs * Ws, Cin1)

    resident = pl.Buffered(1)   # constant index_map -> single VMEM buffer

    red2, up2 = pl.pallas_call(
        _ffmv1_kernel,
        out_shape=(jax.ShapeDtypeStruct((N * H * W, C3), jnp.float32),
                   jax.ShapeDtypeStruct((N * Hs * Ws, C1), jnp.float32)),
        grid_spec=pltpu.PrefetchScalarGridSpec(
            num_scalar_prefetch=0,
            grid=(N // NB,),
            in_specs=[
                pl.BlockSpec((NB, Hp, Wp, Cin3), lambda n: (n, 0, 0, 0)),
                pl.BlockSpec((m1, Cin1), lambda n: (n, 0)),
                # Weights / folded BN: fetched once, kept resident, single
                # buffer (default double-buffering would be pure VMEM waste).
                pl.BlockSpec((3, 3 * Cin3, C3), lambda n: (0, 0, 0),
                             pipeline_mode=resident),
                pl.BlockSpec((Cin1, C1), lambda n: (0, 0),
                             pipeline_mode=resident),
                pl.BlockSpec((1, C3), lambda n: (0, 0), pipeline_mode=resident),
                pl.BlockSpec((1, C3), lambda n: (0, 0), pipeline_mode=resident),
                pl.BlockSpec((1, C1), lambda n: (0, 0), pipeline_mode=resident),
                pl.BlockSpec((1, C1), lambda n: (0, 0), pipeline_mode=resident),
            ],
            out_specs=[
                pl.BlockSpec((m3, C3), lambda n: (n, 0)),
                pl.BlockSpec((m1, C1), lambda n: (n, 0)),
            ],
        ),
        compiler_params=pltpu.CompilerParams(
            dimension_semantics=("parallel",),
            # Re-budgeted for v7x's 64 MiB/TC: ~14 MB of BlockSpec buffers
            # (bf16 inputs, single-buffered weights) + bounded im2col temps.
            vmem_limit_bytes=40 * 1024 * 1024,
        ),
    )(xp, y2, w3, w1, s3, b3, s1, b1)

    return red2.reshape(N, H, W, C3), up2.reshape(N, Hs, Ws, C1)


def _fold_bn(conv_bias, gamma, beta, running_mean, running_var, eps=1e-5):
    """Fold conv bias + BN (eval mode) into per-channel scale & bias."""
    scale = gamma / jnp.sqrt(running_var + eps)
    bias = (conv_bias - running_mean) * scale + beta
    return scale[None, :].astype(jnp.float32), bias[None, :].astype(jnp.float32)


def _pick_batch_block(n, hw, target_m=512):
    """Images per grid step: aim for MXU M ~ target_m, keep >= 2 grid steps."""
    cap = max(1, n // 2)                       # >= 2 steps -> both v7x TCs busy
    want = max(1, min(cap, -(-target_m // hw)))
    for nb in range(want, 0, -1):              # prefer M % 256 == 0 (v6e/v7x MXU)
        if n % nb == 0 and (nb * hw) % 256 == 0:
            return nb
    for nb in range(want, 0, -1):
        if n % nb == 0:
            return nb
    return 1


@jax.jit
def ffmv1_forward(x_nchw, y_nchw, params):
    """FFMv1.forward: x (N,512,H,W), y (N,1024,H/2,W/2) -> (N,768,H,W) f32."""
    N, _, H, W = x_nchw.shape

    # NCHW -> NHWC + bf16 cast + 1-px spatial zero halo for the 3x3 conv, all
    # folded by XLA into the one pass that must materialize the transposed
    # tensor anyway (replaces the per-step in-kernel halo copy).
    x = jnp.pad(jnp.transpose(x_nchw, (0, 2, 3, 1)).astype(jnp.bfloat16),
                ((0, 0), (1, 1), (1, 1), (0, 0)))
    y = jnp.transpose(y_nchw, (0, 2, 3, 1)).astype(jnp.bfloat16)

    r_scale, r_bias = _fold_bn(params["reduce"]["b"], params["reduce"]["gamma"],
                               params["reduce"]["beta"], params["reduce"]["mean"],
                               params["reduce"]["var"])
    u_scale, u_bias = _fold_bn(params["up"]["b"], params["up"]["gamma"],
                               params["up"]["beta"], params["up"]["mean"],
                               params["up"]["var"])

    # bf16 MXU operands; (3,3,Cin,Cout) -> (3, 3*Cin, Cout): kw taps stacked
    # along K in the same order as the in-kernel lane-dim im2col concat.
    w3 = params["reduce"]["w"].astype(jnp.bfloat16)
    w3 = w3.reshape(3, 3 * w3.shape[2], w3.shape[3])
    w1 = params["up"]["w"].astype(jnp.bfloat16)

    nb = _pick_batch_block(N, H * W)
    red, up = _ffmv1_pallas(x, y, w3, w1, r_scale, r_bias, u_scale, u_bias,
                            batch_block=nb)

    # TODO(synk): emitting the 2x-upsampled branch straight from the kernel
    # needs a sublane-interleaving reshape / stride-2 store with no clean
    # Mosaic lowering; keeping `up` at quarter resolution and letting XLA fuse
    # repeat (NHWC H/W axes, never the lane dim) + channel concat into the one
    # mandatory NCHW transpose also moves fewer total HBM bytes.
    up_full = jnp.repeat(jnp.repeat(up, 2, axis=1), 2, axis=2)    # (N,H,W,512)
    out = jnp.concatenate([red, up_full], axis=-1)                # (N,H,W,768)
    return jnp.transpose(out, (0, 3, 1, 2))                       # (N,768,H,W)


def init_params(key):
    """Deterministic parameter init mirroring the module's shapes."""
    ks = jax.random.split(key, 6)

    def bn(k, c):
        k1, k2, k3, k4 = jax.random.split(k, 4)
        return dict(
            gamma=1.0 + 0.1 * jax.random.normal(k1, (c,), jnp.float32),
            beta=0.1 * jax.random.normal(k2, (c,), jnp.float32),
            mean=0.05 * jax.random.normal(k3, (c,), jnp.float32),
            var=jnp.abs(1.0 + 0.1 * jax.random.normal(k4, (c,), jnp.float32)),
        )

    # reduce: Conv2d(512, 256, 3x3), weight stored as (kh, kw, Cin, Cout)
    reduce = dict(
        w=0.02 * jax.random.normal(ks[0], (3, 3, 512, 256), jnp.float32),
        b=0.02 * jax.random.normal(ks[1], (256,), jnp.float32),
        **bn(ks[2], 256),
    )
    # up_reduce: Conv2d(1024, 512, 1x1), weight stored as (Cin, Cout)
    up = dict(
        w=0.02 * jax.random.normal(ks[3], (1024, 512), jnp.float32),
        b=0.02 * jax.random.normal(ks[4], (512,), jnp.float32),
        **bn(ks[5], 512),
    )
    return dict(reduce=reduce, up=up)


if __name__ == "__main__":
    key = jax.random.PRNGKey(0)
    kp, kx, ky = jax.random.split(key, 3)

    params = init_params(kp)

    # Small spatial extents; channel counts fixed by the module (512 / 1024).
    N, H, W = 2, 8, 8
    x = jax.random.normal(kx, (N, 512, H, W), jnp.float32)            # NCHW
    y = jax.random.normal(ky, (N, 1024, H // 2, W // 2), jnp.float32)

    out = ffmv1_forward(x, y, params)
    jax.block_until_ready(out)

    assert out.shape == (N, 256 + 512, H, W), out.shape
    assert out.dtype == jnp.float32
    print("KERNEL_OK")
</pallas_src>

<mosaic_0001>
module attributes {stable_mosaic.version = 11 : i64} {
  func.func @_ffmv1_kernel(%arg0: i32, %arg1: memref<1x10x10x512xbf16, #tpu.memory_space<vmem>>, %arg2: memref<16x1024xbf16, #tpu.memory_space<vmem>>, %arg3: memref<3x1536x256xbf16, #tpu.memory_space<vmem>>, %arg4: memref<1024x512xbf16, #tpu.memory_space<vmem>>, %arg5: memref<1x256xf32, #tpu.memory_space<vmem>>, %arg6: memref<1x256xf32, #tpu.memory_space<vmem>>, %arg7: memref<1x512xf32, #tpu.memory_space<vmem>>, %arg8: memref<1x512xf32, #tpu.memory_space<vmem>>, %arg9: memref<64x256xf32, #tpu.memory_space<vmem>>, %arg10: memref<16x512xf32, #tpu.memory_space<vmem>>) attributes {dimension_semantics = [#tpu.dimension_semantics<parallel>], iteration_bounds = array<i64: 2>, scalar_prefetch = 0 : i64, scratch_operands = 0 : i64, tpu.core_type = #tpu.core_type<tc>, window_params = [{transform_indices = @transform_0, window_bounds = array<i64: 1, 10, 10, 512>}, {transform_indices = @transform_1, window_bounds = array<i64: 16, 1024>}, {pipeline_mode = #tpu.pipeline_mode<synchronous>, transform_indices = @transform_2, window_bounds = array<i64: 3, 1536, 256>}, {pipeline_mode = #tpu.pipeline_mode<synchronous>, transform_indices = @transform_3, window_bounds = array<i64: 1024, 512>}, {pipeline_mode = #tpu.pipeline_mode<synchronous>, transform_indices = @transform_4, window_bounds = array<i64: 1, 256>}, {pipeline_mode = #tpu.pipeline_mode<synchronous>, transform_indices = @transform_5, window_bounds = array<i64: 1, 256>}, {pipeline_mode = #tpu.pipeline_mode<synchronous>, transform_indices = @transform_6, window_bounds = array<i64: 1, 512>}, {pipeline_mode = #tpu.pipeline_mode<synchronous>, transform_indices = @transform_7, window_bounds = array<i64: 1, 512>}, {transform_indices = @transform_8, window_bounds = array<i64: 64, 256>}, {transform_indices = @transform_9, window_bounds = array<i64: 16, 512>}]} {
    %c0 = arith.constant 0 : index
    %c0_0 = arith.constant 0 : index
    %c0_1 = arith.constant 0 : index
    %c0_2 = arith.constant 0 : index
    %0 = vector.load %arg1[%c0, %c0_0, %c0_1, %c0_2] : memref<1x10x10x512xbf16, #tpu.memory_space<vmem>>, vector<1x8x8x512xbf16>
    %c0_3 = arith.constant 0 : index
    %c0_4 = arith.constant 0 : index
    %c1 = arith.constant 1 : index
    %c0_5 = arith.constant 0 : index
    %1 = vector.load %arg1[%c0_3, %c0_4, %c1, %c0_5] : memref<1x10x10x512xbf16, #tpu.memory_space<vmem>>, vector<1x8x8x512xbf16>
    %c0_6 = arith.constant 0 : index
    %c0_7 = arith.constant 0 : index
    %c2 = arith.constant 2 : index
    %c0_8 = arith.constant 0 : index
    %2 = vector.load %arg1[%c0_6, %c0_7, %c2, %c0_8] : memref<1x10x10x512xbf16, #tpu.memory_space<vmem>>, vector<1x8x8x512xbf16>
    %3 = tpu.concatenate %0, %1, %2 in 3 : vector<1x8x8x512xbf16>, vector<1x8x8x512xbf16>, vector<1x8x8x512xbf16> -> vector<1x8x8x1536xbf16>
    %4 = vector.shape_cast %3 : vector<1x8x8x1536xbf16> to vector<64x1536xbf16>
    %c0_9 = arith.constant 0 : index
    %c0_10 = arith.constant 0 : index
    %c0_11 = arith.constant 0 : index
    %5 = vector.load %arg3[%c0_9, %c0_10, %c0_11] : memref<3x1536x256xbf16, #tpu.memory_space<vmem>>, vector<1x1536x256xbf16>
    %6 = vector.shape_cast %5 : vector<1x1536x256xbf16> to vector<1536x256xbf16>
    %cst = arith.constant dense<0.000000e+00> : vector<64x256xf32>
    %7 = tpu.matmul %4, %6, %cst {dimension_numbers = #tpu.dot_dimension_numbers<[1], [0], [0], [1], [0, 0, 1, 1], [], []>} : vector<64x1536xbf16>, vector<1536x256xbf16>, vector<64x256xf32> -> vector<64x256xf32>
    %c1_i32 = arith.constant 1 : i32
    %c0_12 = arith.constant 0 : index
    %8 = arith.index_cast %c1_i32 : i32 to index
    %c0_13 = arith.constant 0 : index
    %c0_14 = arith.constant 0 : index
    %9 = vector.load %arg1[%c0_12, %8, %c0_13, %c0_14] : memref<1x10x10x512xbf16, #tpu.memory_space<vmem>>, vector<1x8x8x512xbf16>
    %c0_15 = arith.constant 0 : index
    %10 = arith.index_cast %c1_i32 : i32 to index
    %c1_16 = arith.constant 1 : index
    %c0_17 = arith.constant 0 : index
    %11 = vector.load %arg1[%c0_15, %10, %c1_16, %c0_17] : memref<1x10x10x512xbf16, #tpu.memory_space<vmem>>, vector<1x8x8x512xbf16>
    %c0_18 = arith.constant 0 : index
    %12 = arith.index_cast %c1_i32 : i32 to index
    %c2_19 = arith.constant 2 : index
    %c0_20 = arith.constant 0 : index
    %13 = vector.load %arg1[%c0_18, %12, %c2_19, %c0_20] : memref<1x10x10x512xbf16, #tpu.memory_space<vmem>>, vector<1x8x8x512xbf16>
    %14 = tpu.concatenate %9, %11, %13 in 3 : vector<1x8x8x512xbf16>, vector<1x8x8x512xbf16>, vector<1x8x8x512xbf16> -> vector<1x8x8x1536xbf16>
    %15 = vector.shape_cast %14 : vector<1x8x8x1536xbf16> to vector<64x1536xbf16>
    %16 = arith.index_cast %c1_i32 : i32 to index
    %c0_21 = arith.constant 0 : index
    %c0_22 = arith.constant 0 : index
    %17 = vector.load %arg3[%16, %c0_21, %c0_22] : memref<3x1536x256xbf16, #tpu.memory_space<vmem>>, vector<1x1536x256xbf16>
    %18 = vector.shape_cast %17 : vector<1x1536x256xbf16> to vector<1536x256xbf16>
    %cst_23 = arith.constant dense<0.000000e+00> : vector<64x256xf32>
    %19 = tpu.matmul %15, %18, %cst_23 {dimension_numbers = #tpu.dot_dimension_numbers<[1], [0], [0], [1], [0, 0, 1, 1], [], []>} : vector<64x1536xbf16>, vector<1536x256xbf16>, vector<64x256xf32> -> vector<64x256xf32>
    %20 = arith.addf %7, %19 : vector<64x256xf32>
    %c2_i32 = arith.constant 2 : i32
    %c0_24 = arith.constant 0 : index
    %21 = arith.index_cast %c2_i32 : i32 to index
    %c0_25 = arith.constant 0 : index
    %c0_26 = arith.constant 0 : index
    %22 = vector.load %arg1[%c0_24, %21, %c0_25, %c0_26] : memref<1x10x10x512xbf16, #tpu.memory_space<vmem>>, vector<1x8x8x512xbf16>
    %c0_27 = arith.constant 0 : index
    %23 = arith.index_cast %c2_i32 : i32 to index
    %c1_28 = arith.constant 1 : index
    %c0_29 = arith.constant 0 : index
    %24 = vector.load %arg1[%c0_27, %23, %c1_28, %c0_29] : memref<1x10x10x512xbf16, #tpu.memory_space<vmem>>, vector<1x8x8x512xbf16>
    %c0_30 = arith.constant 0 : index
    %25 = arith.index_cast %c2_i32 : i32 to index
    %c2_31 = arith.constant 2 : index
    %c0_32 = arith.constant 0 : index
    %26 = vector.load %arg1[%c0_30, %25, %c2_31, %c0_32] : memref<1x10x10x512xbf16, #tpu.memory_space<vmem>>, vector<1x8x8x512xbf16>
    %27 = tpu.concatenate %22, %24, %26 in 3 : vector<1x8x8x512xbf16>, vector<1x8x8x512xbf16>, vector<1x8x8x512xbf16> -> vector<1x8x8x1536xbf16>
    %28 = vector.shape_cast %27 : vector<1x8x8x1536xbf16> to vector<64x1536xbf16>
    %29 = arith.index_cast %c2_i32 : i32 to index
    %c0_33 = arith.constant 0 : index
    %c0_34 = arith.constant 0 : index
    %30 = vector.load %arg3[%29, %c0_33, %c0_34] : memref<3x1536x256xbf16, #tpu.memory_space<vmem>>, vector<1x1536x256xbf16>
    %31 = vector.shape_cast %30 : vector<1x1536x256xbf16> to vector<1536x256xbf16>
    %cst_35 = arith.constant dense<0.000000e+00> : vector<64x256xf32>
    %32 = tpu.matmul %28, %31, %cst_35 {dimension_numbers = #tpu.dot_dimension_numbers<[1], [0], [0], [1], [0, 0, 1, 1], [], []>} : vector<64x1536xbf16>, vector<1536x256xbf16>, vector<64x256xf32> -> vector<64x256xf32>
    %33 = arith.addf %20, %32 : vector<64x256xf32>
    %c2_i32_36 = arith.constant 2 : i32
    %c0_37 = arith.constant 0 : index
    %c0_38 = arith.constant 0 : index
    %34 = vector.load %arg5[%c0_37, %c0_38] : memref<1x256xf32, #tpu.memory_space<vmem>>, vector<1x256xf32>
    %35 = vector.shape_cast %34 : vector<1x256xf32> to vector<256xf32>
    %36 = vector.shape_cast %35 : vector<256xf32> to vector<1x256xf32>
    %37 = vector.broadcast %36 : vector<1x256xf32> to vector<64x256xf32>
    %38 = arith.mulf %33, %37 : vector<64x256xf32>
    %c0_39 = arith.constant 0 : index
    %c0_40 = arith.constant 0 : index
    %39 = vector.load %arg6[%c0_39, %c0_40] : memref<1x256xf32, #tpu.memory_space<vmem>>, vector<1x256xf32>
    %40 = vector.shape_cast %39 : vector<1x256xf32> to vector<256xf32>
    %41 = vector.shape_cast %40 : vector<256xf32> to vector<1x256xf32>
    %42 = vector.broadcast %41 : vector<1x256xf32> to vector<64x256xf32>
    %43 = arith.addf %38, %42 : vector<64x256xf32>
    %cst_41 = arith.constant 2.000000e+01 : f32
    %44 = vector.broadcast %cst_41 : f32 to vector<64x256xf32>
    %45 = arith.minimumf %43, %44 : vector<64x256xf32>
    %46 = math.exp %45 : vector<64x256xf32>
    %cst_42 = arith.constant 2.000000e+00 : f32
    %47 = vector.broadcast %cst_42 : f32 to vector<64x256xf32>
    %48 = arith.addf %46, %47 : vector<64x256xf32>
    %49 = arith.mulf %46, %48 : vector<64x256xf32>
    %50 = arith.mulf %43, %49 : vector<64x256xf32>
    %cst_43 = arith.constant 2.000000e+00 : f32
    %51 = vector.broadcast %cst_43 : f32 to vector<64x256xf32>
    %52 = arith.addf %49, %51 : vector<64x256xf32>
    %53 = tpu.reciprocal %52 {approx = true} : vector<64x256xf32> -> vector<64x256xf32>
    %54 = arith.mulf %50, %53 : vector<64x256xf32>
    %c0_44 = arith.constant 0 : index
    %c0_45 = arith.constant 0 : index
    %55 = vector.load %arg9[%c0_44, %c0_45] : memref<64x256xf32, #tpu.memory_space<vmem>>, vector<64x256xf32>
    tpu.vector_store %arg9[%c0_44, %c0_45], %54 {strides = array<i32>} : memref<64x256xf32, #tpu.memory_space<vmem>>, vector<64x256xf32>,
    %c0_46 = arith.constant 0 : index
    %c0_47 = arith.constant 0 : index
    %56 = vector.load %arg2[%c0_46, %c0_47] : memref<16x1024xbf16, #tpu.memory_space<vmem>>, vector<16x1024xbf16>
    %c0_48 = arith.constant 0 : index
    %c0_49 = arith.constant 0 : index
    %57 = vector.load %arg4[%c0_48, %c0_49] : memref<1024x512xbf16, #tpu.memory_space<vmem>>, vector<1024x512xbf16>
    %cst_50 = arith.constant dense<0.000000e+00> : vector<16x512xf32>
    %58 = tpu.matmul %56, %57, %cst_50 {dimension_numbers = #tpu.dot_dimension_numbers<[1], [0], [0], [1], [0, 0, 1, 1], [], []>} : vector<16x1024xbf16>, vector<1024x512xbf16>, vector<16x512xf32> -> vector<16x512xf32>
    %c0_51 = arith.constant 0 : index
    %c0_52 = arith.constant 0 : index
    %59 = vector.load %arg7[%c0_51, %c0_52] : memref<1x512xf32, #tpu.memory_space<vmem>>, vector<1x512xf32>
    %60 = vector.shape_cast %59 : vector<1x512xf32> to vector<512xf32>
    %61 = vector.shape_cast %60 : vector<512xf32> to vector<1x512xf32>
    %62 = vector.broadcast %61 : vector<1x512xf32> to vector<16x512xf32>
    %63 = arith.mulf %58, %62 : vector<16x512xf32>
    %c0_53 = arith.constant 0 : index
    %c0_54 = arith.constant 0 : index
    %64 = vector.load %arg8[%c0_53, %c0_54] : memref<1x512xf32, #tpu.memory_space<vmem>>, vector<1x512xf32>
    %65 = vector.shape_cast %64 : vector<1x512xf32> to vector<512xf32>
    %66 = vector.shape_cast %65 : vector<512xf32> to vector<1x512xf32>
    %67 = vector.broadcast %66 : vector<1x512xf32> to vector<16x512xf32>
    %68 = arith.addf %63, %67 : vector<16x512xf32>
    %cst_55 = arith.constant 2.000000e+01 : f32
    %69 = vector.broadcast %cst_55 : f32 to vector<16x512xf32>
    %70 = arith.minimumf %68, %69 : vector<16x512xf32>
    %71 = math.exp %70 : vector<16x512xf32>
    %cst_56 = arith.constant 2.000000e+00 : f32
    %72 = vector.broadcast %cst_56 : f32 to vector<16x512xf32>
    %73 = arith.addf %71, %72 : vector<16x512xf32>
    %74 = arith.mulf %71, %73 : vector<16x512xf32>
    %75 = arith.mulf %68, %74 : vector<16x512xf32>
    %cst_57 = arith.constant 2.000000e+00 : f32
    %76 = vector.broadcast %cst_57 : f32 to vector<16x512xf32>
    %77 = arith.addf %74, %76 : vector<16x512xf32>
    %78 = tpu.reciprocal %77 {approx = true} : vector<16x512xf32> -> vector<16x512xf32>
    %79 = arith.mulf %75, %78 : vector<16x512xf32>
    %c0_58 = arith.constant 0 : index
    %c0_59 = arith.constant 0 : index
    %80 = vector.load %arg10[%c0_58, %c0_59] : memref<16x512xf32, #tpu.memory_space<vmem>>, vector<16x512xf32>
    tpu.vector_store %arg10[%c0_58, %c0_59], %79 {strides = array<i32>} : memref<16x512xf32, #tpu.memory_space<vmem>>, vector<16x512xf32>,
    return
  }
  func.func @transform_0(%arg0: i32) -> (i32, i32, i32, i32) {
    %c0_i32 = arith.constant 0 : i32
    %c0_i32_0 = arith.constant 0 : i32
    %c0_i32_1 = arith.constant 0 : i32
    %c0_i32_2 = arith.constant 0 : i32
    return %arg0, %c0_i32, %c0_i32_0, %c0_i32_1 : i32, i32, i32, i32
  }
  func.func @transform_1(%arg0: i32) -> (i32, i32) {
    %c0_i32 = arith.constant 0 : i32
    %c0_i32_0 = arith.constant 0 : i32
    return %arg0, %c0_i32 : i32, i32
  }
  func.func @transform_2(%arg0: i32) -> (i32, i32, i32) {
    %c0_i32 = arith.constant 0 : i32
    %c0_i32_0 = arith.constant 0 : i32
    %c0_i32_1 = arith.constant 0 : i32
    %c0_i32_2 = arith.constant 0 : i32
    return %c0_i32, %c0_i32_0, %c0_i32_1 : i32, i32, i32
  }
  func.func @transform_3(%arg0: i32) -> (i32, i32) {
    %c0_i32 = arith.constant 0 : i32
    %c0_i32_0 = arith.constant 0 : i32
    %c0_i32_1 = arith.constant 0 : i32
    return %c0_i32, %c0_i32_0 : i32, i32
  }
  func.func @transform_4(%arg0: i32) -> (i32, i32) {
    %c0_i32 = arith.constant 0 : i32
    %c0_i32_0 = arith.constant 0 : i32
    %c0_i32_1 = arith.constant 0 : i32
    return %c0_i32, %c0_i32_0 : i32, i32
  }
  func.func @transform_5(%arg0: i32) -> (i32, i32) {
    %c0_i32 = arith.constant 0 : i32
    %c0_i32_0 = arith.constant 0 : i32
    %c0_i32_1 = arith.constant 0 : i32
    return %c0_i32, %c0_i32_0 : i32, i32
  }
  func.func @transform_6(%arg0: i32) -> (i32, i32) {
    %c0_i32 = arith.constant 0 : i32
    %c0_i32_0 = arith.constant 0 : i32
    %c0_i32_1 = arith.constant 0 : i32
    return %c0_i32, %c0_i32_0 : i32, i32
  }
  func.func @transform_7(%arg0: i32) -> (i32, i32) {
    %c0_i32 = arith.constant 0 : i32
    %c0_i32_0 = arith.constant 0 : i32
    %c0_i32_1 = arith.constant 0 : i32
    return %c0_i32, %c0_i32_0 : i32, i32
  }
  func.func @transform_8(%arg0: i32) -> (i32, i32) {
    %c0_i32 = arith.constant 0 : i32
    %c0_i32_0 = arith.constant 0 : i32
    return %arg0, %c0_i32 : i32, i32
  }
  func.func @transform_9(%arg0: i32) -> (i32, i32) {
    %c0_i32 = arith.constant 0 : i32
    %c0_i32_0 = arith.constant 0 : i32
    return %arg0, %c0_i32 : i32, i32
  }
}

</mosaic_0001>

<bundles_post_ra>
// kernel: ffmv1_forward.1
= control target key start
LH: loop header
LB: loop body
LE: loop exit
PB: predicated region body
PF: predicated region fallthrough
CT: control target
= control target key end

     0   :  { %s12876_s30 = smov 0   ;;  %s17913_s0 = inlined_call_operand.vmem [shape: bf16[2,10,10,512], index: 0, kind: input, shape index: {}]   ;;  %s17914_s1 = inlined_call_operand.vmem [shape: bf16[32,1024], index: 1, kind: input, shape index: {}]   ;;  %s17915_s2 = inlined_call_operand.vmem [shape: bf16[3,1536,256], index: 2, kind: input, shape index: {}]   ;;  %s17916_s3 = inlined_call_operand.vmem [shape: bf16[1024,512], index: 3, kind: input, shape index: {}]   ;;  %s17917_s4 = inlined_call_operand.vmem [shape: f32[1,256], index: 4, kind: input, shape index: {}]   ;;  %s17918_s5 = inlined_call_operand.vmem [shape: f32[1,256], index: 5, kind: input, shape index: {}]   ;;  %s17919_s6 = inlined_call_operand.vmem [shape: f32[1,512], index: 6, kind: input, shape index: {}]   ;;  %s17920_s7 = inlined_call_operand.vmem [shape: f32[1,512], index: 7, kind: input, shape index: {}]   ;;  %s17921_s8 = inlined_call_operand.vmem [shape: f32[128,256], index: 8, kind: output, shape index: {0}]   ;;  %s17922_s9 = inlined_call_operand.vmem [shape: f32[32,512], index: 9, kind: output, shape index: {1}]  }
   0x1 LB: > { %s12882_s10 = sadd.s32 4294967295, %s12824_s30   ;;  %p9577_p0 = scmp.ge.s32.totalorder %s12824_s30, 1  ;;  %s12824_s30 = sphi %s12876_s30, %s20_s30  }
   0x2   : > { %p302_p1 = scmp.lt.s32.totalorder %s12824_s30, 3 }
   0x4   : > { %p303_p2 = pnand %p9577_p0, %p302_p1 }
   0x6   : > { %306 = sbr.rel (%p303_p2) target bundleno = 1093 (0x445), region = 52 }
   0xb   : > { %v11258_v0 = vld [vmem:[%s17915_s2 + $0x674] ss:$8 sps:$4 sm:$0xff]   ;;  %v11262_v2 = vld [vmem:[%s17915_s2 + $0x670] ss:$8 sps:$4 sm:$0xff]   ;;  %v11264_v4 = vld [vmem:[%s17915_s2 + $0x664] ss:$8 sps:$4 sm:$0xff]  }
   0xc   : > { %v11260_v1 = vld [vmem:[%s17915_s2 + $0x774] ss:$8 sps:$4 sm:$0xff]   ;;  %2971 = vmatprep.subr.bf16.mxu0 %v11258_v0  ;;  %v11263_v3 = vld [vmem:[%s17915_s2 + $0x770] ss:$8 sps:$4 sm:$0xff]   ;;  %v11266_v5 = vld [vmem:[%s17915_s2 + $0x764] ss:$8 sps:$4 sm:$0xff]  }
   0xd   : > { %3044 = vmatprep.subr.bf16.mxu1 %v11260_v1  ;;  %2972 = vmatpush1.bf16.msra.mxu0 %v11262_v2  ;;  %v11268_v6 = vld [vmem:[%s17915_s2 + $0x660] ss:$8 sps:$4 sm:$0xff]   ;;  %v11270_v8 = vld [vmem:[%s17915_s2 + $0x654] ss:$8 sps:$4 sm:$0xff]   ;;  %v11274_v10 = vld [vmem:[%s17915_s2 + $0x650] ss:$8 sps:$4 sm:$0xff]  }
   0xe   : > { %3045 = vmatpush1.bf16.msra.mxu1 %v11263_v3  ;;  %2973 = vmatprep.subr.bf16.mxu0 %v11264_v4  ;;  %v11269_v7 = vld [vmem:[%s17915_s2 + $0x760] ss:$8 sps:$4 sm:$0xff]   ;;  %v11272_v9 = vld [vmem:[%s17915_s2 + $0x754] ss:$8 sps:$4 sm:$0xff]   ;;  %v11275_v11 = vld [vmem:[%s17915_s2 + $0x750] ss:$8 sps:$4 sm:$0xff]  }
   0xf   : > { %3046 = vmatprep.subr.bf16.mxu1 %v11266_v5  ;;  %v11276_v12 = vld [vmem:[%s17915_s2 + $0x644] ss:$8 sps:$4 sm:$0xff]   ;;  %v11280_v14 = vld [vmem:[%s17915_s2 + $0x640] ss:$8 sps:$4 sm:$0xff]   ;;  %v11282_v16 = vld [vmem:[%s17915_s2 + $0x634] ss:$8 sps:$4 sm:$0xff]  }
  0x10   : > { %v11278_v13 = vld [vmem:[%s17915_s2 + $0x744] ss:$8 sps:$4 sm:$0xff]   ;;  %v11281_v15 = vld [vmem:[%s17915_s2 + $0x740] ss:$8 sps:$4 sm:$0xff]   ;;  %v11284_v17 = vld [vmem:[%s17915_s2 + $0x734] ss:$8 sps:$4 sm:$0xff]  }
  0x11   : > { %2974 = vmatpush1.bf16.msra.mxu0 %v11268_v6  ;;  %v11286_v18 = vld [vmem:[%s17915_s2 + $0x630] ss:$8 sps:$4 sm:$0xff]   ;;  %v11288_v20 = vld [vmem:[%s17915_s2 + $0x624] ss:$8 sps:$4 sm:$0xff]   ;;  %v11292_v22 = vld [vmem:[%s17915_s2 + $0x620] ss:$8 sps:$4 sm:$0xff]  }
  0x12   : > { %3047 = vmatpush1.bf16.msra.mxu1 %v11269_v7  ;;  %2975 = vmatprep.subr.bf16.mxu0 %v11270_v8  ;;  %v11287_v19 = vld [vmem:[%s17915_s2 + $0x730] ss:$8 sps:$4 sm:$0xff]   ;;  %v11290_v21 = vld [vmem:[%s17915_s2 + $0x724] ss:$8 sps:$4 sm:$0xff]   ;;  %v11293_v23 = vld [vmem:[%s17915_s2 + $0x720] ss:$8 sps:$4 sm:$0xff]  }
  0x13   : > { %3048 = vmatprep.subr.bf16.mxu1 %v11272_v9  ;;  %v11294_v24 = vld [vmem:[%s17915_s2 + $0x614] ss:$8 sps:$4 sm:$0xff]   ;;  %v11298_v26 = vld [vmem:[%s17915_s2 + $0x610] ss:$8 sps:$4 sm:$0xff]   ;;  %v11300_v28 = vld [vmem:[%s17915_s2 + $0x604] ss:$8 sps:$4 sm:$0xff]  }
  0x14   : > { %v11296_v25 = vld [vmem:[%s17915_s2 + $0x714] ss:$8 sps:$4 sm:$0xff]   ;;  %v11299_v27 = vld [vmem:[%s17915_s2 + $0x710] ss:$8 sps:$4 sm:$0xff]   ;;  %v11302_v29 = vld [vmem:[%s17915_s2 + $0x704] ss:$8 sps:$4 sm:$0xff]  }
  0x15   : > { %2976 = vmatpush1.bf16.msra.mxu0 %v11274_v10  ;;  %v11304_v30 = vld [vmem:[%s17915_s2 + $0x600] ss:$8 sps:$4 sm:$0xff]   ;;  %p351_p3 = scmp.lt.s32.totalorder %s12882_s10, 1  ;;  %v11306_v32 = vld [vmem:[%s17915_s2 + $0x6f4] ss:$8 sps:$4 sm:$0xff]   ;;  %s9579_s13 = sshll.u32 %s12882_s10, 1 }
  0x16   : > { %3049 = vmatpush1.bf16.msra.mxu1 %v11275_v11  ;;  %2977 = vmatprep.subr.bf16.mxu0 %v11276_v12  ;;  %v11305_v31 = vld [vmem:[%s17915_s2 + $0x700] ss:$8 sps:$4 sm:$0xff]   ;;  %v11308_v33 = vld [vmem:[%s17915_s2 + $0x7f4] ss:$8 sps:$4 sm:$0xff]   ;;  %v11310_v34 = vld [vmem:[%s17915_s2 + $0x6f0] ss:$8 sps:$4 sm:$0xff]  }
  0x17   : > { %3050 = vmatprep.subr.bf16.mxu1 %v11278_v13  ;;  %v11311_v35 = vld [vmem:[%s17915_s2 + $0x7f0] ss:$8 sps:$4 sm:$0xff]   ;;  %s352_s26 = scalar_select %p351_p3, %s12882_s10, 1  ;;  %v11312_v36 = vld [vmem:[%s17915_s2 + $0x6e4] ss:$8 sps:$4 sm:$0xff]  }
  0x18   : > { %v11314_v37 = vld [vmem:[%s17915_s2 + $0x7e4] ss:$8 sps:$4 sm:$0xff]   ;;  %v11316_v38 = vld [vmem:[%s17915_s2 + $0x6e0] ss:$8 sps:$4 sm:$0xff]   ;;  %v11318_v40 = vld [vmem:[%s17915_s2 + $0x6d4] ss:$8 sps:$4 sm:$0xff]  }
  0x19   : > { %2978 = vmatpush1.bf16.msra.mxu0 %v11280_v14  ;;  %s11249_s14 = smul.u32 320, %s352_s26  ;;  %v11317_v39 = vld [vmem:[%s17915_s2 + $0x7e0] ss:$8 sps:$4 sm:$0xff]   ;;  %v11320_v41 = vld [vmem:[%s17915_s2 + $0x7d4] ss:$8 sps:$4 sm:$0xff]   ;;  %p16552_p4 = scmp.lt.s32.totalorder %s9579_s13, 3 }
  0x1a   : > { %3051 = vmatpush1.bf16.msra.mxu1 %v11281_v15  ;;  %2979 = vmatprep.subr.bf16.mxu0 %v11282_v16  ;;  %v11322_v42 = vld [vmem:[%s17915_s2 + $0x6d0] ss:$8 sps:$4 sm:$0xff]   ;;  %v11324_v44 = vld [vmem:[%s17915_s2 + $0x6c4] ss:$8 sps:$4 sm:$0xff]   ;;  %v11328_v46 = vld [vmem:[%s17915_s2 + $0x6c0] ss:$8 sps:$4 sm:$0xff]  }
  0x1b   : > { %3052 = vmatprep.subr.bf16.mxu1 %v11284_v17  ;;  %v11323_v43 = vld [vmem:[%s17915_s2 + $0x7d0] ss:$8 sps:$4 sm:$0xff]   ;;  %s13023_s27 = scalar_lea.vmem %s17913_s0, %s11249_s14  ;;  %v11326_v45 = vld [vmem:[%s17915_s2 + $0x7c4] ss:$8 sps:$4 sm:$0xff]   ;;  %v11329_v47 = vld [vmem:[%s17915_s2 + $0x7c0] ss:$8 sps:$4 sm:$0xff]  }
  0x1c   : > { %v13038_v48 = vld [vmem:[%s13023_s27 + $0x20] sm:$0xff]  ;;  %v11330_v49 = vld [vmem:[%s17915_s2 + $0x6b4] ss:$8 sps:$4 sm:$0xff]   ;;  %v13060_v56 = vld [vmem:[%s13023_s27 + $0x28] sm:$0xff]  ;;  %s18131_s13 = smov (!%p16552_p4, %s9579_s13), 3 }
  0x1d   : > { %2980 = vmatpush1.bf16.msra.mxu0 %v11286_v18  ;;  %v11332_v50 = vld [vmem:[%s17915_s2 + $0x7b4] ss:$8 sps:$4 sm:$0xff]   ;;  %v13047_v51 = vld [vmem:[%s13023_s27 + $0x40] sm:$0xff]  ;;  %v13063_v57 = vld [vmem:[%s13023_s27 + $0x48] sm:$0xff]  ;;  %s11246_s17 = sshll.u32 %s18131_s13, 5 }
  0x1e   : > { %3053 = vmatpush1.bf16.msra.mxu1 %v11287_v19  ;;  %2981 = vmatprep.subr.bf16.mxu0 %v11288_v20  ;;  %v13050_v52 = vld [vmem:[%s13023_s27 + $0x30] sm:$0x11]  ;;  %v13066_v58 = vld [vmem:[%s13023_s27 + $0x38] sm:$0x11]  ;;  %v9957_v59 = vcombine.high %v13038_v48, %v13047_v51  ;;  %v11336_v6 = vld [vmem:[%s17915_s2 + $0x6a4] ss:$8 sps:$4 sm:$0xff]   ;;  %v9959_v10 = vcombine.high %v13060_v56, %v13063_v57  ;;  %s16635_s24 = scalar_lea.vmem %s17914_s1, %s11246_s17  ;;  %s17894_s19 = scalar_lea.vmem %s17922_s9, %s11246_s17 }
  0x1f   : > { %3054 = vmatprep.subr.bf16.mxu1 %v11290_v21  ;;  %v13053_v53 = vld [vmem:[%s13023_s27 + $0x50] sm:$0x11]  ;;  %v9700_v54 = vcombine.low %v13038_v48, %v13050_v52  ;;  %v13071_v60 = vld [vmem:[%s13023_s27 + $0x58] sm:$0x11]  ;;  %v9702_v61 = vcombine.low %v13060_v56, %v13066_v58  ;;  %v11338_v11 = vld [vmem:[%s17915_s2 + $0x7a4] ss:$8 sps:$4 sm:$0xff]  }
  0x20   : > { %v9704_v55 = vcombine.low %v13047_v51, %v13053_v53  ;;  %v11334_v62 = vld [vmem:[%s17915_s2 + $0x6b0] ss:$8 sps:$4 sm:$0xff]   ;;  %3003 = vmatprep.mubr.bf16.mxu0 %v9957_v59  ;;  %v9706_v4 = vcombine.low %v13063_v57, %v13071_v60  ;;  %3076 = vmatprep.mubr.bf16.mxu1 %v9959_v10  ;;  %v11340_v17 = vld [vmem:[%s17915_s2 + $0x6a0] ss:$8 sps:$4 sm:$0xff]   ;;  %v11342_v20 = vld [vmem:[%s17915_s2 + $0x694] ss:$8 sps:$4 sm:$0xff]  }
  0x21   : > { %2982 = vmatpush1.bf16.msra.mxu0 %v11292_v22  ;;  %v1323_v63 = vshrl.u32 %v9700_v54, 16  ;;  %v1325_v0 = vshll.u32 %v9700_v54, 16  ;;  %v11335_v3 = vld [vmem:[%s17915_s2 + $0x7b0] ss:$8 sps:$4 sm:$0xff]   ;;  %v1337_v5 = vshrl.u32 %v9702_v61, 16  ;;  %v1339_v9 = vshll.u32 %v9702_v61, 16 }
  0x22   : > { %3055 = vmatpush1.bf16.msra.mxu1 %v11293_v23  ;;  %2983 = vmatprep.subr.bf16.mxu0 %v11294_v24  ;;  %v1351_v1 = vshrl.u32 %v9704_v55, 16  ;;  %v1353_v2 = vshll.u32 %v9704_v55, 16  ;;  %v1365_v12 = vshrl.u32 %v9706_v4, 16  ;;  %v1367_v13 = vshll.u32 %v9706_v4, 16  ;;  %v11341_v19 = vld [vmem:[%s17915_s2 + $0x7a0] ss:$8 sps:$4 sm:$0xff]  }
  0x23   : > { %3056 = vmatprep.subr.bf16.mxu1 %v11296_v25  ;;  %v1327_v7 = vrot.slane %v1325_v0, 1  ;;  %v1341_v16 = vrot.slane %v1339_v9, 1  ;;  %v11344_v23 = vld [vmem:[%s17915_s2 + $0x794] ss:$8 sps:$4 sm:$0xff]   ;;  %v11346_v25 = vld [vmem:[%s17915_s2 + $0x690] ss:$8 sps:$4 sm:$0xff]   ;;  %v13188_v55 = vcombine.high %v13038_v48, %v13050_v52  ;;  %v13209_v0 = vcombine.high %v13060_v56, %v13066_v58 }
  0x24   : > { %v1355_v8 = vrot.slane %v1353_v2, 1  ;;  %v1369_v18 = vrot.slane %v1367_v13, 1  ;;  %v11377_v59 = vld [vmem:[%s17915_s2 + $0x950] ss:$8 sps:$4 sm:$0xff]   ;;  %v11382_v61 = vld [vmem:[%s17915_s2 + $0x844] ss:$8 sps:$4 sm:$0xff]  }
  0x25   : > { %2984 = vmatpush1.bf16.msra.mxu0 %v11298_v26  ;;  %v13091_v14 = vor.u32 %v1327_v7, %v1323_v63  ;;  %v13104_v21 = vor.u32 %v1341_v16, %v1337_v5  ;;  %v11385_v52 = vld [vmem:[%s17915_s2 + $0x944] ss:$8 sps:$4 sm:$0xff]   ;;  %v1332_v58 = vshll.u32 %v13188_v55, 16  ;;  %v1330_v4 = vshrl.u32 %v13188_v55, 16  ;;  %v11401_v55 = vld [vmem:[%s17915_s2 + $0x910] ss:$8 sps:$4 sm:$0xff]  }
  0x26   : > { %3057 = vmatpush1.bf16.msra.mxu1 %v11299_v27  ;;  %2985 = vmatprep.subr.bf16.mxu0 %v11300_v28  ;;  %v13093_v15 = vor.u32 %v1355_v8, %v1351_v1  ;;  %v13111_v24 = vor.u32 %v1369_v18, %v1365_v12  ;;  %v11347_v27 = vld [vmem:[%s17915_s2 + $0x790] ss:$8 sps:$4 sm:$0xff]   ;;  %v11348_v28 = vld [vmem:[%s17915_s2 + $0x684] ss:$8 sps:$4 sm:$0xff]   ;;  %v13213_v1 = vcombine.high %v13063_v57, %v13071_v60  ;;  %v1346_v9 = vshll.u32 %v13209_v0, 16 }
  0x27   : > { %3058 = vmatprep.subr.bf16.mxu1 %v11302_v29  ;;  %v11350_v29 = vld [vmem:[%s17915_s2 + $0x784] ss:$8 sps:$4 sm:$0xff]   ;;  %v11389_v18 = vld [vmem:[%s17915_s2 + $0x930] ss:$8 sps:$4 sm:$0xff]  }
  0x28   : > { %v9960_v22 = vcombine.low %v13091_v14, %v13093_v15  ;;  %v9962_v26 = vcombine.low %v13104_v21, %v13111_v24  ;;  %v13229_v60 = vld [vmem:[%s13023_s27 + $0xa0] sm:$0xff]  ;;  %v13242_v7 = vld [vmem:[%s13023_s27 + $0xc8] sm:$0xff]  ;;  %v1374_v10 = vshll.u32 %v13213_v1, 16  ;;  %v11479_v21 = vld [vmem:[%s17915_s2 + $0xb54] ss:$8 sps:$4 sm:$0xff]  }
  0x29   : > { %2986 = vmatpush1.bf16.msra.mxu0 %v11304_v30  ;;  %v11352_v30 = vld [vmem:[%s17915_s2 + $0x680] ss:$8 sps:$4 sm:$0xff]  }
  0x2a   : > { %3059 = vmatpush1.bf16.msra.mxu1 %v11305_v31  ;;  %2987 = vmatprep.subr.bf16.mxu0 %v11306_v32  ;;  %v11353_v31 = vld [vmem:[%s17915_s2 + $0x780] ss:$8 sps:$4 sm:$0xff]   ;;  %v11364_v32 = vld [vmem:[%s17915_s2 + $0x874] ss:$8 sps:$4 sm:$0xff]  }
  0x2b   : > { %3060 = vmatprep.subr.bf16.mxu1 %v11308_v33  ;;  %v11367_v33 = vld [vmem:[%s17915_s2 + $0x974] ss:$8 sps:$4 sm:$0xff]   ;;  %v13232_v2 = vld [vmem:[%s13023_s27 + $0xc0] sm:$0xff] }
  0x2c   : > { %v9980_v13 = vcombine.low %v13229_v60, %v13232_v2 }
  0x2d   : > { %2988 = vmatpush2.bf16.msra.mxu0 %v11310_v34  ;;  %v9956_v34 = vcombine.low %v13038_v48, %v13047_v51  ;;  %v13202_v48 = vcombine.high %v13047_v51, %v13053_v53  ;;  %v11380_v51 = vld [vmem:[%s17915_s2 + $0x840] ss:$8 sps:$4 sm:$0xff]  }
  0x2e   : > { %3061 = vmatpush2.bf16.msra.mxu1 %v11311_v35  ;;  %2989 = vmatprep.subr.bf16.mxu0 %v11312_v36  ;;  %v9958_v35 = vcombine.low %v13060_v56, %v13063_v57  ;;  %v11362_v36 = vld [vmem:[%s17915_s2 + $0x870] ss:$8 sps:$4 sm:$0xff]   ;;  %v11383_v53 = vld [vmem:[%s17915_s2 + $0x940] ss:$8 sps:$4 sm:$0xff]   ;;  %v11388_v56 = vld [vmem:[%s17915_s2 + $0x834] ss:$8 sps:$4 sm:$0xff]  }
  0x2f   : > { %3062 = vmatprep.subr.bf16.mxu1 %v11314_v37  ;;  %v11365_v37 = vld [vmem:[%s17915_s2 + $0x970] ss:$8 sps:$4 sm:$0xff]   ;;  %v11391_v57 = vld [vmem:[%s17915_s2 + $0x934] ss:$8 sps:$4 sm:$0xff]   ;;  %v1360_v5 = vshll.u32 %v13202_v48, 16  ;;  %v1358_v8 = vshrl.u32 %v13202_v48, 16 }
  0x30   : > { %v11404_v48 = vld [vmem:[%s17915_s2 + $0x800] ss:$8 sps:$4 sm:$0xff]  }
  0x31   : > { %2990 = vmatpush2.bf16.msra.mxu0 %v11316_v38  ;;  %v11370_v38 = vld [vmem:[%s17915_s2 + $0x864] ss:$8 sps:$4 sm:$0xff]  }
  0x32   : > { %3063 = vmatpush2.bf16.msra.mxu1 %v11317_v39  ;;  %2991 = vmatprep.subr.bf16.mxu0 %v11318_v40  ;;  %v11373_v39 = vld [vmem:[%s17915_s2 + $0x964] ss:$8 sps:$4 sm:$0xff]   ;;  %v11368_v40 = vld [vmem:[%s17915_s2 + $0x860] ss:$8 sps:$4 sm:$0xff]  }
  0x33   : > { %3064 = vmatprep.subr.bf16.mxu1 %v11320_v41  ;;  %v11371_v41 = vld [vmem:[%s17915_s2 + $0x960] ss:$8 sps:$4 sm:$0xff]  }
  0x35   : > { %2992 = vmatpush2.bf16.msra.mxu0 %v11322_v42  ;;  %v11376_v42 = vld [vmem:[%s17915_s2 + $0x854] ss:$8 sps:$4 sm:$0xff]  }
  0x36   : > { %3065 = vmatpush2.bf16.msra.mxu1 %v11323_v43  ;;  %2993 = vmatprep.subr.bf16.mxu0 %v11324_v44  ;;  %v11379_v43 = vld [vmem:[%s17915_s2 + $0x954] ss:$8 sps:$4 sm:$0xff]   ;;  %v11374_v44 = vld [vmem:[%s17915_s2 + $0x850] ss:$8 sps:$4 sm:$0xff]  }
  0x37   : > { %3066 = vmatprep.subr.bf16.mxu1 %v11326_v45  ;;  %v13171_v45 = vld [vmem:[%s13023_s27 + $0x60] sm:$0xff] }
  0x39   : > { %2994 = vmatpush2.bf16.msra.mxu0 %v11328_v46  ;;  %v13174_v46 = vld [vmem:[%s13023_s27 + $0x80] sm:$0xff] }
  0x3a   : > { %3067 = vmatpush2.bf16.msra.mxu1 %v11329_v47  ;;  %2995 = vmatprep.subr.bf16.mxu0 %v11330_v49  ;;  %v9969_v47 = vcombine.high %v13171_v45, %v13174_v46  ;;  %v13179_v49 = vld [vmem:[%s13023_s27 + $0x68] sm:$0xff]  ;;  %v9968_v54 = vcombine.low %v13171_v45, %v13174_v46 }
  0x3b   : > { %3068 = vmatprep.subr.bf16.mxu1 %v11332_v50  ;;  %v13182_v50 = vld [vmem:[%s13023_s27 + $0x88] sm:$0xff] }
  0x3c   : > { %v9970_v63 = vcombine.low %v13179_v49, %v13182_v50 }
  0x3d   : > { %2996 = vmatpush2.bf16.msra.mxu0 %v11334_v62  ;;  %v9971_v62 = vcombine.high %v13179_v49, %v13182_v50 }
  0x3e   : > { %3069 = vmatpush2.bf16.msra.mxu1 %v11335_v3  ;;  %2997 = vmatprep.subr.bf16.mxu0 %v11336_v6  ;;  %v13235_v3 = vld [vmem:[%s13023_s27 + $0xa8] sm:$0xff]  ;;  %v9981_v6 = vcombine.high %v13229_v60, %v13232_v2 }
  0x3f   : > { %3070 = vmatprep.subr.bf16.mxu1 %v11338_v11  ;;  %v11386_v11 = vld [vmem:[%s17915_s2 + $0x830] ss:$8 sps:$4 sm:$0xff]   ;;  %v9983_v12 = vcombine.high %v13235_v3, %v13242_v7  ;;  %v9982_v16 = vcombine.low %v13235_v3, %v13242_v7 }
  0x41   : > { %2998 = vmatpush2.bf16.msra.mxu0 %v11340_v17  ;;  %v1344_v17 = vshrl.u32 %v13209_v0, 16  ;;  %v11412_v0 = vld [vmem:[%s17915_s2 + $0x8f4] ss:$8 sps:$4 sm:$0xff]  }
  0x42   : > { %3071 = vmatpush2.bf16.msra.mxu1 %v11341_v19  ;;  %2999 = vmatprep.subr.bf16.mxu0 %v11342_v20  ;;  %v11394_v19 = vld [vmem:[%s17915_s2 + $0x824] ss:$8 sps:$4 sm:$0xff]   ;;  %v1334_v20 = vrot.slane %v1332_v58, 1  ;;  %v11416_v58 = vld [vmem:[%s17915_s2 + $0x8e0] ss:$8 sps:$4 sm:$0xff]  }
  0x43   : > { %3072 = vmatprep.subr.bf16.mxu1 %v11344_v23  ;;  %v11397_v23 = vld [vmem:[%s17915_s2 + $0x924] ss:$8 sps:$4 sm:$0xff]  }
  0x45   : > { %3000 = vmatpush2.bf16.msra.mxu0 %v11346_v25  ;;  %v1362_v25 = vrot.slane %v1360_v5, 1  ;;  %v11424_v5 = vld [vmem:[%s17915_s2 + $0x8d4] ss:$8 sps:$4 sm:$0xff]  }
  0x46   : > { %3073 = vmatpush2.bf16.msra.mxu1 %v11347_v27  ;;  %3001 = vmatprep.subr.bf16.mxu0 %v11348_v28  ;;  %v1372_v27 = vshrl.u32 %v13213_v1, 16  ;;  %v11392_v28 = vld [vmem:[%s17915_s2 + $0x820] ss:$8 sps:$4 sm:$0xff]   ;;  %v11415_v1 = vld [vmem:[%s17915_s2 + $0x9f4] ss:$8 sps:$4 sm:$0xff]  }
  0x47   : > { %3074 = vmatprep.subr.bf16.mxu1 %v11350_v29  ;;  %v1348_v29 = vrot.slane %v1346_v9, 1  ;;  %v11425_v9 = vld [vmem:[%s17915_s2 + $0x9d0] ss:$8 sps:$4 sm:$0xff]  }
  0x49   : > { %3002 = vmatpush2.bf16.msra.mxu0 %v11352_v30  ;;  %v1376_v30 = vrot.slane %v1374_v10, 1  ;;  %v11430_v10 = vld [vmem:[%s17915_s2 + $0x8c4] ss:$8 sps:$4 sm:$0xff]  }
  0x4a   : > { %3075 = vmatpush2.bf16.msra.mxu1 %v11353_v31  ;;  %3117 = vmatprep.subr.bf16.mxu0 %v11364_v32  ;;  %v11395_v31 = vld [vmem:[%s17915_s2 + $0x920] ss:$8 sps:$4 sm:$0xff]   ;;  %v11400_v32 = vld [vmem:[%s17915_s2 + $0x814] ss:$8 sps:$4 sm:$0xff]  }
  0x4b   : > { %3190 = vmatprep.subr.bf16.mxu1 %v11367_v33  ;;  %v13277_v33 = vld [vmem:[%s13023_s27 + $0xe0] sm:$0xff] }
  0x4c   : > { %3004 = vmatmul.mubr.bf16.vlgmr.msra.gmra.mxu0 %v9956_v34  ;;  %v13280_v34 = vld [vmem:[%s13023_s27 + $0x100] sm:$0xff] }
  0x4d   : > { %3077 = vmatmul.mubr.bf16.vlgmr.msra.gmra.mxu1 %v9958_v35  ;;  %3118 = vmatpush1.bf16.msra.mxu0 %v11362_v36  ;;  %v13283_v35 = vld [vmem:[%s13023_s27 + $0xe8] sm:$0xff] }
  0x4e   : > { %3191 = vmatpush1.bf16.msra.mxu1 %v11365_v37  ;;  %3119 = vmatprep.subr.bf16.mxu0 %v11370_v38  ;;  %v13286_v36 = vld [vmem:[%s13023_s27 + $0x108] sm:$0xff]  ;;  %v11403_v37 = vld [vmem:[%s17915_s2 + $0x914] ss:$8 sps:$4 sm:$0xff]   ;;  %v9993_v38 = vcombine.high %v13277_v33, %v13280_v34 }
  0x4f   : > { %3192 = vmatprep.subr.bf16.mxu1 %v11373_v39  ;;  %3013 = vmatprep.mubr.bf16.mxu0 %v9969_v47  ;;  %v9995_v39 = vcombine.high %v13283_v35, %v13286_v36  ;;  %v9992_v47 = vcombine.low %v13277_v33, %v13280_v34 }
  0x50   : > { %3086 = vmatprep.mubr.bf16.mxu1 %v9971_v62 }
  0x51   : > { %3120 = vmatpush1.bf16.msra.mxu0 %v11368_v40  ;;  %v1335_v40 = vor.u32 %v1334_v20, %v1330_v4  ;;  %v11419_v4 = vld [vmem:[%s17915_s2 + $0x9e0] ss:$8 sps:$4 sm:$0xff]  }
  0x52   : > { %3193 = vmatpush1.bf16.msra.mxu1 %v11371_v41  ;;  %3121 = vmatprep.subr.bf16.mxu0 %v11376_v42  ;;  %v1363_v41 = vor.u32 %v1362_v25, %v1358_v8  ;;  %v1349_v42 = vor.u32 %v1348_v29, %v1344_v17  ;;  %v11422_v8 = vld [vmem:[%s17915_s2 + $0x8d0] ss:$8 sps:$4 sm:$0xff]   ;;  %v11428_v17 = vld [vmem:[%s17915_s2 + $0x8c0] ss:$8 sps:$4 sm:$0xff]   ;;  %v11439_v29 = vld [vmem:[%s17915_s2 + $0x9b4] ss:$8 sps:$4 sm:$0xff]  }
  0x53   : > { %3194 = vmatprep.subr.bf16.mxu1 %v11379_v43  ;;  %v1377_v43 = vor.u32 %v1376_v30, %v1372_v27  ;;  %v13381_v25 = vld [vmem:[%s13023_s27 + $0x98] sm:$0x11] }
  0x54   : > { %3014 = vmatmul.mubr.bf16.gmra.mxu0 %v9968_v54  ;;  %v9994_v54 = vcombine.low %v13283_v35, %v13286_v36  ;;  %v9961_v62 = vcombine.low %v1335_v40, %v1363_v41  ;;  %v11434_v30 = vld [vmem:[%s17915_s2 + $0x8b0] ss:$8 sps:$4 sm:$0xff]  }
  0x55   : > { %3087 = vmatmul.mubr.bf16.gmra.mxu1 %v9970_v63  ;;  %3122 = vmatpush1.bf16.msra.mxu0 %v11374_v44  ;;  %v11398_v44 = vld [vmem:[%s17915_s2 + $0x810] ss:$8 sps:$4 sm:$0xff]   ;;  %v9963_v63 = vcombine.low %v1349_v42, %v1377_v43  ;;  %v11445_v42 = vld [vmem:[%s17915_s2 + $0x9a4] ss:$8 sps:$4 sm:$0xff]  }
  0x56   : > { %3195 = vmatpush1.bf16.msra.mxu1 %v11377_v59  ;;  %3123 = vmatprep.subr.bf16.mxu0 %v11382_v61  ;;  %v11406_v59 = vld [vmem:[%s17915_s2 + $0x804] ss:$8 sps:$4 sm:$0xff]   ;;  %v13409_v41 = vld [vmem:[%s13023_s27 + $0xb0] sm:$0x11] }
  0x57   : > { %3196 = vmatprep.subr.bf16.mxu1 %v11385_v52  ;;  %3023 = vmatprep.mubr.bf16.mxu0 %v9981_v6  ;;  %v11409_v61 = vld [vmem:[%s17915_s2 + $0x904] ss:$8 sps:$4 sm:$0xff]   ;;  %v11407_v52 = vld [vmem:[%s17915_s2 + $0x900] ss:$8 sps:$4 sm:$0xff]   ;;  %v11427_v6 = vld [vmem:[%s17915_s2 + $0x9d4] ss:$8 sps:$4 sm:$0xff]  }
  0x58   : > { %3096 = vmatprep.mubr.bf16.mxu1 %v9983_v12  ;;  %v13360_v12 = vld [vmem:[%s13023_s27 + $0x90] sm:$0x11] }
  0x59   : > { %3124 = vmatpush1.bf16.msra.mxu0 %v11380_v51  ;;  %v11410_v51 = vld [vmem:[%s17915_s2 + $0x8f0] ss:$8 sps:$4 sm:$0xff]   ;;  %v9713_v20 = vcombine.high %v13174_v46, %v13360_v12  ;;  %v9712_v27 = vcombine.low %v13174_v46, %v13360_v12  ;;  %v13400_v46 = vcombine.high %v13182_v50, %v13381_v25 }
  0x5a   : > { %3197 = vmatpush1.bf16.msra.mxu1 %v11383_v53  ;;  %3125 = vmatprep.subr.bf16.mxu0 %v11388_v56  ;;  %v11413_v53 = vld [vmem:[%s17915_s2 + $0x9f0] ss:$8 sps:$4 sm:$0xff]   ;;  %v11418_v56 = vld [vmem:[%s17915_s2 + $0x8e4] ss:$8 sps:$4 sm:$0xff]  }
  0x5b   : > { %3198 = vmatprep.subr.bf16.mxu1 %v11391_v57  ;;  %v11421_v57 = vld [vmem:[%s17915_s2 + $0x9e4] ss:$8 sps:$4 sm:$0xff]   ;;  %v1409_v40 = vshll.u32 %v9712_v27, 16 }
  0x5c   : > { %3024 = vmatmul.mubr.bf16.gmra.mxu0 %v9980_v13  ;;  %v11433_v13 = vld [vmem:[%s17915_s2 + $0x9c4] ss:$8 sps:$4 sm:$0xff]  }
  0x5d   : > { %3097 = vmatmul.mubr.bf16.gmra.mxu1 %v9982_v16  ;;  %3126 = vmatpush1.bf16.msra.mxu0 %v11386_v11  ;;  %v13357_v11 = vld [vmem:[%s13023_s27 + $0x70] sm:$0x11]  ;;  %v13366_v16 = vld [vmem:[%s13023_s27 + $0x78] sm:$0x11] }
  0x5e   : > { %3199 = vmatpush1.bf16.msra.mxu1 %v11389_v18  ;;  %3127 = vmatprep.subr.bf16.mxu0 %v11394_v19  ;;  %v11431_v18 = vld [vmem:[%s17915_s2 + $0x9c0] ss:$8 sps:$4 sm:$0xff]   ;;  %v9709_v19 = vcombine.high %v13171_v45, %v13357_v11 }
  0x5f   : > { %3200 = vmatprep.subr.bf16.mxu1 %v11397_v23  ;;  %3033 = vmatprep.mubr.bf16.mxu0 %v9993_v38  ;;  %v9708_v23 = vcombine.low %v13171_v45, %v13357_v11  ;;  %v13393_v45 = vcombine.high %v13179_v49, %v13366_v16 }
  0x60   : > { %3106 = vmatprep.mubr.bf16.mxu1 %v9995_v39  ;;  %v11442_v39 = vld [vmem:[%s17915_s2 + $0x8a4] ss:$8 sps:$4 sm:$0xff]   ;;  %v1386_v43 = vshrl.u32 %v9709_v19, 16 }
  0x61   : > { %3128 = vmatpush1.bf16.msra.mxu0 %v11392_v28  ;;  %v11436_v28 = vld [vmem:[%s17915_s2 + $0x8b4] ss:$8 sps:$4 sm:$0xff]   ;;  %v1381_v38 = vshll.u32 %v9708_v23, 16 }
  0x62   : > { %3201 = vmatpush1.bf16.msra.mxu1 %v11395_v31  ;;  %3129 = vmatprep.subr.bf16.mxu0 %v11400_v32  ;;  %v11437_v31 = vld [vmem:[%s17915_s2 + $0x9b0] ss:$8 sps:$4 sm:$0xff]   ;;  %v1388_v32 = vshll.u32 %v9709_v19, 16 }
  0x63   : > { %3202 = vmatprep.subr.bf16.mxu1 %v11403_v37  ;;  %v1416_v37 = vshll.u32 %v9713_v20, 16 }
  0x64   : > { %3034 = vmatmul.mubr.bf16.gmra.mxu0 %v9992_v47  ;;  %v1402_v47 = vshll.u32 %v13393_v45, 16 }
  0x65   : > { %3107 = vmatmul.mubr.bf16.gmra.mxu1 %v9994_v54  ;;  %3130 = vmatpush1.bf16.msra.mxu0 %v11398_v44  ;;  %v1414_v44 = vshrl.u32 %v9713_v20, 16  ;;  %v11440_v54 = vld [vmem:[%s17915_s2 + $0x8a0] ss:$8 sps:$4 sm:$0xff]  }
  0x66   : > { %3203 = vmatpush1.bf16.msra.mxu1 %v11401_v55  ;;  %3131 = vmatprep.subr.bf16.mxu0 %v11406_v59  ;;  %v11443_v55 = vld [vmem:[%s17915_s2 + $0x9a0] ss:$8 sps:$4 sm:$0xff]   ;;  %v1379_v59 = vshrl.u32 %v9708_v23, 16 }
  0x67   : > { %3204 = vmatprep.subr.bf16.mxu1 %v11409_v61  ;;  %3149 = vmatprep.mubr.bf16.mxu0 %v9961_v62  ;;  %v1430_v61 = vshll.u32 %v13400_v46, 16  ;;  %v13424_v62 = vcombine.low %v13179_v49, %v13366_v16  ;;  %v11451_v49 = vld [vmem:[%s17915_s2 + $0x994] ss:$8 sps:$4 sm:$0xff]  }
  0x68   : > { %3222 = vmatprep.mubr.bf16.mxu1 %v9963_v63  ;;  %v13428_v63 = vcombine.low %v13182_v50, %v13381_v25  ;;  %v1407_v50 = vshrl.u32 %v9712_v27, 16  ;;  %v11449_v27 = vld [vmem:[%s17915_s2 + $0x990] ss:$8 sps:$4 sm:$0xff]  }
  0x69   : > { %3132 = vmatpush1.bf16.msra.mxu0 %v11404_v48  ;;  %v13431_v48 = vld [vmem:[%s13023_s27 + $0xd0] sm:$0x11] }
  0x6a   : > { %3205 = vmatpush1.bf16.msra.mxu1 %v11407_v52  ;;  %3133 = vmatprep.subr.bf16.mxu0 %v11412_v0  ;;  %v11448_v52 = vld [vmem:[%s17915_s2 + $0x894] ss:$8 sps:$4 sm:$0xff]   ;;  %v1390_v0 = vrot.slane %v1388_v32, 1 }
  0x6b   : > { %3206 = vmatprep.subr.bf16.mxu1 %v11415_v1  ;;  %v1418_v1 = vrot.slane %v1416_v37, 1  ;;  %v1421_v37 = vshrl.u32 %v13428_v63, 16 }
  0x6d   : > { %3134 = vmatpush2.bf16.msra.mxu0 %v11410_v51  ;;  %v1383_v51 = vrot.slane %v1381_v38, 1  ;;  %v13462_v19 = vor.u32 %v1418_v1, %v1414_v44 }
  0x6e   : > { %3207 = vmatpush2.bf16.msra.mxu1 %v11413_v53  ;;  %3135 = vmatprep.subr.bf16.mxu0 %v11418_v56  ;;  %v13438_v53 = vcombine.high %v13229_v60, %v13409_v41  ;;  %v1411_v56 = vrot.slane %v1409_v40, 1  ;;  %v11452_v40 = vld [vmem:[%s17915_s2 + $0x880] ss:$8 sps:$4 sm:$0xff]  }
  0x6f   : > { %3208 = vmatprep.subr.bf16.mxu1 %v11421_v57  ;;  %v1400_v57 = vshrl.u32 %v13393_v45, 16  ;;  %v13464_v20 = vor.u32 %v1383_v51, %v1379_v59  ;;  %v1393_v45 = vshrl.u32 %v13424_v62, 16 }
  0x70   : > { %v1444_v23 = vshll.u32 %v13438_v53, 16 }
  0x71   : > { %3136 = vmatpush2.bf16.msra.mxu0 %v11416_v58  ;;  %v1404_v58 = vrot.slane %v1402_v47, 1 }
  0x72   : > { %3209 = vmatpush2.bf16.msra.mxu1 %v11419_v4  ;;  %3137 = vmatprep.subr.bf16.mxu0 %v11424_v5  ;;  %v13446_v4 = vcombine.high %v13232_v2, %v13431_v48  ;;  %v13449_v5 = vld [vmem:[%s13023_s27 + $0xb8] sm:$0x11] }
  0x73   : > { %3210 = vmatprep.subr.bf16.mxu1 %v11427_v6  ;;  %v13452_v6 = vld [vmem:[%s13023_s27 + $0xd8] sm:$0x11]  ;;  %v13487_v32 = vor.u32 %v1404_v58, %v1400_v57 }
  0x74   : > { %v1472_v38 = vshll.u32 %v13446_v4, 16  ;;  %v1470_v59 = vshrl.u32 %v13446_v4, 16  ;;  %v13524_v1 = vcombine.low %v13242_v7, %v13452_v6  ;;  %v13543_v4 = vld [vmem:[%s13023_s27 + $0x110] sm:$0x11] }
  0x75   : > { %3138 = vmatpush2.bf16.msra.mxu0 %v11422_v8  ;;  %v1428_v8 = vshrl.u32 %v13400_v46, 16  ;;  %v13482_v46 = vcombine.high %v13242_v7, %v13452_v6 }
  0x76   : > { %3211 = vmatpush2.bf16.msra.mxu1 %v11425_v9  ;;  %3139 = vmatprep.subr.bf16.mxu0 %v11430_v10  ;;  %v1432_v9 = vrot.slane %v1430_v61, 1  ;;  %v1395_v10 = vshll.u32 %v13424_v62, 16  ;;  %v11460_v62 = vld [vmem:[%s17915_s2 + $0xa74] ss:$8 sps:$4 sm:$0xff]   ;;  %v1474_v51 = vrot.slane %v1472_v38, 1 }
  0x77   : > { %3212 = vmatprep.subr.bf16.mxu1 %v11433_v13  ;;  %v1423_v13 = vshll.u32 %v13428_v63, 16  ;;  %v11463_v63 = vld [vmem:[%s17915_s2 + $0xb74] ss:$8 sps:$4 sm:$0xff]   ;;  %v11464_v38 = vld [vmem:[%s17915_s2 + $0xa60] ss:$8 sps:$4 sm:$0xff]  }
  0x78   : > { %v1397_v44 = vrot.slane %v1395_v10, 1 }
  0x79   : > { %3140 = vmatpush2.bf16.msra.mxu0 %v11428_v17  ;;  %v11446_v17 = vld [vmem:[%s17915_s2 + $0x890] ss:$8 sps:$4 sm:$0xff]   ;;  %v1425_v47 = vrot.slane %v1423_v13, 1  ;;  %v1484_v13 = vshrl.u32 %v13482_v46, 16 }
  0x7a   : > { %3213 = vmatpush2.bf16.msra.mxu1 %v11431_v18  ;;  %3141 = vmatprep.subr.bf16.mxu0 %v11436_v28  ;;  %v13460_v18 = vor.u32 %v1390_v0, %v1386_v43  ;;  %v11454_v28 = vld [vmem:[%s17915_s2 + $0x884] ss:$8 sps:$4 sm:$0xff]   ;;  %v13501_v43 = vor.u32 %v1432_v9, %v1428_v8  ;;  %v13520_v0 = vcombine.low %v13235_v3, %v13449_v5 }
  0x7b   : > { %3214 = vmatprep.subr.bf16.mxu1 %v11439_v29  ;;  %v13473_v29 = vor.u32 %v1411_v56, %v1407_v50  ;;  %v11458_v50 = vld [vmem:[%s17915_s2 + $0xa70] ss:$8 sps:$4 sm:$0xff]   ;;  %v13547_v9 = vor.u32 %v1397_v44, %v1393_v45  ;;  %v13549_v10 = vor.u32 %v1425_v47, %v1421_v37  ;;  %v11466_v45 = vld [vmem:[%s17915_s2 + $0xa64] ss:$8 sps:$4 sm:$0xff]   ;;  %v13575_v37 = vcombine.high %v13280_v34, %v13543_v4 }
  0x7c   : > { %v9973_v7 = vcombine.low %v13460_v18, %v13462_v19  ;;  %v9975_v8 = vcombine.low %v13487_v32, %v13501_v43  ;;  %v13556_v18 = vld [vmem:[%s13023_s27 + $0x118] sm:$0x11] }
  0x7d   : > { %3142 = vmatpush2.bf16.msra.mxu0 %v11434_v30  ;;  %v13478_v30 = vcombine.high %v13235_v3, %v13449_v5  ;;  %v11461_v3 = vld [vmem:[%s17915_s2 + $0xb70] ss:$8 sps:$4 sm:$0xff]   ;;  %v9972_v56 = vcombine.low %v13464_v20, %v13473_v29  ;;  %v13591_v47 = vcombine.high %v13286_v36, %v13556_v18  ;;  %v11496_v29 = vld [vmem:[%s17915_s2 + $0xa34] ss:$8 sps:$4 sm:$0xff]  }
  0x7e   : > { %3215 = vmatpush2.bf16.msra.mxu1 %v11437_v31  ;;  %3143 = vmatprep.subr.bf16.mxu0 %v11442_v39  ;;  %v11457_v31 = vld [vmem:[%s17915_s2 + $0x984] ss:$8 sps:$4 sm:$0xff]   ;;  %v13493_v39 = vcombine.low %v13229_v60, %v13409_v41  ;;  %v1446_v60 = vrot.slane %v1444_v23, 1 }
  0x7f   : > { %3216 = vmatprep.subr.bf16.mxu1 %v11445_v42  ;;  %v11455_v42 = vld [vmem:[%s17915_s2 + $0x980] ss:$8 sps:$4 sm:$0xff]   ;;  %v1456_v58 = vshrl.u32 %v13478_v30, 16 }
  0x80   : > { %v1435_v61 = vshrl.u32 %v13493_v39, 16 }
  0x81   : > { %3144 = vmatpush2.bf16.msra.mxu0 %v11440_v54  ;;  %v13505_v54 = vcombine.low %v13232_v2, %v13431_v48  ;;  %v1458_v2 = vshll.u32 %v13478_v30, 16  ;;  %v11469_v30 = vld [vmem:[%s17915_s2 + $0xb64] ss:$8 sps:$4 sm:$0xff]  }
  0x82   : > { %3217 = vmatpush2.bf16.msra.mxu1 %v11443_v55  ;;  %3145 = vmatprep.subr.bf16.mxu0 %v11448_v52  ;;  %v1442_v55 = vshrl.u32 %v13438_v53, 16  ;;  %v1486_v52 = vshll.u32 %v13482_v46, 16  ;;  %v1437_v53 = vshll.u32 %v13493_v39, 16  ;;  %v13645_v39 = vcombine.low %v13286_v36, %v13556_v18 }
  0x83   : > { %3218 = vmatprep.subr.bf16.mxu1 %v11451_v49  ;;  %v13528_v49 = vld [vmem:[%s13023_s27 + $0xf0] sm:$0x11]  ;;  %v1465_v57 = vshll.u32 %v13505_v54, 16  ;;  %v1460_v19 = vrot.slane %v1458_v2, 1 }
  0x84   : > { %v1488_v23 = vrot.slane %v1486_v52, 1  ;;  %v13566_v46 = vor.u32 %v1446_v60, %v1442_v55  ;;  %v13571_v32 = vcombine.high %v13277_v33, %v13528_v49  ;;  %v1439_v43 = vrot.slane %v1437_v53, 1 }
  0x85   : > { %3146 = vmatpush2.bf16.msra.mxu0 %v11446_v17  ;;  %v13553_v17 = vld [vmem:[%s13023_s27 + $0xf8] sm:$0x11]  ;;  %v1467_v55 = vrot.slane %v1465_v57, 1  ;;  %v1449_v60 = vshrl.u32 %v13520_v0, 16  ;;  %v1461_v14 = vor.u32 %v1460_v19, %v1456_v58  ;;  %v13613_v2 = vcombine.low %v13277_v33, %v13528_v49 }
  0x86   : > { %3219 = vmatpush2.bf16.msra.mxu1 %v11449_v27  ;;  %3147 = vmatprep.subr.bf16.mxu0 %v11454_v28  ;;  %v1451_v27 = vshll.u32 %v13520_v0, 16  ;;  %v1479_v28 = vshll.u32 %v13524_v1, 16  ;;  %v13587_v44 = vcombine.high %v13283_v35, %v13553_v17  ;;  %v1489_v15 = vor.u32 %v1488_v23, %v1484_v13  ;;  %v11474_v0 = vld [vmem:[%s17915_s2 + $0xa50] ss:$8 sps:$4 sm:$0xff]  }
  0x87   : > { %3220 = vmatprep.subr.bf16.mxu1 %v11457_v31  ;;  %v1463_v31 = vshrl.u32 %v13505_v54, 16  ;;  %v9974_v54 = vcombine.low %v13547_v9, %v13549_v10  ;;  %v1500_v24 = vshll.u32 %v13571_v32, 16  ;;  %v13617_v52 = vcombine.low %v13280_v34, %v13543_v4 }
  0x88   : > { %v13629_v33 = vor.u32 %v1439_v43, %v1435_v61  ;;  %v1514_v34 = vshll.u32 %v13587_v44, 16  ;;  %v1542_v53 = vshll.u32 %v13591_v47, 16  ;;  %v13641_v57 = vcombine.low %v13283_v35, %v13553_v17  ;;  %v11489_v61 = vld [vmem:[%s17915_s2 + $0xb44] ss:$8 sps:$4 sm:$0xff]  }
  0x89   : > { %3148 = vmatpush2.bf16.msra.mxu0 %v11452_v40  ;;  %v11467_v40 = vld [vmem:[%s17915_s2 + $0xb60] ss:$8 sps:$4 sm:$0xff]   ;;  %v9987_v58 = vcombine.low %v1461_v14, %v1489_v15  ;;  %v1526_v10 = vshrl.u32 %v13575_v37, 16  ;;  %v1502_v13 = vrot.slane %v1500_v24, 1  ;;  %v1493_v19 = vshll.u32 %v13613_v2, 16 }
  0x8a   : > { %3221 = vmatpush2.bf16.msra.mxu1 %v11455_v42  ;;  %3263 = vmatprep.subr.bf16.mxu0 %v11460_v62  ;;  %v13583_v42 = vor.u32 %v1474_v51, %v1470_v59  ;;  %v1477_v59 = vshrl.u32 %v13524_v1, 16  ;;  %v11476_v62 = vld [vmem:[%s17915_s2 + $0xa54] ss:$8 sps:$4 sm:$0xff]   ;;  %v11477_v1 = vld [vmem:[%s17915_s2 + $0xb50] ss:$8 sps:$4 sm:$0xff]   ;;  %v1521_v36 = vshll.u32 %v13617_v52, 16 }
  0x8b   : > { %3336 = vmatprep.subr.bf16.mxu1 %v11463_v63  ;;  %v1481_v63 = vrot.slane %v1479_v28, 1  ;;  %v1512_v23 = vshrl.u32 %v13587_v44, 16  ;;  %v1540_v28 = vshrl.u32 %v13591_v47, 16  ;;  %v1491_v20 = vshrl.u32 %v13613_v2, 16  ;;  %v11494_v44 = vld [vmem:[%s17915_s2 + $0xa30] ss:$8 sps:$4 sm:$0xff]  }
  0x8c   : > { %3150 = vmatmul.mubr.bf16.vlgmr.msra.gmra.mxu0 %v9960_v22  ;;  %v1453_v22 = vrot.slane %v1451_v27, 1  ;;  %v9985_v51 = vcombine.low %v13566_v46, %v13583_v42  ;;  %v1516_v27 = vrot.slane %v1514_v34, 1  ;;  %v1507_v46 = vshll.u32 %v13641_v57, 16  ;;  %v11504_v24 = vld [vmem:[%s17915_s2 + $0xa20] ss:$8 sps:$4 sm:$0xff]  }
  0x8d   : > { %3223 = vmatmul.mubr.bf16.vlgmr.msra.gmra.mxu1 %v9962_v26  ;;  %3264 = vmatpush1.bf16.msra.mxu0 %v11458_v50  ;;  %v1528_v26 = vshll.u32 %v13575_v37, 16  ;;  %v11486_v50 = vld [vmem:[%s17915_s2 + $0xa44] ss:$8 sps:$4 sm:$0xff]   ;;  %v1482_v9 = vor.u32 %v1481_v63, %v1477_v59  ;;  %v1519_v43 = vshrl.u32 %v13617_v52, 16  ;;  %v1495_v47 = vrot.slane %v1493_v19, 1 }
  0x8e   : > { %3337 = vmatpush1.bf16.msra.mxu1 %v11461_v3  ;;  %3265 = vmatprep.subr.bf16.mxu0 %v11466_v45  ;;  %v13636_v3 = vor.u32 %v1467_v55, %v1463_v31  ;;  %v1544_v45 = vrot.slane %v1542_v53, 1  ;;  %v1535_v31 = vshll.u32 %v13645_v39, 16  ;;  %v1517_v55 = vor.u32 %v1516_v27, %v1512_v23  ;;  %v11506_v63 = vld [vmem:[%s17915_s2 + $0xa24] ss:$8 sps:$4 sm:$0xff]   ;;  %v11514_v19 = vld [vmem:[%s17915_s2 + $0xa10] ss:$8 sps:$4 sm:$0xff]  }
  0x8f   : > { %3338 = vmatprep.subr.bf16.mxu1 %v11469_v30  ;;  %3159 = vmatprep.mubr.bf16.mxu0 %v9973_v7  ;;  %v1498_v7 = vshrl.u32 %v13571_v32, 16  ;;  %v1530_v35 = vrot.slane %v1528_v26, 1  ;;  %v11484_v30 = vld [vmem:[%s17915_s2 + $0xa40] ss:$8 sps:$4 sm:$0xff]   ;;  %v1505_v59 = vshrl.u32 %v13641_v57, 16  ;;  %v1533_v14 = vshrl.u32 %v13645_v39, 16 }
  0x90   : > { %3232 = vmatprep.mubr.bf16.mxu1 %v9975_v8  ;;  %v1454_v8 = vor.u32 %v1453_v22, %v1449_v60  ;;  %v11487_v32 = vld [vmem:[%s17915_s2 + $0xb40] ss:$8 sps:$4 sm:$0xff]   ;;  %v9984_v37 = vcombine.low %v13629_v33, %v13636_v3  ;;  %v1545_v60 = vor.u32 %v1544_v45, %v1540_v28  ;;  %v1537_v15 = vrot.slane %v1535_v31, 1  ;;  %v11497_v22 = vld [vmem:[%s17915_s2 + $0xb30] ss:$8 sps:$4 sm:$0xff]  }
  0x91   : > { %3266 = vmatpush1.bf16.msra.mxu0 %v11464_v38  ;;  %v1531_v42 = vor.u32 %v1530_v35, %v1526_v10  ;;  %v11507_v26 = vld [vmem:[%s17915_s2 + $0xb20] ss:$8 sps:$4 sm:$0xff]   ;;  %v1496_v52 = vor.u32 %v1495_v47, %v1491_v20  ;;  %v13706_v3 = vld [vmem:[%s13023_s27 + $0x30] sm:$0x11]  ;;  %v13733_v27 = vld [vmem:[%s13023_s27 + $0x58] sm:$0x11] }
  0x92   : > { %3339 = vmatpush1.bf16.msra.mxu1 %v11467_v40  ;;  %3267 = vmatprep.subr.bf16.mxu0 %v11476_v62  ;;  %v9986_v38 = vcombine.low %v1454_v8, %v1482_v9  ;;  %v1503_v40 = vor.u32 %v1502_v13, %v1498_v7  ;;  %v1509_v62 = vrot.slane %v1507_v46, 1  ;;  %v1538_v33 = vor.u32 %v1537_v15, %v1533_v14  ;;  %v13697_v34 = vld [vmem:[%s13023_s27 + $0x20] sm:$0xee]  ;;  %v13711_v57 = vld [vmem:[%s13023_s27 + $0x48] sm:$0xee] }
  0x93   : > { %3340 = vmatprep.subr.bf16.mxu1 %v11479_v21  ;;  %v11509_v21 = vld [vmem:[%s17915_s2 + $0xb24] ss:$8 sps:$4 sm:$0xff]   ;;  %v9733_v7 = vcombine.high %v13697_v34, %v13706_v3  ;;  %v11516_v39 = vld [vmem:[%s17915_s2 + $0xa14] ss:$8 sps:$4 sm:$0xff]   ;;  %v9739_v28 = vcombine.high %v13711_v57, %v13733_v27 }
  0x94   : > { %3160 = vmatmul.mubr.bf16.gmra.mxu0 %v9972_v56  ;;  %v11499_v56 = vld [vmem:[%s17915_s2 + $0xb34] ss:$8 sps:$4 sm:$0xff]   ;;  %v9997_v2 = vcombine.low %v1503_v40, %v1531_v42  ;;  %v13700_v53 = vld [vmem:[%s13023_s27 + $0x40] sm:$0xee]  ;;  %v9689_v14 = vld [vmem:[%s13023_s27 + $0x68] sm:$0xee] }
  0x95   : > { %3233 = vmatmul.mubr.bf16.gmra.mxu1 %v9974_v54  ;;  %3268 = vmatpush1.bf16.msra.mxu0 %v11474_v0  ;;  %v1523_v54 = vrot.slane %v1521_v36, 1  ;;  %v13725_v9 = vld [vmem:[%s13023_s27 + $0x38] sm:$0x11]  ;;  %v1627_v35 = vrot.slane %v9733_v7, 1  ;;  %v11526_v46 = vld [vmem:[%s17915_s2 + $0xa04] ss:$8 sps:$4 sm:$0xff]  }
  0x96   : > { %3341 = vmatpush1.bf16.msra.mxu1 %v11477_v1  ;;  %3269 = vmatprep.subr.bf16.mxu0 %v11486_v50  ;;  %v9999_v1 = vcombine.low %v1517_v55, %v1545_v60  ;;  %v13703_v50 = vld [vmem:[%s13023_s27 + $0x28] sm:$0xee]  ;;  %v9688_v20 = vld [vmem:[%s13023_s27 + $0x60] sm:$0xee]  ;;  %v11535_v55 = vld [vmem:[%s17915_s2 + $0xbf4] ss:$8 sps:$4 sm:$0xff]  }
  0x97   : > { %3342 = vmatprep.subr.bf16.mxu1 %v11489_v61  ;;  %3169 = vmatprep.mubr.bf16.mxu0 %v9985_v51  ;;  %v1524_v0 = vor.u32 %v1523_v54, %v1519_v43  ;;  %v1510_v51 = vor.u32 %v1509_v62, %v1505_v59  ;;  %v11519_v61 = vld [vmem:[%s17915_s2 + $0xb14] ss:$8 sps:$4 sm:$0xff]   ;;  %v9735_v10 = vcombine.high %v13703_v50, %v13725_v9  ;;  %v11529_v31 = vld [vmem:[%s17915_s2 + $0xb04] ss:$8 sps:$4 sm:$0xff]   ;;  %v11527_v43 = vld [vmem:[%s17915_s2 + $0xb00] ss:$8 sps:$4 sm:$0xff]  }
  0x98   : > { %3242 = vmatprep.mubr.bf16.mxu1 %v9987_v58  ;;  %v13720_v58 = vld [vmem:[%s13023_s27 + $0x50] sm:$0x11]  ;;  %v9741_v40 = vcombine.high %v9688_v20, %v13357_v11  ;;  %v9691_v15 = vld [vmem:[%s13023_s27 + $0x88] sm:$0xee] }
  0x99   : > { %3270 = vmatpush1.bf16.msra.mxu0 %v11484_v30  ;;  %v9737_v8 = vcombine.high %v13700_v53, %v13720_v58  ;;  %v9996_v13 = vcombine.low %v1496_v52, %v1524_v0  ;;  %v9998_v36 = vcombine.low %v1510_v51, %v1538_v33  ;;  %v1629_v45 = vrot.slane %v9735_v10, 1  ;;  %v11517_v30 = vld [vmem:[%s17915_s2 + $0xb10] ss:$8 sps:$4 sm:$0xff]   ;;  %v11532_v54 = vld [vmem:[%s17915_s2 + $0xaf4] ss:$8 sps:$4 sm:$0xff]  }
  0x9a   : > { %3343 = vmatpush1.bf16.msra.mxu1 %v11487_v32  ;;  %3271 = vmatprep.subr.bf16.mxu0 %v11496_v29  ;;  %v1633_v32 = vrot.slane %v9739_v28, 1  ;;  %v9690_v29 = vld [vmem:[%s13023_s27 + $0x80] sm:$0xee]  ;;  %v13764_v60 = vrot.slane %v9741_v40, 1  ;;  %v9746_v0 = vcombine.low %v9691_v15, %v13381_v25 }
  0x9b   : > { %3344 = vmatprep.subr.bf16.mxu1 %v11499_v56  ;;  %v1631_v23 = vrot.slane %v9737_v8, 1  ;;  %v11524_v56 = vld [vmem:[%s17915_s2 + $0xa00] ss:$8 sps:$4 sm:$0xff]   ;;  %v9745_v42 = vcombine.high %v9690_v29, %v13360_v12  ;;  %v9744_v47 = vcombine.low %v9690_v29, %v13360_v12  ;;  %v11542_v29 = vld [vmem:[%s17915_s2 + $0xad0] ss:$8 sps:$4 sm:$0xff]  }
  0x9c   : > { %3170 = vmatmul.mubr.bf16.gmra.mxu0 %v9984_v37  ;;  %v13800_v7 = vrot.slane %v9746_v0, 1  ;;  %v9694_v10 = vld [vmem:[%s13023_s27 + $0xc0] sm:$0xee] }
  0x9d   : > { %3243 = vmatmul.mubr.bf16.gmra.mxu1 %v9986_v38  ;;  %3272 = vmatpush1.bf16.msra.mxu0 %v11494_v44  ;;  %v9965_v37 = vcombine.low %v1627_v35, %v1631_v23  ;;  %v9967_v38 = vcombine.low %v1629_v45, %v1633_v32  ;;  %v9740_v44 = vcombine.low %v9688_v20, %v13357_v11  ;;  %v13766_v59 = vrot.slane %v9745_v42, 1  ;;  %v11530_v11 = vld [vmem:[%s17915_s2 + $0xaf0] ss:$8 sps:$4 sm:$0xff]   ;;  %v11547_v45 = vld [vmem:[%s17915_s2 + $0xbd4] ss:$8 sps:$4 sm:$0xff]  }
  0x9e   : > { %3345 = vmatpush1.bf16.msra.mxu1 %v11497_v22  ;;  %3273 = vmatprep.subr.bf16.mxu0 %v11506_v63  ;;  %v13773_v62 = vrot.slane %v9744_v47, 1  ;;  %v11533_v22 = vld [vmem:[%s17915_s2 + $0xbf0] ss:$8 sps:$4 sm:$0xff]   ;;  %v9753_v23 = vcombine.high %v9694_v10, %v13431_v48  ;;  %v9752_v28 = vcombine.low %v9694_v10, %v13431_v48 }
  0x9f   : > { %3346 = vmatprep.subr.bf16.mxu1 %v11509_v21  ;;  %3179 = vmatprep.mubr.bf16.mxu0 %v9997_v2  ;;  %v13771_v12 = vrot.slane %v9740_v44, 1  ;;  %v9977_v63 = vcombine.low %v13764_v60, %v13766_v59  ;;  %v9743_v21 = vcombine.high %v9689_v14, %v13366_v16  ;;  %v11538_v2 = vld [vmem:[%s17915_s2 + $0xae4] ss:$8 sps:$4 sm:$0xff]  }
  0xa0   : > { %3252 = vmatprep.mubr.bf16.mxu1 %v9999_v1  ;;  %v11541_v1 = vld [vmem:[%s17915_s2 + $0xbe4] ss:$8 sps:$4 sm:$0xff]   ;;  %v13831_v32 = vrot.slane %v9752_v28, 1 }
  0xa1   : > { %3274 = vmatpush1.bf16.msra.mxu0 %v11504_v24  ;;  %v9747_v24 = vcombine.high %v9691_v15, %v13381_v25  ;;  %v9976_v52 = vcombine.low %v13771_v12, %v13773_v62  ;;  %v13794_v51 = vrot.slane %v9743_v21, 1  ;;  %v11539_v25 = vld [vmem:[%s17915_s2 + $0xbe0] ss:$8 sps:$4 sm:$0xff]   ;;  %v11614_v60 = vld [vmem:[%s17915_s2 + $0x44] ss:$8 sps:$4 sm:$0xff]  }
  0xa2   : > { %3347 = vmatpush1.bf16.msra.mxu1 %v11507_v26  ;;  %3275 = vmatprep.subr.bf16.mxu0 %v11516_v39  ;;  %v9742_v26 = vcombine.low %v9689_v14, %v13366_v16  ;;  %v9692_v39 = vld [vmem:[%s13023_s27 + $0xa0] sm:$0xee]  ;;  %v11624_v12 = vld [vmem:[%s17915_s2 + $0x34] ss:$8 sps:$4 sm:$0xff]  }
  0xa3   : > { %3348 = vmatprep.subr.bf16.mxu1 %v11519_v61  ;;  %v13796_v16 = vrot.slane %v9747_v24, 1  ;;  %v11536_v61 = vld [vmem:[%s17915_s2 + $0xae0] ss:$8 sps:$4 sm:$0xff]   ;;  %v9748_v35 = vcombine.low %v9692_v39, %v13409_v41  ;;  %v11627_v62 = vld [vmem:[%s17915_s2 + $0x134] ss:$8 sps:$4 sm:$0xff]  }
  0xa4   : > { %3180 = vmatmul.mubr.bf16.gmra.mxu0 %v9996_v13  ;;  %v13798_v33 = vrot.slane %v9742_v26, 1  ;;  %v9749_v13 = vcombine.high %v9692_v39, %v13409_v41  ;;  %v11548_v14 = vld [vmem:[%s17915_s2 + $0xac0] ss:$8 sps:$4 sm:$0xff]   ;;  %v11559_v39 = vld [vmem:[%s17915_s2 + $0xbb4] ss:$8 sps:$4 sm:$0xff]  }
  0xa5   : > { %3253 = vmatmul.mubr.bf16.gmra.mxu1 %v9998_v36  ;;  %3276 = vmatpush1.bf16.msra.mxu0 %v11514_v19  ;;  %v9979_v8 = vcombine.low %v13794_v51, %v13796_v16  ;;  %v11544_v19 = vld [vmem:[%s17915_s2 + $0xad4] ss:$8 sps:$4 sm:$0xff]   ;;  %v9698_v15 = vld [vmem:[%s13023_s27 + $0x100] sm:$0xee] }
  0xa6   : > { %3349 = vmatpush1.bf16.msra.mxu1 %v11517_v30  ;;  %3277 = vmatprep.subr.bf16.mxu0 %v11526_v46  ;;  %v9978_v36 = vcombine.low %v13798_v33, %v13800_v7  ;;  %v13824_v41 = vrot.slane %v9749_v13, 1  ;;  %v13826_v30 = vrot.slane %v9748_v35, 1  ;;  %v9693_v46 = vld [vmem:[%s13023_s27 + $0xa8] sm:$0xee]  ;;  %v9761_v0 = vcombine.high %v9698_v15, %v13543_v4  ;;  %v14013_v59 = vld [vmem:[%s13023_s27 + $0x20] sm:$0xff] }
  0xa7   : > { %3350 = vmatprep.subr.bf16.mxu1 %v11529_v31  ;;  %3295 = vmatprep.mubr.bf16.mxu0 %v9965_v37  ;;  %v13829_v31 = vrot.slane %v9753_v23, 1  ;;  %v9695_v37 = vld [vmem:[%s13023_s27 + $0xc8] sm:$0xee]  ;;  %v9751_v20 = vcombine.high %v9693_v46, %v13449_v5  ;;  %v9750_v48 = vcombine.low %v9693_v46, %v13449_v5 }
  0xa8   : > { %3368 = vmatprep.mubr.bf16.mxu1 %v9967_v38  ;;  %v9755_v38 = vcombine.high %v9695_v37, %v13452_v6  ;;  %v9754_v40 = vcombine.low %v9695_v37, %v13452_v6  ;;  %v11550_v5 = vld [vmem:[%s17915_s2 + $0xac4] ss:$8 sps:$4 sm:$0xff]   ;;  %v11551_v24 = vld [vmem:[%s17915_s2 + $0xbc0] ss:$8 sps:$4 sm:$0xff]   ;;  %v13888_v10 = vrot.slane %v9761_v0, 1  ;;  %v9732_v0 = vcombine.low %v13697_v34, %v13706_v3 }
  0xa9   : > { %3278 = vmatpush1.bf16.msra.mxu0 %v11524_v56  ;;  %v11545_v56 = vld [vmem:[%s17915_s2 + $0xbd0] ss:$8 sps:$4 sm:$0xff]   ;;  %v9989_v42 = vcombine.low %v13824_v41, %v13829_v31  ;;  %v13851_v44 = vrot.slane %v9751_v20, 1  ;;  %v13853_v47 = vrot.slane %v9750_v48, 1  ;;  %v11553_v6 = vld [vmem:[%s17915_s2 + $0xbc4] ss:$8 sps:$4 sm:$0xff]  }
  0xaa   : > { %3351 = vmatpush1.bf16.msra.mxu1 %v11527_v43  ;;  %3279 = vmatprep.subr.bf16.mxu0 %v11532_v54  ;;  %v9988_v43 = vcombine.low %v13826_v30, %v13831_v32  ;;  %v13858_v54 = vrot.slane %v9755_v38, 1  ;;  %v9699_v35 = vld [vmem:[%s13023_s27 + $0x108] sm:$0xee]  ;;  %v11557_v37 = vld [vmem:[%s17915_s2 + $0xbb0] ss:$8 sps:$4 sm:$0xff]   ;;  %v1626_v3 = vrot.slane %v9732_v0, 1 }
  0xab   : > { %3352 = vmatprep.subr.bf16.mxu1 %v11535_v55  ;;  %v13860_v55 = vrot.slane %v9754_v40, 1  ;;  %v9763_v28 = vcombine.high %v9699_v35, %v13556_v18  ;;  %v9762_v46 = vcombine.low %v9699_v35, %v13556_v18  ;;  %v11565_v40 = vld [vmem:[%s17915_s2 + $0xba4] ss:$8 sps:$4 sm:$0xff]   ;;  %v11591_v35 = vld [vmem:[%s17915_s2 + $0x174] ss:$8 sps:$4 sm:$0xff]  }
  0xac   : > { %v9991_v26 = vcombine.low %v13851_v44, %v13858_v54  ;;  %v11577_v34 = vld [vmem:[%s17915_s2 + $0xb84] ss:$8 sps:$4 sm:$0xff]   ;;  %v11625_v41 = vld [vmem:[%s17915_s2 + $0x130] ss:$8 sps:$4 sm:$0xff]   ;;  %v11644_v30 = vld [vmem:[%s17915_s2 + $0x14] ss:$8 sps:$4 sm:$0xff]  }
  0xad   : > { %3280 = vmatpush2.bf16.msra.mxu0 %v11530_v11  ;;  %v9696_v11 = vld [vmem:[%s13023_s27 + $0xe0] sm:$0xee]  ;;  %v13917_v38 = vrot.slane %v9762_v46, 1  ;;  %v14029_v0 = vld [vmem:[%s13023_s27 + $0x8] sm:$0xff]  ;;  %v11647_v32 = vld [vmem:[%s17915_s2 + $0x114] ss:$8 sps:$4 sm:$0xff]  }
  0xae   : > { %3353 = vmatpush2.bf16.msra.mxu1 %v11533_v22  ;;  %3281 = vmatprep.subr.bf16.mxu0 %v11538_v2  ;;  %v9757_v22 = vcombine.high %v9696_v11, %v13528_v49  ;;  %v9756_v21 = vcombine.low %v9696_v11, %v13528_v49  ;;  %v9990_v2 = vcombine.low %v13853_v47, %v13860_v55  ;;  %v11556_v49 = vld [vmem:[%s17915_s2 + $0xab4] ss:$8 sps:$4 sm:$0xff]   ;;  %v11560_v11 = vld [vmem:[%s17915_s2 + $0xaa0] ss:$8 sps:$4 sm:$0xff]   ;;  %v11594_v46 = vld [vmem:[%s17915_s2 + $0x64] ss:$8 sps:$4 sm:$0xff]  }
  0xaf   : > { %3354 = vmatprep.subr.bf16.mxu1 %v11541_v1  ;;  %v9760_v1 = vcombine.low %v9698_v15, %v13543_v4  ;;  %v9697_v4 = vld [vmem:[%s13023_s27 + $0xe8] sm:$0xee]  ;;  %v11568_v15 = vld [vmem:[%s17915_s2 + $0xa94] ss:$8 sps:$4 sm:$0xff]   ;;  %v11645_v47 = vld [vmem:[%s17915_s2 + $0x110] ss:$8 sps:$4 sm:$0xff]  }
  0xb0   : > { %v9759_v23 = vcombine.high %v9697_v4, %v13553_v17  ;;  %v11617_v51 = vld [vmem:[%s17915_s2 + $0x144] ss:$8 sps:$4 sm:$0xff]  }
  0xb1   : > { %3282 = vmatpush2.bf16.msra.mxu0 %v11536_v61  ;;  %v13884_v61 = vrot.slane %v9757_v22, 1  ;;  %v13890_v13 = vrot.slane %v9760_v1, 1  ;;  %v11571_v22 = vld [vmem:[%s17915_s2 + $0xb94] ss:$8 sps:$4 sm:$0xff]   ;;  %v9736_v1 = vcombine.low %v13700_v53, %v13720_v58  ;;  %v11572_v53 = vld [vmem:[%s17915_s2 + $0xa80] ss:$8 sps:$4 sm:$0xff]  }
  0xb2   : > { %3355 = vmatpush2.bf16.msra.mxu1 %v11539_v25  ;;  %3283 = vmatprep.subr.bf16.mxu0 %v11544_v19  ;;  %v13886_v25 = vrot.slane %v9756_v21, 1  ;;  %v11554_v19 = vld [vmem:[%s17915_s2 + $0xab0] ss:$8 sps:$4 sm:$0xff]   ;;  %v11637_v44 = vld [vmem:[%s17915_s2 + $0x124] ss:$8 sps:$4 sm:$0xff]  }
  0xb3   : > { %3356 = vmatprep.subr.bf16.mxu1 %v11547_v45  ;;  %v9758_v45 = vcombine.low %v9697_v4, %v13553_v17  ;;  %v10001_v20 = vcombine.low %v13884_v61, %v13888_v10  ;;  %v13913_v17 = vrot.slane %v9763_v28, 1  ;;  %v11566_v21 = vld [vmem:[%s17915_s2 + $0xa90] ss:$8 sps:$4 sm:$0xff]   ;;  %v11574_v4 = vld [vmem:[%s17915_s2 + $0xa84] ss:$8 sps:$4 sm:$0xff]  }
  0xb4   : > { %v10000_v48 = vcombine.low %v13886_v25, %v13890_v13  ;;  %v11586_v28 = vld [vmem:[%s17915_s2 + $0x70] ss:$8 sps:$4 sm:$0xff]   ;;  %v11654_v55 = vld [vmem:[%s17915_s2 + $0x4] ss:$8 sps:$4 sm:$0xff]   ;;  %v11660_v25 = vld [vmem:[%s17915_s2 + $0xf4] ss:$8 sps:$4 sm:$0xff]  }
  0xb5   : > { %3284 = vmatpush2.bf16.msra.mxu0 %v11542_v29  ;;  %v11562_v29 = vld [vmem:[%s17915_s2 + $0xaa4] ss:$8 sps:$4 sm:$0xff]   ;;  %v13915_v18 = vrot.slane %v9758_v45, 1  ;;  %v11589_v45 = vld [vmem:[%s17915_s2 + $0x170] ss:$8 sps:$4 sm:$0xff]  }
  0xb6   : > { %3357 = vmatpush2.bf16.msra.mxu1 %v11545_v56  ;;  %3285 = vmatprep.subr.bf16.mxu0 %v11550_v5  ;;  %v13911_v56 = vrot.slane %v9759_v23, 1  ;;  %v11663_v13 = vld [vmem:[%s17915_s2 + $0x1f4] ss:$8 sps:$4 sm:$0xff]  }
  0xb7   : > { %3358 = vmatprep.subr.bf16.mxu1 %v11553_v6  ;;  %v10002_v6 = vcombine.low %v13915_v18, %v13917_v38  ;;  %v11666_v18 = vld [vmem:[%s17915_s2 + $0xe4] ss:$8 sps:$4 sm:$0xff]  }
  0xb8   : > { %v10003_v5 = vcombine.low %v13911_v56, %v13913_v17  ;;  %v11655_v56 = vld [vmem:[%s17915_s2 + $0x100] ss:$8 sps:$4 sm:$0xff]   ;;  %v11661_v17 = vld [vmem:[%s17915_s2 + $0x1f0] ss:$8 sps:$4 sm:$0xff]   ;;  %v11669_v38 = vld [vmem:[%s17915_s2 + $0x1e4] ss:$8 sps:$4 sm:$0xff]  }
  0xb9   : > { %3286 = vmatpush2.bf16.msra.mxu0 %v11548_v14  ;;  %v11563_v14 = vld [vmem:[%s17915_s2 + $0xba0] ss:$8 sps:$4 sm:$0xff]  }
  0xba   : > { %3359 = vmatpush2.bf16.msra.mxu1 %v11551_v24  ;;  %3287 = vmatprep.subr.bf16.mxu0 %v11556_v49  ;;  %v11569_v24 = vld [vmem:[%s17915_s2 + $0xb90] ss:$8 sps:$4 sm:$0xff]   ;;  %v9734_v49 = vcombine.low %v13703_v50, %v13725_v9  ;;  %v11575_v50 = vld [vmem:[%s17915_s2 + $0xb80] ss:$8 sps:$4 sm:$0xff]  }
  0xbb   : > { %3360 = vmatprep.subr.bf16.mxu1 %v11559_v39  ;;  %v9738_v39 = vcombine.low %v13711_v57, %v13733_v27  ;;  %v1630_v57 = vrot.slane %v9736_v1, 1  ;;  %v11588_v27 = vld [vmem:[%s17915_s2 + $0x74] ss:$8 sps:$4 sm:$0xff]  }
  0xbc   : > { %v1628_v58 = vrot.slane %v9734_v49, 1  ;;  %v14032_v1 = vld [vmem:[%s13023_s27 + $0x18] sm:$0x11] }
  0xbd   : > { %3288 = vmatpush2.bf16.msra.mxu0 %v11554_v19  ;;  %v1632_v9 = vrot.slane %v9738_v39, 1  ;;  %v9964_v19 = vcombine.low %v1626_v3, %v1630_v57  ;;  %v14035_v49 = vld [vmem:[%s13023_s27 + $0x38] sm:$0x11]  ;;  %v9590_v39 = vcombine.low %v14029_v0, %v14032_v1  ;;  %v14043_v57 = vld [vmem:[%s13023_s27 + $0x28] sm:$0xff] }
  0xbe   : > { %3361 = vmatpush2.bf16.msra.mxu1 %v11557_v37  ;;  %3289 = vmatprep.subr.bf16.mxu0 %v11562_v29  ;;  %v11597_v37 = vld [vmem:[%s17915_s2 + $0x164] ss:$8 sps:$4 sm:$0xff]   ;;  %v11592_v29 = vld [vmem:[%s17915_s2 + $0x60] ss:$8 sps:$4 sm:$0xff]   ;;  %v10199_v10 = vcombine.high %v14029_v0, %v14043_v57 }
  0xbf   : > { %3362 = vmatprep.subr.bf16.mxu1 %v11565_v40  ;;  %v9966_v23 = vcombine.low %v1628_v58, %v1632_v9  ;;  %v11595_v40 = vld [vmem:[%s17915_s2 + $0x160] ss:$8 sps:$4 sm:$0xff]   ;;  %v9594_v9 = vcombine.low %v14043_v57, %v14035_v49 }
  0xc0   : > { %v11615_v58 = vld [vmem:[%s17915_s2 + $0x140] ss:$8 sps:$4 sm:$0xff]  }
  0xc1   : > { %3290 = vmatpush2.bf16.msra.mxu0 %v11560_v11  ;;  %v11604_v11 = vld [vmem:[%s17915_s2 + $0x54] ss:$8 sps:$4 sm:$0xff]  }
  0xc2   : > { %3363 = vmatpush2.bf16.msra.mxu1 %v11563_v14  ;;  %3291 = vmatprep.subr.bf16.mxu0 %v11568_v15  ;;  %v11607_v14 = vld [vmem:[%s17915_s2 + $0x154] ss:$8 sps:$4 sm:$0xff]   ;;  %v11602_v15 = vld [vmem:[%s17915_s2 + $0x50] ss:$8 sps:$4 sm:$0xff]  }
  0xc3   : > { %3364 = vmatprep.subr.bf16.mxu1 %v11571_v22  ;;  %v11605_v22 = vld [vmem:[%s17915_s2 + $0x150] ss:$8 sps:$4 sm:$0xff]  }
  0xc5   : > { %3292 = vmatpush2.bf16.msra.mxu0 %v11566_v21  ;;  %v14007_v21 = vld [vmem:[%s13023_s27] sm:$0xff] }
  0xc6   : > { %3365 = vmatpush2.bf16.msra.mxu1 %v11569_v24  ;;  %3293 = vmatprep.subr.bf16.mxu0 %v11574_v4  ;;  %v14019_v24 = vld [vmem:[%s13023_s27 + $0x30] sm:$0x11]  ;;  %v11612_v4 = vld [vmem:[%s17915_s2 + $0x40] ss:$8 sps:$4 sm:$0xff]   ;;  %v10197_v61 = vcombine.high %v14007_v21, %v14013_v59 }
  0xc7   : > { %3366 = vmatprep.subr.bf16.mxu1 %v11577_v34 }
  0xc9   : > { %3294 = vmatpush2.bf16.msra.mxu0 %v11572_v53 }
  0xca   : > { %3367 = vmatpush2.bf16.msra.mxu1 %v11575_v50  ;;  %4465 = vmatprep.subr.bf16.mxu0 %v11588_v27  ;;  %v568_v27 = vshrl.u32 %v9590_v39, 16 }
  0xcb   : > { %4538 = vmatprep.subr.bf16.mxu1 %v11591_v35  ;;  %v570_v35 = vshll.u32 %v9590_v39, 16  ;;  %v11684_v39 = vld [vmem:[%s17915_s2 + $0xb4] ss:$8 sps:$4 sm:$0xff]  }
  0xcc   : > { %3296 = vmatmul.mubr.bf16.vlgmr.msra.gmra.mxu0 %v9964_v19  ;;  %v598_v19 = vshll.u32 %v9594_v9, 16 }
  0xcd   : > { %3369 = vmatmul.mubr.bf16.vlgmr.msra.gmra.mxu1 %v9966_v23  ;;  %4466 = vmatpush1.bf16.msra.mxu0 %v11586_v28  ;;  %v572_v7 = vrot.slane %v570_v35, 1  ;;  %v11699_v35 = vld [vmem:[%s17915_s2 + $0x194] ss:$8 sps:$4 sm:$0xff]  }
  0xce   : > { %4539 = vmatpush1.bf16.msra.mxu1 %v11589_v45  ;;  %4467 = vmatprep.subr.bf16.mxu0 %v11594_v46  ;;  %v11622_v45 = vld [vmem:[%s17915_s2 + $0x30] ss:$8 sps:$4 sm:$0xff]   ;;  %v600_v46 = vrot.slane %v598_v19, 1  ;;  %v11712_v19 = vld [vmem:[%s17915_s2 + $0x274] ss:$8 sps:$4 sm:$0xff]  }
  0xcf   : > { %4540 = vmatprep.subr.bf16.mxu1 %v11597_v37  ;;  %3305 = vmatprep.mubr.bf16.mxu0 %v9977_v63  ;;  %v14016_v63 = vld [vmem:[%s13023_s27 + $0x10] sm:$0x11]  ;;  %v14075_v37 = vor.u32 %v572_v7, %v568_v27  ;;  %v11700_v7 = vld [vmem:[%s17915_s2 + $0x80] ss:$8 sps:$4 sm:$0xff]  }
  0xd0   : > { %3378 = vmatprep.mubr.bf16.mxu1 %v9979_v8  ;;  %v9588_v16 = vcombine.low %v14007_v21, %v14016_v63  ;;  %v9592_v8 = vcombine.low %v14013_v59, %v14019_v24  ;;  %v11696_v27 = vld [vmem:[%s17915_s2 + $0x94] ss:$8 sps:$4 sm:$0xff]  }
  0xd1   : > { %4468 = vmatpush1.bf16.msra.mxu0 %v11592_v29  ;;  %v11775_v29 = vld [vmem:[%s17915_s2 + $0x3d4] ss:$8 sps:$4 sm:$0xff]  }
  0xd2   : > { %4541 = vmatpush1.bf16.msra.mxu1 %v11595_v40  ;;  %4469 = vmatprep.subr.bf16.mxu0 %v11604_v11  ;;  %v554_v34 = vshrl.u32 %v9588_v16, 16  ;;  %v556_v53 = vshll.u32 %v9588_v16, 16  ;;  %v582_v50 = vshrl.u32 %v9592_v8, 16  ;;  %v584_v3 = vshll.u32 %v9592_v8, 16  ;;  %v11635_v40 = vld [vmem:[%s17915_s2 + $0x120] ss:$8 sps:$4 sm:$0xff]  }
  0xd3   : > { %4542 = vmatprep.subr.bf16.mxu1 %v11607_v14  ;;  %v11672_v11 = vld [vmem:[%s17915_s2 + $0xd4] ss:$8 sps:$4 sm:$0xff]   ;;  %v11676_v16 = vld [vmem:[%s17915_s2 + $0xc0] ss:$8 sps:$4 sm:$0xff]  }
  0xd4   : > { %3306 = vmatmul.mubr.bf16.gmra.mxu0 %v9976_v52  ;;  %v558_v52 = vrot.slane %v556_v53, 1  ;;  %v586_v33 = vrot.slane %v584_v3, 1  ;;  %v11675_v14 = vld [vmem:[%s17915_s2 + $0x1d4] ss:$8 sps:$4 sm:$0xff]   ;;  %v11679_v8 = vld [vmem:[%s17915_s2 + $0x1c0] ss:$8 sps:$4 sm:$0xff]  }
  0xd5   : > { %3379 = vmatmul.mubr.bf16.gmra.mxu1 %v9978_v36  ;;  %4470 = vmatpush1.bf16.msra.mxu0 %v11602_v15  ;;  %v596_v36 = vshrl.u32 %v9594_v9, 16  ;;  %v11670_v15 = vld [vmem:[%s17915_s2 + $0xd0] ss:$8 sps:$4 sm:$0xff]   ;;  %v11693_v3 = vld [vmem:[%s17915_s2 + $0x1a4] ss:$8 sps:$4 sm:$0xff]  }
  0xd6   : > { %4543 = vmatpush1.bf16.msra.mxu1 %v11605_v22  ;;  %4471 = vmatprep.subr.bf16.mxu0 %v11614_v60  ;;  %v14068_v23 = vor.u32 %v558_v52, %v554_v34  ;;  %v14070_v28 = vor.u32 %v586_v33, %v582_v50  ;;  %v11673_v22 = vld [vmem:[%s17915_s2 + $0x1d0] ss:$8 sps:$4 sm:$0xff]   ;;  %v11678_v60 = vld [vmem:[%s17915_s2 + $0xc4] ss:$8 sps:$4 sm:$0xff]   ;;  %v11691_v9 = vld [vmem:[%s17915_s2 + $0x1a0] ss:$8 sps:$4 sm:$0xff]  }
  0xd7   : > { %4544 = vmatprep.subr.bf16.mxu1 %v11617_v51  ;;  %3315 = vmatprep.mubr.bf16.mxu0 %v9989_v42  ;;  %v11634_v42 = vld [vmem:[%s17915_s2 + $0x24] ss:$8 sps:$4 sm:$0xff]   ;;  %v14088_v54 = vor.u32 %v600_v46, %v596_v36  ;;  %v11682_v34 = vld [vmem:[%s17915_s2 + $0xb0] ss:$8 sps:$4 sm:$0xff]   ;;  %v11703_v36 = vld [vmem:[%s17915_s2 + $0x180] ss:$8 sps:$4 sm:$0xff]  }
  0xd8   : > { %3388 = vmatprep.mubr.bf16.mxu1 %v9991_v26  ;;  %v11632_v26 = vld [vmem:[%s17915_s2 + $0x20] ss:$8 sps:$4 sm:$0xff]   ;;  %v11681_v51 = vld [vmem:[%s17915_s2 + $0x1c4] ss:$8 sps:$4 sm:$0xff]   ;;  %v11685_v53 = vld [vmem:[%s17915_s2 + $0x1b0] ss:$8 sps:$4 sm:$0xff]  }
  0xd9   : > { %4472 = vmatpush1.bf16.msra.mxu0 %v11612_v4  ;;  %v11687_v4 = vld [vmem:[%s17915_s2 + $0x1b4] ss:$8 sps:$4 sm:$0xff]   ;;  %v11690_v50 = vld [vmem:[%s17915_s2 + $0xa4] ss:$8 sps:$4 sm:$0xff]   ;;  %v11710_v46 = vld [vmem:[%s17915_s2 + $0x270] ss:$8 sps:$4 sm:$0xff]  }
  0xda   : > { %4545 = vmatpush1.bf16.msra.mxu1 %v11615_v58  ;;  %4473 = vmatprep.subr.bf16.mxu0 %v11624_v12  ;;  %v11688_v58 = vld [vmem:[%s17915_s2 + $0xa0] ss:$8 sps:$4 sm:$0xff]   ;;  %v11694_v12 = vld [vmem:[%s17915_s2 + $0x90] ss:$8 sps:$4 sm:$0xff]   ;;  %v11702_v52 = vld [vmem:[%s17915_s2 + $0x84] ss:$8 sps:$4 sm:$0xff]  }
  0xdb   : > { %4546 = vmatprep.subr.bf16.mxu1 %v11627_v62  ;;  %v11697_v62 = vld [vmem:[%s17915_s2 + $0x190] ss:$8 sps:$4 sm:$0xff]   ;;  %v11705_v33 = vld [vmem:[%s17915_s2 + $0x184] ss:$8 sps:$4 sm:$0xff]  }
  0xdc   : > { %3316 = vmatmul.mubr.bf16.gmra.mxu0 %v9988_v43  ;;  %v11642_v43 = vld [vmem:[%s17915_s2 + $0x10] ss:$8 sps:$4 sm:$0xff]  }
  0xdd   : > { %3389 = vmatmul.mubr.bf16.gmra.mxu1 %v9990_v2  ;;  %4474 = vmatpush1.bf16.msra.mxu0 %v11622_v45  ;;  %v11657_v2 = vld [vmem:[%s17915_s2 + $0x104] ss:$8 sps:$4 sm:$0xff]   ;;  %v11715_v45 = vld [vmem:[%s17915_s2 + $0x374] ss:$8 sps:$4 sm:$0xff]  }
  0xde   : > { %4547 = vmatpush1.bf16.msra.mxu1 %v11625_v41  ;;  %4475 = vmatprep.subr.bf16.mxu0 %v11634_v42  ;;  %v14250_v41 = vld [vmem:[%s13023_s27 + $0x40] sm:$0xff] }
  0xdf   : > { %4548 = vmatprep.subr.bf16.mxu1 %v11637_v44  ;;  %3325 = vmatprep.mubr.bf16.mxu0 %v10001_v20  ;;  %v11652_v20 = vld [vmem:[%s17915_s2] ss:$8 sps:$4 sm:$0xff]  }
  0xe0   : > { %3398 = vmatprep.mubr.bf16.mxu1 %v10003_v5  ;;  %v11664_v5 = vld [vmem:[%s17915_s2 + $0xe0] ss:$8 sps:$4 sm:$0xff]  }
  0xe1   : > { %4476 = vmatpush1.bf16.msra.mxu0 %v11632_v26  ;;  %v14253_v42 = vld [vmem:[%s13023_s27 + $0x60] sm:$0xff]  ;;  %v14256_v44 = vld [vmem:[%s13023_s27 + $0x48] sm:$0xff]  ;;  %v10196_v26 = vcombine.low %v14007_v21, %v14013_v59 }
  0xe2   : > { %4549 = vmatpush1.bf16.msra.mxu1 %v11635_v40  ;;  %4477 = vmatprep.subr.bf16.mxu0 %v11644_v30  ;;  %v10198_v40 = vcombine.low %v14029_v0, %v14043_v57  ;;  %v14263_v30 = vld [vmem:[%s13023_s27 + $0x68] sm:$0xff] }
  0xe3   : > { %4550 = vmatprep.subr.bf16.mxu1 %v11647_v32  ;;  %v11713_v32 = vld [vmem:[%s17915_s2 + $0x370] ss:$8 sps:$4 sm:$0xff]  }
  0xe4   : > { %3326 = vmatmul.mubr.bf16.gmra.mxu0 %v10000_v48  ;;  %v11658_v48 = vld [vmem:[%s17915_s2 + $0xf0] ss:$8 sps:$4 sm:$0xff]  }
  0xe5   : > { %3399 = vmatmul.mubr.bf16.gmra.mxu1 %v10002_v6  ;;  %4478 = vmatpush1.bf16.msra.mxu0 %v11642_v43  ;;  %v11667_v6 = vld [vmem:[%s17915_s2 + $0x1e0] ss:$8 sps:$4 sm:$0xff]   ;;  %v11718_v43 = vld [vmem:[%s17915_s2 + $0x264] ss:$8 sps:$4 sm:$0xff]  }
  0xe6   : > { %4551 = vmatpush1.bf16.msra.mxu1 %v11645_v47  ;;  %4479 = vmatprep.subr.bf16.mxu0 %v11654_v55  ;;  %v11721_v47 = vld [vmem:[%s17915_s2 + $0x364] ss:$8 sps:$4 sm:$0xff]   ;;  %v10209_v55 = vcombine.high %v14250_v41, %v14253_v42 }
  0xe7   : > { %4552 = vmatprep.subr.bf16.mxu1 %v11657_v2  ;;  %4497 = vmatprep.mubr.bf16.mxu0 %v10197_v61  ;;  %v10211_v2 = vcombine.high %v14256_v44, %v14263_v30 }
  0xe8   : > { %4570 = vmatprep.mubr.bf16.mxu1 %v10199_v10 }
  0xe9   : > { %4480 = vmatpush1.bf16.msra.mxu0 %v11652_v20  ;;  %v11716_v20 = vld [vmem:[%s17915_s2 + $0x260] ss:$8 sps:$4 sm:$0xff]  }
  0xea   : > { %4553 = vmatpush1.bf16.msra.mxu1 %v11655_v56  ;;  %4481 = vmatprep.subr.bf16.mxu0 %v11660_v25  ;;  %v11719_v56 = vld [vmem:[%s17915_s2 + $0x360] ss:$8 sps:$4 sm:$0xff]  }
  0xeb   : > { %4554 = vmatprep.subr.bf16.mxu1 %v11663_v13  ;;  %v11724_v13 = vld [vmem:[%s17915_s2 + $0x254] ss:$8 sps:$4 sm:$0xff]  }
  0xed   : > { %4482 = vmatpush2.bf16.msra.mxu0 %v11658_v48 }
  0xee   : > { %4555 = vmatpush2.bf16.msra.mxu1 %v11661_v17  ;;  %4483 = vmatprep.subr.bf16.mxu0 %v11666_v18  ;;  %v11727_v18 = vld [vmem:[%s17915_s2 + $0x354] ss:$8 sps:$4 sm:$0xff]  }
  0xef   : > { %4556 = vmatprep.subr.bf16.mxu1 %v11669_v38 }
  0xf1   : > { %4484 = vmatpush2.bf16.msra.mxu0 %v11664_v5  ;;  %v14295_v5 = vld [vmem:[%s13023_s27 + $0x80] sm:$0xff] }
  0xf2   : > { %4557 = vmatpush2.bf16.msra.mxu1 %v11667_v6  ;;  %4485 = vmatprep.subr.bf16.mxu0 %v11672_v11  ;;  %v14298_v6 = vld [vmem:[%s13023_s27 + $0xa0] sm:$0xff] }
  0xf3   : > { %4558 = vmatprep.subr.bf16.mxu1 %v11675_v14 }
  0xf5   : > { %4486 = vmatpush2.bf16.msra.mxu0 %v11670_v15  ;;  %v10208_v15 = vcombine.low %v14250_v41, %v14253_v42 }
  0xf6   : > { %4559 = vmatpush2.bf16.msra.mxu1 %v11673_v22  ;;  %4487 = vmatprep.subr.bf16.mxu0 %v11678_v60  ;;  %v10210_v22 = vcombine.low %v14256_v44, %v14263_v30  ;;  %v14305_v60 = vld [vmem:[%s13023_s27 + $0x88] sm:$0xff] }
  0xf7   : > { %4560 = vmatprep.subr.bf16.mxu1 %v11681_v51  ;;  %v14308_v51 = vld [vmem:[%s13023_s27 + $0xa8] sm:$0xff] }
  0xf9   : > { %4488 = vmatpush2.bf16.msra.mxu0 %v11676_v16  ;;  %v14312_v16 = vcombine.high %v14007_v21, %v14016_v63  ;;  %v11733_v63 = vld [vmem:[%s17915_s2 + $0x344] ss:$8 sps:$4 sm:$0xff]  }
  0xfa   : > { %4561 = vmatpush2.bf16.msra.mxu1 %v11679_v8  ;;  %4489 = vmatprep.subr.bf16.mxu0 %v11684_v39  ;;  %v11722_v39 = vld [vmem:[%s17915_s2 + $0x250] ss:$8 sps:$4 sm:$0xff]  }
  0xfb   : > { %4562 = vmatprep.subr.bf16.mxu1 %v11687_v4  ;;  %v11725_v4 = vld [vmem:[%s17915_s2 + $0x350] ss:$8 sps:$4 sm:$0xff]  }
  0xfd   : > { %4490 = vmatpush2.bf16.msra.mxu0 %v11682_v34  ;;  %v11730_v34 = vld [vmem:[%s17915_s2 + $0x244] ss:$8 sps:$4 sm:$0xff]  }
  0xfe   : > { %4563 = vmatpush2.bf16.msra.mxu1 %v11685_v53  ;;  %4491 = vmatprep.subr.bf16.mxu0 %v11690_v50  ;;  %v14334_v50 = vcombine.high %v14013_v59, %v14019_v24  ;;  %v563_v59 = vshll.u32 %v14312_v16, 16  ;;  %v11728_v24 = vld [vmem:[%s17915_s2 + $0x240] ss:$8 sps:$4 sm:$0xff]  }
  0xff   : > { %4564 = vmatprep.subr.bf16.mxu1 %v11693_v3  ;;  %v10221_v3 = vcombine.high %v14295_v5, %v14298_v6 }
 0x101   : > { %4492 = vmatpush2.bf16.msra.mxu0 %v11688_v58  ;;  %v10223_v58 = vcombine.high %v14305_v60, %v14308_v51 }
 0x102   : > { %4565 = vmatpush2.bf16.msra.mxu1 %v11691_v9  ;;  %4493 = vmatprep.subr.bf16.mxu0 %v11696_v27  ;;  %v14342_v9 = vcombine.high %v14029_v0, %v14032_v1  ;;  %v14346_v27 = vcombine.high %v14043_v57, %v14035_v49  ;;  %v11731_v0 = vld [vmem:[%s17915_s2 + $0x340] ss:$8 sps:$4 sm:$0xff]   ;;  %v561_v49 = vshrl.u32 %v14312_v16, 16  ;;  %v11736_v57 = vld [vmem:[%s17915_s2 + $0x234] ss:$8 sps:$4 sm:$0xff]  }
 0x103   : > { %4566 = vmatprep.subr.bf16.mxu1 %v11699_v35 }
 0x105   : > { %4494 = vmatpush2.bf16.msra.mxu0 %v11694_v12 }
 0x106   : > { %4567 = vmatpush2.bf16.msra.mxu1 %v11697_v62  ;;  %4495 = vmatprep.subr.bf16.mxu0 %v11702_v52  ;;  %v11739_v62 = vld [vmem:[%s17915_s2 + $0x334] ss:$8 sps:$4 sm:$0xff]  }
 0x107   : > { %4568 = vmatprep.subr.bf16.mxu1 %v11705_v33 }
 0x109   : > { %4496 = vmatpush2.bf16.msra.mxu0 %v11700_v7  ;;  %v591_v7 = vshll.u32 %v14334_v50, 16 }
 0x10a   : > { %4569 = vmatpush2.bf16.msra.mxu1 %v11703_v36  ;;  %4611 = vmatprep.subr.bf16.mxu0 %v11712_v19  ;;  %v14366_v36 = vld [vmem:[%s13023_s27 + $0xc0] sm:$0xff] }
 0x10b   : > { %4684 = vmatprep.subr.bf16.mxu1 %v11715_v45  ;;  %v14369_v19 = vld [vmem:[%s13023_s27 + $0xe0] sm:$0xff] }
 0x10c   : > { %v3005_v61 = vpop.f32.mrf.mxu0  ;;  %4498 = vmatmul.mubr.bf16.vlgmr.msra.gmra.mxu0 %v10196_v26  ;;  %v577_v26 = vshll.u32 %v14342_v9, 16  ;;  %v10233_v16 = vcombine.high %v14366_v36, %v14369_v19 }
 0x10d   : > { %v3078_v10 = vpop.f32.mrf.mxu1  ;;  %4571 = vmatmul.mubr.bf16.vlgmr.msra.gmra.mxu1 %v10198_v40  ;;  %4612 = vmatpush1.bf16.msra.mxu0 %v11710_v46  ;;  %v589_v46 = vshrl.u32 %v14334_v50, 16  ;;  %v605_v40 = vshll.u32 %v14346_v27, 16 }
 0x10e   : > { %v14284_v25 = vadd.f32 %v3078_v10, %v3005_v61  ;;  %4685 = vmatpush1.bf16.msra.mxu1 %v11713_v32  ;;  %v3007_v48 = vpop.f32.mrf.mxu0  ;;  %4613 = vmatprep.subr.bf16.mxu0 %v11718_v43  ;;  %v10220_v32 = vcombine.low %v14295_v5, %v14298_v6  ;;  %v10222_v43 = vcombine.low %v14305_v60, %v14308_v51  ;;  %v565_v10 = vrot.slane %v563_v59, 1 }
 0x10f   : > { %v3080_v17 = vpop.f32.mrf.mxu1  ;;  %4686 = vmatprep.subr.bf16.mxu1 %v11721_v47  ;;  %4507 = vmatprep.mubr.bf16.mxu0 %v10209_v55  ;;  %v14381_v47 = vld [vmem:[%s13023_s27 + $0xc8] sm:$0xff] }
 0x110   : > { %v14292_v38 = vadd.f32 %v3080_v17, %v3007_v48  ;;  %4580 = vmatprep.mubr.bf16.mxu1 %v10211_v2  ;;  %v3009_v11 = vpop.f32.mrf.mxu0  ;;  %v14384_v55 = vld [vmem:[%s13023_s27 + $0xe8] sm:$0xff] }
 0x111   : > { %v3082_v14 = vpop.f32.mrf.mxu1  ;;  %4614 = vmatpush1.bf16.msra.mxu0 %v11716_v20  ;;  %v575_v20 = vshrl.u32 %v14342_v9, 16  ;;  %v11742_v48 = vld [vmem:[%s17915_s2 + $0x224] ss:$8 sps:$4 sm:$0xff]   ;;  %v11748_v9 = vld [vmem:[%s17915_s2 + $0x214] ss:$8 sps:$4 sm:$0xff]  }
 0x112   : > { %v14314_v8 = vadd.f32 %v3082_v14, %v3009_v11  ;;  %4687 = vmatpush1.bf16.msra.mxu1 %v11719_v56  ;;  %v14325_v53 = vpop.f32.mrf.mxu0  ;;  %4615 = vmatprep.subr.bf16.mxu0 %v11724_v13  ;;  %v11734_v56 = vld [vmem:[%s17915_s2 + $0x230] ss:$8 sps:$4 sm:$0xff]  }
 0x113   : > { %17941 = vst [vmem:[#allocation2_spill] sm:$0xff] %v14325_v53  ;;  %v14327_v21 = vpop.f32.mrf.mxu1  ;;  %4688 = vmatprep.subr.bf16.mxu1 %v11727_v18  ;;  %v11737_v13 = vld [vmem:[%s17915_s2 + $0x330] ss:$8 sps:$4 sm:$0xff]   ;;  %v11745_v18 = vld [vmem:[%s17915_s2 + $0x324] ss:$8 sps:$4 sm:$0xff]  }
 0x114   : > { %17942 = vst [vmem:[#allocation3_spill] sm:$0xff] %v14327_v21  ;;  %4508 = vmatmul.mubr.bf16.gmra.mxu0 %v10208_v15  ;;  %v3015_v35 = vpop.f32.mrf.mxu0  ;;  %v593_v15 = vrot.slane %v591_v7, 1  ;;  %v10232_v7 = vcombine.low %v14366_v36, %v14369_v19 }
 0x115   : > { %4581 = vmatmul.mubr.bf16.gmra.mxu1 %v10210_v22  ;;  %v3088_v12 = vpop.f32.mrf.mxu1  ;;  %4616 = vmatpush1.bf16.msra.mxu0 %v11722_v39  ;;  %v603_v22 = vshrl.u32 %v14346_v27, 16  ;;  %v10235_v39 = vcombine.high %v14381_v47, %v14384_v55 }
 0x116   : > { %4689 = vmatpush1.bf16.msra.mxu1 %v11725_v4  ;;  %v14355_v1 = vadd.f32 %v3088_v12, %v3015_v35  ;;  %4617 = vmatprep.subr.bf16.mxu0 %v11730_v34  ;;  %v3017_v52 = vpop.f32.mrf.mxu0  ;;  %v579_v4 = vrot.slane %v577_v26, 1  ;;  %v607_v34 = vrot.slane %v605_v40, 1  ;;  %v11751_v35 = vld [vmem:[%s17915_s2 + $0x314] ss:$8 sps:$4 sm:$0xff]   ;;  %v11746_v26 = vld [vmem:[%s17915_s2 + $0x210] ss:$8 sps:$4 sm:$0xff]   ;;  %v10234_v40 = vcombine.low %v14381_v47, %v14384_v55 }
 0x117   : > { %4690 = vmatprep.subr.bf16.mxu1 %v11733_v63  ;;  %v3090_v33 = vpop.f32.mrf.mxu1  ;;  %4517 = vmatprep.mubr.bf16.mxu0 %v10221_v3  ;;  %v11740_v3 = vld [vmem:[%s17915_s2 + $0x220] ss:$8 sps:$4 sm:$0xff]  }
 0x118   : > { %4590 = vmatprep.mubr.bf16.mxu1 %v10223_v58  ;;  %v14371_v45 = vadd.f32 %v3090_v33, %v3017_v52  ;;  %v3019_v2 = vpop.f32.mrf.mxu0  ;;  %v11743_v58 = vld [vmem:[%s17915_s2 + $0x320] ss:$8 sps:$4 sm:$0xff]   ;;  %v608_v52 = vor.u32 %v607_v34, %v603_v22  ;;  %v14427_v33 = vld [vmem:[%s13023_s27 + $0x50] sm:$0x11] }
 0x119   : > { %v3092_v61 = vpop.f32.mrf.mxu1  ;;  %4618 = vmatpush1.bf16.msra.mxu0 %v11728_v24  ;;  %v566_v24 = vor.u32 %v565_v10, %v561_v49  ;;  %v11757_v10 = vld [vmem:[%s17915_s2 + $0x304] ss:$8 sps:$4 sm:$0xff]  }
 0x11a   : > { %4691 = vmatpush1.bf16.msra.mxu1 %v11731_v0  ;;  %v14396_v17 = vadd.f32 %v3092_v61, %v3019_v2  ;;  %4619 = vmatprep.subr.bf16.mxu0 %v11736_v57  ;;  %v14401_v11 = vpop.f32.mrf.mxu0  ;;  %v594_v0 = vor.u32 %v593_v15, %v589_v46  ;;  %v11754_v61 = vld [vmem:[%s17915_s2 + $0x204] ss:$8 sps:$4 sm:$0xff]  }
 0x11b   : > { %4692 = vmatprep.subr.bf16.mxu1 %v11739_v62  ;;  %17944 = vst [vmem:[#allocation5_spill] sm:$0xff] %v14401_v11  ;;  %v14403_v14 = vpop.f32.mrf.mxu1  ;;  %v580_v62 = vor.u32 %v579_v4, %v575_v20  ;;  %v11760_v4 = vld [vmem:[%s17915_s2 + $0x2f4] ss:$8 sps:$4 sm:$0xff]  }
 0x11c   : > { %17943 = vst [vmem:[#allocation4_spill] sm:$0xff] %v14396_v17  ;;  %17945 = vst [vmem:[#allocation6_spill] sm:$0xff] %v14403_v14  ;;  %4518 = vmatmul.mubr.bf16.gmra.mxu0 %v10220_v32  ;;  %v3025_v63 = vpop.f32.mrf.mxu0  ;;  %v14437_v32 = vld [vmem:[%s13023_s27 + $0x70] sm:$0x11]  ;;  %v10201_v15 = vcombine.low %v566_v24, %v594_v0 }
 0x11d   : > { %4591 = vmatmul.mubr.bf16.gmra.mxu1 %v10222_v43  ;;  %v3098_v50 = vpop.f32.mrf.mxu1  ;;  %4620 = vmatpush1.bf16.msra.mxu0 %v11734_v56  ;;  %v11749_v43 = vld [vmem:[%s17915_s2 + $0x310] ss:$8 sps:$4 sm:$0xff]   ;;  %v10203_v22 = vcombine.low %v580_v62, %v608_v52 }
 0x11e   : > { %4693 = vmatpush1.bf16.msra.mxu1 %v11737_v13  ;;  %v14419_v27 = vadd.f32 %v3098_v50, %v3025_v63  ;;  %4621 = vmatprep.subr.bf16.mxu0 %v11742_v48  ;;  %v3027_v12 = vpop.f32.mrf.mxu0  ;;  %v14456_v13 = vcombine.high %v14250_v41, %v14427_v33  ;;  %v11752_v48 = vld [vmem:[%s17915_s2 + $0x200] ss:$8 sps:$4 sm:$0xff]   ;;  %v11763_v50 = vld [vmem:[%s17915_s2 + $0x3f4] ss:$8 sps:$4 sm:$0xff]   ;;  %v11758_v24 = vld [vmem:[%s17915_s2 + $0x2f0] ss:$8 sps:$4 sm:$0xff]  }
 0x11f   : > { %4694 = vmatprep.subr.bf16.mxu1 %v11745_v18  ;;  %v3100_v59 = vpop.f32.mrf.mxu1  ;;  %4527 = vmatprep.mubr.bf16.mxu0 %v10233_v16  ;;  %v11755_v18 = vld [vmem:[%s17915_s2 + $0x300] ss:$8 sps:$4 sm:$0xff]   ;;  %v14466_v16 = vcombine.high %v14253_v42, %v14437_v32  ;;  %v11761_v0 = vld [vmem:[%s17915_s2 + $0x3f0] ss:$8 sps:$4 sm:$0xff]  }
 0x120   : > { %17946 = vst [vmem:[#allocation7_spill] sm:$0xff] %v14419_v27  ;;  %4600 = vmatprep.mubr.bf16.mxu1 %v10235_v39  ;;  %v14424_v57 = vadd.f32 %v3100_v59, %v3027_v12  ;;  %v3029_v49 = vpop.f32.mrf.mxu0  ;;  %v14470_v39 = vcombine.low %v14250_v41, %v14427_v33  ;;  %v14486_v12 = vld [vmem:[%s13023_s27 + $0x58] sm:$0x11]  ;;  %v14660_v27 = vld [vmem:[%s13023_s27 + $0xf0] sm:$0x11] }
 0x121   : > { %v3102_v46 = vpop.f32.mrf.mxu1  ;;  %4622 = vmatpush1.bf16.msra.mxu0 %v11740_v3  ;;  %v14489_v59 = vld [vmem:[%s13023_s27 + $0x78] sm:$0x11] }
 0x122   : > { %17947 = vst [vmem:[#allocation8_spill] sm:$0xff] %v14424_v57  ;;  %4695 = vmatpush1.bf16.msra.mxu1 %v11743_v58  ;;  %v14442_v2 = vadd.f32 %v3102_v46, %v3029_v49  ;;  %4623 = vmatprep.subr.bf16.mxu0 %v11748_v9  ;;  %v14450_v20 = vpop.f32.mrf.mxu0  ;;  %v619_v9 = vshll.u32 %v14456_v13, 16  ;;  %v612_v52 = vshll.u32 %v14470_v39, 16  ;;  %v617_v46 = vshrl.u32 %v14456_v13, 16  ;;  %v14524_v13 = vld [vmem:[%s13023_s27 + $0xb0] sm:$0x11] }
 0x123   : > { %4696 = vmatprep.subr.bf16.mxu1 %v11751_v35  ;;  %17949 = vst [vmem:[#allocation10_spill] sm:$0xff] %v14450_v20  ;;  %v14452_v56 = vpop.f32.mrf.mxu1  ;;  %v14483_v35 = vcombine.low %v14253_v42, %v14437_v32  ;;  %v647_v42 = vshll.u32 %v14466_v16, 16  ;;  %v11778_v20 = vld [vmem:[%s17915_s2 + $0x2c4] ss:$8 sps:$4 sm:$0xff]   ;;  %v14626_v57 = vld [vmem:[%s13023_s27 + $0xd0] sm:$0x11] }
 0x124   : > { %17948 = vst [vmem:[#allocation9_spill] sm:$0xff] %v14442_v2  ;;  %17950 = vst [vmem:[#allocation11_spill] sm:$0xff] %v14452_v56  ;;  %4528 = vmatmul.mubr.bf16.gmra.mxu0 %v10232_v7  ;;  %v3035_v34 = vpop.f32.mrf.mxu0  ;;  %v11766_v7 = vld [vmem:[%s17915_s2 + $0x2e4] ss:$8 sps:$4 sm:$0xff]  }
 0x125   : > { %4601 = vmatmul.mubr.bf16.gmra.mxu1 %v10234_v40  ;;  %v3108_v63 = vpop.f32.mrf.mxu1  ;;  %4624 = vmatpush1.bf16.msra.mxu0 %v11746_v26  ;;  %v11769_v26 = vld [vmem:[%s17915_s2 + $0x3e4] ss:$8 sps:$4 sm:$0xff]  }
 0x126   : > { %4697 = vmatpush1.bf16.msra.mxu1 %v11749_v43  ;;  %v14478_v3 = vadd.f32 %v3108_v63, %v3035_v34  ;;  %4625 = vmatprep.subr.bf16.mxu0 %v11754_v61  ;;  %v3037_v41 = vpop.f32.mrf.mxu0  ;;  %v645_v43 = vshrl.u32 %v14466_v16, 16  ;;  %v14521_v34 = vld [vmem:[%s13023_s27 + $0x90] sm:$0x11]  ;;  %v14528_v16 = vld [vmem:[%s13023_s27 + $0x98] sm:$0x11]  ;;  %v614_v63 = vrot.slane %v612_v52, 1 }
 0x127   : > { %4698 = vmatprep.subr.bf16.mxu1 %v11757_v10  ;;  %v3110_v58 = vpop.f32.mrf.mxu1  ;;  %4643 = vmatprep.mubr.bf16.mxu0 %v10201_v15  ;;  %v610_v10 = vshrl.u32 %v14470_v39, 16  ;;  %v14514_v15 = vcombine.high %v14256_v44, %v14486_v12  ;;  %v649_v39 = vrot.slane %v647_v42, 1  ;;  %v638_v42 = vshrl.u32 %v14483_v35, 16 }
 0x128   : > { %17951 = vst [vmem:[#allocation12_spill] sm:$0xff] %v14478_v3  ;;  %v14497_v62 = vadd.f32 %v3110_v58, %v3037_v41  ;;  %4716 = vmatprep.mubr.bf16.mxu1 %v10203_v22  ;;  %v3039_v40 = vpop.f32.mrf.mxu0  ;;  %v14518_v22 = vcombine.high %v14263_v30, %v14489_v59  ;;  %v14532_v41 = vcombine.low %v14256_v44, %v14486_v12 }
 0x129   : > { %v3112_v49 = vpop.f32.mrf.mxu1  ;;  %4626 = vmatpush1.bf16.msra.mxu0 %v11752_v48  ;;  %v621_v48 = vrot.slane %v619_v9, 1  ;;  %v14536_v58 = vcombine.low %v14263_v30, %v14489_v59  ;;  %v14549_v9 = vcombine.high %v14295_v5, %v14521_v34  ;;  %v14553_v44 = vcombine.high %v14298_v6, %v14524_v13  ;;  %v11772_v30 = vld [vmem:[%s17915_s2 + $0x2d4] ss:$8 sps:$4 sm:$0xff]  }
 0x12a   : > { %17952 = vst [vmem:[#allocation13_spill] sm:$0xff] %v14497_v62  ;;  %4699 = vmatpush1.bf16.msra.mxu1 %v11755_v18  ;;  %v14509_v61 = vadd.f32 %v3112_v49, %v3039_v40  ;;  %4627 = vmatprep.subr.bf16.mxu0 %v11760_v4  ;;  %v640_v18 = vshll.u32 %v14483_v35, 16  ;;  %v14539_v40 = vld [vmem:[%s13023_s27 + $0xb8] sm:$0x11]  ;;  %v11764_v4 = vld [vmem:[%s17915_s2 + $0x2e0] ss:$8 sps:$4 sm:$0xff]   ;;  %v14580_v56 = vor.u32 %v649_v39, %v645_v43 }
 0x12b   : > { %4700 = vmatprep.subr.bf16.mxu1 %v11763_v50  ;;  %v11767_v50 = vld [vmem:[%s17915_s2 + $0x3e0] ss:$8 sps:$4 sm:$0xff]   ;;  %v633_v52 = vshll.u32 %v14514_v15, 16  ;;  %v661_v49 = vshll.u32 %v14518_v22, 16  ;;  %v14564_v31 = vor.u32 %v621_v48, %v617_v46  ;;  %v14572_v35 = vcombine.high %v14308_v51, %v14539_v40  ;;  %v11781_v43 = vld [vmem:[%s17915_s2 + $0x3c4] ss:$8 sps:$4 sm:$0xff]  }
 0x12c   : > { %17953 = vst [vmem:[#allocation14_spill] sm:$0xff] %v14509_v61  ;;  %v14582_v46 = vor.u32 %v614_v63, %v610_v10  ;;  %v626_v48 = vshll.u32 %v14532_v41, 16  ;;  %v631_v14 = vshrl.u32 %v14514_v15, 16  ;;  %v659_v11 = vshrl.u32 %v14518_v22, 16  ;;  %v11784_v61 = vld [vmem:[%s17915_s2 + $0x2b4] ss:$8 sps:$4 sm:$0xff]  }
 0x12d   : > { %4628 = vmatpush2.bf16.msra.mxu0 %v11758_v24  ;;  %v642_v24 = vrot.slane %v640_v18, 1  ;;  %v654_v18 = vshll.u32 %v14536_v58, 16  ;;  %v675_v21 = vshll.u32 %v14549_v9, 16  ;;  %v703_v53 = vshll.u32 %v14553_v44, 16 }
 0x12e   : > { %4701 = vmatpush2.bf16.msra.mxu1 %v11761_v0  ;;  %4629 = vmatprep.subr.bf16.mxu0 %v11766_v7  ;;  %v14568_v0 = vcombine.high %v14305_v60, %v14528_v16  ;;  %v11770_v7 = vld [vmem:[%s17915_s2 + $0x2d0] ss:$8 sps:$4 sm:$0xff]   ;;  %v635_v10 = vrot.slane %v633_v52, 1  ;;  %v663_v39 = vrot.slane %v661_v49, 1  ;;  %v14598_v63 = vcombine.low %v14295_v5, %v14521_v34  ;;  %v11776_v5 = vld [vmem:[%s17915_s2 + $0x2c0] ss:$8 sps:$4 sm:$0xff]  }
 0x12f   : > { %4702 = vmatprep.subr.bf16.mxu1 %v11769_v26  ;;  %v11773_v26 = vld [vmem:[%s17915_s2 + $0x3d0] ss:$8 sps:$4 sm:$0xff]   ;;  %v14602_v15 = vcombine.low %v14298_v6, %v14524_v13  ;;  %v624_v22 = vshrl.u32 %v14532_v41, 16  ;;  %v14609_v52 = vcombine.low %v14305_v60, %v14528_v16  ;;  %v11779_v6 = vld [vmem:[%s17915_s2 + $0x3c0] ss:$8 sps:$4 sm:$0xff]   ;;  %v656_v41 = vrot.slane %v654_v18, 1 }
 0x130   : > { %v673_v49 = vshrl.u32 %v14549_v9, 16  ;;  %v14622_v60 = vor.u32 %v642_v24, %v638_v42  ;;  %v677_v62 = vrot.slane %v675_v21, 1  ;;  %v701_v3 = vshrl.u32 %v14553_v44, 16 }
 0x131   : > { %4630 = vmatpush2.bf16.msra.mxu0 %v11764_v4  ;;  %v689_v4 = vshll.u32 %v14568_v0, 16  ;;  %v705_v2 = vrot.slane %v703_v53, 1  ;;  %v687_v9 = vshrl.u32 %v14568_v0, 16  ;;  %v14633_v18 = vcombine.low %v14308_v51, %v14539_v40  ;;  %v11787_v53 = vld [vmem:[%s17915_s2 + $0x3b4] ss:$8 sps:$4 sm:$0xff]  }
 0x132   : > { %4703 = vmatpush2.bf16.msra.mxu1 %v11767_v50  ;;  %4631 = vmatprep.subr.bf16.mxu0 %v11772_v30  ;;  %v717_v50 = vshll.u32 %v14572_v35, 16  ;;  %v652_v30 = vshrl.u32 %v14536_v58, 16  ;;  %v696_v58 = vshll.u32 %v14602_v15, 16  ;;  %v715_v44 = vshrl.u32 %v14572_v35, 16  ;;  %v11782_v0 = vld [vmem:[%s17915_s2 + $0x2b0] ss:$8 sps:$4 sm:$0xff]  }
 0x133   : > { %4704 = vmatprep.subr.bf16.mxu1 %v11775_v29  ;;  %v628_v29 = vrot.slane %v626_v48, 1  ;;  %v668_v48 = vshll.u32 %v14598_v63, 16  ;;  %v691_v21 = vrot.slane %v689_v4, 1  ;;  %v682_v24 = vshll.u32 %v14609_v52, 16 }
 0x134   : > { %v719_v42 = vrot.slane %v717_v50, 1  ;;  %v14645_v51 = vor.u32 %v663_v39, %v659_v11  ;;  %v14654_v35 = vor.u32 %v677_v62, %v673_v49  ;;  %v14656_v4 = vor.u32 %v705_v2, %v701_v3  ;;  %v11790_v2 = vld [vmem:[%s17915_s2 + $0x2a4] ss:$8 sps:$4 sm:$0xff]  }
 0x135   : > { %4632 = vmatpush2.bf16.msra.mxu0 %v11770_v7  ;;  %v14643_v7 = vor.u32 %v635_v10, %v631_v14  ;;  %v666_v50 = vshrl.u32 %v14598_v63, 16  ;;  %v14664_v11 = vcombine.high %v14366_v36, %v14626_v57  ;;  %v670_v14 = vrot.slane %v668_v48, 1  ;;  %v11793_v3 = vld [vmem:[%s17915_s2 + $0x3a4] ss:$8 sps:$4 sm:$0xff]  }
 0x136   : > { %4705 = vmatpush2.bf16.msra.mxu1 %v11773_v26  ;;  %4633 = vmatprep.subr.bf16.mxu0 %v11778_v20  ;;  %v14647_v20 = vor.u32 %v628_v29, %v624_v22  ;;  %v14649_v26 = vor.u32 %v656_v41, %v652_v30  ;;  %v694_v10 = vshrl.u32 %v14602_v15, 16  ;;  %v698_v39 = vrot.slane %v696_v58, 1  ;;  %v11791_v41 = vld [vmem:[%s17915_s2 + $0x3a0] ss:$8 sps:$4 sm:$0xff]   ;;  %v11815_v30 = vld [vmem:[%s17915_s2 + $0x574] ss:$8 sps:$4 sm:$0xff]  }
 0x137   : > { %4706 = vmatprep.subr.bf16.mxu1 %v11781_v43  ;;  %v11785_v43 = vld [vmem:[%s17915_s2 + $0x3b0] ss:$8 sps:$4 sm:$0xff]   ;;  %v710_v22 = vshll.u32 %v14633_v18, 16  ;;  %v14674_v62 = vor.u32 %v691_v21, %v687_v9  ;;  %v14676_v63 = vor.u32 %v719_v42, %v715_v44  ;;  %v684_v15 = vrot.slane %v682_v24, 1 }
 0x138   : > { %v14700_v58 = vcombine.high %v14369_v19, %v14660_v27  ;;  %v731_v9 = vshll.u32 %v14664_v11, 16  ;;  %v14706_v21 = vor.u32 %v670_v14, %v666_v50  ;;  %v14708_v44 = vor.u32 %v698_v39, %v694_v10  ;;  %v413_v50 = vld [vmem:[%s13023_s27 + $0x40] sm:$0xee]  ;;  %v11797_v10 = vld [vmem:[%s17915_s2 + $0x390] ss:$8 sps:$4 sm:$0xff]  }
 0x139   : > { %4634 = vmatpush2.bf16.msra.mxu0 %v11776_v5  ;;  %v680_v5 = vshrl.u32 %v14609_v52, 16  ;;  %v11796_v52 = vld [vmem:[%s17915_s2 + $0x294] ss:$8 sps:$4 sm:$0xff]   ;;  %v708_v42 = vshrl.u32 %v14633_v18, 16  ;;  %v712_v24 = vrot.slane %v710_v22, 1  ;;  %v9629_v22 = vcombine.high %v413_v50, %v14427_v33 }
 0x13a   : > { %4707 = vmatpush2.bf16.msra.mxu1 %v11779_v6  ;;  %4635 = vmatprep.subr.bf16.mxu0 %v11784_v61  ;;  %v11788_v61 = vld [vmem:[%s17915_s2 + $0x2a0] ss:$8 sps:$4 sm:$0xff]   ;;  %v11794_v18 = vld [vmem:[%s17915_s2 + $0x290] ss:$8 sps:$4 sm:$0xff]   ;;  %v759_v29 = vshll.u32 %v14700_v58, 16  ;;  %v14759_v48 = vcombine.low %v14369_v19, %v14660_v27 }
 0x13b   : > { %4708 = vmatprep.subr.bf16.mxu1 %v11787_v53  ;;  %v11799_v53 = vld [vmem:[%s17915_s2 + $0x394] ss:$8 sps:$4 sm:$0xff]   ;;  %v14713_v49 = vor.u32 %v684_v15, %v680_v5  ;;  %v415_v14 = vld [vmem:[%s13023_s27 + $0x60] sm:$0xee]  ;;  %v733_v15 = vrot.slane %v731_v9, 1  ;;  %v14755_v9 = vor.u32 %v712_v24, %v708_v42 }
 0x13c   : > { %v14729_v39 = vld [vmem:[%s13023_s27 + $0xd8] sm:$0x11]  ;;  %v11805_v5 = vld [vmem:[%s17915_s2 + $0x384] ss:$8 sps:$4 sm:$0xff]   ;;  %v14788_v19 = vrot.slane %v759_v29, 1 }
 0x13d   : > { %4636 = vmatpush2.bf16.msra.mxu0 %v11782_v0  ;;  %v729_v0 = vshrl.u32 %v14664_v11, 16  ;;  %v9633_v11 = vcombine.high %v415_v14, %v14437_v32 }
 0x13e   : > { %4709 = vmatpush2.bf16.msra.mxu1 %v11785_v43  ;;  %4637 = vmatprep.subr.bf16.mxu0 %v11790_v2  ;;  %v14718_v43 = vcombine.low %v14366_v36, %v14626_v57  ;;  %v9628_v36 = vcombine.low %v413_v50, %v14427_v33  ;;  %v9632_v2 = vcombine.low %v415_v14, %v14437_v32  ;;  %v14745_v33 = vld [vmem:[%s13023_s27 + $0xf8] sm:$0x11]  ;;  %v14747_v32 = vrot.slane %v9629_v22, 1  ;;  %v414_v22 = vld [vmem:[%s13023_s27 + $0x48] sm:$0xee] }
 0x13f   : > { %4710 = vmatprep.subr.bf16.mxu1 %v11793_v3  ;;  %v11802_v3 = vld [vmem:[%s17915_s2 + $0x284] ss:$8 sps:$4 sm:$0xff]   ;;  %v14749_v50 = vrot.slane %v9633_v11, 1  ;;  %v9631_v42 = vcombine.high %v414_v22, %v14486_v12 }
 0x140   : > { %17954 = vst [vmem:[#allocation15_spill] sm:$0xff] %v14718_v43  ;;  %17955 = vst [vmem:[#allocation16_spill] sm:$0xff] %v14747_v32  ;;  %v14751_v14 = vrot.slane %v9628_v36, 1  ;;  %v14753_v6 = vrot.slane %v9632_v2, 1  ;;  %v416_v11 = vld [vmem:[%s13023_s27 + $0x68] sm:$0xee] }
 0x141   : > { %4638 = vmatpush2.bf16.msra.mxu0 %v11788_v61  ;;  %17956 = vst [vmem:[#allocation17_spill] sm:$0xff] %v14749_v50  ;;  %v724_v61 = vshll.u32 %v14718_v43, 16  ;;  %v11800_v36 = vld [vmem:[%s17915_s2 + $0x280] ss:$8 sps:$4 sm:$0xff]   ;;  %v9635_v24 = vcombine.high %v416_v11, %v14489_v59  ;;  %v11812_v2 = vld [vmem:[%s17915_s2 + $0x474] ss:$8 sps:$4 sm:$0xff]   ;;  %v14786_v43 = vor.u32 %v733_v15, %v729_v0  ;;  %v9630_v50 = vcombine.low %v414_v22, %v14486_v12 }
 0x142   : > { %4711 = vmatpush2.bf16.msra.mxu1 %v11791_v41  ;;  %17957 = vst [vmem:[#allocation18_spill] sm:$0xff] %v14751_v14  ;;  %17958 = vst [vmem:[#allocation19_spill] sm:$0xff] %v14753_v6  ;;  %4639 = vmatprep.subr.bf16.mxu0 %v11796_v52  ;;  %v14764_v41 = vcombine.high %v14381_v47, %v14729_v39  ;;  %v11803_v52 = vld [vmem:[%s17915_s2 + $0x380] ss:$8 sps:$4 sm:$0xff]   ;;  %v14795_v14 = vcombine.high %v14384_v55, %v14745_v33  ;;  %v14797_v32 = vrot.slane %v9631_v42, 1 }
 0x143   : > { %4712 = vmatprep.subr.bf16.mxu1 %v11799_v53  ;;  %v9634_v53 = vcombine.low %v416_v11, %v14489_v59  ;;  %v14799_v17 = vrot.slane %v9635_v24, 1  ;;  %v417_v0 = vld [vmem:[%s13023_s27 + $0x80] sm:$0xee]  ;;  %v14802_v29 = vrot.slane %v9630_v50, 1  ;;  %v11810_v15 = vld [vmem:[%s17915_s2 + $0x470] ss:$8 sps:$4 sm:$0xff]  }
 0x144   : > { %17959 = vst [vmem:[#allocation20_spill] sm:$0xff] %v14797_v32  ;;  %v419_v59 = vld [vmem:[%s13023_s27 + $0xa0] sm:$0xee]  ;;  %v11813_v22 = vld [vmem:[%s17915_s2 + $0x570] ss:$8 sps:$4 sm:$0xff]   ;;  %v14840_v32 = vpop.f32.mrf.mxu1 }
 0x145   : > { %4640 = vmatpush2.bf16.msra.mxu0 %v11794_v18  ;;  %17960 = vst [vmem:[#allocation21_spill] sm:$0xff] %v14799_v17  ;;  %v14804_v12 = vrot.slane %v9634_v53, 1  ;;  %v9637_v18 = vcombine.high %v417_v0, %v14521_v34  ;;  %v9641_v50 = vcombine.high %v419_v59, %v14524_v13  ;;  %v9640_v11 = vcombine.low %v419_v59, %v14524_v13  ;;  %v418_v6 = vld [vmem:[%s13023_s27 + $0x88] sm:$0xee]  ;;  %v14838_v17 = vpop.f32.mrf.mxu0 }
 0x146   : > { %4713 = vmatpush2.bf16.msra.mxu1 %v11797_v10  ;;  %4641 = vmatprep.subr.bf16.mxu0 %v11802_v3  ;;  %v9636_v10 = vcombine.low %v417_v0, %v14521_v34  ;;  %v14815_v3 = vrot.slane %v724_v61, 1  ;;  %v11818_v34 = vld [vmem:[%s17915_s2 + $0x464] ss:$8 sps:$4 sm:$0xff]   ;;  %v752_v53 = vshll.u32 %v14759_v48, 16  ;;  %v745_v13 = vshll.u32 %v14764_v41, 16  ;;  %17964 = vst [vmem:[#allocation25_spill] sm:$0xff] %v14838_v17 }
 0x147   : > { %4714 = vmatprep.subr.bf16.mxu1 %v11805_v5  ;;  %17961 = vst [vmem:[#allocation22_spill] sm:$0xff] %v14804_v12  ;;  %v14827_v24 = vrot.slane %v9637_v18, 1  ;;  %v14833_v59 = vrot.slane %v9641_v50, 1  ;;  %v14835_v5 = vrot.slane %v9640_v11, 1  ;;  %17965 = vst [vmem:[#allocation26_spill] sm:$0xff] %v14840_v32  ;;  %v14848_v18 = vcombine.low %v14381_v47, %v14729_v39 }
 0x148   : > { %v14829_v61 = vrot.slane %v9636_v10, 1  ;;  %v420_v10 = vld [vmem:[%s13023_s27 + $0xa8] sm:$0xee]  ;;  %v9639_v50 = vcombine.high %v418_v6, %v14528_v16  ;;  %v9638_v11 = vcombine.low %v418_v6, %v14528_v16  ;;  %v17966_v17 = vcombine.low %v14068_v23, %v14070_v28  ;;  %v11828_v47 = vld [vmem:[%s17915_s2 + $0x454] ss:$8 sps:$4 sm:$0xff]  }
 0x149   : > { %4642 = vmatpush2.bf16.msra.mxu0 %v11800_v36  ;;  %17963 = vst [vmem:[#allocation24_spill] sm:$0xff] %v14835_v5  ;;  %v11821_v36 = vld [vmem:[%s17915_s2 + $0x564] ss:$8 sps:$4 sm:$0xff]   ;;  %v9643_v0 = vcombine.high %v420_v10, %v14539_v40  ;;  %v9642_v32 = vcombine.low %v420_v10, %v14539_v40  ;;  %v17967_v12 = vcombine.low %v14075_v37, %v14088_v54  ;;  %v14874_v42 = vrot.slane %v752_v53, 1 }
 0x14a   : > { %17962 = vst [vmem:[#allocation23_spill] sm:$0xff] %v14829_v61  ;;  %4715 = vmatpush2.bf16.msra.mxu1 %v11803_v52  ;;  %4757 = vmatprep.subr.bf16.mxu0 %v11812_v2  ;;  %v773_v52 = vshll.u32 %v14795_v14, 16  ;;  %v11816_v2 = vld [vmem:[%s17915_s2 + $0x460] ss:$8 sps:$4 sm:$0xff]   ;;  %v771_v40 = vshrl.u32 %v14795_v14, 16  ;;  %v14877_v10 = vrot.slane %v9639_v50, 1  ;;  %v14884_v23 = vcombine.low %v14384_v55, %v14745_v33 }
 0x14b   : > { %4830 = vmatprep.subr.bf16.mxu1 %v11815_v30  ;;  %v11819_v30 = vld [vmem:[%s17915_s2 + $0x560] ss:$8 sps:$4 sm:$0xff]   ;;  %v14879_v5 = vrot.slane %v9638_v11, 1  ;;  %v14886_v28 = vrot.slane %v9643_v0, 1  ;;  %v14888_v37 = vrot.slane %v9642_v32, 1  ;;  %v17968_v11 = vcombine.low %v14564_v31, %v14580_v56 }
 0x14c   : > { %v3151_v16 = vpop.f32.mrf.mxu0  ;;  %4644 = vmatmul.mubr.bf16.vlgmr.msra.gmra.mxu0 %v17966_v17  ;;  %v421_v54 = vld [vmem:[%s13023_s27 + $0xc0] sm:$0xee]  ;;  %v11829_v31 = vld [vmem:[%s17915_s2 + $0x550] ss:$8 sps:$4 sm:$0xff]  }
 0x14d   : > { %v3224_v6 = vpop.f32.mrf.mxu1  ;;  %4717 = vmatmul.mubr.bf16.vlgmr.msra.gmra.mxu1 %v17967_v12  ;;  %v3152_v61 = vadd.f32 %v3151_v16, %v14284_v25  ;;  %4758 = vmatpush1.bf16.msra.mxu0 %v11810_v15  ;;  %v423_v17 = vld [vmem:[%s13023_s27 + $0xe0] sm:$0xee]  ;;  %v11831_v25 = vld [vmem:[%s17915_s2 + $0x554] ss:$8 sps:$4 sm:$0xff]   ;;  %v747_v15 = vrot.slane %v745_v13, 1  ;;  %v9644_v0 = vcombine.low %v421_v54, %v14626_v57 }
 0x14e   : > { %4831 = vmatpush1.bf16.msra.mxu1 %v11813_v22  ;;  %v3153_v12 = vpop.f32.mrf.mxu0  ;;  %4759 = vmatprep.subr.bf16.mxu0 %v11818_v34  ;;  %v9645_v22 = vcombine.high %v421_v54, %v14626_v57  ;;  %v9649_v55 = vcombine.high %v423_v17, %v14660_v27  ;;  %v17969_v34 = vcombine.low %v14643_v7, %v14645_v51  ;;  %v17970_v54 = vshrl.u32 %v14700_v58, 16  ;;  %v11846_v14 = vld [vmem:[%s17915_s2 + $0x430] ss:$8 sps:$4 sm:$0xff]  }
 0x14f   : > { %v3226_v53 = vpop.f32.mrf.mxu1  ;;  %4832 = vmatprep.subr.bf16.mxu1 %v11821_v36  ;;  %v14898_v50 = vadd.f32 %v3224_v6, %v3152_v61  ;;  %v3154_v32 = vadd.f32 %v3153_v12, %v14292_v38  ;;  %4653 = vmatprep.mubr.bf16.mxu0 %v17968_v11  ;;  %v775_v36 = vrot.slane %v773_v52, 1  ;;  %v11826_v38 = vld [vmem:[%s17915_s2 + $0x450] ss:$8 sps:$4 sm:$0xff]   ;;  %v9648_v61 = vcombine.low %v423_v17, %v14660_v27  ;;  %v11841_v27 = vld [vmem:[%s17915_s2 + $0x544] ss:$8 sps:$4 sm:$0xff]  }
 0x150   : > { %4726 = vmatprep.mubr.bf16.mxu1 %v17969_v34  ;;  %v3155_v16 = vpop.f32.mrf.mxu0  ;;  %v14917_v7 = vrot.slane %v9645_v22, 1  ;;  %v14919_v51 = vrot.slane %v9649_v55, 1  ;;  %v14928_v12 = vor.u32 %v14788_v19, %v17970_v54  ;;  %v14930_v11 = vrot.slane %v9644_v0, 1  ;;  %v422_v34 = vld [vmem:[%s13023_s27 + $0xc8] sm:$0xee]  ;;  %v17986_v13 = vld [vmem:[#allocation9_spill] sm:$0xff] }
 0x151   : > { %v3228_v57 = vpop.f32.mrf.mxu1  ;;  %v14922_v52 = vadd.f32 %v3226_v53, %v3154_v32  ;;  %v3156_v6 = vadd.f32 %v3155_v16, %v14314_v8  ;;  %4760 = vmatpush1.bf16.msra.mxu0 %v11816_v2  ;;  %v424_v22 = vld [vmem:[%s13023_s27 + $0xe8] sm:$0xee]  ;;  %v14946_v19 = vrot.slane %v9648_v61, 1  ;;  %v9647_v2 = vcombine.high %v422_v34, %v14729_v39  ;;  %v11848_v54 = vld [vmem:[%s17915_s2 + $0x434] ss:$8 sps:$4 sm:$0xff]  }
 0x152   : > { %4833 = vmatpush1.bf16.msra.mxu1 %v11819_v30  ;;  %v14934_v56 = vpop.f32.mrf.mxu0  ;;  %4761 = vmatprep.subr.bf16.mxu0 %v11828_v47  ;;  %v11838_v8 = vld [vmem:[%s17915_s2 + $0x444] ss:$8 sps:$4 sm:$0xff]   ;;  %v9651_v30 = vcombine.high %v424_v22, %v14745_v33  ;;  %v11836_v47 = vld [vmem:[%s17915_s2 + $0x440] ss:$8 sps:$4 sm:$0xff]   ;;  %v9646_v0 = vcombine.low %v422_v34, %v14729_v39  ;;  %v9650_v32 = vcombine.low %v424_v22, %v14745_v33  ;;  %v766_v58 = vshll.u32 %v14884_v23, 16 }
 0x153   : > { %17971 = vst [vmem:[#allocation27_spill] sm:$0xff] %v14934_v56  ;;  %v14936_v55 = vpop.f32.mrf.mxu1  ;;  %4834 = vmatprep.subr.bf16.mxu1 %v11831_v25  ;;  %v14950_v17 = vadd.f32 %v3228_v57, %v3156_v6  ;;  %v11839_v53 = vld [vmem:[%s17915_s2 + $0x540] ss:$8 sps:$4 sm:$0xff]   ;;  %v738_v25 = vshll.u32 %v14848_v18, 16  ;;  %v17973_v61 = vcombine.low %v14582_v46, %v14622_v60  ;;  %v17974_v6 = vcombine.low %v14647_v20, %v14649_v26  ;;  %v11851_v60 = vld [vmem:[%s17915_s2 + $0x534] ss:$8 sps:$4 sm:$0xff]  }
 0x154   : > { %17972 = vst [vmem:[#allocation28_spill] sm:$0xff] %v14936_v55  ;;  %v3161_v16 = vpop.f32.mrf.mxu0  ;;  %v14973_v33 = vrot.slane %v9647_v2, 1  ;;  %v14975_v34 = vrot.slane %v9651_v30, 1  ;;  %v736_v20 = vshrl.u32 %v14848_v18, 16  ;;  %v14982_v26 = vrot.slane %v9646_v0, 1 }
 0x155   : > { %4654 = vmatmul.mubr.bf16.gmra.mxu0 %v17973_v61  ;;  %v3234_v57 = vpop.f32.mrf.mxu1  ;;  %4727 = vmatmul.mubr.bf16.gmra.mxu1 %v17974_v6  ;;  %v3162_v46 = vadd.f32 %v3161_v16, %v14355_v1  ;;  %v14984_v22 = vrot.slane %v9650_v32, 1  ;;  %v17975_v30 = vshrl.u32 %v14764_v41, 16  ;;  %v14996_v18 = vld [vmem:[%s13023_s27] sm:$0xee]  ;;  %v17976_v41 = vcombine.low %v14654_v35, %v14656_v4 }
 0x156   : > { %4762 = vmatpush1.bf16.msra.mxu0 %v11826_v38  ;;  %4835 = vmatpush1.bf16.msra.mxu1 %v11829_v31  ;;  %v3163_v2 = vpop.f32.mrf.mxu0  ;;  %v14992_v38 = vor.u32 %v775_v36, %v771_v40  ;;  %v764_v31 = vshrl.u32 %v14884_v23, 16  ;;  %v17977_v40 = vcombine.low %v14674_v62, %v14676_v63  ;;  %v740_v23 = vrot.slane %v738_v25, 1  ;;  %v15025_v62 = vld [vmem:[%s13023_s27 + $0x28] sm:$0xee]  ;;  %v17978_v63 = vld [vmem:[#allocation4_spill] sm:$0xff] }
 0x157   : > { %v3236_v61 = vpop.f32.mrf.mxu1  ;;  %4763 = vmatprep.subr.bf16.mxu0 %v11838_v8  ;;  %4836 = vmatprep.subr.bf16.mxu1 %v11841_v27  ;;  %v14988_v1 = vor.u32 %v747_v15, %v17975_v30  ;;  %v3164_v8 = vadd.f32 %v3163_v2, %v14371_v45  ;;  %v15001_v27 = vadd.f32 %v3234_v57, %v3162_v46  ;;  %v15013_v15 = vld [vmem:[%s13023_s27 + $0x20] sm:$0xee]  ;;  %v768_v16 = vrot.slane %v766_v58, 1  ;;  %v15022_v57 = vld [vmem:[%s13023_s27 + $0x8] sm:$0xee] }
 0x158   : > { %4663 = vmatprep.mubr.bf16.mxu0 %v17976_v41  ;;  %4736 = vmatprep.mubr.bf16.mxu1 %v17977_v40  ;;  %v3165_v36 = vpop.f32.mrf.mxu0  ;;  %v10224_v35 = vcombine.low %v14706_v21, %v14708_v44  ;;  %v10226_v4 = vcombine.low %v14713_v49, %v14755_v9  ;;  %v11849_v21 = vld [vmem:[%s17915_s2 + $0x530] ss:$8 sps:$4 sm:$0xff]   ;;  %v11858_v49 = vld [vmem:[%s17915_s2 + $0x424] ss:$8 sps:$4 sm:$0xff]  }
 0x159   : > { %v3238_v32 = vpop.f32.mrf.mxu1  ;;  %v3166_v25 = vadd.f32 %v3165_v36, %v17978_v63  ;;  %v15028_v6 = vadd.f32 %v3236_v61, %v3164_v8  ;;  %v17979_v44 = vld [vmem:[#allocation15_spill] sm:$0xff]  ;;  %v15051_v61 = vld [vmem:[%s13023_s27 + $0x10] sm:$0x11] }
 0x15a   : > { %4764 = vmatpush1.bf16.msra.mxu0 %v11836_v47  ;;  %4837 = vmatpush1.bf16.msra.mxu1 %v11839_v53  ;;  %v17980_v9 = vshrl.u32 %v17979_v44, 16  ;;  %v15041_v46 = vpop.f32.mrf.mxu0  ;;  %v11861_v47 = vld [vmem:[%s17915_s2 + $0x524] ss:$8 sps:$4 sm:$0xff]   ;;  %v10237_v53 = vcombine.low %v14786_v43, %v14928_v12  ;;  %v9621_v30 = vcombine.high %v14996_v18, %v15051_v61  ;;  %v15070_v12 = vld [vmem:[%s13023_s27 + $0x38] sm:$0x11]  ;;  %v769_v44 = vor.u32 %v768_v16, %v764_v31  ;;  %v17985_v31 = vld [vmem:[#allocation8_spill] sm:$0xff] }
 0x15b   : > { %17981 = vst [vmem:[#allocation4_spill] sm:$0xff] %v15041_v46  ;;  %v15043_v2 = vpop.f32.mrf.mxu1  ;;  %4765 = vmatprep.subr.bf16.mxu0 %v11848_v54  ;;  %4838 = vmatprep.subr.bf16.mxu1 %v11851_v60  ;;  %v15060_v41 = vadd.f32 %v3238_v32, %v3166_v25  ;;  %v10239_v54 = vcombine.low %v14988_v1, %v14992_v38  ;;  %v15065_v60 = vld [vmem:[%s13023_s27 + $0x18] sm:$0x11]  ;;  %v11856_v32 = vld [vmem:[%s17915_s2 + $0x420] ss:$8 sps:$4 sm:$0xff]   ;;  %v17983_v1 = vshrl.u32 %v14759_v48, 16 }
 0x15c   : > { %v15039_v58 = vor.u32 %v14815_v3, %v17980_v9  ;;  %17982 = vst [vmem:[#allocation15_spill] sm:$0xff] %v15043_v2  ;;  %v15056_v3 = vld [vmem:[%s13023_s27 + $0x30] sm:$0x11]  ;;  %v9623_v43 = vcombine.high %v15022_v57, %v15065_v60  ;;  %v9627_v40 = vcombine.high %v15025_v62, %v15070_v12  ;;  %v3171_v36 = vpop.f32.mrf.mxu0  ;;  %v741_v25 = vor.u32 %v740_v23, %v736_v20  ;;  %v17984_v9 = vld [vmem:[#allocation7_spill] sm:$0xff] }
 0x15d   : > { %v9625_v8 = vcombine.high %v15013_v15, %v15056_v3  ;;  %4664 = vmatmul.mubr.bf16.gmra.mxu0 %v10224_v35  ;;  %v3244_v63 = vpop.f32.mrf.mxu1  ;;  %4737 = vmatmul.mubr.bf16.gmra.mxu1 %v10226_v4  ;;  %v755_v38 = vor.u32 %v14874_v42, %v17983_v1  ;;  %v3172_v45 = vadd.f32 %v3171_v36, %v17984_v9  ;;  %v11859_v35 = vld [vmem:[%s17915_s2 + $0x520] ss:$8 sps:$4 sm:$0xff]   ;;  %v11868_v4 = vld [vmem:[%s17915_s2 + $0x414] ss:$8 sps:$4 sm:$0xff]   ;;  %v858_v42 = vrot.slane %v9621_v30, 1 }
 0x15e   : > { %4766 = vmatpush1.bf16.msra.mxu0 %v11846_v14  ;;  %4839 = vmatpush1.bf16.msra.mxu1 %v11849_v21  ;;  %v3173_v39 = vpop.f32.mrf.mxu0  ;;  %v11871_v48 = vld [vmem:[%s17915_s2 + $0x514] ss:$8 sps:$4 sm:$0xff]   ;;  %v860_v16 = vrot.slane %v9623_v43, 1  ;;  %v864_v21 = vrot.slane %v9627_v40, 1 }
 0x15f   : > { %v3246_v0 = vpop.f32.mrf.mxu1  ;;  %4767 = vmatprep.subr.bf16.mxu0 %v11858_v49  ;;  %4840 = vmatprep.subr.bf16.mxu1 %v11861_v47  ;;  %v862_v20 = vrot.slane %v9625_v8, 1  ;;  %v3174_v14 = vadd.f32 %v3173_v39, %v17985_v31  ;;  %v15091_v23 = vadd.f32 %v3244_v63, %v3172_v45  ;;  %v10236_v9 = vcombine.low %v15039_v58, %v755_v38  ;;  %v11866_v49 = vld [vmem:[%s17915_s2 + $0x410] ss:$8 sps:$4 sm:$0xff]   ;;  %v11878_v45 = vld [vmem:[%s17915_s2 + $0x404] ss:$8 sps:$4 sm:$0xff]  }
 0x160   : > { %4673 = vmatprep.mubr.bf16.mxu0 %v10237_v53  ;;  %4746 = vmatprep.mubr.bf16.mxu1 %v10239_v54  ;;  %v3175_v36 = vpop.f32.mrf.mxu0  ;;  %v10238_v47 = vcombine.low %v741_v25, %v769_v44  ;;  %v11869_v39 = vld [vmem:[%s17915_s2 + $0x510] ss:$8 sps:$4 sm:$0xff]   ;;  %v10207_v43 = vcombine.low %v860_v16, %v864_v21  ;;  %v11879_v44 = vld [vmem:[%s17915_s2 + $0x500] ss:$8 sps:$4 sm:$0xff]  }
 0x161   : > { %v3248_v1 = vpop.f32.mrf.mxu1  ;;  %v3176_v30 = vadd.f32 %v3175_v36, %v17986_v13  ;;  %v15098_v8 = vadd.f32 %v3246_v0, %v3174_v14  ;;  %v11881_v13 = vld [vmem:[%s17915_s2 + $0x504] ss:$8 sps:$4 sm:$0xff]   ;;  %v10205_v54 = vcombine.low %v858_v42, %v862_v20  ;;  %v17989_v38 = vld [vmem:[#allocation12_spill] sm:$0xff]  ;;  %v17990_v20 = vld [vmem:[#allocation13_spill] sm:$0xff] }
 0x162   : > { %4768 = vmatpush1.bf16.msra.mxu0 %v11856_v32  ;;  %4841 = vmatpush1.bf16.msra.mxu1 %v11859_v35  ;;  %v15106_v58 = vpop.f32.mrf.mxu0  ;;  %v11876_v32 = vld [vmem:[%s17915_s2 + $0x400] ss:$8 sps:$4 sm:$0xff]   ;;  %v11884_v35 = vld [vmem:[%s17915_s2 + $0x4f4] ss:$8 sps:$4 sm:$0xff]  }
 0x163   : > { %17987 = vst [vmem:[#allocation7_spill] sm:$0xff] %v15106_v58  ;;  %v15108_v53 = vpop.f32.mrf.mxu1  ;;  %4769 = vmatprep.subr.bf16.mxu0 %v11868_v4  ;;  %4842 = vmatprep.subr.bf16.mxu1 %v11871_v48  ;;  %v15113_v0 = vadd.f32 %v3248_v1, %v3176_v30  ;;  %v11887_v42 = vld [vmem:[%s17915_s2 + $0x5f4] ss:$8 sps:$4 sm:$0xff]   ;;  %v17992_v36 = vld [vmem:[#allocation14_spill] sm:$0xff]  ;;  %v9622_v58 = vcombine.low %v15022_v57, %v15065_v60 }
 0x164   : > { %17988 = vst [vmem:[#allocation8_spill] sm:$0xff] %v15108_v53  ;;  %v3181_v40 = vpop.f32.mrf.mxu0  ;;  %v11890_v30 = vld [vmem:[%s17915_s2 + $0x4e4] ss:$8 sps:$4 sm:$0xff]   ;;  %v11924_v57 = vld [vmem:[%s17915_s2 + $0x480] ss:$8 sps:$4 sm:$0xff]  }
 0x165   : > { %4674 = vmatmul.mubr.bf16.gmra.mxu0 %v10236_v9  ;;  %v3254_v63 = vpop.f32.mrf.mxu1  ;;  %4747 = vmatmul.mubr.bf16.gmra.mxu1 %v10238_v47  ;;  %v3182_v25 = vadd.f32 %v3181_v40, %v17989_v38  ;;  %v11885_v47 = vld [vmem:[%s17915_s2 + $0x5f0] ss:$8 sps:$4 sm:$0xff]   ;;  %v11899_v40 = vld [vmem:[%s17915_s2 + $0x5d4] ss:$8 sps:$4 sm:$0xff]   ;;  %v11902_v38 = vld [vmem:[%s17915_s2 + $0x4c4] ss:$8 sps:$4 sm:$0xff]  }
 0x166   : > { %4770 = vmatpush1.bf16.msra.mxu0 %v11866_v49  ;;  %4843 = vmatpush1.bf16.msra.mxu1 %v11869_v39  ;;  %v3183_v4 = vpop.f32.mrf.mxu0  ;;  %v11882_v49 = vld [vmem:[%s17915_s2 + $0x4f0] ss:$8 sps:$4 sm:$0xff]   ;;  %v11893_v39 = vld [vmem:[%s17915_s2 + $0x5e4] ss:$8 sps:$4 sm:$0xff]  }
 0x167   : > { %v3256_v48 = vpop.f32.mrf.mxu1  ;;  %4771 = vmatprep.subr.bf16.mxu0 %v11878_v45  ;;  %4844 = vmatprep.subr.bf16.mxu1 %v11881_v13  ;;  %v3184_v31 = vadd.f32 %v3183_v4, %v17990_v20  ;;  %v15129_v14 = vadd.f32 %v3254_v63, %v3182_v25  ;;  %v11888_v13 = vld [vmem:[%s17915_s2 + $0x4e0] ss:$8 sps:$4 sm:$0xff]   ;;  %v11894_v63 = vld [vmem:[%s17915_s2 + $0x4d0] ss:$8 sps:$4 sm:$0xff]   ;;  %v11905_v25 = vld [vmem:[%s17915_s2 + $0x5c4] ss:$8 sps:$4 sm:$0xff]  }
 0x168   : > { %4789 = vmatprep.mubr.bf16.mxu0 %v10205_v54  ;;  %4862 = vmatprep.mubr.bf16.mxu1 %v10207_v43  ;;  %v3185_v16 = vpop.f32.mrf.mxu0  ;;  %v11891_v54 = vld [vmem:[%s17915_s2 + $0x5e0] ss:$8 sps:$4 sm:$0xff]   ;;  %v11896_v43 = vld [vmem:[%s17915_s2 + $0x4d4] ss:$8 sps:$4 sm:$0xff]  }
 0x169   : > { %17991 = vst [vmem:[#allocation9_spill] sm:$0xff] %v15129_v14  ;;  %v3258_v21 = vpop.f32.mrf.mxu1  ;;  %v3186_v1 = vadd.f32 %v3185_v16, %v17992_v36  ;;  %v15132_v9 = vadd.f32 %v3256_v48, %v3184_v31  ;;  %v11908_v4 = vld [vmem:[%s17915_s2 + $0x4b4] ss:$8 sps:$4 sm:$0xff]   ;;  %v11906_v16 = vld [vmem:[%s17915_s2 + $0x4b0] ss:$8 sps:$4 sm:$0xff]   ;;  %v15200_v36 = vld [vmem:[%s13023_s27 + $0x60] sm:$0xff] }
 0x16a   : > { %4772 = vmatpush1.bf16.msra.mxu0 %v11876_v32  ;;  %4845 = vmatpush1.bf16.msra.mxu1 %v11879_v44  ;;  %v11897_v32 = vld [vmem:[%s17915_s2 + $0x5d0] ss:$8 sps:$4 sm:$0xff]   ;;  %v11900_v44 = vld [vmem:[%s17915_s2 + $0x4c0] ss:$8 sps:$4 sm:$0xff]   ;;  %v11911_v48 = vld [vmem:[%s17915_s2 + $0x5b4] ss:$8 sps:$4 sm:$0xff]  }
 0x16b   : > { %17993 = vst [vmem:[#allocation12_spill] sm:$0xff] %v15132_v9  ;;  %4773 = vmatprep.subr.bf16.mxu0 %v11884_v35  ;;  %4846 = vmatprep.subr.bf16.mxu1 %v11887_v42  ;;  %v15146_v45 = vadd.f32 %v3258_v21, %v3186_v1  ;;  %v11903_v35 = vld [vmem:[%s17915_s2 + $0x5c0] ss:$8 sps:$4 sm:$0xff]   ;;  %v15188_v20 = vld [vmem:[%s13023_s27 + $0x50] sm:$0x11] }
 0x16c   : > { %v15185_v42 = vld [vmem:[%s13023_s27 + $0x40] sm:$0xff]  ;;  %17995 = vst [vmem:[#allocation14_spill] sm:$0xff] %v15188_v20  ;;  %v15191_v31 = vld [vmem:[%s13023_s27 + $0x70] sm:$0x11]  ;;  %v15203_v1 = vld [vmem:[%s13023_s27 + $0x58] sm:$0x11] }
 0x16d   : > { %17994 = vst [vmem:[#allocation13_spill] sm:$0xff] %v15146_v45  ;;  %17996 = vst [vmem:[#allocation29_spill] sm:$0xff] %v15191_v31  ;;  %v11909_v21 = vld [vmem:[%s17915_s2 + $0x5b0] ss:$8 sps:$4 sm:$0xff]  }
 0x16e   : > { %4774 = vmatpush2.bf16.msra.mxu0 %v11882_v49  ;;  %4847 = vmatpush2.bf16.msra.mxu1 %v11885_v47  ;;  %17997 = vst [vmem:[#allocation30_spill] sm:$0xff] %v15203_v1  ;;  %v15206_v49 = vld [vmem:[%s13023_s27 + $0x78] sm:$0x11]  ;;  %v15209_v47 = vld [vmem:[%s13023_s27 + $0x48] sm:$0xff] }
 0x16f   : > { %4775 = vmatprep.subr.bf16.mxu0 %v11890_v30  ;;  %4848 = vmatprep.subr.bf16.mxu1 %v11893_v39  ;;  %17998 = vst [vmem:[#allocation31_spill] sm:$0xff] %v15206_v49  ;;  %v10484_v30 = vcombine.low %v15185_v42, %v15188_v20  ;;  %v15214_v39 = vld [vmem:[%s13023_s27 + $0x68] sm:$0xff] }
 0x171   : > { %v5081_v20 = vshrl.u32 %v10484_v30, 16 }
 0x172   : > { %4776 = vmatpush2.bf16.msra.mxu0 %v11888_v13  ;;  %4849 = vmatpush2.bf16.msra.mxu1 %v11891_v54  ;;  %v11914_v13 = vld [vmem:[%s17915_s2 + $0x4a4] ss:$8 sps:$4 sm:$0xff]  }
 0x173   : > { %4777 = vmatprep.subr.bf16.mxu0 %v11896_v43  ;;  %4850 = vmatprep.subr.bf16.mxu1 %v11899_v40  ;;  %v11917_v54 = vld [vmem:[%s17915_s2 + $0x5a4] ss:$8 sps:$4 sm:$0xff]   ;;  %v10488_v43 = vcombine.low %v15200_v36, %v15191_v31  ;;  %v10486_v40 = vcombine.low %v15209_v47, %v15203_v1  ;;  %v9624_v1 = vcombine.low %v15013_v15, %v15056_v3  ;;  %v859_v3 = vrot.slane %v9622_v58, 1  ;;  %v11943_v58 = vld [vmem:[%s17915_s2 + $0xd74] ss:$8 sps:$4 sm:$0xff]  }
 0x174   : > { %v9626_v31 = vcombine.low %v15025_v62, %v15070_v12  ;;  %v11927_v62 = vld [vmem:[%s17915_s2 + $0x580] ss:$8 sps:$4 sm:$0xff]   ;;  %v11940_v12 = vld [vmem:[%s17915_s2 + $0xc74] ss:$8 sps:$4 sm:$0xff]  }
 0x175   : > { %v5109_v46 = vshrl.u32 %v10488_v43, 16  ;;  %v5095_v55 = vshrl.u32 %v10486_v40, 16  ;;  %v861_v15 = vrot.slane %v9624_v1, 1 }
 0x176   : > { %4778 = vmatpush2.bf16.msra.mxu0 %v11894_v63  ;;  %4851 = vmatpush2.bf16.msra.mxu1 %v11897_v32  ;;  %v10490_v63 = vcombine.low %v15214_v39, %v15206_v49  ;;  %v11912_v32 = vld [vmem:[%s17915_s2 + $0x4a0] ss:$8 sps:$4 sm:$0xff]   ;;  %v11918_v49 = vld [vmem:[%s17915_s2 + $0x490] ss:$8 sps:$4 sm:$0xff]   ;;  %v863_v14 = vrot.slane %v9626_v31, 1 }
 0x177   : > { %4779 = vmatprep.subr.bf16.mxu0 %v11902_v38  ;;  %4852 = vmatprep.subr.bf16.mxu1 %v11905_v25  ;;  %v11915_v38 = vld [vmem:[%s17915_s2 + $0x5a0] ss:$8 sps:$4 sm:$0xff]   ;;  %v11920_v25 = vld [vmem:[%s17915_s2 + $0x494] ss:$8 sps:$4 sm:$0xff]  }
 0x178   : > { %v5125_v53 = vshll.u32 %v10490_v63, 16 }
 0x17a   : > { %4780 = vmatpush2.bf16.msra.mxu0 %v11900_v44  ;;  %4853 = vmatpush2.bf16.msra.mxu1 %v11903_v35  ;;  %v5083_v44 = vshll.u32 %v10484_v30, 16  ;;  %v11923_v35 = vld [vmem:[%s17915_s2 + $0x594] ss:$8 sps:$4 sm:$0xff]   ;;  %v10206_v30 = vcombine.low %v859_v3, %v863_v14  ;;  %v12094_v14 = vld [vmem:[%s17915_s2 + $0xe24] ss:$8 sps:$4 sm:$0xff]  }
 0x17b   : > { %4781 = vmatprep.subr.bf16.mxu0 %v11908_v4  ;;  %4854 = vmatprep.subr.bf16.mxu1 %v11911_v48  ;;  %v5111_v4 = vshll.u32 %v10488_v43, 16  ;;  %v5097_v48 = vshll.u32 %v10486_v40, 16  ;;  %v15286_v43 = vpop.f32.mrf.mxu0 }
 0x17c   : > { %v5085_v2 = vrot.slane %v5083_v44, 1 }
 0x17d   : > { %v5113_v56 = vrot.slane %v5111_v4, 1  ;;  %v5099_v45 = vrot.slane %v5097_v48, 1 }
 0x17e   : > { %4782 = vmatpush2.bf16.msra.mxu0 %v11906_v16  ;;  %4855 = vmatpush2.bf16.msra.mxu1 %v11909_v21  ;;  %v11921_v16 = vld [vmem:[%s17915_s2 + $0x590] ss:$8 sps:$4 sm:$0xff]   ;;  %v11926_v21 = vld [vmem:[%s17915_s2 + $0x484] ss:$8 sps:$4 sm:$0xff]   ;;  %v15266_v60 = vor.u32 %v5085_v2, %v5081_v20 }
 0x17f   : > { %4783 = vmatprep.subr.bf16.mxu0 %v11914_v13  ;;  %4856 = vmatprep.subr.bf16.mxu1 %v11917_v54  ;;  %v11929_v13 = vld [vmem:[%s17915_s2 + $0x584] ss:$8 sps:$4 sm:$0xff]   ;;  %v9620_v54 = vcombine.low %v14996_v18, %v15051_v61  ;;  %v5123_v18 = vshrl.u32 %v10490_v63, 16  ;;  %v5127_v61 = vrot.slane %v5125_v53, 1  ;;  %v15274_v53 = vor.u32 %v5113_v56, %v5109_v46  ;;  %v11938_v2 = vld [vmem:[%s17915_s2 + $0xc70] ss:$8 sps:$4 sm:$0xff]   ;;  %v15288_v56 = vpop.f32.mrf.mxu1 }
 0x180   : > { %v15276_v31 = vor.u32 %v5099_v45, %v5095_v55  ;;  %v11941_v20 = vld [vmem:[%s17915_s2 + $0xd70] ss:$8 sps:$4 sm:$0xff]   ;;  %v11946_v55 = vld [vmem:[%s17915_s2 + $0xc64] ss:$8 sps:$4 sm:$0xff]  }
 0x181   : > { %v857_v9 = vrot.slane %v9620_v54, 1  ;;  %v15278_v1 = vor.u32 %v5127_v61, %v5123_v18  ;;  %v11949_v46 = vld [vmem:[%s17915_s2 + $0xd64] ss:$8 sps:$4 sm:$0xff]   ;;  %v18002_v54 = vld [vmem:[#allocation20_spill] sm:$0xff]  ;;  %v18003_v18 = vld [vmem:[#allocation21_spill] sm:$0xff] }
 0x182   : > { %4784 = vmatpush2.bf16.msra.mxu0 %v11912_v32  ;;  %4857 = vmatpush2.bf16.msra.mxu1 %v11915_v38  ;;  %v11944_v32 = vld [vmem:[%s17915_s2 + $0xc60] ss:$8 sps:$4 sm:$0xff]   ;;  %v18004_v61 = vcombine.low %v18002_v54, %v18003_v18 }
 0x183   : > { %4785 = vmatprep.subr.bf16.mxu0 %v11920_v25  ;;  %4858 = vmatprep.subr.bf16.mxu1 %v11923_v35  ;;  %v11947_v38 = vld [vmem:[%s17915_s2 + $0xd60] ss:$8 sps:$4 sm:$0xff]   ;;  %v11956_v35 = vld [vmem:[%s17915_s2 + $0xc54] ss:$8 sps:$4 sm:$0xff]  }
 0x186   : > { %4786 = vmatpush2.bf16.msra.mxu0 %v11918_v49  ;;  %4859 = vmatpush2.bf16.msra.mxu1 %v11921_v16  ;;  %v10204_v49 = vcombine.low %v857_v9, %v861_v15  ;;  %v17999_v16 = vld [vmem:[#allocation16_spill] sm:$0xff] }
 0x187   : > { %4787 = vmatprep.subr.bf16.mxu0 %v11926_v21  ;;  %4860 = vmatprep.subr.bf16.mxu1 %v11929_v13  ;;  %v18000_v21 = vld [vmem:[#allocation17_spill] sm:$0xff] }
 0x188   : > { %v18001_v13 = vcombine.low %v17999_v16, %v18000_v21  ;;  %v18010_v21 = vcombine.low %v14827_v24, %v14833_v59  ;;  %v11977_v24 = vld [vmem:[%s17915_s2 + $0xd30] ss:$8 sps:$4 sm:$0xff]  }
 0x18a   : > { %4788 = vmatpush2.bf16.msra.mxu0 %v11924_v57  ;;  %4861 = vmatpush2.bf16.msra.mxu1 %v11927_v62  ;;  %v11954_v57 = vld [vmem:[%s17915_s2 + $0xc50] ss:$8 sps:$4 sm:$0xff]  }
 0x18b   : > { %6729 = vmatprep.subr.bf16.mxu0 %v11940_v12  ;;  %6802 = vmatprep.subr.bf16.mxu1 %v11943_v58 }
 0x18c   : > { %v3297_v45 = vpop.f32.mrf.mxu0 }
 0x18d   : > { %v3370_v40 = vpop.f32.mrf.mxu1  ;;  %4790 = vmatmul.mubr.bf16.vlgmr.msra.gmra.mxu0 %v10204_v49  ;;  %4863 = vmatmul.mubr.bf16.vlgmr.msra.gmra.mxu1 %v10206_v30  ;;  %v3298_v63 = vadd.f32 %v3297_v45, %v14898_v50  ;;  %v11959_v50 = vld [vmem:[%s17915_s2 + $0xd54] ss:$8 sps:$4 sm:$0xff]   ;;  %v11966_v30 = vld [vmem:[%s17915_s2 + $0xc44] ss:$8 sps:$4 sm:$0xff]  }
 0x18e   : > { %6730 = vmatpush1.bf16.msra.mxu0 %v11938_v2  ;;  %6803 = vmatpush1.bf16.msra.mxu1 %v11941_v20  ;;  %v3299_v25 = vpop.f32.mrf.mxu0 }
 0x18f   : > { %v3372_v44 = vpop.f32.mrf.mxu1  ;;  %6731 = vmatprep.subr.bf16.mxu0 %v11946_v55  ;;  %6804 = vmatprep.subr.bf16.mxu1 %v11949_v46  ;;  %v15313_v4 = vadd.f32 %v3370_v40, %v3298_v63  ;;  %v3300_v48 = vadd.f32 %v3299_v25, %v14922_v52  ;;  %v11957_v52 = vld [vmem:[%s17915_s2 + $0xd50] ss:$8 sps:$4 sm:$0xff]   ;;  %v18005_v55 = vld [vmem:[#allocation18_spill] sm:$0xff]  ;;  %v18006_v46 = vld [vmem:[#allocation19_spill] sm:$0xff] }
 0x190   : > { %4799 = vmatprep.mubr.bf16.mxu0 %v18001_v13  ;;  %4872 = vmatprep.mubr.bf16.mxu1 %v18004_v61  ;;  %v3301_v15 = vpop.f32.mrf.mxu0  ;;  %v18007_v45 = vcombine.low %v18005_v55, %v18006_v46  ;;  %v18008_v63 = vld [vmem:[#allocation22_spill] sm:$0xff]  ;;  %v18011_v13 = vcombine.low %v14877_v10, %v14886_v28  ;;  %v11974_v61 = vld [vmem:[%s17915_s2 + $0xc30] ss:$8 sps:$4 sm:$0xff]  }
 0x191   : > { %v3374_v3 = vpop.f32.mrf.mxu1  ;;  %v15325_v62 = vadd.f32 %v3372_v44, %v3300_v48  ;;  %v3302_v12 = vadd.f32 %v3301_v15, %v14950_v17  ;;  %v11969_v17 = vld [vmem:[%s17915_s2 + $0xd44] ss:$8 sps:$4 sm:$0xff]   ;;  %v11964_v25 = vld [vmem:[%s17915_s2 + $0xc40] ss:$8 sps:$4 sm:$0xff]  }
 0x192   : > { %6732 = vmatpush1.bf16.msra.mxu0 %v11944_v32  ;;  %6805 = vmatpush1.bf16.msra.mxu1 %v11947_v38  ;;  %v15331_v58 = vpop.f32.mrf.mxu0  ;;  %v18009_v32 = vcombine.low %v14802_v29, %v18008_v63  ;;  %v11967_v44 = vld [vmem:[%s17915_s2 + $0xd40] ss:$8 sps:$4 sm:$0xff]   ;;  %v11976_v29 = vld [vmem:[%s17915_s2 + $0xc34] ss:$8 sps:$4 sm:$0xff]   ;;  %v11986_v28 = vld [vmem:[%s17915_s2 + $0xc24] ss:$8 sps:$4 sm:$0xff]  }
 0x193   : > { %v15333_v49 = vpop.f32.mrf.mxu1  ;;  %6733 = vmatprep.subr.bf16.mxu0 %v11956_v35  ;;  %6806 = vmatprep.subr.bf16.mxu1 %v11959_v50  ;;  %v15341_v2 = vadd.f32 %v3374_v3, %v3302_v12  ;;  %v18012_v12 = vld [vmem:[#allocation23_spill] sm:$0xff] }
 0x194   : > { %v3307_v20 = vpop.f32.mrf.mxu0  ;;  %v11984_v55 = vld [vmem:[%s17915_s2 + $0xc20] ss:$8 sps:$4 sm:$0xff]  }
 0x195   : > { %4800 = vmatmul.mubr.bf16.gmra.mxu0 %v18007_v45  ;;  %v3380_v40 = vpop.f32.mrf.mxu1  ;;  %4873 = vmatmul.mubr.bf16.gmra.mxu1 %v18009_v32  ;;  %v3308_v38 = vadd.f32 %v3307_v20, %v15001_v27  ;;  %v11979_v27 = vld [vmem:[%s17915_s2 + $0xd34] ss:$8 sps:$4 sm:$0xff]   ;;  %v18015_v20 = vcombine.low %v14879_v5, %v14888_v37  ;;  %v11987_v45 = vld [vmem:[%s17915_s2 + $0xd20] ss:$8 sps:$4 sm:$0xff]  }
 0x196   : > { %6734 = vmatpush1.bf16.msra.mxu0 %v11954_v57  ;;  %6807 = vmatpush1.bf16.msra.mxu1 %v11957_v52  ;;  %v3309_v35 = vpop.f32.mrf.mxu0  ;;  %v18013_v52 = vld [vmem:[#allocation24_spill] sm:$0xff] }
 0x197   : > { %v3382_v50 = vpop.f32.mrf.mxu1  ;;  %6735 = vmatprep.subr.bf16.mxu0 %v11966_v30  ;;  %6808 = vmatprep.subr.bf16.mxu1 %v11969_v17  ;;  %v3310_v48 = vadd.f32 %v3309_v35, %v15028_v6  ;;  %v15363_v16 = vadd.f32 %v3380_v40, %v3308_v38  ;;  %v11989_v6 = vld [vmem:[%s17915_s2 + $0xd24] ss:$8 sps:$4 sm:$0xff]   ;;  %v18014_v30 = vcombine.low %v18012_v12, %v18013_v52  ;;  %v11996_v5 = vld [vmem:[%s17915_s2 + $0xc14] ss:$8 sps:$4 sm:$0xff]  }
 0x198   : > { %4809 = vmatprep.mubr.bf16.mxu0 %v18010_v21  ;;  %4882 = vmatprep.mubr.bf16.mxu1 %v18011_v13  ;;  %v3311_v54 = vpop.f32.mrf.mxu0  ;;  %v11999_v37 = vld [vmem:[%s17915_s2 + $0xd14] ss:$8 sps:$4 sm:$0xff]   ;;  %v18016_v38 = vcombine.low %v14917_v7, %v14919_v51  ;;  %v11997_v7 = vld [vmem:[%s17915_s2 + $0xd10] ss:$8 sps:$4 sm:$0xff]   ;;  %v10743_v21 = vcombine.high %v15209_v47, %v15214_v39 }
 0x199   : > { %v3384_v18 = vpop.f32.mrf.mxu1  ;;  %v3312_v15 = vadd.f32 %v3311_v54, %v15060_v41  ;;  %v15375_v3 = vadd.f32 %v3382_v50, %v3310_v48  ;;  %v11994_v50 = vld [vmem:[%s17915_s2 + $0xc10] ss:$8 sps:$4 sm:$0xff]   ;;  %v10741_v48 = vcombine.high %v15185_v42, %v15200_v36  ;;  %v18018_v54 = vcombine.low %v14930_v11, %v14946_v19  ;;  %v12012_v19 = vld [vmem:[%s17915_s2 + $0xcf4] ss:$8 sps:$4 sm:$0xff]  }
 0x19a   : > { %6736 = vmatpush1.bf16.msra.mxu0 %v11964_v25  ;;  %6809 = vmatpush1.bf16.msra.mxu1 %v11967_v44  ;;  %v15380_v59 = vpop.f32.mrf.mxu0  ;;  %v18017_v25 = vcombine.low %v14973_v33, %v14975_v34  ;;  %v12006_v34 = vld [vmem:[%s17915_s2 + $0xc04] ss:$8 sps:$4 sm:$0xff]  }
 0x19b   : > { %v15382_v10 = vpop.f32.mrf.mxu1  ;;  %6737 = vmatprep.subr.bf16.mxu0 %v11976_v29  ;;  %6810 = vmatprep.subr.bf16.mxu1 %v11979_v27  ;;  %v15390_v41 = vadd.f32 %v3384_v18, %v3312_v15  ;;  %v12004_v15 = vld [vmem:[%s17915_s2 + $0xc00] ss:$8 sps:$4 sm:$0xff]  }
 0x19c   : > { %v3317_v57 = vpop.f32.mrf.mxu0 }
 0x19d   : > { %4810 = vmatmul.mubr.bf16.gmra.mxu0 %v18014_v30  ;;  %v3390_v17 = vpop.f32.mrf.mxu1  ;;  %4883 = vmatmul.mubr.bf16.gmra.mxu1 %v18015_v20  ;;  %v3318_v46 = vadd.f32 %v3317_v57, %v15091_v23  ;;  %v12010_v20 = vld [vmem:[%s17915_s2 + $0xcf0] ss:$8 sps:$4 sm:$0xff]  }
 0x19e   : > { %6738 = vmatpush1.bf16.msra.mxu0 %v11974_v61  ;;  %6811 = vmatpush1.bf16.msra.mxu1 %v11977_v24  ;;  %v3319_v40 = vpop.f32.mrf.mxu0  ;;  %v18019_v61 = vcombine.low %v14982_v26, %v14984_v22  ;;  %v18020_v24 = vld [vmem:[#allocation9_spill] sm:$0xff]  ;;  %v18021_v22 = vld [vmem:[#allocation12_spill] sm:$0xff] }
 0x19f   : > { %v3392_v63 = vpop.f32.mrf.mxu1  ;;  %6739 = vmatprep.subr.bf16.mxu0 %v11986_v28  ;;  %6812 = vmatprep.subr.bf16.mxu1 %v11989_v6  ;;  %v3320_v23 = vadd.f32 %v3319_v40, %v15098_v8  ;;  %v15412_v32 = vadd.f32 %v3390_v17, %v3318_v46  ;;  %v12009_v8 = vld [vmem:[%s17915_s2 + $0xd04] ss:$8 sps:$4 sm:$0xff]   ;;  %v12007_v6 = vld [vmem:[%s17915_s2 + $0xd00] ss:$8 sps:$4 sm:$0xff]   ;;  %v12015_v26 = vld [vmem:[%s17915_s2 + $0xdf4] ss:$8 sps:$4 sm:$0xff]  }
 0x1a0   : > { %4819 = vmatprep.mubr.bf16.mxu0 %v18016_v38  ;;  %4892 = vmatprep.mubr.bf16.mxu1 %v18017_v25  ;;  %v3321_v44 = vpop.f32.mrf.mxu0  ;;  %v12013_v40 = vld [vmem:[%s17915_s2 + $0xdf0] ss:$8 sps:$4 sm:$0xff]   ;;  %v12019_v38 = vld [vmem:[%s17915_s2 + $0xde0] ss:$8 sps:$4 sm:$0xff]   ;;  %v12024_v25 = vld [vmem:[%s17915_s2 + $0xcd4] ss:$8 sps:$4 sm:$0xff]  }
 0x1a1   : > { %v3394_v35 = vpop.f32.mrf.mxu1  ;;  %v3322_v29 = vadd.f32 %v3321_v44, %v15113_v0  ;;  %v15424_v27 = vadd.f32 %v3392_v63, %v3320_v23  ;;  %v12018_v63 = vld [vmem:[%s17915_s2 + $0xce4] ss:$8 sps:$4 sm:$0xff]   ;;  %v12016_v23 = vld [vmem:[%s17915_s2 + $0xce0] ss:$8 sps:$4 sm:$0xff]   ;;  %v12027_v44 = vld [vmem:[%s17915_s2 + $0xdd4] ss:$8 sps:$4 sm:$0xff]  }
 0x1a2   : > { %6740 = vmatpush1.bf16.msra.mxu0 %v11984_v55  ;;  %6813 = vmatpush1.bf16.msra.mxu1 %v11987_v45  ;;  %v15429_v51 = vpop.f32.mrf.mxu0  ;;  %v18022_v55 = vld [vmem:[#allocation13_spill] sm:$0xff] }
 0x1a3   : > { %v15431_v33 = vpop.f32.mrf.mxu1  ;;  %6741 = vmatprep.subr.bf16.mxu0 %v11996_v5  ;;  %6814 = vmatprep.subr.bf16.mxu1 %v11999_v37  ;;  %v15439_v0 = vadd.f32 %v3394_v35, %v3322_v29  ;;  %v12021_v5 = vld [vmem:[%s17915_s2 + $0xde4] ss:$8 sps:$4 sm:$0xff]   ;;  %v12022_v35 = vld [vmem:[%s17915_s2 + $0xcd0] ss:$8 sps:$4 sm:$0xff]  }
 0x1a4   : > { %v3327_v13 = vpop.f32.mrf.mxu0  ;;  %v12030_v29 = vld [vmem:[%s17915_s2 + $0xcc4] ss:$8 sps:$4 sm:$0xff]  }
 0x1a5   : > { %4820 = vmatmul.mubr.bf16.gmra.mxu0 %v18018_v54  ;;  %v3400_v18 = vpop.f32.mrf.mxu1  ;;  %4893 = vmatmul.mubr.bf16.gmra.mxu1 %v18019_v61  ;;  %v3328_v28 = vadd.f32 %v3327_v13, %v18020_v24  ;;  %v12034_v13 = vld [vmem:[%s17915_s2 + $0xcb0] ss:$8 sps:$4 sm:$0xff]   ;;  %v12045_v61 = vld [vmem:[%s17915_s2 + $0xda4] ss:$8 sps:$4 sm:$0xff]   ;;  %v12043_v24 = vld [vmem:[%s17915_s2 + $0xda0] ss:$8 sps:$4 sm:$0xff]  }
 0x1a6   : > { %6742 = vmatpush1.bf16.msra.mxu0 %v11994_v50  ;;  %6815 = vmatpush1.bf16.msra.mxu1 %v11997_v7  ;;  %v3329_v57 = vpop.f32.mrf.mxu0  ;;  %v12025_v50 = vld [vmem:[%s17915_s2 + $0xdd0] ss:$8 sps:$4 sm:$0xff]   ;;  %v12033_v7 = vld [vmem:[%s17915_s2 + $0xdc4] ss:$8 sps:$4 sm:$0xff]  }
 0x1a7   : > { %v3402_v11 = vpop.f32.mrf.mxu1  ;;  %6743 = vmatprep.subr.bf16.mxu0 %v12006_v34  ;;  %6816 = vmatprep.subr.bf16.mxu1 %v12009_v8  ;;  %v3330_v12 = vadd.f32 %v3329_v57, %v18021_v22  ;;  %v15465_v52 = vadd.f32 %v3400_v18, %v3328_v28  ;;  %v12028_v34 = vld [vmem:[%s17915_s2 + $0xcc0] ss:$8 sps:$4 sm:$0xff]   ;;  %v12037_v54 = vld [vmem:[%s17915_s2 + $0xdb0] ss:$8 sps:$4 sm:$0xff]   ;;  %v12042_v18 = vld [vmem:[%s17915_s2 + $0xca4] ss:$8 sps:$4 sm:$0xff]  }
 0x1a8   : > { %6761 = vmatprep.mubr.bf16.mxu0 %v10741_v48  ;;  %6834 = vmatprep.mubr.bf16.mxu1 %v10743_v21  ;;  %v3331_v30 = vpop.f32.mrf.mxu0  ;;  %v12031_v8 = vld [vmem:[%s17915_s2 + $0xdc0] ss:$8 sps:$4 sm:$0xff]   ;;  %v12036_v48 = vld [vmem:[%s17915_s2 + $0xcb4] ss:$8 sps:$4 sm:$0xff]   ;;  %v12046_v57 = vld [vmem:[%s17915_s2 + $0xc90] ss:$8 sps:$4 sm:$0xff]  }
 0x1a9   : > { %v3404_v17 = vpop.f32.mrf.mxu1  ;;  %v3332_v46 = vadd.f32 %v3331_v30, %v18022_v55  ;;  %v15471_v45 = vadd.f32 %v3402_v11, %v3330_v12  ;;  %v12039_v21 = vld [vmem:[%s17915_s2 + $0xdb4] ss:$8 sps:$4 sm:$0xff]   ;;  %v12049_v11 = vld [vmem:[%s17915_s2 + $0xd90] ss:$8 sps:$4 sm:$0xff]   ;;  %v12052_v22 = vld [vmem:[%s17915_s2 + $0xc80] ss:$8 sps:$4 sm:$0xff]  }
 0x1aa   : > { %6744 = vmatpush1.bf16.msra.mxu0 %v12004_v15  ;;  %6817 = vmatpush1.bf16.msra.mxu1 %v12007_v6  ;;  %v12040_v15 = vld [vmem:[%s17915_s2 + $0xca0] ss:$8 sps:$4 sm:$0xff]   ;;  %v12048_v28 = vld [vmem:[%s17915_s2 + $0xc94] ss:$8 sps:$4 sm:$0xff]  }
 0x1ab   : > { %6745 = vmatprep.subr.bf16.mxu0 %v12012_v19  ;;  %6818 = vmatprep.subr.bf16.mxu1 %v12015_v26  ;;  %v15482_v37 = vadd.f32 %v3404_v17, %v3332_v46  ;;  %v12051_v6 = vld [vmem:[%s17915_s2 + $0xd94] ss:$8 sps:$4 sm:$0xff]   ;;  %v12054_v19 = vld [vmem:[%s17915_s2 + $0xc84] ss:$8 sps:$4 sm:$0xff]   ;;  %v12055_v12 = vld [vmem:[%s17915_s2 + $0xd80] ss:$8 sps:$4 sm:$0xff]  }
 0x1ac   : > { %v12057_v26 = vld [vmem:[%s17915_s2 + $0xd84] ss:$8 sps:$4 sm:$0xff]   ;;  %v12064_v55 = vld [vmem:[%s17915_s2 + $0xe74] ss:$8 sps:$4 sm:$0xff]  }
 0x1ad   : > { %v18023_v30 = vld [vmem:[#allocation2_spill] sm:$0xff]  ;;  %v18024_v17 = vld [vmem:[#allocation3_spill] sm:$0xff]  ;;  %v12067_v46 = vld [vmem:[%s17915_s2 + $0xf74] ss:$8 sps:$4 sm:$0xff]  }
 0x1ae   : > { %6746 = vmatpush2.bf16.msra.mxu0 %v12010_v20  ;;  %6819 = vmatpush2.bf16.msra.mxu1 %v12013_v40  ;;  %v3085_v20 = vadd.f32 %v18024_v17, %v18023_v30  ;;  %v15571_v40 = vld [vmem:[%s13023_s27 + $0x80] sm:$0xff]  ;;  %v12076_v30 = vld [vmem:[%s17915_s2 + $0xe54] ss:$8 sps:$4 sm:$0xff]  }
 0x1af   : > { %6747 = vmatprep.subr.bf16.mxu0 %v12018_v63  ;;  %6820 = vmatprep.subr.bf16.mxu1 %v12021_v5  ;;  %v18025_v63 = vld [vmem:[#allocation27_spill] sm:$0xff]  ;;  %v12079_v17 = vld [vmem:[%s17915_s2 + $0xf54] ss:$8 sps:$4 sm:$0xff]  }
 0x1b0   : > { %v3158_v5 = vadd.f32 %v18025_v63, %v3085_v20  ;;  %v18030_v20 = vld [vmem:[#allocation10_spill] sm:$0xff] }
 0x1b1   : > { %v15628_v63 = vld [vmem:[%s13023_s27 + $0xc0] sm:$0xff] }
 0x1b2   : > { %6748 = vmatpush2.bf16.msra.mxu0 %v12016_v23  ;;  %6821 = vmatpush2.bf16.msra.mxu1 %v12019_v38  ;;  %v12062_v23 = vld [vmem:[%s17915_s2 + $0xe70] ss:$8 sps:$4 sm:$0xff]   ;;  %v15578_v38 = vld [vmem:[%s13023_s27 + $0xa0] sm:$0xff] }
 0x1b3   : > { %6749 = vmatprep.subr.bf16.mxu0 %v12024_v25  ;;  %6822 = vmatprep.subr.bf16.mxu1 %v12027_v44  ;;  %v15581_v25 = vld [vmem:[%s13023_s27 + $0x88] sm:$0xff]  ;;  %v10740_v44 = vcombine.low %v15185_v42, %v15200_v36 }
 0x1b6   : > { %6750 = vmatpush2.bf16.msra.mxu0 %v12022_v35  ;;  %6823 = vmatpush2.bf16.msra.mxu1 %v12025_v50  ;;  %v10742_v35 = vcombine.low %v15209_v47, %v15214_v39  ;;  %v15588_v50 = vld [vmem:[%s13023_s27 + $0xa8] sm:$0xff] }
 0x1b7   : > { %6751 = vmatprep.subr.bf16.mxu0 %v12030_v29  ;;  %6824 = vmatprep.subr.bf16.mxu1 %v12033_v7  ;;  %v18026_v29 = vld [vmem:[#allocation5_spill] sm:$0xff]  ;;  %v18027_v7 = vld [vmem:[#allocation6_spill] sm:$0xff] }
 0x1ba   : > { %6752 = vmatpush2.bf16.msra.mxu0 %v12028_v34  ;;  %6825 = vmatpush2.bf16.msra.mxu1 %v12031_v8  ;;  %v3095_v34 = vadd.f32 %v18027_v7, %v18026_v29  ;;  %v12065_v8 = vld [vmem:[%s17915_s2 + $0xf70] ss:$8 sps:$4 sm:$0xff]   ;;  %v15638_v7 = vld [vmem:[%s13023_s27 + $0xc8] sm:$0xff] }
 0x1bb   : > { %6753 = vmatprep.subr.bf16.mxu0 %v12036_v48  ;;  %6826 = vmatprep.subr.bf16.mxu1 %v12039_v21  ;;  %v15595_v48 = vpop.f32.mrf.mxu0  ;;  %v15597_v21 = vpop.f32.mrf.mxu1 }
 0x1be   : > { %6754 = vmatpush2.bf16.msra.mxu0 %v12034_v13  ;;  %6827 = vmatpush2.bf16.msra.mxu1 %v12037_v54  ;;  %v12070_v13 = vld [vmem:[%s17915_s2 + $0xe64] ss:$8 sps:$4 sm:$0xff]  }
 0x1bf   : > { %6755 = vmatprep.subr.bf16.mxu0 %v12042_v18  ;;  %6828 = vmatprep.subr.bf16.mxu1 %v12045_v61  ;;  %v12073_v54 = vld [vmem:[%s17915_s2 + $0xf64] ss:$8 sps:$4 sm:$0xff]   ;;  %v18028_v18 = vld [vmem:[#allocation28_spill] sm:$0xff] }
 0x1c0   : > { %v3231_v61 = vadd.f32 %v18028_v18, %v3158_v5  ;;  %v15631_v5 = vld [vmem:[%s13023_s27 + $0xe0] sm:$0xff] }
 0x1c2   : > { %6756 = vmatpush2.bf16.msra.mxu0 %v12040_v15  ;;  %6829 = vmatpush2.bf16.msra.mxu1 %v12043_v24  ;;  %v18029_v15 = vld [vmem:[#allocation4_spill] sm:$0xff] }
 0x1c3   : > { %6757 = vmatprep.subr.bf16.mxu0 %v12048_v28  ;;  %6830 = vmatprep.subr.bf16.mxu1 %v12051_v6  ;;  %v3168_v24 = vadd.f32 %v18029_v15, %v3095_v34  ;;  %v10753_v28 = vcombine.high %v15571_v40, %v15578_v38  ;;  %v10755_v6 = vcombine.high %v15581_v25, %v15588_v50  ;;  %v15641_v34 = vld [vmem:[%s13023_s27 + $0xe8] sm:$0xff] }
 0x1c6   : > { %6758 = vmatpush2.bf16.msra.mxu0 %v12046_v57  ;;  %6831 = vmatpush2.bf16.msra.mxu1 %v12049_v11 }
 0x1c7   : > { %6759 = vmatprep.subr.bf16.mxu0 %v12054_v19  ;;  %6832 = vmatprep.subr.bf16.mxu1 %v12057_v26  ;;  %v12068_v19 = vld [vmem:[%s17915_s2 + $0xe60] ss:$8 sps:$4 sm:$0xff]   ;;  %v3304_v26 = vadd.f32 %v15331_v58, %v3231_v61 }
 0x1c8   : > { %v18031_v58 = vld [vmem:[#allocation11_spill] sm:$0xff]  ;;  %v18033_v61 = vld [vmem:[#allocation14_spill] sm:$0xff] }
 0x1c9   : > { %v15649_v15 = vcombine.high %v15185_v42, %v18033_v61  ;;  %v12077_v42 = vld [vmem:[%s17915_s2 + $0xf50] ss:$8 sps:$4 sm:$0xff]  }
 0x1ca   : > { %6760 = vmatpush2.bf16.msra.mxu0 %v12052_v22  ;;  %6833 = vmatpush2.bf16.msra.mxu1 %v12055_v12  ;;  %v12071_v12 = vld [vmem:[%s17915_s2 + $0xf60] ss:$8 sps:$4 sm:$0xff]  }
 0x1cb   : > { %6875 = vmatprep.subr.bf16.mxu0 %v12064_v55  ;;  %6948 = vmatprep.subr.bf16.mxu1 %v12067_v46  ;;  %v3105_v55 = vadd.f32 %v18031_v58, %v18030_v20 }
 0x1cc   : > { %v4499_v57 = vpop.f32.mrf.mxu0 }
 0x1cd   : > { %v4572_v11 = vpop.f32.mrf.mxu1  ;;  %6762 = vmatmul.mubr.bf16.vlgmr.msra.gmra.mxu0 %v10740_v44  ;;  %6835 = vmatmul.mubr.bf16.vlgmr.msra.gmra.mxu1 %v10742_v35  ;;  %v4500_v22 = vadd.f32 %v4499_v57, %v15313_v4 }
 0x1ce   : > { %6876 = vmatpush1.bf16.msra.mxu0 %v12062_v23  ;;  %6949 = vmatpush1.bf16.msra.mxu1 %v12065_v8  ;;  %v4501_v4 = vpop.f32.mrf.mxu0  ;;  %v18032_v23 = vld [vmem:[#allocation15_spill] sm:$0xff] }
 0x1cf   : > { %v4574_v46 = vpop.f32.mrf.mxu1  ;;  %6877 = vmatprep.subr.bf16.mxu0 %v12070_v13  ;;  %6950 = vmatprep.subr.bf16.mxu1 %v12073_v54  ;;  %v3241_v44 = vadd.f32 %v18032_v23, %v3168_v24  ;;  %v15634_v35 = vadd.f32 %v4572_v11, %v4500_v22  ;;  %v4502_v29 = vadd.f32 %v4501_v4, %v15325_v62  ;;  %v18034_v24 = vld [vmem:[#allocation29_spill] sm:$0xff]  ;;  %v18035_v22 = vld [vmem:[#allocation7_spill] sm:$0xff] }
 0x1d0   : > { %6771 = vmatprep.mubr.bf16.mxu0 %v10753_v28  ;;  %6844 = vmatprep.mubr.bf16.mxu1 %v10755_v6  ;;  %v4503_v8 = vpop.f32.mrf.mxu0  ;;  %v10752_v13 = vcombine.low %v15571_v40, %v15578_v38  ;;  %v10754_v54 = vcombine.low %v15581_v25, %v15588_v50  ;;  %v15653_v62 = vcombine.high %v15200_v36, %v18034_v24  ;;  %v12074_v11 = vld [vmem:[%s17915_s2 + $0xe50] ss:$8 sps:$4 sm:$0xff]  }
 0x1d1   : > { %v4576_v18 = vpop.f32.mrf.mxu1  ;;  %v3377_v28 = vadd.f32 %v15333_v49, %v3304_v26  ;;  %v15656_v6 = vadd.f32 %v4574_v46, %v4502_v29  ;;  %v4504_v57 = vadd.f32 %v4503_v8, %v15341_v2  ;;  %v3178_v20 = vadd.f32 %v18035_v22, %v3105_v55  ;;  %v12082_v49 = vld [vmem:[%s17915_s2 + $0xe44] ss:$8 sps:$4 sm:$0xff]   ;;  %v18040_v22 = vld [vmem:[#allocation25_spill] sm:$0xff] }
 0x1d2   : > { %6878 = vmatpush1.bf16.msra.mxu0 %v12068_v19  ;;  %6951 = vmatpush1.bf16.msra.mxu1 %v12071_v12  ;;  %v4505_v36 = vpop.f32.mrf.mxu0  ;;  %v12085_v2 = vld [vmem:[%s17915_s2 + $0xf44] ss:$8 sps:$4 sm:$0xff]   ;;  %v10767_v46 = vcombine.high %v15638_v7, %v15641_v34  ;;  %v5090_v8 = vshll.u32 %v15649_v15, 16 }
 0x1d3   : > { %v4578_v58 = vpop.f32.mrf.mxu1  ;;  %6879 = vmatprep.subr.bf16.mxu0 %v12076_v30  ;;  %6952 = vmatprep.subr.bf16.mxu1 %v12079_v17  ;;  %v18036_v19 = vld [vmem:[#allocation30_spill] sm:$0xff]  ;;  %v18037_v12 = vld [vmem:[#allocation31_spill] sm:$0xff]  ;;  %v15680_v55 = vadd.f32 %v4576_v18, %v4504_v57  ;;  %v4506_v30 = vadd.f32 %v4505_v36, %v3377_v28  ;;  %v10765_v17 = vcombine.high %v15628_v63, %v15631_v5  ;;  %v12088_v28 = vld [vmem:[%s17915_s2 + $0xe34] ss:$8 sps:$4 sm:$0xff]   ;;  %v5118_v57 = vshll.u32 %v15653_v62, 16 }
 0x1d4   : > { %v15674_v26 = vcombine.high %v15209_v47, %v18036_v19  ;;  %v15678_v4 = vcombine.high %v15214_v39, %v18037_v12  ;;  %v4509_v23 = vpop.f32.mrf.mxu0  ;;  %v12080_v47 = vld [vmem:[%s17915_s2 + $0xe40] ss:$8 sps:$4 sm:$0xff]   ;;  %v3314_v18 = vadd.f32 %v15380_v59, %v3241_v44 }
 0x1d5   : > { %18038 = vst [vmem:[#allocation16_spill] sm:$0xff] %v15680_v55  ;;  %v4582_v29 = vpop.f32.mrf.mxu1  ;;  %v12083_v39 = vld [vmem:[%s17915_s2 + $0xf40] ss:$8 sps:$4 sm:$0xff]   ;;  %6772 = vmatmul.mubr.bf16.gmra.mxu0 %v10752_v13  ;;  %6845 = vmatmul.mubr.bf16.gmra.mxu1 %v10754_v54  ;;  %v15694_v61 = vadd.f32 %v4578_v58, %v4506_v30  ;;  %v4510_v24 = vadd.f32 %v4509_v23, %v15363_v16  ;;  %v12091_v16 = vld [vmem:[%s17915_s2 + $0xf34] ss:$8 sps:$4 sm:$0xff]  }
 0x1d6   : > { %6880 = vmatpush1.bf16.msra.mxu0 %v12074_v11  ;;  %6953 = vmatpush1.bf16.msra.mxu1 %v12077_v42  ;;  %v18041_v36 = vld [vmem:[#allocation26_spill] sm:$0xff]  ;;  %v4511_v54 = vpop.f32.mrf.mxu0  ;;  %v5104_v59 = vshll.u32 %v15674_v26, 16  ;;  %v5132_v44 = vshll.u32 %v15678_v4, 16  ;;  %v18042_v11 = vld [vmem:[#allocation8_spill] sm:$0xff] }
 0x1d7   : > { %18039 = vst [vmem:[#allocation17_spill] sm:$0xff] %v15694_v61  ;;  %v3115_v13 = vadd.f32 %v18041_v36, %v18040_v22  ;;  %v4584_v19 = vpop.f32.mrf.mxu1  ;;  %6881 = vmatprep.subr.bf16.mxu0 %v12082_v49  ;;  %6954 = vmatprep.subr.bf16.mxu1 %v12085_v2  ;;  %v3251_v42 = vadd.f32 %v18042_v11, %v3178_v20  ;;  %v12086_v49 = vld [vmem:[%s17915_s2 + $0xe30] ss:$8 sps:$4 sm:$0xff]   ;;  %v15719_v30 = vld [vmem:[%s13023_s27 + $0x100] sm:$0xff]  ;;  %v5088_v20 = vshrl.u32 %v15649_v15, 16  ;;  %v15730_v36 = vld [vmem:[%s13023_s27 + $0x108] sm:$0xff] }
 0x1d8   : > { %v4512_v58 = vadd.f32 %v4511_v54, %v15375_v3  ;;  %v15710_v12 = vadd.f32 %v4582_v29, %v4510_v24  ;;  %v12089_v2 = vld [vmem:[%s17915_s2 + $0xf30] ss:$8 sps:$4 sm:$0xff]   ;;  %6781 = vmatprep.mubr.bf16.mxu0 %v10765_v17  ;;  %6854 = vmatprep.mubr.bf16.mxu1 %v10767_v46  ;;  %v15722_v23 = vld [vmem:[%s13023_s27 + $0x120] sm:$0xff]  ;;  %v4513_v22 = vpop.f32.mrf.mxu0  ;;  %v10764_v29 = vcombine.low %v15628_v63, %v15631_v5  ;;  %v15733_v54 = vld [vmem:[%s13023_s27 + $0x128] sm:$0xff]  ;;  %v5092_v17 = vrot.slane %v5090_v8, 1 }
 0x1d9   : > { %v4586_v3 = vpop.f32.mrf.mxu1  ;;  %v10766_v24 = vcombine.low %v15638_v7, %v15641_v34  ;;  %v5116_v46 = vshrl.u32 %v15653_v62, 16  ;;  %v3387_v11 = vadd.f32 %v15382_v10, %v3314_v18  ;;  %v4514_v9 = vadd.f32 %v4513_v22, %v15390_v41 }
 0x1da   : > { %18043 = vst [vmem:[#allocation20_spill] sm:$0xff] %v15710_v12  ;;  %v15738_v15 = vadd.f32 %v4584_v19, %v4512_v58  ;;  %6882 = vmatpush1.bf16.msra.mxu0 %v12080_v47  ;;  %6955 = vmatpush1.bf16.msra.mxu1 %v12083_v39  ;;  %v12097_v12 = vld [vmem:[%s17915_s2 + $0xf24] ss:$8 sps:$4 sm:$0xff]   ;;  %v5120_v61 = vrot.slane %v5118_v57, 1  ;;  %v4515_v8 = vpop.f32.mrf.mxu0  ;;  %v5102_v10 = vshrl.u32 %v15674_v26, 16  ;;  %v5106_v41 = vrot.slane %v5104_v59, 1 }
 0x1db   : > { %v4588_v55 = vpop.f32.mrf.mxu1  ;;  %6883 = vmatprep.subr.bf16.mxu0 %v12088_v28  ;;  %6956 = vmatprep.subr.bf16.mxu1 %v12091_v16  ;;  %v5130_v62 = vshrl.u32 %v15678_v4, 16  ;;  %v5134_v47 = vrot.slane %v5132_v44, 1  ;;  %v4516_v39 = vadd.f32 %v4515_v8, %v3387_v11  ;;  %v15748_v18 = vadd.f32 %v4586_v3, %v4514_v9  ;;  %v12092_v26 = vld [vmem:[%s17915_s2 + $0xe20] ss:$8 sps:$4 sm:$0xff]   ;;  %v12100_v44 = vld [vmem:[%s17915_s2 + $0xe14] ss:$8 sps:$4 sm:$0xff]  }
 0x1dc   : > { %v10777_v19 = vcombine.high %v15719_v30, %v15722_v23  ;;  %v10779_v58 = vcombine.high %v15730_v36, %v15733_v54  ;;  %v3188_v57 = vadd.f32 %v15286_v43, %v3115_v13  ;;  %v4519_v22 = vpop.f32.mrf.mxu0  ;;  %v3324_v4 = vadd.f32 %v15429_v51, %v3251_v42  ;;  %v12095_v43 = vld [vmem:[%s17915_s2 + $0xf20] ss:$8 sps:$4 sm:$0xff]  }
 0x1dd   : > { %v4592_v28 = vpop.f32.mrf.mxu1  ;;  %6782 = vmatmul.mubr.bf16.gmra.mxu0 %v10764_v29  ;;  %6855 = vmatmul.mubr.bf16.gmra.mxu1 %v10766_v24  ;;  %v4520_v9 = vadd.f32 %v4519_v22, %v15412_v32  ;;  %v15760_v16 = vadd.f32 %v4588_v55, %v4516_v39  ;;  %v12103_v32 = vld [vmem:[%s17915_s2 + $0xf14] ss:$8 sps:$4 sm:$0xff]   ;;  %v5093_v51 = vor.u32 %v5092_v17, %v5088_v20  ;;  %v12101_v17 = vld [vmem:[%s17915_s2 + $0xf10] ss:$8 sps:$4 sm:$0xff]  }
 0x1de   : > { %6884 = vmatpush1.bf16.msra.mxu0 %v12086_v49  ;;  %6957 = vmatpush1.bf16.msra.mxu1 %v12089_v2  ;;  %v4521_v13 = vpop.f32.mrf.mxu0  ;;  %v5121_v55 = vor.u32 %v5120_v61, %v5116_v46  ;;  %v5107_v42 = vor.u32 %v5106_v41, %v5102_v10  ;;  %v5135_v3 = vor.u32 %v5134_v47, %v5130_v62 }
 0x1df   : > { %v4594_v59 = vpop.f32.mrf.mxu1  ;;  %6885 = vmatprep.subr.bf16.mxu0 %v12094_v14  ;;  %6958 = vmatprep.subr.bf16.mxu1 %v12097_v12  ;;  %v4522_v49 = vadd.f32 %v4521_v13, %v15424_v27  ;;  %v15772_v2 = vadd.f32 %v4592_v28, %v4520_v9  ;;  %v10776_v29 = vcombine.low %v15719_v30, %v15722_v23  ;;  %v12098_v27 = vld [vmem:[%s17915_s2 + $0xe10] ss:$8 sps:$4 sm:$0xff]   ;;  %v12104_v28 = vld [vmem:[%s17915_s2 + $0xe00] ss:$8 sps:$4 sm:$0xff]  }
 0x1e0   : > { %6791 = vmatprep.mubr.bf16.mxu0 %v10777_v19  ;;  %6864 = vmatprep.mubr.bf16.mxu1 %v10779_v58  ;;  %v4523_v14 = vpop.f32.mrf.mxu0  ;;  %v10778_v24 = vcombine.low %v15730_v36, %v15733_v54  ;;  %v3397_v11 = vadd.f32 %v15431_v33, %v3324_v4  ;;  %v3261_v46 = vadd.f32 %v15288_v56, %v3188_v57  ;;  %v12106_v33 = vld [vmem:[%s17915_s2 + $0xe04] ss:$8 sps:$4 sm:$0xff]   ;;  %v12112_v4 = vld [vmem:[%s17915_s2 + $0xef4] ss:$8 sps:$4 sm:$0xff]  }
 0x1e1   : > { %v4596_v12 = vpop.f32.mrf.mxu1  ;;  %v4524_v61 = vadd.f32 %v4523_v14, %v15439_v0  ;;  %v15780_v20 = vadd.f32 %v4594_v59, %v4522_v49  ;;  %v12109_v0 = vld [vmem:[%s17915_s2 + $0xf04] ss:$8 sps:$4 sm:$0xff]   ;;  %v10745_v47 = vcombine.low %v5093_v51, %v5121_v55  ;;  %v10747_v39 = vcombine.low %v5107_v42, %v5135_v3  ;;  %v12110_v59 = vld [vmem:[%s17915_s2 + $0xef0] ss:$8 sps:$4 sm:$0xff]  }
 0x1e2   : > { %6886 = vmatpush1.bf16.msra.mxu0 %v12092_v26  ;;  %6959 = vmatpush1.bf16.msra.mxu1 %v12095_v43  ;;  %v4525_v8 = vpop.f32.mrf.mxu0  ;;  %v3334_v56 = vadd.f32 %v15595_v48, %v3261_v46  ;;  %v12107_v26 = vld [vmem:[%s17915_s2 + $0xf00] ss:$8 sps:$4 sm:$0xff]   ;;  %v10456_v55 = vld [vmem:[%s13023_s27 + $0x90] sm:$0x11]  ;;  %v12122_v3 = vld [vmem:[%s17915_s2 + $0xee4] ss:$8 sps:$4 sm:$0xff]  }
 0x1e3   : > { %18044 = vst [vmem:[#allocation21_spill] sm:$0xff] %v15780_v20  ;;  %v4598_v10 = vpop.f32.mrf.mxu1  ;;  %6887 = vmatprep.subr.bf16.mxu0 %v12100_v44  ;;  %6960 = vmatprep.subr.bf16.mxu1 %v12103_v32  ;;  %v4526_v41 = vadd.f32 %v4525_v8, %v3397_v11  ;;  %v15795_v62 = vadd.f32 %v4596_v12, %v4524_v61  ;;  %v12113_v44 = vld [vmem:[%s17915_s2 + $0xff0] ss:$8 sps:$4 sm:$0xff]   ;;  %v12128_v46 = vld [vmem:[%s17915_s2 + $0xed4] ss:$8 sps:$4 sm:$0xff]  }
 0x1e4   : > { %v4529_v19 = vpop.f32.mrf.mxu0  ;;  %v3407_v42 = vadd.f32 %v15597_v21, %v3334_v56  ;;  %v10493_v11 = vcombine.high %v15571_v40, %v10456_v55  ;;  %v12131_v8 = vld [vmem:[%s17915_s2 + $0xfd4] ss:$8 sps:$4 sm:$0xff]   ;;  %v15866_v56 = vcombine.low %v15571_v40, %v10456_v55  ;;  %v12139_v40 = vld [vmem:[%s17915_s2 + $0xfc0] ss:$8 sps:$4 sm:$0xff]  }
 0x1e5   : > { %18045 = vst [vmem:[#allocation18_spill] sm:$0xff] %v15795_v62  ;;  %v4602_v58 = vpop.f32.mrf.mxu1  ;;  %6792 = vmatmul.mubr.bf16.gmra.mxu0 %v10776_v29  ;;  %6865 = vmatmul.mubr.bf16.gmra.mxu1 %v10778_v24  ;;  %v4530_v57 = vadd.f32 %v4529_v19, %v15465_v52  ;;  %v15799_v22 = vadd.f32 %v4598_v10, %v4526_v41  ;;  %v12115_v52 = vld [vmem:[%s17915_s2 + $0xff4] ss:$8 sps:$4 sm:$0xff]   ;;  %v12125_v29 = vld [vmem:[%s17915_s2 + $0xfe4] ss:$8 sps:$4 sm:$0xff]  }
 0x1e6   : > { %6888 = vmatpush1.bf16.msra.mxu0 %v12098_v27  ;;  %6961 = vmatpush1.bf16.msra.mxu1 %v12101_v17  ;;  %v4531_v48 = vpop.f32.mrf.mxu0  ;;  %v12120_v27 = vld [vmem:[%s17915_s2 + $0xee0] ss:$8 sps:$4 sm:$0xff]   ;;  %v12129_v41 = vld [vmem:[%s17915_s2 + $0xfd0] ss:$8 sps:$4 sm:$0xff]  }
 0x1e7   : > { %18046 = vst [vmem:[#allocation19_spill] sm:$0xff] %v15799_v22  ;;  %v4604_v9 = vpop.f32.mrf.mxu1  ;;  %6889 = vmatprep.subr.bf16.mxu0 %v12106_v33  ;;  %6962 = vmatprep.subr.bf16.mxu1 %v12109_v0  ;;  %v4532_v43 = vadd.f32 %v4531_v48, %v15471_v45  ;;  %v15814_v13 = vadd.f32 %v4602_v58, %v4530_v57  ;;  %v12123_v17 = vld [vmem:[%s17915_s2 + $0xfe0] ss:$8 sps:$4 sm:$0xff]   ;;  %v5146_v33 = vshll.u32 %v10493_v11, 16  ;;  %v12126_v0 = vld [vmem:[%s17915_s2 + $0xed0] ss:$8 sps:$4 sm:$0xff]  }
 0x1e8   : > { %6907 = vmatprep.mubr.bf16.mxu0 %v10745_v47  ;;  %6980 = vmatprep.mubr.bf16.mxu1 %v10747_v39  ;;  %v4533_v32 = vpop.f32.mrf.mxu0  ;;  %v12138_v47 = vld [vmem:[%s17915_s2 + $0xec4] ss:$8 sps:$4 sm:$0xff]   ;;  %v10457_v58 = vld [vmem:[%s13023_s27 + $0x98] sm:$0x11]  ;;  %v10460_v48 = vld [vmem:[%s13023_s27 + $0xd0] sm:$0x11] }
 0x1e9   : > { %18047 = vst [vmem:[#allocation22_spill] sm:$0xff] %v15814_v13  ;;  %v4606_v51 = vpop.f32.mrf.mxu1  ;;  %v4534_v45 = vadd.f32 %v4533_v32, %v15482_v37  ;;  %v15825_v49 = vadd.f32 %v4604_v9, %v4532_v43  ;;  %v10458_v37 = vld [vmem:[%s13023_s27 + $0xb0] sm:$0x11]  ;;  %v12141_v39 = vld [vmem:[%s17915_s2 + $0xfc4] ss:$8 sps:$4 sm:$0xff]   ;;  %v5139_v32 = vshll.u32 %v15866_v56, 16  ;;  %v15889_v55 = vcombine.high %v15581_v25, %v10457_v58 }
 0x1ea   : > { %6890 = vmatpush1.bf16.msra.mxu0 %v12104_v28  ;;  %6963 = vmatpush1.bf16.msra.mxu1 %v12107_v26  ;;  %v4535_v14 = vpop.f32.mrf.mxu0  ;;  %v10497_v10 = vcombine.high %v15578_v38, %v10458_v37  ;;  %v15869_v57 = vcombine.low %v15578_v38, %v10458_v37  ;;  %v10459_v28 = vld [vmem:[%s13023_s27 + $0xb8] sm:$0x11]  ;;  %v5144_v26 = vshrl.u32 %v10493_v11, 16  ;;  %v12136_v9 = vld [vmem:[%s17915_s2 + $0xec0] ss:$8 sps:$4 sm:$0xff]  }
 0x1eb   : > { %18048 = vst [vmem:[#allocation23_spill] sm:$0xff] %v15825_v49  ;;  %v4608_v12 = vpop.f32.mrf.mxu1  ;;  %6891 = vmatprep.subr.bf16.mxu0 %v12112_v4  ;;  %6964 = vmatprep.subr.bf16.mxu1 %v12115_v52  ;;  %v4536_v24 = vadd.f32 %v4535_v14, %v3407_v42  ;;  %v15833_v21 = vadd.f32 %v4606_v51, %v4534_v45  ;;  %v5148_v4 = vrot.slane %v5146_v33, 1  ;;  %v10462_v43 = vld [vmem:[%s13023_s27 + $0xf0] sm:$0x11]  ;;  %v15899_v14 = vld [vmem:[%s13023_s27 + $0xf8] sm:$0x11] }
 0x1ec   : > { %v5174_v19 = vshll.u32 %v10497_v10, 16  ;;  %v5172_v52 = vshrl.u32 %v10497_v10, 16  ;;  %v12144_v38 = vld [vmem:[%s17915_s2 + $0xeb4] ss:$8 sps:$4 sm:$0xff]   ;;  %v5167_v51 = vshll.u32 %v15869_v57, 16  ;;  %v15892_v42 = vcombine.low %v15581_v25, %v10457_v58 }
 0x1ed   : > { %18049 = vst [vmem:[#allocation24_spill] sm:$0xff] %v15833_v21  ;;  %v15837_v61 = vadd.f32 %v4608_v12, %v4536_v24  ;;  %v15895_v45 = vcombine.low %v15588_v50, %v10459_v28  ;;  %v12142_v12 = vld [vmem:[%s17915_s2 + $0xeb0] ss:$8 sps:$4 sm:$0xff]   ;;  %v15908_v25 = vcombine.high %v15588_v50, %v10459_v28  ;;  %v15911_v24 = vcombine.low %v15628_v63, %v10460_v48  ;;  %v12154_v37 = vld [vmem:[%s17915_s2 + $0xea4] ss:$8 sps:$4 sm:$0xff]  }
 0x1ee   : > { %6892 = vmatpush2.bf16.msra.mxu0 %v12110_v59  ;;  %6965 = vmatpush2.bf16.msra.mxu1 %v12113_v44  ;;  %v12147_v59 = vld [vmem:[%s17915_s2 + $0xfb4] ss:$8 sps:$4 sm:$0xff]   ;;  %v5176_v44 = vrot.slane %v5174_v19, 1  ;;  %v12157_v11 = vld [vmem:[%s17915_s2 + $0xfa4] ss:$8 sps:$4 sm:$0xff]   ;;  %v5165_v10 = vshrl.u32 %v15869_v57, 16  ;;  %v15932_v33 = vcombine.high %v15628_v63, %v10460_v48  ;;  %v16007_v20 = vcombine.high %v15641_v34, %v15899_v14 }
 0x1ef   : > { %18050 = vst [vmem:[#allocation9_spill] sm:$0xff] %v15837_v61  ;;  %6893 = vmatprep.subr.bf16.mxu0 %v12122_v3  ;;  %6966 = vmatprep.subr.bf16.mxu1 %v12125_v29  ;;  %v10461_v3 = vld [vmem:[%s13023_s27 + $0xd8] sm:$0x11]  ;;  %v12152_v50 = vld [vmem:[%s17915_s2 + $0xea0] ss:$8 sps:$4 sm:$0xff]   ;;  %v5169_v19 = vrot.slane %v5167_v51, 1 }
 0x1f0   : > { %v12145_v29 = vld [vmem:[%s17915_s2 + $0xfb0] ss:$8 sps:$4 sm:$0xff]   ;;  %v5160_v58 = vshll.u32 %v15889_v55, 16  ;;  %v12155_v63 = vld [vmem:[%s17915_s2 + $0xfa0] ss:$8 sps:$4 sm:$0xff]   ;;  %v5188_v57 = vshll.u32 %v15908_v25, 16  ;;  %v15951_v28 = vcombine.low %v15638_v7, %v10461_v3  ;;  %v15979_v51 = vcombine.high %v15638_v7, %v10461_v3 }
 0x1f1   : > { %v12163_v48 = vld [vmem:[%s17915_s2 + $0xf94] ss:$8 sps:$4 sm:$0xff]   ;;  %v12169_v7 = vld [vmem:[%s17915_s2 + $0xf84] ss:$8 sps:$4 sm:$0xff]   ;;  %v5151_v61 = vshrl.u32 %v15892_v42, 16  ;;  %v5200_v13 = vshrl.u32 %v15932_v33, 16 }
 0x1f2   : > { %6894 = vmatpush2.bf16.msra.mxu0 %v12120_v27  ;;  %6967 = vmatpush2.bf16.msra.mxu1 %v12123_v17  ;;  %v15919_v27 = vor.u32 %v5148_v4, %v5144_v26  ;;  %v15921_v17 = vor.u32 %v5176_v44, %v5172_v52  ;;  %v15955_v26 = vcombine.low %v15641_v34, %v15899_v14  ;;  %v12160_v4 = vld [vmem:[%s17915_s2 + $0xe94] ss:$8 sps:$4 sm:$0xff]   ;;  %v5202_v44 = vshll.u32 %v15932_v33, 16  ;;  %v12167_v34 = vld [vmem:[%s17915_s2 + $0xf80] ss:$8 sps:$4 sm:$0xff]  }
 0x1f3   : > { %6895 = vmatprep.subr.bf16.mxu0 %v12128_v46  ;;  %6968 = vmatprep.subr.bf16.mxu1 %v12131_v8  ;;  %v15924_v46 = vld [vmem:[%s13023_s27 + $0x110] sm:$0x11]  ;;  %v5137_v8 = vshrl.u32 %v15866_v56, 16  ;;  %v5158_v56 = vshrl.u32 %v15889_v55, 16  ;;  %v15967_v52 = vld [vmem:[%s13023_s27 + $0x118] sm:$0x11] }
 0x1f4   : > { %v15983_v55 = vcombine.low %v15719_v30, %v15924_v46  ;;  %v5190_v3 = vrot.slane %v5188_v57, 1  ;;  %v5204_v62 = vrot.slane %v5202_v44, 1  ;;  %v12174_v44 = vld [vmem:[%s17915_s2 + $0x1070] ss:$8 sps:$4 sm:$0xff]  }
 0x1f6   : > { %6896 = vmatpush2.bf16.msra.mxu0 %v12126_v0  ;;  %6969 = vmatpush2.bf16.msra.mxu1 %v12129_v41  ;;  %v15935_v0 = vcombine.high %v15631_v5, %v10462_v43  ;;  %v15938_v41 = vcombine.low %v15631_v5, %v10462_v43  ;;  %v5153_v5 = vshll.u32 %v15892_v42, 16  ;;  %v12158_v43 = vld [vmem:[%s17915_s2 + $0xe90] ss:$8 sps:$4 sm:$0xff]   ;;  %v16011_v42 = vcombine.low %v15730_v36, %v15967_v52 }
 0x1f7   : > { %6897 = vmatprep.subr.bf16.mxu0 %v12138_v47  ;;  %6970 = vmatprep.subr.bf16.mxu1 %v12141_v39  ;;  %v15941_v47 = vld [vmem:[%s13023_s27 + $0x130] sm:$0x11]  ;;  %v5141_v39 = vrot.slane %v5139_v32, 1 }
 0x1f8   : > { %v5230_v32 = vshll.u32 %v15935_v0, 16  ;;  %v5155_v21 = vrot.slane %v5153_v5, 1  ;;  %v5228_v22 = vshrl.u32 %v15935_v0, 16  ;;  %v16026_v0 = vor.u32 %v5169_v19, %v5165_v10 }
 0x1f9   : > { %v16024_v14 = vor.u32 %v5141_v39, %v5137_v8  ;;  %v5216_v8 = vshll.u32 %v15979_v51, 16  ;;  %v16041_v10 = vor.u32 %v5204_v62, %v5200_v13  ;;  %v16059_v62 = vcombine.high %v15719_v30, %v15924_v46  ;;  %v12185_v30 = vld [vmem:[%s17915_s2 + $0x1164] ss:$8 sps:$4 sm:$0xff]  }
 0x1fa   : > { %6898 = vmatpush2.bf16.msra.mxu0 %v12136_v9  ;;  %6971 = vmatpush2.bf16.msra.mxu1 %v12139_v40  ;;  %v5181_v40 = vshll.u32 %v15895_v45, 16  ;;  %v15995_v9 = vcombine.low %v15722_v23, %v15941_v47 }
 0x1fb   : > { %6899 = vmatprep.subr.bf16.mxu0 %v12144_v38  ;;  %6972 = vmatprep.subr.bf16.mxu1 %v12147_v59  ;;  %v12161_v38 = vld [vmem:[%s17915_s2 + $0xf90] ss:$8 sps:$4 sm:$0xff]   ;;  %v5186_v59 = vshrl.u32 %v15908_v25, 16  ;;  %v5195_v25 = vshll.u32 %v15911_v24, 16  ;;  %v10756_v13 = vcombine.low %v16024_v14, %v16026_v0  ;;  %v5265_v14 = vshll.u32 %v16011_v42, 16 }
 0x1fc   : > { %v5183_v49 = vrot.slane %v5181_v40, 1 }
 0x1fd   : > { %v5197_v57 = vrot.slane %v5195_v25, 1  ;;  %v5191_v40 = vor.u32 %v5190_v3, %v5186_v59  ;;  %v5237_v59 = vshll.u32 %v15955_v26, 16  ;;  %v5218_v25 = vrot.slane %v5216_v8, 1  ;;  %v12188_v8 = vld [vmem:[%s17915_s2 + $0x1050] ss:$8 sps:$4 sm:$0xff]  }
 0x1fe   : > { %6900 = vmatpush2.bf16.msra.mxu0 %v12142_v12  ;;  %6973 = vmatpush2.bf16.msra.mxu1 %v12145_v29  ;;  %v15986_v12 = vld [vmem:[%s13023_s27 + $0x138] sm:$0x11]  ;;  %v12166_v29 = vld [vmem:[%s17915_s2 + $0xe84] ss:$8 sps:$4 sm:$0xff]  }
 0x1ff   : > { %6901 = vmatprep.subr.bf16.mxu0 %v12154_v37  ;;  %6974 = vmatprep.subr.bf16.mxu1 %v12157_v11  ;;  %v5162_v37 = vrot.slane %v5160_v58, 1  ;;  %v5223_v11 = vshll.u32 %v15938_v41, 16  ;;  %v5179_v58 = vshrl.u32 %v15895_v45, 16  ;;  %v5221_v45 = vshrl.u32 %v15938_v41, 16  ;;  %v12176_v41 = vld [vmem:[%s17915_s2 + $0x1074] ss:$8 sps:$4 sm:$0xff]  }
 0x200   : > { %v16016_v33 = vcombine.low %v15733_v54, %v15986_v12 }
 0x201   : > { %v5225_v5 = vrot.slane %v5223_v11, 1  ;;  %v16039_v39 = vor.u32 %v5183_v49, %v5179_v58  ;;  %v5209_v49 = vshll.u32 %v15951_v28, 16  ;;  %v16082_v11 = vcombine.high %v15733_v54, %v15986_v12 }
 0x202   : > { %6902 = vmatpush2.bf16.msra.mxu0 %v12152_v50  ;;  %6975 = vmatpush2.bf16.msra.mxu1 %v12155_v63  ;;  %v5232_v50 = vrot.slane %v5230_v32, 1  ;;  %v5193_v63 = vshrl.u32 %v15911_v24, 16  ;;  %v12164_v24 = vld [vmem:[%s17915_s2 + $0xe80] ss:$8 sps:$4 sm:$0xff]   ;;  %v16069_v32 = vcombine.high %v15722_v23, %v15941_v47  ;;  %v18051_v12 = vcombine.low %v15266_v60, %v15274_v53 }
 0x203   : > { %6903 = vmatprep.subr.bf16.mxu0 %v12160_v4  ;;  %6976 = vmatprep.subr.bf16.mxu1 %v12163_v48  ;;  %v12179_v4 = vld [vmem:[%s17915_s2 + $0x1174] ss:$8 sps:$4 sm:$0xff]   ;;  %v16034_v48 = vor.u32 %v5162_v37, %v5158_v56  ;;  %v12177_v56 = vld [vmem:[%s17915_s2 + $0x1170] ss:$8 sps:$4 sm:$0xff]   ;;  %v5214_v37 = vshrl.u32 %v15979_v51, 16  ;;  %v5242_v51 = vshrl.u32 %v16007_v20, 16  ;;  %v18052_v58 = vcombine.low %v15276_v31, %v15278_v1 }
 0x204   : > { %v16043_v19 = vor.u32 %v5232_v50, %v5228_v22  ;;  %v12182_v22 = vld [vmem:[%s17915_s2 + $0x1064] ss:$8 sps:$4 sm:$0xff]   ;;  %v12180_v23 = vld [vmem:[%s17915_s2 + $0x1060] ss:$8 sps:$4 sm:$0xff]   ;;  %v12190_v50 = vld [vmem:[%s17915_s2 + $0x1054] ss:$8 sps:$4 sm:$0xff]  }
 0x205   : > { %v10759_v46 = vcombine.low %v16034_v48, %v5191_v40  ;;  %v5235_v60 = vshrl.u32 %v15955_v26, 16  ;;  %v5239_v53 = vrot.slane %v5237_v59, 1  ;;  %v5286_v31 = vshll.u32 %v16069_v32, 16 }
 0x206   : > { %6904 = vmatpush2.bf16.msra.mxu0 %v12158_v43  ;;  %6977 = vmatpush2.bf16.msra.mxu1 %v12161_v38  ;;  %v16036_v43 = vor.u32 %v5155_v21, %v5151_v61  ;;  %v5244_v38 = vshll.u32 %v16007_v20, 16  ;;  %v16052_v21 = vor.u32 %v5197_v57, %v5193_v63  ;;  %v16054_v61 = vor.u32 %v5225_v5, %v5221_v45 }
 0x207   : > { %6905 = vmatprep.subr.bf16.mxu0 %v12166_v29  ;;  %6978 = vmatprep.subr.bf16.mxu1 %v12169_v7  ;;  %v16073_v29 = vcombine.high %v15730_v36, %v15967_v52  ;;  %v12183_v36 = vld [vmem:[%s17915_s2 + $0x1160] ss:$8 sps:$4 sm:$0xff]   ;;  %v10769_v52 = vcombine.low %v16041_v10, %v16043_v19  ;;  %v5207_v20 = vshrl.u32 %v15951_v28, 16  ;;  %v5211_v57 = vrot.slane %v5209_v49, 1  ;;  %v12193_v28 = vld [vmem:[%s17915_s2 + $0x1154] ss:$8 sps:$4 sm:$0xff]  }
 0x208   : > { %v10758_v47 = vcombine.low %v16036_v43, %v16039_v39  ;;  %v5246_v7 = vrot.slane %v5244_v38, 1  ;;  %v10768_v63 = vcombine.low %v16052_v21, %v16054_v61  ;;  %v5258_v45 = vshll.u32 %v16059_v62, 16  ;;  %v12191_v38 = vld [vmem:[%s17915_s2 + $0x1150] ss:$8 sps:$4 sm:$0xff]   ;;  %v12222_v21 = vld [vmem:[%s17915_s2 + $0x1014] ss:$8 sps:$4 sm:$0xff]  }
 0x209   : > { %v18053_v40 = vcombine.low %v15919_v27, %v15921_v17  ;;  %v12201_v27 = vld [vmem:[%s17915_s2 + $0x1144] ss:$8 sps:$4 sm:$0xff]   ;;  %v16138_v17 = vor.u32 %v5211_v57, %v5207_v20  ;;  %v5249_v59 = vshrl.u32 %v15983_v55, 16  ;;  %v18055_v57 = vld [vmem:[#allocation17_spill] sm:$0xff]  ;;  %v5293_v0 = vshll.u32 %v16016_v33, 16  ;;  %v18056_v43 = vld [vmem:[#allocation20_spill] sm:$0xff] }
 0x20a   : > { %6906 = vmatpush2.bf16.msra.mxu0 %v12164_v24  ;;  %6979 = vmatpush2.bf16.msra.mxu1 %v12167_v34  ;;  %v16114_v34 = vor.u32 %v5218_v25, %v5214_v37  ;;  %v16145_v25 = vor.u32 %v5239_v53, %v5235_v60  ;;  %v12206_v60 = vld [vmem:[%s17915_s2 + $0x1034] ss:$8 sps:$4 sm:$0xff]   ;;  %v12207_v10 = vld [vmem:[%s17915_s2 + $0x1130] ss:$8 sps:$4 sm:$0xff]  }
 0x20b   : > { %7021 = vmatprep.subr.bf16.mxu0 %v12176_v41  ;;  %7094 = vmatprep.subr.bf16.mxu1 %v12179_v4  ;;  %v5256_v41 = vshrl.u32 %v16059_v62, 16  ;;  %v5300_v4 = vshll.u32 %v16082_v11, 16  ;;  %v12209_v53 = vld [vmem:[%s17915_s2 + $0x1134] ss:$8 sps:$4 sm:$0xff]  }
 0x20c   : > { %v4645_v3 = vpop.f32.mrf.mxu0 }
 0x20d   : > { %v4718_v54 = vpop.f32.mrf.mxu1  ;;  %6908 = vmatmul.mubr.bf16.vlgmr.msra.gmra.mxu0 %v18051_v12  ;;  %6981 = vmatmul.mubr.bf16.vlgmr.msra.gmra.mxu1 %v18052_v58  ;;  %v4646_v5 = vadd.f32 %v4645_v3, %v15634_v35  ;;  %v5272_v35 = vshll.u32 %v16073_v29, 16  ;;  %v5298_v58 = vshrl.u32 %v16082_v11, 16  ;;  %v5302_v20 = vrot.slane %v5300_v4, 1 }
 0x20e   : > { %7022 = vmatpush1.bf16.msra.mxu0 %v12174_v44  ;;  %7095 = vmatpush1.bf16.msra.mxu1 %v12177_v56  ;;  %v4647_v1 = vpop.f32.mrf.mxu0  ;;  %v5247_v44 = vor.u32 %v5246_v7, %v5242_v51  ;;  %v5284_v56 = vshrl.u32 %v16069_v32, 16  ;;  %v18054_v32 = vld [vmem:[#allocation16_spill] sm:$0xff]  ;;  %v5288_v51 = vrot.slane %v5286_v31, 1  ;;  %v5277_v4 = vshrl.u32 %v15995_v9, 16 }
 0x20f   : > { %v4720_v24 = vpop.f32.mrf.mxu1  ;;  %7023 = vmatprep.subr.bf16.mxu0 %v12182_v22  ;;  %7096 = vmatprep.subr.bf16.mxu1 %v12185_v30  ;;  %v16119_v26 = vadd.f32 %v4718_v54, %v4646_v5  ;;  %v4648_v48 = vadd.f32 %v4647_v1, %v15656_v6  ;;  %v12198_v6 = vld [vmem:[%s17915_s2 + $0x1044] ss:$8 sps:$4 sm:$0xff]   ;;  %v5260_v22 = vrot.slane %v5258_v45, 1  ;;  %v5251_v30 = vshll.u32 %v15983_v55, 16 }
 0x210   : > { %6917 = vmatprep.mubr.bf16.mxu0 %v18053_v40  ;;  %6990 = vmatprep.mubr.bf16.mxu1 %v10759_v46  ;;  %v4649_v49 = vpop.f32.mrf.mxu0  ;;  %v5270_v54 = vshrl.u32 %v16073_v29, 16  ;;  %v5274_v12 = vrot.slane %v5272_v35, 1  ;;  %v5279_v29 = vshll.u32 %v15995_v9, 16  ;;  %v10770_v35 = vcombine.low %v16138_v17, %v16145_v25  ;;  %v16230_v25 = vld [vmem:[%s13023_s27 + $0x50] sm:$0x11] }
 0x211   : > { %v4722_v62 = vpop.f32.mrf.mxu1  ;;  %v16142_v46 = vadd.f32 %v4720_v24, %v4648_v48  ;;  %v4650_v37 = vadd.f32 %v4649_v49, %v18054_v32  ;;  %v16172_v31 = vor.u32 %v5260_v22, %v5256_v41  ;;  %v5253_v1 = vrot.slane %v5251_v30, 1  ;;  %v16182_v24 = vld [vmem:[%s13023_s27 + $0x40] sm:$0xee] }
 0x212   : > { %7024 = vmatpush1.bf16.msra.mxu0 %v12180_v23  ;;  %7097 = vmatpush1.bf16.msra.mxu1 %v12183_v36  ;;  %v4651_v7 = vpop.f32.mrf.mxu0  ;;  %v12196_v23 = vld [vmem:[%s17915_s2 + $0x1040] ss:$8 sps:$4 sm:$0xff]   ;;  %v16190_v48 = vor.u32 %v5274_v12, %v5270_v54  ;;  %v16192_v40 = vor.u32 %v5302_v20, %v5298_v58  ;;  %v5281_v49 = vrot.slane %v5279_v29, 1  ;;  %v5263_v9 = vshrl.u32 %v16011_v42, 16  ;;  %v12204_v42 = vld [vmem:[%s17915_s2 + $0x1030] ss:$8 sps:$4 sm:$0xff]  }
 0x213   : > { %v4724_v3 = vpop.f32.mrf.mxu1  ;;  %7025 = vmatprep.subr.bf16.mxu0 %v12190_v50  ;;  %7098 = vmatprep.subr.bf16.mxu1 %v12193_v28  ;;  %v16149_v55 = vadd.f32 %v4722_v62, %v4650_v37  ;;  %v4652_v45 = vadd.f32 %v4651_v7, %v18055_v57  ;;  %v12199_v36 = vld [vmem:[%s17915_s2 + $0x1140] ss:$8 sps:$4 sm:$0xff]   ;;  %v10771_v50 = vcombine.low %v16114_v34, %v5247_v44  ;;  %v5267_v17 = vrot.slane %v5265_v14, 1  ;;  %v16235_v7 = vld [vmem:[%s13023_s27 + $0x70] sm:$0x11]  ;;  %v18057_v14 = vld [vmem:[#allocation21_spill] sm:$0xff] }
 0x214   : > { %v16185_v28 = vld [vmem:[%s13023_s27 + $0x60] sm:$0xee]  ;;  %v5291_v22 = vshrl.u32 %v16016_v33, 16  ;;  %v5295_v30 = vrot.slane %v5293_v0, 1  ;;  %v10783_v37 = vcombine.low %v16190_v48, %v16192_v40  ;;  %v16246_v20 = vld [vmem:[%s13023_s27 + $0x58] sm:$0x11] }
 0x215   : > { %v4655_v5 = vpop.f32.mrf.mxu0  ;;  %6918 = vmatmul.mubr.bf16.gmra.mxu0 %v10756_v13  ;;  %v4728_v11 = vpop.f32.mrf.mxu1  ;;  %6991 = vmatmul.mubr.bf16.gmra.mxu1 %v10758_v47  ;;  %v16176_v13 = vadd.f32 %v4724_v3, %v4652_v45  ;;  %v16179_v47 = vor.u32 %v5288_v51, %v5284_v56  ;;  %v10517_v51 = vcombine.high %v16182_v24, %v16230_v25  ;;  %v12212_v58 = vld [vmem:[%s17915_s2 + $0x1020] ss:$8 sps:$4 sm:$0xff]   ;;  %v16251_v45 = vld [vmem:[%s13023_s27 + $0x78] sm:$0x11] }
 0x216   : > { %v4656_v39 = vadd.f32 %v4655_v5, %v18056_v43  ;;  %7026 = vmatpush1.bf16.msra.mxu0 %v12188_v8  ;;  %7099 = vmatpush1.bf16.msra.mxu1 %v12191_v38  ;;  %v16195_v8 = vld [vmem:[%s13023_s27 + $0x48] sm:$0xee]  ;;  %v10521_v3 = vcombine.high %v16185_v28, %v16235_v7  ;;  %v5268_v29 = vor.u32 %v5267_v17, %v5263_v9  ;;  %v18058_v48 = vld [vmem:[#allocation18_spill] sm:$0xff]  ;;  %v12223_v9 = vld [vmem:[%s17915_s2 + $0x1110] ss:$8 sps:$4 sm:$0xff]  }
 0x217   : > { %v4657_v34 = vpop.f32.mrf.mxu0  ;;  %v4730_v41 = vpop.f32.mrf.mxu1  ;;  %7027 = vmatprep.subr.bf16.mxu0 %v12198_v6  ;;  %7100 = vmatprep.subr.bf16.mxu1 %v12201_v27  ;;  %v16198_v38 = vld [vmem:[%s13023_s27 + $0x68] sm:$0xee]  ;;  %v16207_v27 = vor.u32 %v5253_v1, %v5249_v59  ;;  %v10781_v33 = vcombine.low %v16172_v31, %v16179_v47  ;;  %v10519_v57 = vcombine.high %v16195_v8, %v16246_v20  ;;  %v5385_v31 = vrot.slane %v10517_v51, 1 }
 0x218   : > { %v4658_v44 = vadd.f32 %v4657_v34, %v15738_v15  ;;  %v16201_v56 = vadd.f32 %v4728_v11, %v4656_v39  ;;  %6927 = vmatprep.mubr.bf16.mxu0 %v10769_v52  ;;  %7000 = vmatprep.mubr.bf16.mxu1 %v10771_v50  ;;  %v12214_v52 = vld [vmem:[%s17915_s2 + $0x1024] ss:$8 sps:$4 sm:$0xff]   ;;  %v5282_v50 = vor.u32 %v5281_v49, %v5277_v4  ;;  %v5389_v1 = vrot.slane %v10521_v3, 1  ;;  %v12220_v49 = vld [vmem:[%s17915_s2 + $0x1010] ss:$8 sps:$4 sm:$0xff]  }
 0x219   : > { %v4659_v62 = vpop.f32.mrf.mxu0  ;;  %v4732_v6 = vpop.f32.mrf.mxu1  ;;  %v12217_v59 = vld [vmem:[%s17915_s2 + $0x1124] ss:$8 sps:$4 sm:$0xff]   ;;  %v5296_v5 = vor.u32 %v5295_v30, %v5291_v22  ;;  %v5387_v39 = vrot.slane %v10519_v57, 1  ;;  %v12231_v51 = vld [vmem:[%s17915_s2 + $0x1100] ss:$8 sps:$4 sm:$0xff]  }
 0x21a   : > { %v4660_v15 = vadd.f32 %v4659_v62, %v15748_v18  ;;  %v16211_v32 = vadd.f32 %v4730_v41, %v4658_v44  ;;  %7028 = vmatpush1.bf16.msra.mxu0 %v12196_v23  ;;  %7101 = vmatpush1.bf16.msra.mxu1 %v12199_v36  ;;  %v10523_v23 = vcombine.high %v16198_v38, %v16251_v45  ;;  %v12233_v17 = vld [vmem:[%s17915_s2 + $0x1104] ss:$8 sps:$4 sm:$0xff]   ;;  %v12239_v57 = vld [vmem:[%s17915_s2 + $0x11f4] ss:$8 sps:$4 sm:$0xff]  }
 0x21b   : > { %v4661_v19 = vpop.f32.mrf.mxu0  ;;  %v4734_v18 = vpop.f32.mrf.mxu1  ;;  %7029 = vmatprep.subr.bf16.mxu0 %v12206_v60  ;;  %7102 = vmatprep.subr.bf16.mxu1 %v12209_v53  ;;  %v12215_v53 = vld [vmem:[%s17915_s2 + $0x1120] ss:$8 sps:$4 sm:$0xff]   ;;  %v10782_v4 = vcombine.low %v5268_v29, %v5296_v5  ;;  %v18062_v5 = vld [vmem:[#allocation24_spill] sm:$0xff] }
 0x21c   : > { %v4662_v54 = vadd.f32 %v4661_v19, %v15760_v16  ;;  %v16240_v12 = vadd.f32 %v4732_v6, %v4660_v15  ;;  %v5391_v47 = vrot.slane %v10523_v23, 1  ;;  %v18059_v22 = vld [vmem:[#allocation19_spill] sm:$0xff] }
 0x21d   : > { %v4665_v36 = vpop.f32.mrf.mxu0  ;;  %6928 = vmatmul.mubr.bf16.gmra.mxu0 %v10768_v63  ;;  %v4738_v16 = vpop.f32.mrf.mxu1  ;;  %7001 = vmatmul.mubr.bf16.gmra.mxu1 %v10770_v35  ;;  %v10780_v35 = vcombine.low %v16207_v27, %v5282_v50  ;;  %v12230_v27 = vld [vmem:[%s17915_s2 + $0x1004] ss:$8 sps:$4 sm:$0xff]  }
 0x21e   : > { %v4666_v11 = vadd.f32 %v4665_v36, %v15772_v2  ;;  %v16259_v60 = vadd.f32 %v4734_v18, %v4662_v54  ;;  %7030 = vmatpush1.bf16.msra.mxu0 %v12204_v42  ;;  %7103 = vmatpush1.bf16.msra.mxu1 %v12207_v10  ;;  %v12225_v2 = vld [vmem:[%s17915_s2 + $0x1114] ss:$8 sps:$4 sm:$0xff]   ;;  %v10749_v42 = vcombine.low %v5385_v31, %v5389_v1  ;;  %v18060_v18 = vld [vmem:[#allocation22_spill] sm:$0xff]  ;;  %v18061_v23 = vld [vmem:[#allocation23_spill] sm:$0xff] }
 0x21f   : > { %v4667_v61 = vpop.f32.mrf.mxu0  ;;  %v4740_v63 = vpop.f32.mrf.mxu1  ;;  %7031 = vmatprep.subr.bf16.mxu0 %v12214_v52  ;;  %7104 = vmatprep.subr.bf16.mxu1 %v12217_v59  ;;  %v10751_v10 = vcombine.low %v5387_v39, %v5391_v47  ;;  %v12242_v31 = vld [vmem:[%s17915_s2 + $0x10e4] ss:$8 sps:$4 sm:$0xff]  }
 0x220   : > { %v4668_v0 = vadd.f32 %v4667_v61, %v18057_v14  ;;  %v16271_v43 = vadd.f32 %v4738_v16, %v4666_v11  ;;  %6937 = vmatprep.mubr.bf16.mxu0 %v10781_v33  ;;  %7010 = vmatprep.mubr.bf16.mxu1 %v10783_v37  ;;  %v12228_v37 = vld [vmem:[%s17915_s2 + $0x1000] ss:$8 sps:$4 sm:$0xff]   ;;  %v12237_v61 = vld [vmem:[%s17915_s2 + $0x11f0] ss:$8 sps:$4 sm:$0xff]   ;;  %v12245_v1 = vld [vmem:[%s17915_s2 + $0x11e4] ss:$8 sps:$4 sm:$0xff]  }
 0x221   : > { %v4669_v34 = vpop.f32.mrf.mxu0  ;;  %v4742_v41 = vpop.f32.mrf.mxu1  ;;  %v18063_v14 = vld [vmem:[#allocation9_spill] sm:$0xff] }
 0x222   : > { %v4670_v40 = vadd.f32 %v4669_v34, %v18058_v48  ;;  %v16275_v44 = vadd.f32 %v4740_v63, %v4668_v0  ;;  %7032 = vmatpush1.bf16.msra.mxu0 %v12212_v58  ;;  %7105 = vmatpush1.bf16.msra.mxu1 %v12215_v53  ;;  %v12236_v58 = vld [vmem:[%s17915_s2 + $0x10f4] ss:$8 sps:$4 sm:$0xff]   ;;  %v12240_v34 = vld [vmem:[%s17915_s2 + $0x10e0] ss:$8 sps:$4 sm:$0xff]   ;;  %v12246_v48 = vld [vmem:[%s17915_s2 + $0x10d0] ss:$8 sps:$4 sm:$0xff]  }
 0x223   : > { %v4671_v62 = vpop.f32.mrf.mxu0  ;;  %v4744_v6 = vpop.f32.mrf.mxu1  ;;  %7033 = vmatprep.subr.bf16.mxu0 %v12222_v21  ;;  %7106 = vmatprep.subr.bf16.mxu1 %v12225_v2  ;;  %v12234_v21 = vld [vmem:[%s17915_s2 + $0x10f0] ss:$8 sps:$4 sm:$0xff]  }
 0x224   : > { %v4672_v30 = vadd.f32 %v4671_v62, %v18059_v22  ;;  %v16290_v15 = vadd.f32 %v4742_v41, %v4670_v40  ;;  %v12243_v41 = vld [vmem:[%s17915_s2 + $0x11e0] ss:$8 sps:$4 sm:$0xff]   ;;  %v12249_v40 = vld [vmem:[%s17915_s2 + $0x11d0] ss:$8 sps:$4 sm:$0xff]  }
 0x225   : > { %v4675_v33 = vpop.f32.mrf.mxu0  ;;  %6938 = vmatmul.mubr.bf16.gmra.mxu0 %v10780_v35  ;;  %v4748_v19 = vpop.f32.mrf.mxu1  ;;  %7011 = vmatmul.mubr.bf16.gmra.mxu1 %v10782_v4  ;;  %v12248_v35 = vld [vmem:[%s17915_s2 + $0x10d4] ss:$8 sps:$4 sm:$0xff]   ;;  %v12252_v62 = vld [vmem:[%s17915_s2 + $0x10c0] ss:$8 sps:$4 sm:$0xff]   ;;  %v12258_v22 = vld [vmem:[%s17915_s2 + $0x10b0] ss:$8 sps:$4 sm:$0xff]  }
 0x226   : > { %v4676_v52 = vadd.f32 %v4675_v33, %v18060_v18  ;;  %v16293_v59 = vadd.f32 %v4744_v6, %v4672_v30  ;;  %7034 = vmatpush1.bf16.msra.mxu0 %v12220_v49  ;;  %7107 = vmatpush1.bf16.msra.mxu1 %v12223_v9  ;;  %v12251_v4 = vld [vmem:[%s17915_s2 + $0x11d4] ss:$8 sps:$4 sm:$0xff]   ;;  %v12254_v49 = vld [vmem:[%s17915_s2 + $0x10c4] ss:$8 sps:$4 sm:$0xff]   ;;  %v12255_v6 = vld [vmem:[%s17915_s2 + $0x11c0] ss:$8 sps:$4 sm:$0xff]  }
 0x227   : > { %v4677_v3 = vpop.f32.mrf.mxu0  ;;  %v4750_v54 = vpop.f32.mrf.mxu1  ;;  %7035 = vmatprep.subr.bf16.mxu0 %v12230_v27  ;;  %7108 = vmatprep.subr.bf16.mxu1 %v12233_v17  ;;  %v12257_v9 = vld [vmem:[%s17915_s2 + $0x11c4] ss:$8 sps:$4 sm:$0xff]   ;;  %v12260_v27 = vld [vmem:[%s17915_s2 + $0x10b4] ss:$8 sps:$4 sm:$0xff]   ;;  %v12261_v30 = vld [vmem:[%s17915_s2 + $0x11b0] ss:$8 sps:$4 sm:$0xff]  }
 0x228   : > { %v4678_v36 = vadd.f32 %v4677_v3, %v18061_v23  ;;  %v16308_v16 = vadd.f32 %v4748_v19, %v4676_v52  ;;  %7053 = vmatprep.mubr.bf16.mxu0 %v10749_v42  ;;  %7126 = vmatprep.mubr.bf16.mxu1 %v10751_v10  ;;  %v12263_v17 = vld [vmem:[%s17915_s2 + $0x11b4] ss:$8 sps:$4 sm:$0xff]   ;;  %v12266_v42 = vld [vmem:[%s17915_s2 + $0x10a4] ss:$8 sps:$4 sm:$0xff]   ;;  %v12264_v33 = vld [vmem:[%s17915_s2 + $0x10a0] ss:$8 sps:$4 sm:$0xff]   ;;  %v10520_v3 = vcombine.low %v16185_v28, %v16235_v7 }
 0x229   : > { %v4679_v50 = vpop.f32.mrf.mxu0  ;;  %v4752_v29 = vpop.f32.mrf.mxu1  ;;  %v12269_v10 = vld [vmem:[%s17915_s2 + $0x11a4] ss:$8 sps:$4 sm:$0xff]   ;;  %v12267_v19 = vld [vmem:[%s17915_s2 + $0x11a0] ss:$8 sps:$4 sm:$0xff]   ;;  %v12272_v18 = vld [vmem:[%s17915_s2 + $0x1094] ss:$8 sps:$4 sm:$0xff]  }
 0x22a   : > { %v4680_v11 = vadd.f32 %v4679_v50, %v18062_v5  ;;  %v16311_v53 = vadd.f32 %v4750_v54, %v4678_v36  ;;  %7036 = vmatpush1.bf16.msra.mxu0 %v12228_v37  ;;  %7109 = vmatpush1.bf16.msra.mxu1 %v12231_v51  ;;  %v12275_v52 = vld [vmem:[%s17915_s2 + $0x1194] ss:$8 sps:$4 sm:$0xff]   ;;  %v16391_v37 = vld [vmem:[%s13023_s27 + $0x80] sm:$0xee]  ;;  %v10516_v51 = vcombine.low %v16182_v24, %v16230_v25  ;;  %v12270_v23 = vld [vmem:[%s17915_s2 + $0x1090] ss:$8 sps:$4 sm:$0xff]  }
 0x22b   : > { %v4681_v63 = vpop.f32.mrf.mxu0  ;;  %v4754_v2 = vpop.f32.mrf.mxu1  ;;  %7037 = vmatprep.subr.bf16.mxu0 %v12236_v58  ;;  %7110 = vmatprep.subr.bf16.mxu1 %v12239_v57  ;;  %v16398_v54 = vld [vmem:[%s13023_s27 + $0xa0] sm:$0xee]  ;;  %v16401_v58 = vld [vmem:[%s13023_s27 + $0x88] sm:$0xee]  ;;  %v10518_v36 = vcombine.low %v16195_v8, %v16246_v20  ;;  %v10522_v24 = vcombine.low %v16198_v38, %v16251_v45  ;;  %v12273_v28 = vld [vmem:[%s17915_s2 + $0x1190] ss:$8 sps:$4 sm:$0xff]  }
 0x22c   : > { %v4682_v0 = vadd.f32 %v4681_v63, %v18063_v14  ;;  %v16326_v39 = vadd.f32 %v4752_v29, %v4680_v11  ;;  %v16404_v57 = vld [vmem:[%s13023_s27 + $0xa8] sm:$0xee]  ;;  %v5384_v7 = vrot.slane %v10516_v51, 1  ;;  %v5388_v38 = vrot.slane %v10520_v3, 1  ;;  %v12806_v20 = vld [vmem:[%s13023_s27 + $0x90] sm:$0x11] }
 0x22d   : > { %v12278_v25 = vld [vmem:[%s17915_s2 + $0x1084] ss:$8 sps:$4 sm:$0xff]   ;;  %v10525_v45 = vcombine.high %v16391_v37, %v12806_v20  ;;  %v12276_v50 = vld [vmem:[%s17915_s2 + $0x1080] ss:$8 sps:$4 sm:$0xff]   ;;  %v12807_v5 = vld [vmem:[%s13023_s27 + $0xb0] sm:$0x11] }
 0x22e   : > { %v16328_v47 = vadd.f32 %v4754_v2, %v4682_v0  ;;  %7038 = vmatpush2.bf16.msra.mxu0 %v12234_v21  ;;  %7111 = vmatpush2.bf16.msra.mxu1 %v12237_v61  ;;  %v12281_v8 = vld [vmem:[%s17915_s2 + $0x1184] ss:$8 sps:$4 sm:$0xff]   ;;  %v12279_v29 = vld [vmem:[%s17915_s2 + $0x1180] ss:$8 sps:$4 sm:$0xff]   ;;  %v10529_v11 = vcombine.high %v16398_v54, %v12807_v5  ;;  %v12808_v21 = vld [vmem:[%s13023_s27 + $0x98] sm:$0x11] }
 0x22f   : > { %7039 = vmatprep.subr.bf16.mxu0 %v12242_v31  ;;  %7112 = vmatprep.subr.bf16.mxu1 %v12245_v1  ;;  %v10527_v61 = vcombine.high %v16401_v58, %v12808_v21  ;;  %v12809_v63 = vld [vmem:[%s13023_s27 + $0xb8] sm:$0x11]  ;;  %v5386_v31 = vrot.slane %v10518_v36, 1  ;;  %v5390_v1 = vrot.slane %v10522_v24, 1  ;;  %v12292_v14 = vld [vmem:[%s17916_s3 + $0xe4] ss:$16 sps:$4 sm:$0xff]  }
 0x230   : > { %v10531_v2 = vcombine.high %v16404_v57, %v12809_v63  ;;  %v12295_v0 = vld [vmem:[%s17916_s3 + $0x2e4] ss:$16 sps:$4 sm:$0xff]   ;;  %v16478_v3 = vld [vmem:[%s13023_s27 + $0xd8] sm:$0x11]  ;;  %v12299_v36 = vld [vmem:[%s17916_s3 + $0x2c0] ss:$16 sps:$4 sm:$0xff]  }
 0x231   : > { %v12301_v51 = vld [vmem:[%s17916_s3 + $0x2c4] ss:$16 sps:$4 sm:$0xff]  }
 0x232   : > { %7040 = vmatpush2.bf16.msra.mxu0 %v12240_v34  ;;  %7113 = vmatpush2.bf16.msra.mxu1 %v12243_v41  ;;  %v16443_v34 = vld [vmem:[%s13023_s27 + $0xc0] sm:$0xee] }
 0x233   : > { %7041 = vmatprep.subr.bf16.mxu0 %v12248_v35  ;;  %7114 = vmatprep.subr.bf16.mxu1 %v12251_v4  ;;  %v16446_v41 = vld [vmem:[%s13023_s27 + $0xe0] sm:$0xee]  ;;  %v10748_v35 = vcombine.low %v5384_v7, %v5388_v38  ;;  %v5393_v4 = vrot.slane %v10525_v45, 1 }
 0x234   : > { %v12311_v45 = vld [vmem:[%s17916_s3 + $0x2a4] ss:$16 sps:$4 sm:$0xff]  }
 0x236   : > { %7042 = vmatpush2.bf16.msra.mxu0 %v12246_v48  ;;  %7115 = vmatpush2.bf16.msra.mxu1 %v12249_v40  ;;  %v16449_v48 = vld [vmem:[%s13023_s27 + $0xc8] sm:$0xee] }
 0x237   : > { %7043 = vmatprep.subr.bf16.mxu0 %v12254_v49  ;;  %7116 = vmatprep.subr.bf16.mxu1 %v12257_v9  ;;  %v16452_v40 = vld [vmem:[%s13023_s27 + $0xe8] sm:$0xee]  ;;  %v10524_v49 = vcombine.low %v16391_v37, %v12806_v20  ;;  %v5397_v9 = vrot.slane %v10529_v11, 1  ;;  %v12298_v37 = vld [vmem:[%s17916_s3 + $0xc4] ss:$16 sps:$4 sm:$0xff]  }
 0x238   : > { %v12308_v20 = vld [vmem:[%s17916_s3 + $0xa4] ss:$16 sps:$4 sm:$0xff]  }
 0x239   : > { %v16493_v24 = vrot.slane %v10524_v49, 1  ;;  %v16532_v49 = vld [vmem:[%s13023_s27 + $0x108] sm:$0xee] }
 0x23a   : > { %7044 = vmatpush2.bf16.msra.mxu0 %v12252_v62  ;;  %7117 = vmatpush2.bf16.msra.mxu1 %v12255_v6  ;;  %v5395_v62 = vrot.slane %v10527_v61, 1  ;;  %v5399_v6 = vrot.slane %v10531_v2, 1 }
 0x23b   : > { %7045 = vmatprep.subr.bf16.mxu0 %v12260_v27  ;;  %7118 = vmatprep.subr.bf16.mxu1 %v12263_v17  ;;  %v10750_v27 = vcombine.low %v5386_v31, %v5390_v1  ;;  %v12290_v17 = vld [vmem:[%s17916_s3 + $0xe0] ss:$16 sps:$4 sm:$0xff]  }
 0x23e   : > { %7046 = vmatpush2.bf16.msra.mxu0 %v12258_v22  ;;  %7119 = vmatpush2.bf16.msra.mxu1 %v12261_v30  ;;  %v10528_v22 = vcombine.low %v16398_v54, %v12807_v5  ;;  %v10526_v30 = vcombine.low %v16401_v58, %v12808_v21  ;;  %v10535_v54 = vcombine.high %v16449_v48, %v16478_v3  ;;  %v16483_v58 = vld [vmem:[%s13023_s27 + $0xf8] sm:$0x11] }
 0x23f   : > { %7047 = vmatprep.subr.bf16.mxu0 %v12266_v42  ;;  %7120 = vmatprep.subr.bf16.mxu1 %v12269_v10  ;;  %v10530_v42 = vcombine.low %v16404_v57, %v12809_v63  ;;  %v12293_v10 = vld [vmem:[%s17916_s3 + $0x2e0] ss:$16 sps:$4 sm:$0xff]   ;;  %v10539_v57 = vcombine.high %v16452_v40, %v16483_v58 }
 0x240   : > { %v16495_v38 = vrot.slane %v10528_v22, 1  ;;  %v16510_v63 = vld [vmem:[%s13023_s27 + $0x100] sm:$0xee]  ;;  %v10538_v22 = vcombine.low %v16452_v40, %v16483_v58 }
 0x242   : > { %7048 = vmatpush2.bf16.msra.mxu0 %v12264_v33  ;;  %7121 = vmatpush2.bf16.msra.mxu1 %v12267_v19  ;;  %v12810_v33 = vld [vmem:[%s13023_s27 + $0xd0] sm:$0x11] }
 0x243   : > { %7049 = vmatprep.subr.bf16.mxu0 %v12272_v18  ;;  %7122 = vmatprep.subr.bf16.mxu1 %v12275_v52  ;;  %v10533_v19 = vcombine.high %v16443_v34, %v12810_v33  ;;  %v16467_v18 = vld [vmem:[%s13023_s27 + $0xf0] sm:$0x11]  ;;  %v10532_v11 = vcombine.low %v16443_v34, %v12810_v33 }
 0x244   : > { %v10537_v52 = vcombine.high %v16446_v41, %v16467_v18  ;;  %v10536_v1 = vcombine.low %v16446_v41, %v16467_v18  ;;  %v12309_v41 = vld [vmem:[%s17916_s3 + $0x2a0] ss:$16 sps:$4 sm:$0xff]  }
 0x245   : > { %v16505_v21 = vrot.slane %v10533_v19, 1  ;;  %v12321_v19 = vld [vmem:[%s17916_s3 + $0x284] ss:$16 sps:$4 sm:$0xff]  }
 0x246   : > { %7050 = vmatpush2.bf16.msra.mxu0 %v12270_v23  ;;  %7123 = vmatpush2.bf16.msra.mxu1 %v12273_v28  ;;  %v12296_v23 = vld [vmem:[%s17916_s3 + $0xc0] ss:$16 sps:$4 sm:$0xff]   ;;  %v10761_v28 = vcombine.low %v5393_v4, %v5397_v9  ;;  %v16507_v61 = vrot.slane %v10537_v52, 1  ;;  %v16535_v9 = vld [vmem:[%s13023_s27 + $0x128] sm:$0xee]  ;;  %v16562_v18 = vrot.slane %v10536_v1, 1 }
 0x247   : > { %7051 = vmatprep.subr.bf16.mxu0 %v12278_v25  ;;  %7124 = vmatprep.subr.bf16.mxu1 %v12281_v8  ;;  %v10763_v25 = vcombine.low %v5395_v62, %v5399_v6  ;;  %v12306_v4 = vld [vmem:[%s17916_s3 + $0xa0] ss:$16 sps:$4 sm:$0xff]  }
 0x248   : > { %v10773_v33 = vcombine.low %v16505_v21, %v16507_v61  ;;  %v12331_v61 = vld [vmem:[%s17916_s3 + $0x264] ss:$16 sps:$4 sm:$0xff]  }
 0x24a   : > { %7052 = vmatpush2.bf16.msra.mxu0 %v12276_v50  ;;  %7125 = vmatpush2.bf16.msra.mxu1 %v12279_v29  ;;  %v5394_v50 = vrot.slane %v10526_v30, 1  ;;  %v5398_v29 = vrot.slane %v10530_v42, 1 }
 0x24b   : > { %8983 = vmatprep.subr.bf16.mxu0 %v12292_v14  ;;  %9026 = vmatprep.subr.bf16.mxu1 %v12295_v0  ;;  %v16516_v14 = vrot.slane %v10539_v57, 1  ;;  %v16519_v0 = vld [vmem:[%s13023_s27 + $0x120] sm:$0xee] }
 0x24d   : > { %v4791_v8 = vpop.f32.mrf.mxu0  ;;  %v4864_v7 = vpop.f32.mrf.mxu1  ;;  %7054 = vmatmul.mubr.bf16.vlgmr.msra.gmra.mxu0 %v10748_v35  ;;  %7127 = vmatmul.mubr.bf16.vlgmr.msra.gmra.mxu1 %v10750_v27  ;;  %v10762_v27 = vcombine.low %v5394_v50, %v5398_v29 }
 0x24e   : > { %v4792_v5 = vadd.f32 %v4791_v8, %v16119_v26  ;;  %8984 = vmatpush1.bf16.msra.mxu0 %v12290_v17  ;;  %9027 = vmatpush1.bf16.msra.mxu1 %v12293_v10  ;;  %v16514_v26 = vrot.slane %v10535_v54, 1  ;;  %v10534_v17 = vcombine.low %v16449_v48, %v16478_v3  ;;  %v16546_v10 = vrot.slane %v10532_v11, 1  ;;  %v16569_v3 = vld [vmem:[%s13023_s27 + $0x130] sm:$0x11] }
 0x24f   : > { %v4793_v2 = vpop.f32.mrf.mxu0  ;;  %v4866_v31 = vpop.f32.mrf.mxu1  ;;  %8985 = vmatprep.subr.bf16.mxu0 %v12298_v37  ;;  %9028 = vmatprep.subr.bf16.mxu1 %v12301_v51  ;;  %v12814_v37 = vld [vmem:[%s13023_s27 + $0x110] sm:$0x11]  ;;  %v10545_v54 = vcombine.high %v16519_v0, %v16569_v3 }
 0x250   : > { %v16522_v34 = vadd.f32 %v4864_v7, %v4792_v5  ;;  %v4794_v35 = vadd.f32 %v4793_v2, %v16142_v46  ;;  %7063 = vmatprep.mubr.bf16.mxu0 %v10761_v28  ;;  %7136 = vmatprep.mubr.bf16.mxu1 %v10763_v25  ;;  %v10760_v46 = vcombine.low %v16493_v24, %v16495_v38  ;;  %v12816_v24 = vld [vmem:[%s13023_s27 + $0x118] sm:$0x11] }
 0x251   : > { %v4795_v62 = vpop.f32.mrf.mxu0  ;;  %v4868_v6 = vpop.f32.mrf.mxu1  ;;  %v10775_v52 = vcombine.low %v16514_v26, %v16516_v14  ;;  %v10541_v51 = vcombine.high %v16510_v63, %v12814_v37  ;;  %v10543_v28 = vcombine.high %v16532_v49, %v12816_v24  ;;  %v12817_v25 = vld [vmem:[%s13023_s27 + $0x138] sm:$0x11]  ;;  %v10772_v21 = vcombine.low %v16546_v10, %v16562_v18  ;;  %v12326_v14 = vld [vmem:[%s17916_s3 + $0x60] ss:$16 sps:$4 sm:$0xff]   ;;  %s9582_s27 = sshll.u32 %s12882_s10, 3 }
 0x252   : > { %18064 = vst [vmem:[#allocation12_spill] sm:$0xff] %v16522_v34  ;;  %v16543_v30 = vadd.f32 %v4866_v31, %v4794_v35  ;;  %v4796_v42 = vadd.f32 %v4795_v62, %v16149_v55  ;;  %8986 = vmatpush1.bf16.msra.mxu0 %v12296_v23  ;;  %9029 = vmatpush1.bf16.msra.mxu1 %v12299_v36  ;;  %v12318_v55 = vld [vmem:[%s17916_s3 + $0x84] ss:$16 sps:$4 sm:$0xff]   ;;  %v12316_v23 = vld [vmem:[%s17916_s3 + $0x80] ss:$16 sps:$4 sm:$0xff]   ;;  %v5413_v31 = vrot.slane %v10545_v54, 1 }
 0x253   : > { %v4797_v48 = vpop.f32.mrf.mxu0  ;;  %v4870_v40 = vpop.f32.mrf.mxu1  ;;  %8987 = vmatprep.subr.bf16.mxu0 %v12308_v20  ;;  %9030 = vmatprep.subr.bf16.mxu1 %v12311_v45  ;;  %v12319_v36 = vld [vmem:[%s17916_s3 + $0x280] ss:$16 sps:$4 sm:$0xff]   ;;  %v10547_v8 = vcombine.high %v16535_v9, %v12817_v25  ;;  %v5402_v20 = vrot.slane %v10534_v17, 1  ;;  %v5406_v45 = vrot.slane %v10538_v22, 1  ;;  %v10540_v2 = vcombine.low %v16510_v63, %v12814_v37  ;;  %p17697_p5 = scmp.lt.s32.totalorder %s9582_s27, 15 }
 0x254   : > { %18065 = vst [vmem:[#allocation13_spill] sm:$0xff] %v16543_v30  ;;  %v16573_v58 = vadd.f32 %v4868_v6, %v4796_v42  ;;  %v4798_v57 = vadd.f32 %v4797_v48, %v16176_v13  ;;  %v12328_v13 = vld [vmem:[%s17916_s3 + $0x64] ss:$16 sps:$4 sm:$0xff]   ;;  %v12329_v35 = vld [vmem:[%s17916_s3 + $0x260] ss:$16 sps:$4 sm:$0xff]  }
 0x255   : > { %v4801_v7 = vpop.f32.mrf.mxu0  ;;  %7064 = vmatmul.mubr.bf16.gmra.mxu0 %v10760_v46  ;;  %v4874_v38 = vpop.f32.mrf.mxu1  ;;  %7137 = vmatmul.mubr.bf16.gmra.mxu1 %v10762_v27  ;;  %v10774_v6 = vcombine.low %v5402_v20, %v5406_v45  ;;  %v10542_v46 = vcombine.low %v16532_v49, %v12816_v24  ;;  %v10546_v27 = vcombine.low %v16535_v9, %v12817_v25  ;;  %v12341_v49 = vld [vmem:[%s17916_s3 + $0x244] ss:$16 sps:$4 sm:$0xff]   ;;  %v5408_v9 = vrot.slane %v10540_v2, 1  ;;  %v12339_v54 = vld [vmem:[%s17916_s3 + $0x240] ss:$16 sps:$4 sm:$0xff]   ;;  %v16662_v45 = vld [vmem:[%s16635_s24 + $0x8] sm:$0xff] }
 0x256   : > { %18067 = vst [vmem:[#allocation2_spill] sm:$0xff] %v16573_v58  ;;  %v16589_v50 = vadd.f32 %v4870_v40, %v4798_v57  ;;  %v4802_v29 = vadd.f32 %v4801_v7, %v16201_v56  ;;  %8988 = vmatpush1.bf16.msra.mxu0 %v12306_v4  ;;  %9031 = vmatpush1.bf16.msra.mxu1 %v12309_v41  ;;  %v5409_v56 = vrot.slane %v10541_v51, 1  ;;  %v5411_v4 = vrot.slane %v10543_v28, 1  ;;  %v16656_v25 = vld [vmem:[%s16635_s24] sm:$0xff]  ;;  %v12581_v58 = vld [vmem:[%s17916_s3 + $0x368] ss:$16 sps:$4 sm:$0xff]  }
 0x257   : > { %v4803_v5 = vpop.f32.mrf.mxu0  ;;  %v4876_v11 = vpop.f32.mrf.mxu1  ;;  %8989 = vmatprep.subr.bf16.mxu0 %v12318_v55  ;;  %9032 = vmatprep.subr.bf16.mxu1 %v12321_v19  ;;  %v5415_v41 = vrot.slane %v10547_v8, 1  ;;  %v5414_v37 = vrot.slane %v10546_v27, 1  ;;  %v16659_v20 = vld [vmem:[%s16635_s24 + $0x20] sm:$0xff]  ;;  %v12590_v30 = vld [vmem:[%s17916_s3 + $0x128] ss:$16 sps:$4 sm:$0xff]   ;;  %s18133_s27 = smov (!%p17697_p5, %s9582_s27), 15 }
 0x258   : > { %18068 = vst [vmem:[#allocation3_spill] sm:$0xff] %v16589_v50  ;;  %v4804_v1 = vadd.f32 %v4803_v5, %v16211_v32  ;;  %v16605_v26 = vadd.f32 %v4874_v38, %v4802_v29  ;;  %7073 = vmatprep.mubr.bf16.mxu0 %v10773_v33  ;;  %7146 = vmatprep.mubr.bf16.mxu1 %v10775_v52  ;;  %v5410_v52 = vrot.slane %v10542_v46, 1  ;;  %v16665_v29 = vld [vmem:[%s16635_s24 + $0x28] sm:$0xff]  ;;  %v12367_v27 = vld [vmem:[%s17916_s3 + $0x3e4] ss:$16 sps:$4 sm:$0xff]   ;;  %s11247_s16 = sshll.u32 %s18133_s27, 4 }
 0x259   : > { %v4805_v63 = vpop.f32.mrf.mxu0  ;;  %v4878_v62 = vpop.f32.mrf.mxu1  ;;  %v10544_v32 = vcombine.low %v16519_v0, %v16569_v3  ;;  %v12338_v0 = vld [vmem:[%s17916_s3 + $0x44] ss:$16 sps:$4 sm:$0xff]   ;;  %v10785_v48 = vcombine.low %v5409_v56, %v5413_v31  ;;  %v10787_v40 = vcombine.low %v5411_v4, %v5415_v41  ;;  %v12336_v3 = vld [vmem:[%s17916_s3 + $0x40] ss:$16 sps:$4 sm:$0xff]   ;;  %v12580_v50 = vld [vmem:[%s17916_s3 + $0x16c] ss:$16 sps:$4 sm:$0xff]   ;;  %s17779_s28 = scalar_lea.vmem %s17921_s8, %s11247_s16 }
 0x25a   : > { %18069 = vst [vmem:[#allocation27_spill] sm:$0xff] %v16605_v26  ;;  %v4806_v17 = vadd.f32 %v4805_v63, %v16240_v12  ;;  %v16618_v22 = vadd.f32 %v4876_v11, %v4804_v1  ;;  %8990 = vmatpush1.bf16.msra.mxu0 %v12316_v23  ;;  %9033 = vmatpush1.bf16.msra.mxu1 %v12319_v36  ;;  %v12351_v36 = vld [vmem:[%s17916_s3 + $0x224] ss:$16 sps:$4 sm:$0xff]   ;;  %v12574_v26 = vld [vmem:[%s17916_s3 + $0x18c] ss:$16 sps:$4 sm:$0xff]  }
 0x25b   : > { %v4807_v42 = vpop.f32.mrf.mxu0  ;;  %v4880_v10 = vpop.f32.mrf.mxu1  ;;  %8991 = vmatprep.subr.bf16.mxu0 %v12328_v13  ;;  %9034 = vmatprep.subr.bf16.mxu1 %v12331_v61  ;;  %v5412_v18 = vrot.slane %v10544_v32, 1  ;;  %v10786_v13 = vcombine.low %v5410_v52, %v5414_v37  ;;  %v12361_v56 = vld [vmem:[%s17916_s3 + $0x204] ss:$16 sps:$4 sm:$0xff]   ;;  %v12368_v37 = vld [vmem:[%s17916_s3 + $0x1c0] ss:$16 sps:$4 sm:$0xff]  }
 0x25c   : > { %18070 = vst [vmem:[#allocation5_spill] sm:$0xff] %v16618_v22  ;;  %v4808_v12 = vadd.f32 %v4807_v42, %v16259_v60  ;;  %v16628_v33 = vadd.f32 %v4878_v62, %v4806_v17  ;;  %v12569_v22 = vld [vmem:[%s17916_s3 + $0x3a8] ss:$16 sps:$4 sm:$0xff]  }
 0x25d   : > { %v4811_v55 = vpop.f32.mrf.mxu0  ;;  %7074 = vmatmul.mubr.bf16.gmra.mxu0 %v10772_v21  ;;  %v4884_v19 = vpop.f32.mrf.mxu1  ;;  %7147 = vmatmul.mubr.bf16.gmra.mxu1 %v10774_v6  ;;  %v10784_v38 = vcombine.low %v5408_v9, %v5412_v18  ;;  %v12349_v21 = vld [vmem:[%s17916_s3 + $0x220] ss:$16 sps:$4 sm:$0xff]  }
 0x25e   : > { %18071 = vst [vmem:[#allocation6_spill] sm:$0xff] %v16628_v33  ;;  %v4812_v51 = vadd.f32 %v4811_v55, %v16271_v43  ;;  %v16638_v60 = vadd.f32 %v4880_v10, %v4808_v12  ;;  %8992 = vmatpush1.bf16.msra.mxu0 %v12326_v14  ;;  %9035 = vmatpush1.bf16.msra.mxu1 %v12329_v35  ;;  %v12348_v43 = vld [vmem:[%s17916_s3 + $0x24] ss:$16 sps:$4 sm:$0xff]   ;;  %v12359_v6 = vld [vmem:[%s17916_s3 + $0x200] ss:$16 sps:$4 sm:$0xff]  }
 0x25f   : > { %v4813_v57 = vpop.f32.mrf.mxu0  ;;  %v4886_v23 = vpop.f32.mrf.mxu1  ;;  %8993 = vmatprep.subr.bf16.mxu0 %v12338_v0  ;;  %9036 = vmatprep.subr.bf16.mxu1 %v12341_v49  ;;  %v16687_v14 = vcombine.high %v16656_v25, %v16659_v20  ;;  %v16691_v35 = vcombine.high %v16662_v45, %v16665_v29  ;;  %v12362_v12 = vld [vmem:[%s17916_s3 + $0x1e0] ss:$16 sps:$4 sm:$0xff]   ;;  %v12373_v55 = vld [vmem:[%s17916_s3 + $0x3c4] ss:$16 sps:$4 sm:$0xff]   ;;  %v12568_v33 = vld [vmem:[%s17916_s3 + $0x1ac] ss:$16 sps:$4 sm:$0xff]  }
 0x260   : > { %18072 = vst [vmem:[#allocation28_spill] sm:$0xff] %v16638_v60  ;;  %v4814_v24 = vadd.f32 %v4813_v57, %v16275_v44  ;;  %v16653_v28 = vadd.f32 %v4884_v19, %v4812_v51  ;;  %7083 = vmatprep.mubr.bf16.mxu0 %v10785_v48  ;;  %7156 = vmatprep.mubr.bf16.mxu1 %v10787_v40  ;;  %v12346_v44 = vld [vmem:[%s17916_s3 + $0x20] ss:$16 sps:$4 sm:$0xff]   ;;  %v12563_v60 = vld [vmem:[%s17916_s3 + $0x3c8] ss:$16 sps:$4 sm:$0xff]  }
 0x261   : > { %v4815_v8 = vpop.f32.mrf.mxu0  ;;  %v4888_v7 = vpop.f32.mrf.mxu1  ;;  %v12371_v51 = vld [vmem:[%s17916_s3 + $0x3c0] ss:$16 sps:$4 sm:$0xff]  }
 0x262   : > { %18073 = vst [vmem:[#allocation4_spill] sm:$0xff] %v16653_v28  ;;  %v4816_v5 = vadd.f32 %v4815_v8, %v16290_v15  ;;  %v16668_v11 = vadd.f32 %v4886_v23, %v4814_v24  ;;  %8994 = vmatpush1.bf16.msra.mxu0 %v12336_v3  ;;  %9037 = vmatpush1.bf16.msra.mxu1 %v12339_v54  ;;  %v12358_v15 = vld [vmem:[%s17916_s3 + $0x4] ss:$16 sps:$4 sm:$0xff]   ;;  %v12374_v54 = vld [vmem:[%s17916_s3 + $0x1a0] ss:$16 sps:$4 sm:$0xff]  }
 0x263   : > { %v4817_v61 = vpop.f32.mrf.mxu0  ;;  %v4890_v2 = vpop.f32.mrf.mxu1  ;;  %8995 = vmatprep.subr.bf16.mxu0 %v12348_v43  ;;  %9038 = vmatprep.subr.bf16.mxu1 %v12351_v36  ;;  %v12379_v3 = vld [vmem:[%s17916_s3 + $0x3a4] ss:$16 sps:$4 sm:$0xff]   ;;  %v12377_v57 = vld [vmem:[%s17916_s3 + $0x3a0] ss:$16 sps:$4 sm:$0xff]   ;;  %v12562_v28 = vld [vmem:[%s17916_s3 + $0x1cc] ss:$16 sps:$4 sm:$0xff]  }
 0x264   : > { %18074 = vst [vmem:[#allocation10_spill] sm:$0xff] %v16668_v11  ;;  %v4818_v31 = vadd.f32 %v4817_v61, %v16293_v59  ;;  %v16683_v1 = vadd.f32 %v4888_v7, %v4816_v5  ;;  %v12356_v59 = vld [vmem:[%s17916_s3] ss:$16 sps:$4 sm:$0xff]   ;;  %v12382_v23 = vld [vmem:[%s17916_s3 + $0x184] ss:$16 sps:$4 sm:$0xff]  }
 0x265   : > { %v4821_v4 = vpop.f32.mrf.mxu0  ;;  %7084 = vmatmul.mubr.bf16.gmra.mxu0 %v10784_v38  ;;  %v4894_v41 = vpop.f32.mrf.mxu1  ;;  %7157 = vmatmul.mubr.bf16.gmra.mxu1 %v10786_v13  ;;  %v12385_v43 = vld [vmem:[%s17916_s3 + $0x384] ss:$16 sps:$4 sm:$0xff]   ;;  %v12380_v36 = vld [vmem:[%s17916_s3 + $0x180] ss:$16 sps:$4 sm:$0xff]   ;;  %v12557_v11 = vld [vmem:[%s17916_s3 + $0x3e8] ss:$16 sps:$4 sm:$0xff]  }
 0x266   : > { %18075 = vst [vmem:[#allocation11_spill] sm:$0xff] %v16683_v1  ;;  %v4822_v63 = vadd.f32 %v4821_v4, %v16308_v16  ;;  %v16694_v62 = vadd.f32 %v4890_v2, %v4818_v31  ;;  %8996 = vmatpush1.bf16.msra.mxu0 %v12346_v44  ;;  %9039 = vmatpush1.bf16.msra.mxu1 %v12349_v21  ;;  %v12364_v16 = vld [vmem:[%s17916_s3 + $0x1e4] ss:$16 sps:$4 sm:$0xff]   ;;  %v12383_v24 = vld [vmem:[%s17916_s3 + $0x380] ss:$16 sps:$4 sm:$0xff]  }
 0x267   : > { %v4823_v32 = vpop.f32.mrf.mxu0  ;;  %v4896_v46 = vpop.f32.mrf.mxu1  ;;  %8997 = vmatprep.subr.bf16.mxu0 %v12358_v15  ;;  %9040 = vmatprep.subr.bf16.mxu1 %v12361_v56  ;;  %v12388_v8 = vld [vmem:[%s17916_s3 + $0x164] ss:$16 sps:$4 sm:$0xff]   ;;  %v12386_v38 = vld [vmem:[%s17916_s3 + $0x160] ss:$16 sps:$4 sm:$0xff]   ;;  %v12556_v1 = vld [vmem:[%s17916_s3 + $0x1ec] ss:$16 sps:$4 sm:$0xff]  }
 0x268   : > { %18076 = vst [vmem:[#allocation15_spill] sm:$0xff] %v16694_v62  ;;  %v4824_v17 = vadd.f32 %v4823_v32, %v16311_v53  ;;  %v16709_v42 = vadd.f32 %v4894_v41, %v4822_v63  ;;  %9015 = vmatprep.mubr.bf16.mxu0 %v16687_v14  ;;  %9058 = vmatprep.mubr.bf16.mxu1 %v16691_v35  ;;  %v12365_v53 = vld [vmem:[%s17916_s3 + $0x3e0] ss:$16 sps:$4 sm:$0xff]   ;;  %v12391_v7 = vld [vmem:[%s17916_s3 + $0x364] ss:$16 sps:$4 sm:$0xff]  }
 0x269   : > { %v4825_v10 = vpop.f32.mrf.mxu0  ;;  %v4898_v0 = vpop.f32.mrf.mxu1  ;;  %v12389_v13 = vld [vmem:[%s17916_s3 + $0x360] ss:$16 sps:$4 sm:$0xff]   ;;  %v12394_v5 = vld [vmem:[%s17916_s3 + $0x144] ss:$16 sps:$4 sm:$0xff]   ;;  %v12551_v62 = vld [vmem:[%s17916_s3 + $0x208] ss:$16 sps:$4 sm:$0xff]  }
 0x26a   : > { %18077 = vst [vmem:[#allocation14_spill] sm:$0xff] %v16709_v42  ;;  %v4826_v49 = vadd.f32 %v4825_v10, %v16326_v39  ;;  %v16714_v9 = vadd.f32 %v4896_v46, %v4824_v17  ;;  %8998 = vmatpush1.bf16.msra.mxu0 %v12356_v59  ;;  %9041 = vmatpush1.bf16.msra.mxu1 %v12359_v6  ;;  %v12370_v39 = vld [vmem:[%s17916_s3 + $0x1c4] ss:$16 sps:$4 sm:$0xff]   ;;  %v12392_v21 = vld [vmem:[%s17916_s3 + $0x140] ss:$16 sps:$4 sm:$0xff]   ;;  %v16832_v10 = vld [vmem:[%s16635_s24 + $0x18] sm:$0xff] }
 0x26b   : > { %v4827_v48 = vpop.f32.mrf.mxu0  ;;  %v4900_v40 = vpop.f32.mrf.mxu1  ;;  %8999 = vmatprep.subr.bf16.mxu0 %v12364_v16  ;;  %9042 = vmatprep.subr.bf16.mxu1 %v12367_v27  ;;  %v12397_v44 = vld [vmem:[%s17916_s3 + $0x344] ss:$16 sps:$4 sm:$0xff]   ;;  %v12395_v61 = vld [vmem:[%s17916_s3 + $0x340] ss:$16 sps:$4 sm:$0xff]   ;;  %v16822_v16 = vcombine.low %v16656_v25, %v16659_v20  ;;  %v16826_v27 = vcombine.low %v16662_v45, %v16665_v29  ;;  %v12545_v42 = vld [vmem:[%s17916_s3 + $0x228] ss:$16 sps:$4 sm:$0xff]  }
 0x26c   : > { %18078 = vst [vmem:[#allocation29_spill] sm:$0xff] %v16714_v9  ;;  %v4828_v19 = vadd.f32 %v4827_v48, %v16328_v47  ;;  %v16729_v18 = vadd.f32 %v4898_v0, %v4826_v49  ;;  %v12376_v47 = vld [vmem:[%s17916_s3 + $0x1a4] ss:$16 sps:$4 sm:$0xff]   ;;  %v12398_v56 = vld [vmem:[%s17916_s3 + $0x120] ss:$16 sps:$4 sm:$0xff]   ;;  %v16835_v0 = vld [vmem:[%s16635_s24 + $0x38] sm:$0xff] }
 0x26d   : > { %v12400_v2 = vld [vmem:[%s17916_s3 + $0x124] ss:$16 sps:$4 sm:$0xff]   ;;  %v12401_v31 = vld [vmem:[%s17916_s3 + $0x320] ss:$16 sps:$4 sm:$0xff]   ;;  %v12544_v9 = vld [vmem:[%s17916_s3 + $0x2c] ss:$16 sps:$4 sm:$0xff]  }
 0x26e   : > { %18079 = vst [vmem:[#allocation7_spill] sm:$0xff] %v16729_v18  ;;  %v16731_v52 = vadd.f32 %v4900_v40, %v4828_v19  ;;  %9000 = vmatpush2.bf16.msra.mxu0 %v12362_v12  ;;  %9043 = vmatpush2.bf16.msra.mxu1 %v12365_v53  ;;  %v12403_v15 = vld [vmem:[%s17916_s3 + $0x324] ss:$16 sps:$4 sm:$0xff]   ;;  %v12404_v63 = vld [vmem:[%s17916_s3 + $0x100] ss:$16 sps:$4 sm:$0xff]   ;;  %v16855_v12 = vcombine.high %v16832_v10, %v16835_v0 }
 0x26f   : > { %9001 = vmatprep.subr.bf16.mxu0 %v12370_v39  ;;  %9044 = vmatprep.subr.bf16.mxu1 %v12373_v55  ;;  %v12406_v4 = vld [vmem:[%s17916_s3 + $0x104] ss:$16 sps:$4 sm:$0xff]   ;;  %v12407_v59 = vld [vmem:[%s17916_s3 + $0x300] ss:$16 sps:$4 sm:$0xff]  }
 0x270   : > { %18080 = vst [vmem:[#allocation30_spill] sm:$0xff] %v16731_v52  ;;  %v12409_v41 = vld [vmem:[%s17916_s3 + $0x304] ss:$16 sps:$4 sm:$0xff]   ;;  %v12410_v49 = vld [vmem:[%s17916_s3 + $0x4e0] ss:$16 sps:$4 sm:$0xff]  }
 0x271   : > { %v12412_v6 = vld [vmem:[%s17916_s3 + $0x4e4] ss:$16 sps:$4 sm:$0xff]   ;;  %v12413_v25 = vld [vmem:[%s17916_s3 + $0x6e0] ss:$16 sps:$4 sm:$0xff]  }
 0x272   : > { %9002 = vmatpush2.bf16.msra.mxu0 %v12368_v37  ;;  %9045 = vmatpush2.bf16.msra.mxu1 %v12371_v51  ;;  %v12415_v32 = vld [vmem:[%s17916_s3 + $0x6e4] ss:$16 sps:$4 sm:$0xff]   ;;  %v12416_v40 = vld [vmem:[%s17916_s3 + $0x4c0] ss:$16 sps:$4 sm:$0xff]  }
 0x273   : > { %9003 = vmatprep.subr.bf16.mxu0 %v12376_v47  ;;  %9046 = vmatprep.subr.bf16.mxu1 %v12379_v3  ;;  %v16818_v46 = vld [vmem:[%s16635_s24 + $0x10] sm:$0xff] }
 0x274   : > { %v16829_v17 = vld [vmem:[%s16635_s24 + $0x30] sm:$0xff] }
 0x275   : > { %v12418_v20 = vld [vmem:[%s17916_s3 + $0x4c4] ss:$16 sps:$4 sm:$0xff]   ;;  %v16851_v29 = vcombine.high %v16818_v46, %v16829_v17  ;;  %v12419_v39 = vld [vmem:[%s17916_s3 + $0x6c0] ss:$16 sps:$4 sm:$0xff]  }
 0x276   : > { %9004 = vmatpush2.bf16.msra.mxu0 %v12374_v54  ;;  %9047 = vmatpush2.bf16.msra.mxu1 %v12377_v57  ;;  %v12421_v45 = vld [vmem:[%s17916_s3 + $0x6c4] ss:$16 sps:$4 sm:$0xff]   ;;  %v12422_v54 = vld [vmem:[%s17916_s3 + $0x4a0] ss:$16 sps:$4 sm:$0xff]  }
 0x277   : > { %9005 = vmatprep.subr.bf16.mxu0 %v12382_v23  ;;  %9048 = vmatprep.subr.bf16.mxu1 %v12385_v43  ;;  %v12424_v37 = vld [vmem:[%s17916_s3 + $0x4a4] ss:$16 sps:$4 sm:$0xff]   ;;  %v12425_v57 = vld [vmem:[%s17916_s3 + $0x6a0] ss:$16 sps:$4 sm:$0xff]  }
 0x278   : > { %v12427_v51 = vld [vmem:[%s17916_s3 + $0x6a4] ss:$16 sps:$4 sm:$0xff]  }
 0x27a   : > { %9006 = vmatpush2.bf16.msra.mxu0 %v12380_v36  ;;  %9049 = vmatpush2.bf16.msra.mxu1 %v12383_v24  ;;  %v12430_v36 = vld [vmem:[%s17916_s3 + $0x484] ss:$16 sps:$4 sm:$0xff]  }
 0x27b   : > { %9007 = vmatprep.subr.bf16.mxu0 %v12388_v8  ;;  %9050 = vmatprep.subr.bf16.mxu1 %v12391_v7  ;;  %v12433_v24 = vld [vmem:[%s17916_s3 + $0x684] ss:$16 sps:$4 sm:$0xff]  }
 0x27e   : > { %9008 = vmatpush2.bf16.msra.mxu0 %v12386_v38  ;;  %9051 = vmatpush2.bf16.msra.mxu1 %v12389_v13  ;;  %v12428_v38 = vld [vmem:[%s17916_s3 + $0x480] ss:$16 sps:$4 sm:$0xff]  }
 0x27f   : > { %9009 = vmatprep.subr.bf16.mxu0 %v12394_v5  ;;  %9052 = vmatprep.subr.bf16.mxu1 %v12397_v44  ;;  %v12431_v13 = vld [vmem:[%s17916_s3 + $0x680] ss:$16 sps:$4 sm:$0xff]   ;;  %v12436_v5 = vld [vmem:[%s17916_s3 + $0x464] ss:$16 sps:$4 sm:$0xff]  }
 0x280   : > { %v12439_v44 = vld [vmem:[%s17916_s3 + $0x664] ss:$16 sps:$4 sm:$0xff]  }
 0x282   : > { %9010 = vmatpush2.bf16.msra.mxu0 %v12392_v21  ;;  %9053 = vmatpush2.bf16.msra.mxu1 %v12395_v61 }
 0x283   : > { %9011 = vmatprep.subr.bf16.mxu0 %v12400_v2  ;;  %9054 = vmatprep.subr.bf16.mxu1 %v12403_v15 }
 0x286   : > { %9012 = vmatpush2.bf16.msra.mxu0 %v12398_v56  ;;  %9055 = vmatpush2.bf16.msra.mxu1 %v12401_v31  ;;  %v12434_v56 = vld [vmem:[%s17916_s3 + $0x460] ss:$16 sps:$4 sm:$0xff]  }
 0x287   : > { %9013 = vmatprep.subr.bf16.mxu0 %v12406_v4  ;;  %9056 = vmatprep.subr.bf16.mxu1 %v12409_v41  ;;  %v12437_v31 = vld [vmem:[%s17916_s3 + $0x660] ss:$16 sps:$4 sm:$0xff]   ;;  %v12442_v4 = vld [vmem:[%s17916_s3 + $0x444] ss:$16 sps:$4 sm:$0xff]  }
 0x288   : > { %v12445_v41 = vld [vmem:[%s17916_s3 + $0x644] ss:$16 sps:$4 sm:$0xff]  }
 0x28a   : > { %9014 = vmatpush2.bf16.msra.mxu0 %v12404_v63  ;;  %9057 = vmatpush2.bf16.msra.mxu1 %v12407_v59 }
 0x28b   : > { %9069 = vmatprep.subr.bf16.mxu0 %v12412_v6  ;;  %9112 = vmatprep.subr.bf16.mxu1 %v12415_v32 }
 0x28d   : > { %v16857_v53 = vpop.f32.mrf.mxu0  ;;  %v16859_v48 = vpop.f32.mrf.mxu1  ;;  %9016 = vmatmul.mubr.bf16.vlgmr.msra.gmra.mxu0 %v16822_v16  ;;  %9059 = vmatmul.mubr.bf16.vlgmr.msra.gmra.mxu1 %v16826_v27 }
 0x28e   : > { %9070 = vmatpush1.bf16.msra.mxu0 %v12410_v49  ;;  %9113 = vmatpush1.bf16.msra.mxu1 %v12413_v25  ;;  %v12440_v49 = vld [vmem:[%s17916_s3 + $0x440] ss:$16 sps:$4 sm:$0xff]  }
 0x28f   : > { %v16869_v55 = vpop.f32.mrf.mxu0  ;;  %v16871_v19 = vpop.f32.mrf.mxu1  ;;  %9071 = vmatprep.subr.bf16.mxu0 %v12418_v20  ;;  %9114 = vmatprep.subr.bf16.mxu1 %v12421_v45  ;;  %v12443_v25 = vld [vmem:[%s17916_s3 + $0x640] ss:$16 sps:$4 sm:$0xff]   ;;  %v12448_v20 = vld [vmem:[%s17916_s3 + $0x424] ss:$16 sps:$4 sm:$0xff]  }
 0x290   : > { %9101 = vmatprep.mubr.bf16.mxu0 %v16851_v29  ;;  %9144 = vmatprep.mubr.bf16.mxu1 %v16855_v12  ;;  %v12451_v45 = vld [vmem:[%s17916_s3 + $0x624] ss:$16 sps:$4 sm:$0xff]  }
 0x291   : > { %v16881_v47 = vpop.f32.mrf.mxu0  ;;  %v16883_v3 = vpop.f32.mrf.mxu1 }
 0x292   : > { %9072 = vmatpush1.bf16.msra.mxu0 %v12416_v40  ;;  %9115 = vmatpush1.bf16.msra.mxu1 %v12419_v39 }
 0x293   : > { %v16891_v23 = vpop.f32.mrf.mxu0  ;;  %v16893_v43 = vpop.f32.mrf.mxu1  ;;  %9073 = vmatprep.subr.bf16.mxu0 %v12424_v37  ;;  %9116 = vmatprep.subr.bf16.mxu1 %v12427_v51 }
 0x294   : > { %v6843_v34 = vadd.f32 %v16893_v43, %v16891_v23 }
 0x295   : > { %v16901_v8 = vpop.f32.mrf.mxu0  ;;  %v16903_v7 = vpop.f32.mrf.mxu1 }
 0x296   : > { %9074 = vmatpush1.bf16.msra.mxu0 %v12422_v54  ;;  %9117 = vmatpush1.bf16.msra.mxu1 %v12425_v57  ;;  %v12446_v54 = vld [vmem:[%s17916_s3 + $0x420] ss:$16 sps:$4 sm:$0xff]  }
 0x297   : > { %9075 = vmatprep.subr.bf16.mxu0 %v12430_v36  ;;  %9118 = vmatprep.subr.bf16.mxu1 %v12433_v24  ;;  %v16917_v21 = vpop.f32.mrf.mxu0  ;;  %v16919_v61 = vpop.f32.mrf.mxu1  ;;  %v12449_v57 = vld [vmem:[%s17916_s3 + $0x620] ss:$16 sps:$4 sm:$0xff]   ;;  %v12454_v36 = vld [vmem:[%s17916_s3 + $0x404] ss:$16 sps:$4 sm:$0xff]  }
 0x298   : > { %v12457_v24 = vld [vmem:[%s17916_s3 + $0x604] ss:$16 sps:$4 sm:$0xff]  }
 0x299   : > { %v16921_v2 = vpop.f32.mrf.mxu0  ;;  %v16923_v15 = vpop.f32.mrf.mxu1 }
 0x29a   : > { %9076 = vmatpush1.bf16.msra.mxu0 %v12428_v38  ;;  %9119 = vmatpush1.bf16.msra.mxu1 %v12431_v13 }
 0x29b   : > { %9077 = vmatprep.subr.bf16.mxu0 %v12436_v5  ;;  %9120 = vmatprep.subr.bf16.mxu1 %v12439_v44  ;;  %v16937_v63 = vpop.f32.mrf.mxu0  ;;  %v16939_v59 = vpop.f32.mrf.mxu1 }
 0x29d   : > { %v16941_v6 = vpop.f32.mrf.mxu0  ;;  %v16943_v32 = vpop.f32.mrf.mxu1 }
 0x29e   : > { %9078 = vmatpush1.bf16.msra.mxu0 %v12434_v56  ;;  %9121 = vmatpush1.bf16.msra.mxu1 %v12437_v31  ;;  %v12452_v56 = vld [vmem:[%s17916_s3 + $0x400] ss:$16 sps:$4 sm:$0xff]  }
 0x29f   : > { %9079 = vmatprep.subr.bf16.mxu0 %v12442_v4  ;;  %9122 = vmatprep.subr.bf16.mxu1 %v12445_v41  ;;  %v16957_v40 = vpop.f32.mrf.mxu0  ;;  %v16959_v39 = vpop.f32.mrf.mxu1  ;;  %v12455_v31 = vld [vmem:[%s17916_s3 + $0x600] ss:$16 sps:$4 sm:$0xff]   ;;  %v12460_v4 = vld [vmem:[%s17916_s3 + $0x5e4] ss:$16 sps:$4 sm:$0xff]  }
 0x2a0   : > { %v12463_v41 = vld [vmem:[%s17916_s3 + $0x7e4] ss:$16 sps:$4 sm:$0xff]  }
 0x2a1   : > { %v16961_v37 = vpop.f32.mrf.mxu0  ;;  %v16963_v51 = vpop.f32.mrf.mxu1 }
 0x2a2   : > { %9080 = vmatpush1.bf16.msra.mxu0 %v12440_v49  ;;  %9123 = vmatpush1.bf16.msra.mxu1 %v12443_v25 }
 0x2a3   : > { %9081 = vmatprep.subr.bf16.mxu0 %v12448_v20  ;;  %9124 = vmatprep.subr.bf16.mxu1 %v12451_v45  ;;  %v16977_v38 = vpop.f32.mrf.mxu0  ;;  %v16979_v13 = vpop.f32.mrf.mxu1 }
 0x2a5   : > { %v16981_v5 = vpop.f32.mrf.mxu0  ;;  %v16983_v44 = vpop.f32.mrf.mxu1 }
 0x2a6   : > { %9082 = vmatpush1.bf16.msra.mxu0 %v12446_v54  ;;  %9125 = vmatpush1.bf16.msra.mxu1 %v12449_v57  ;;  %v12458_v54 = vld [vmem:[%s17916_s3 + $0x5e0] ss:$16 sps:$4 sm:$0xff]  }
 0x2a7   : > { %9083 = vmatprep.subr.bf16.mxu0 %v12454_v36  ;;  %9126 = vmatprep.subr.bf16.mxu1 %v12457_v24  ;;  %v16997_v49 = vpop.f32.mrf.mxu0  ;;  %v16999_v25 = vpop.f32.mrf.mxu1  ;;  %v12461_v57 = vld [vmem:[%s17916_s3 + $0x7e0] ss:$16 sps:$4 sm:$0xff]   ;;  %v12466_v24 = vld [vmem:[%s17916_s3 + $0x5c4] ss:$16 sps:$4 sm:$0xff]  }
 0x2a9   : > { %v6797_v20 = vpop.f32.mrf.mxu0  ;;  %v6870_v45 = vpop.f32.mrf.mxu1 }
 0x2aa   : > { %9084 = vmatpush1.bf16.msra.mxu0 %v12452_v56  ;;  %9127 = vmatpush1.bf16.msra.mxu1 %v12455_v31  ;;  %v17007_v36 = vadd.f32 %v6870_v45, %v6797_v20  ;;  %v12469_v56 = vld [vmem:[%s17916_s3 + $0x7c4] ss:$16 sps:$4 sm:$0xff]   ;;  %v12464_v20 = vld [vmem:[%s17916_s3 + $0x5c0] ss:$16 sps:$4 sm:$0xff]  }
 0x2ab   : > { %9085 = vmatprep.subr.bf16.mxu0 %v12460_v4  ;;  %9128 = vmatprep.subr.bf16.mxu1 %v12463_v41  ;;  %v6799_v31 = vpop.f32.mrf.mxu0  ;;  %v6872_v52 = vpop.f32.mrf.mxu1  ;;  %v12467_v4 = vld [vmem:[%s17916_s3 + $0x7c0] ss:$16 sps:$4 sm:$0xff]   ;;  %v12472_v41 = vld [vmem:[%s17916_s3 + $0x5a4] ss:$16 sps:$4 sm:$0xff]  }
 0x2ac   : > { %18081 = vst [vmem:[#allocation31_spill] sm:$0xff] %v17007_v36  ;;  %v17015_v18 = vadd.f32 %v6872_v52, %v6799_v31  ;;  %v12475_v52 = vld [vmem:[%s17916_s3 + $0x7a4] ss:$16 sps:$4 sm:$0xff]   ;;  %v12470_v45 = vld [vmem:[%s17916_s3 + $0x5a0] ss:$16 sps:$4 sm:$0xff]  }
 0x2ad   : > { %v12479_v31 = vld [vmem:[%s17916_s3 + $0x780] ss:$16 sps:$4 sm:$0xff]   ;;  %v12575_v36 = vld [vmem:[%s17916_s3 + $0x388] ss:$16 sps:$4 sm:$0xff]  }
 0x2ae   : > { %18082 = vst [vmem:[#allocation25_spill] sm:$0xff] %v17015_v18  ;;  %9086 = vmatpush2.bf16.msra.mxu0 %v12458_v54  ;;  %9129 = vmatpush2.bf16.msra.mxu1 %v12461_v57  ;;  %v12473_v54 = vld [vmem:[%s17916_s3 + $0x7a0] ss:$16 sps:$4 sm:$0xff]   ;;  %v12478_v57 = vld [vmem:[%s17916_s3 + $0x584] ss:$16 sps:$4 sm:$0xff]  }
 0x2af   : > { %9087 = vmatprep.subr.bf16.mxu0 %v12466_v24  ;;  %9130 = vmatprep.subr.bf16.mxu1 %v12469_v56  ;;  %v12481_v24 = vld [vmem:[%s17916_s3 + $0x784] ss:$16 sps:$4 sm:$0xff]   ;;  %v12476_v56 = vld [vmem:[%s17916_s3 + $0x580] ss:$16 sps:$4 sm:$0xff]   ;;  %v12550_v18 = vld [vmem:[%s17916_s3 + $0xc] ss:$16 sps:$4 sm:$0xff]  }
 0x2b2   : > { %9088 = vmatpush2.bf16.msra.mxu0 %v12464_v20  ;;  %9131 = vmatpush2.bf16.msra.mxu1 %v12467_v4  ;;  %v12484_v20 = vld [vmem:[%s17916_s3 + $0x564] ss:$16 sps:$4 sm:$0xff]  }
 0x2b3   : > { %9089 = vmatprep.subr.bf16.mxu0 %v12472_v41  ;;  %9132 = vmatprep.subr.bf16.mxu1 %v12475_v52  ;;  %v12487_v4 = vld [vmem:[%s17916_s3 + $0x764] ss:$16 sps:$4 sm:$0xff]   ;;  %v12482_v41 = vld [vmem:[%s17916_s3 + $0x560] ss:$16 sps:$4 sm:$0xff]  }
 0x2b4   : > { %v12485_v52 = vld [vmem:[%s17916_s3 + $0x760] ss:$16 sps:$4 sm:$0xff]  }
 0x2b6   : > { %9090 = vmatpush2.bf16.msra.mxu0 %v12470_v45  ;;  %9133 = vmatpush2.bf16.msra.mxu1 %v12473_v54  ;;  %v12490_v45 = vld [vmem:[%s17916_s3 + $0x544] ss:$16 sps:$4 sm:$0xff]  }
 0x2b7   : > { %9091 = vmatprep.subr.bf16.mxu0 %v12478_v57  ;;  %9134 = vmatprep.subr.bf16.mxu1 %v12481_v24  ;;  %v12493_v54 = vld [vmem:[%s17916_s3 + $0x744] ss:$16 sps:$4 sm:$0xff]   ;;  %v12488_v57 = vld [vmem:[%s17916_s3 + $0x540] ss:$16 sps:$4 sm:$0xff]  }
 0x2b8   : > { %v12491_v24 = vld [vmem:[%s17916_s3 + $0x740] ss:$16 sps:$4 sm:$0xff]  }
 0x2ba   : > { %9092 = vmatpush2.bf16.msra.mxu0 %v12476_v56  ;;  %9135 = vmatpush2.bf16.msra.mxu1 %v12479_v31  ;;  %v12496_v56 = vld [vmem:[%s17916_s3 + $0x524] ss:$16 sps:$4 sm:$0xff]  }
 0x2bb   : > { %9093 = vmatprep.subr.bf16.mxu0 %v12484_v20  ;;  %9136 = vmatprep.subr.bf16.mxu1 %v12487_v4  ;;  %v12499_v31 = vld [vmem:[%s17916_s3 + $0x724] ss:$16 sps:$4 sm:$0xff]   ;;  %v12494_v20 = vld [vmem:[%s17916_s3 + $0x520] ss:$16 sps:$4 sm:$0xff]  }
 0x2bc   : > { %v12497_v4 = vld [vmem:[%s17916_s3 + $0x720] ss:$16 sps:$4 sm:$0xff]  }
 0x2be   : > { %9094 = vmatpush2.bf16.msra.mxu0 %v12482_v41  ;;  %9137 = vmatpush2.bf16.msra.mxu1 %v12485_v52  ;;  %v12502_v41 = vld [vmem:[%s17916_s3 + $0x504] ss:$16 sps:$4 sm:$0xff]  }
 0x2bf   : > { %9095 = vmatprep.subr.bf16.mxu0 %v12490_v45  ;;  %9138 = vmatprep.subr.bf16.mxu1 %v12493_v54  ;;  %v12505_v52 = vld [vmem:[%s17916_s3 + $0x704] ss:$16 sps:$4 sm:$0xff]   ;;  %v12500_v45 = vld [vmem:[%s17916_s3 + $0x500] ss:$16 sps:$4 sm:$0xff]  }
 0x2c0   : > { %v12503_v54 = vld [vmem:[%s17916_s3 + $0x700] ss:$16 sps:$4 sm:$0xff]  }
 0x2c2   : > { %9096 = vmatpush2.bf16.msra.mxu0 %v12488_v57  ;;  %9139 = vmatpush2.bf16.msra.mxu1 %v12491_v24  ;;  %v12508_v57 = vld [vmem:[%s17916_s3 + $0xec] ss:$16 sps:$4 sm:$0xff]  }
 0x2c3   : > { %9097 = vmatprep.subr.bf16.mxu0 %v12496_v56  ;;  %9140 = vmatprep.subr.bf16.mxu1 %v12499_v31  ;;  %v12511_v24 = vld [vmem:[%s17916_s3 + $0x2ec] ss:$16 sps:$4 sm:$0xff]   ;;  %v17103_v56 = vcombine.low %v16818_v46, %v16829_v17  ;;  %v17107_v31 = vcombine.low %v16832_v10, %v16835_v0  ;;  %v12512_v10 = vld [vmem:[%s17916_s3 + $0xc8] ss:$16 sps:$4 sm:$0xff]  }
 0x2c4   : > { %v12514_v46 = vld [vmem:[%s17916_s3 + $0xcc] ss:$16 sps:$4 sm:$0xff]   ;;  %v12515_v0 = vld [vmem:[%s17916_s3 + $0x2c8] ss:$16 sps:$4 sm:$0xff]  }
 0x2c5   : > { %18083 = vst [vmem:[#allocation26_spill] sm:$0xff] %v17103_v56  ;;  %18084 = vst [vmem:[#allocation8_spill] sm:$0xff] %v17107_v31  ;;  %v12517_v17 = vld [vmem:[%s17916_s3 + $0x2cc] ss:$16 sps:$4 sm:$0xff]  }
 0x2c6   : > { %9098 = vmatpush2.bf16.msra.mxu0 %v12494_v20  ;;  %9141 = vmatpush2.bf16.msra.mxu1 %v12497_v4  ;;  %v12506_v20 = vld [vmem:[%s17916_s3 + $0xe8] ss:$16 sps:$4 sm:$0xff]  }
 0x2c7   : > { %9099 = vmatprep.subr.bf16.mxu0 %v12502_v41  ;;  %9142 = vmatprep.subr.bf16.mxu1 %v12505_v52  ;;  %v12509_v4 = vld [vmem:[%s17916_s3 + $0x2e8] ss:$16 sps:$4 sm:$0xff]   ;;  %v12520_v52 = vld [vmem:[%s17916_s3 + $0xac] ss:$16 sps:$4 sm:$0xff]  }
 0x2ca   : > { %9100 = vmatpush2.bf16.msra.mxu0 %v12500_v45  ;;  %9143 = vmatpush2.bf16.msra.mxu1 %v12503_v54  ;;  %v12523_v45 = vld [vmem:[%s17916_s3 + $0x2ac] ss:$16 sps:$4 sm:$0xff]  }
 0x2cb   : > { %9155 = vmatprep.subr.bf16.mxu0 %v12508_v57  ;;  %9198 = vmatprep.subr.bf16.mxu1 %v12511_v24  ;;  %v12518_v57 = vld [vmem:[%s17916_s3 + $0xa8] ss:$16 sps:$4 sm:$0xff]  }
 0x2cc   : > { %v12521_v24 = vld [vmem:[%s17916_s3 + $0x2a8] ss:$16 sps:$4 sm:$0xff]  }
 0x2cd   : > { %9102 = vmatmul.mubr.bf16.vlgmr.msra.gmra.mxu0 %v17103_v56  ;;  %9145 = vmatmul.mubr.bf16.vlgmr.msra.gmra.mxu1 %v17107_v31  ;;  %v17129_v41 = vpop.f32.mrf.mxu0  ;;  %v17139_v54 = vpop.f32.mrf.mxu1  ;;  %v12536_v31 = vld [vmem:[%s17916_s3 + $0x48] ss:$16 sps:$4 sm:$0xff]  }
 0x2ce   : > { %9156 = vmatpush1.bf16.msra.mxu0 %v12506_v20  ;;  %9199 = vmatpush1.bf16.msra.mxu1 %v12509_v4 }
 0x2cf   : > { %9157 = vmatprep.subr.bf16.mxu0 %v12514_v46  ;;  %9200 = vmatprep.subr.bf16.mxu1 %v12517_v17  ;;  %v17147_v20 = vpop.f32.mrf.mxu0  ;;  %v17155_v4 = vpop.f32.mrf.mxu1  ;;  %v12524_v46 = vld [vmem:[%s17916_s3 + $0x88] ss:$16 sps:$4 sm:$0xff]  }
 0x2d0   : > { %9187 = vmatprep.mubr.bf16.mxu0 %v16687_v14  ;;  %9230 = vmatprep.mubr.bf16.mxu1 %v16691_v35  ;;  %v12526_v14 = vld [vmem:[%s17916_s3 + $0x8c] ss:$16 sps:$4 sm:$0xff]   ;;  %v12527_v17 = vld [vmem:[%s17916_s3 + $0x288] ss:$16 sps:$4 sm:$0xff]  }
 0x2d1   : > { %v12529_v35 = vld [vmem:[%s17916_s3 + $0x28c] ss:$16 sps:$4 sm:$0xff]  }
 0x2d2   : > { %9158 = vmatpush1.bf16.msra.mxu0 %v12512_v10  ;;  %9201 = vmatpush1.bf16.msra.mxu1 %v12515_v0  ;;  %v17163_v10 = vpop.f32.mrf.mxu0  ;;  %v12532_v0 = vld [vmem:[%s17916_s3 + $0x6c] ss:$16 sps:$4 sm:$0xff]  }
 0x2d3   : > { %9159 = vmatprep.subr.bf16.mxu0 %v12520_v52  ;;  %9202 = vmatprep.subr.bf16.mxu1 %v12523_v45  ;;  %v12535_v52 = vld [vmem:[%s17916_s3 + $0x26c] ss:$16 sps:$4 sm:$0xff]   ;;  %v17171_v45 = vpop.f32.mrf.mxu1 }
 0x2d6   : > { %9160 = vmatpush1.bf16.msra.mxu0 %v12518_v57  ;;  %9203 = vmatpush1.bf16.msra.mxu1 %v12521_v24  ;;  %v12530_v57 = vld [vmem:[%s17916_s3 + $0x68] ss:$16 sps:$4 sm:$0xff]  }
 0x2d7   : > { %9161 = vmatprep.subr.bf16.mxu0 %v12526_v14  ;;  %9204 = vmatprep.subr.bf16.mxu1 %v12529_v35  ;;  %v12533_v24 = vld [vmem:[%s17916_s3 + $0x268] ss:$16 sps:$4 sm:$0xff]   ;;  %v17179_v14 = vpop.f32.mrf.mxu0  ;;  %v12538_v35 = vld [vmem:[%s17916_s3 + $0x4c] ss:$16 sps:$4 sm:$0xff]  }
 0x2da   : > { %9162 = vmatpush1.bf16.msra.mxu0 %v12524_v46  ;;  %9205 = vmatpush1.bf16.msra.mxu1 %v12527_v17  ;;  %v12541_v46 = vld [vmem:[%s17916_s3 + $0x24c] ss:$16 sps:$4 sm:$0xff]   ;;  %v17187_v17 = vpop.f32.mrf.mxu1 }
 0x2db   : > { %9163 = vmatprep.subr.bf16.mxu0 %v12532_v0  ;;  %9206 = vmatprep.subr.bf16.mxu1 %v12535_v52  ;;  %v12539_v0 = vld [vmem:[%s17916_s3 + $0x248] ss:$16 sps:$4 sm:$0xff]   ;;  %v17195_v52 = vpop.f32.mrf.mxu0 }
 0x2dc   : > { %v17197_v56 = vpop.f32.mrf.mxu1 }
 0x2de   : > { %9164 = vmatpush1.bf16.msra.mxu0 %v12530_v57  ;;  %9207 = vmatpush1.bf16.msra.mxu1 %v12533_v24  ;;  %v12547_v57 = vld [vmem:[%s17916_s3 + $0x22c] ss:$16 sps:$4 sm:$0xff]   ;;  %v12542_v24 = vld [vmem:[%s17916_s3 + $0x28] ss:$16 sps:$4 sm:$0xff]  }
 0x2df   : > { %9165 = vmatprep.subr.bf16.mxu0 %v12538_v35  ;;  %9208 = vmatprep.subr.bf16.mxu1 %v12541_v46  ;;  %v17211_v35 = vpop.f32.mrf.mxu0  ;;  %v17213_v46 = vpop.f32.mrf.mxu1 }
 0x2e2   : > { %9166 = vmatpush1.bf16.msra.mxu0 %v12536_v31  ;;  %9209 = vmatpush1.bf16.msra.mxu1 %v12539_v0  ;;  %v12553_v31 = vld [vmem:[%s17916_s3 + $0x20c] ss:$16 sps:$4 sm:$0xff]   ;;  %v12548_v0 = vld [vmem:[%s17916_s3 + $0x8] ss:$16 sps:$4 sm:$0xff]  }
 0x2e3   : > { %9167 = vmatprep.subr.bf16.mxu0 %v12544_v9  ;;  %9210 = vmatprep.subr.bf16.mxu1 %v12547_v57  ;;  %v17227_v9 = vpop.f32.mrf.mxu0  ;;  %v17229_v57 = vpop.f32.mrf.mxu1 }
 0x2e6   : > { %9168 = vmatpush1.bf16.msra.mxu0 %v12542_v24  ;;  %9211 = vmatpush1.bf16.msra.mxu1 %v12545_v42  ;;  %v12559_v42 = vld [vmem:[%s17916_s3 + $0x3ec] ss:$16 sps:$4 sm:$0xff]   ;;  %v12554_v24 = vld [vmem:[%s17916_s3 + $0x1e8] ss:$16 sps:$4 sm:$0xff]  }
 0x2e7   : > { %9169 = vmatprep.subr.bf16.mxu0 %v12550_v18  ;;  %9212 = vmatprep.subr.bf16.mxu1 %v12553_v31  ;;  %v17243_v18 = vpop.f32.mrf.mxu0  ;;  %v17245_v31 = vpop.f32.mrf.mxu1 }
 0x2e8   : > { %18085 = vst [vmem:[#allocation16_spill] sm:$0xff] %v17245_v31  ;;  %v6841_v31 = vadd.f32 %v16883_v3, %v16881_v47  ;;  %v6847_v47 = vadd.f32 %v16903_v7, %v16901_v8  ;;  %v6857_v8 = vadd.f32 %v16943_v32, %v16941_v6  ;;  %v12610_v32 = vld [vmem:[%s17916_s3 + $0x4cc] ss:$16 sps:$4 sm:$0xff]  }
 0x2ea   : > { %9170 = vmatpush1.bf16.msra.mxu0 %v12548_v0  ;;  %9213 = vmatpush1.bf16.msra.mxu1 %v12551_v62  ;;  %v12565_v62 = vld [vmem:[%s17916_s3 + $0x3cc] ss:$16 sps:$4 sm:$0xff]   ;;  %v12560_v0 = vld [vmem:[%s17916_s3 + $0x1c8] ss:$16 sps:$4 sm:$0xff]  }
 0x2eb   : > { %9171 = vmatprep.subr.bf16.mxu0 %v12556_v1  ;;  %9214 = vmatprep.subr.bf16.mxu1 %v12559_v42  ;;  %v17259_v1 = vpop.f32.mrf.mxu0  ;;  %v17261_v42 = vpop.f32.mrf.mxu1 }
 0x2ec   : > { %18086 = vst [vmem:[#allocation17_spill] sm:$0xff] %v17261_v42  ;;  %v12592_v42 = vld [vmem:[%s17916_s3 + $0x12c] ss:$16 sps:$4 sm:$0xff]  }
 0x2ee   : > { %9172 = vmatpush2.bf16.msra.mxu0 %v12554_v24  ;;  %9215 = vmatpush2.bf16.msra.mxu1 %v12557_v11  ;;  %v12571_v11 = vld [vmem:[%s17916_s3 + $0x3ac] ss:$16 sps:$4 sm:$0xff]   ;;  %v12566_v24 = vld [vmem:[%s17916_s3 + $0x1a8] ss:$16 sps:$4 sm:$0xff]  }
 0x2ef   : > { %9173 = vmatprep.subr.bf16.mxu0 %v12562_v28  ;;  %9216 = vmatprep.subr.bf16.mxu1 %v12565_v62  ;;  %v17275_v28 = vpop.f32.mrf.mxu0  ;;  %v17277_v62 = vpop.f32.mrf.mxu1 }
 0x2f0   : > { %18087 = vst [vmem:[#allocation20_spill] sm:$0xff] %v17277_v62  ;;  %v12584_v62 = vld [vmem:[%s17916_s3 + $0x148] ss:$16 sps:$4 sm:$0xff]  }
 0x2f2   : > { %9174 = vmatpush2.bf16.msra.mxu0 %v12560_v0  ;;  %9217 = vmatpush2.bf16.msra.mxu1 %v12563_v60  ;;  %v12577_v60 = vld [vmem:[%s17916_s3 + $0x38c] ss:$16 sps:$4 sm:$0xff]   ;;  %v12572_v0 = vld [vmem:[%s17916_s3 + $0x188] ss:$16 sps:$4 sm:$0xff]  }
 0x2f3   : > { %9175 = vmatprep.subr.bf16.mxu0 %v12568_v33  ;;  %9218 = vmatprep.subr.bf16.mxu1 %v12571_v11  ;;  %v17291_v33 = vpop.f32.mrf.mxu0  ;;  %v17293_v11 = vpop.f32.mrf.mxu1 }
 0x2f4   : > { %18088 = vst [vmem:[#allocation21_spill] sm:$0xff] %v17293_v11  ;;  %v12586_v11 = vld [vmem:[%s17916_s3 + $0x14c] ss:$16 sps:$4 sm:$0xff]  }
 0x2f6   : > { %9176 = vmatpush2.bf16.msra.mxu0 %v12566_v24  ;;  %9219 = vmatpush2.bf16.msra.mxu1 %v12569_v22  ;;  %v12583_v22 = vld [vmem:[%s17916_s3 + $0x36c] ss:$16 sps:$4 sm:$0xff]   ;;  %v12578_v24 = vld [vmem:[%s17916_s3 + $0x168] ss:$16 sps:$4 sm:$0xff]  }
 0x2f7   : > { %9177 = vmatprep.subr.bf16.mxu0 %v12574_v26  ;;  %9220 = vmatprep.subr.bf16.mxu1 %v12577_v60  ;;  %v17307_v26 = vpop.f32.mrf.mxu0  ;;  %v17309_v60 = vpop.f32.mrf.mxu1 }
 0x2f8   : > { %18089 = vst [vmem:[#allocation18_spill] sm:$0xff] %v17307_v26  ;;  %18090 = vst [vmem:[#allocation19_spill] sm:$0xff] %v17309_v60  ;;  %v12596_v26 = vld [vmem:[%s17916_s3 + $0x108] ss:$16 sps:$4 sm:$0xff]  }
 0x2f9   : > { %v17325_v60 = vpop.f32.mrf.mxu1 }
 0x2fa   : > { %9178 = vmatpush2.bf16.msra.mxu0 %v12572_v0  ;;  %9221 = vmatpush2.bf16.msra.mxu1 %v12575_v36  ;;  %v12589_v36 = vld [vmem:[%s17916_s3 + $0x34c] ss:$16 sps:$4 sm:$0xff]   ;;  %v7185_v0 = vlaneseq  ;;  %18092 = vst [vmem:[#allocation23_spill] sm:$0xff] %v17325_v60 }
 0x2fb   : > { %9179 = vmatprep.subr.bf16.mxu0 %v12580_v50  ;;  %9222 = vmatprep.subr.bf16.mxu1 %v12583_v22  ;;  %v12587_v50 = vld [vmem:[%s17916_s3 + $0x348] ss:$16 sps:$4 sm:$0xff]   ;;  %v17323_v22 = vpop.f32.mrf.mxu0  ;;  %v17343_v60 = vpop.f32.mrf.mxu1 }
 0x2fc   : > { %18091 = vst [vmem:[#allocation22_spill] sm:$0xff] %v17323_v22  ;;  %18095 = vst [vmem:[#allocation32_spill] sm:$0xff] %v17343_v60  ;;  %v7183_v22 = vld [vmem:[%s17917_s4] sm:$0x3]  ;;  %v6839_v60 = vadd.f32 %v16871_v19, %v16869_v55  ;;  %v12604_v55 = vld [vmem:[%s17916_s3 + $0x4ec] ss:$16 sps:$4 sm:$0xff]  }
 0x2fd   : > { %v12607_v19 = vld [vmem:[%s17916_s3 + $0x6ec] ss:$16 sps:$4 sm:$0xff]  }
 0x2fe   : > { %9180 = vmatpush2.bf16.msra.mxu0 %v12578_v24  ;;  %9223 = vmatpush2.bf16.msra.mxu1 %v12581_v58  ;;  %v12595_v58 = vld [vmem:[%s17916_s3 + $0x32c] ss:$16 sps:$4 sm:$0xff]   ;;  %v17333_v24 = vshrl.u32 %v7185_v0, 7  ;;  %v6912_v7 = vadd.f32 %v17147_v20, %v6839_v60 }
 0x2ff   : > { %9181 = vmatprep.subr.bf16.mxu0 %v12586_v11  ;;  %9224 = vmatprep.subr.bf16.mxu1 %v12589_v36  ;;  %v12593_v11 = vld [vmem:[%s17916_s3 + $0x328] ss:$16 sps:$4 sm:$0xff]   ;;  %v17341_v36 = vpop.f32.mrf.mxu0  ;;  %v12598_v0 = vld [vmem:[%s17916_s3 + $0x10c] ss:$16 sps:$4 sm:$0xff]  }
 0x300   : > { %18093 = vst [vmem:[#allocation24_spill] sm:$0xff] %v17333_v24  ;;  %18094 = vst [vmem:[#allocation9_spill] sm:$0xff] %v17341_v36  ;;  %v17358_v36 = vsub.s32 1, %v17333_v24  ;;  %v12613_v20 = vld [vmem:[%s17916_s3 + $0x6cc] ss:$16 sps:$4 sm:$0xff]  }
 0x302   : > { %9182 = vmatpush2.bf16.msra.mxu0 %v12584_v62  ;;  %9225 = vmatpush2.bf16.msra.mxu1 %v12587_v50  ;;  %v12601_v62 = vld [vmem:[%s17916_s3 + $0x30c] ss:$16 sps:$4 sm:$0xff]   ;;  %v17352_v50 = vsub.s32 0, %v17333_v24  ;;  %v12599_v24 = vld [vmem:[%s17916_s3 + $0x308] ss:$16 sps:$4 sm:$0xff]   ;;  %v17397_v43 = vrot.slane %v7183_v22, %v17358_v36 }
 0x303   : > { %9183 = vmatprep.subr.bf16.mxu0 %v12592_v42  ;;  %9226 = vmatprep.subr.bf16.mxu1 %v12595_v58  ;;  %v7211_v42 = vld [vmem:[%s17918_s5] sm:$0x3]  ;;  %v6837_v58 = vadd.f32 %v16859_v48, %v16857_v53  ;;  %v17377_v53 = vpop.f32.mrf.mxu0  ;;  %v17379_v48 = vpop.f32.mrf.mxu1 }
 0x304   : > { %18096 = vst [vmem:[#allocation33_spill] sm:$0xff] %v17379_v48  ;;  %v17394_v23 = vrot.slane %v7211_v42, %v17352_v50  ;;  %v17406_v48 = vrot.slane %v7211_v42, %v17358_v36 }
 0x305   : > { %v6910_v3 = vadd.f32 %v17129_v41, %v6837_v58  ;;  %v6914_v41 = vadd.f32 %v17163_v10, %v6841_v31  ;;  %v17424_v6 = vpop.f32.mrf.mxu1  ;;  %v18097_v58 = vld [vmem:[#allocation12_spill] sm:$0xff] }
 0x306   : > { %9184 = vmatpush2.bf16.msra.mxu0 %v12590_v30  ;;  %9227 = vmatpush2.bf16.msra.mxu1 %v12593_v11  ;;  %v17382_v30 = vrot.slane %v7183_v22, %v17352_v50  ;;  %v6849_v11 = vadd.f32 %v16919_v61, %v16917_v21  ;;  %v12602_v21 = vld [vmem:[%s17916_s3 + $0x4e8] ss:$16 sps:$4 sm:$0xff]  }
 0x307   : > { %9185 = vmatprep.subr.bf16.mxu0 %v12598_v0  ;;  %9228 = vmatprep.subr.bf16.mxu1 %v12601_v62  ;;  %v6851_v0 = vadd.f32 %v16923_v15, %v16921_v2  ;;  %v6853_v62 = vadd.f32 %v16939_v59, %v16937_v63  ;;  %v12605_v61 = vld [vmem:[%s17916_s3 + $0x6e8] ss:$16 sps:$4 sm:$0xff]   ;;  %v6859_v2 = vadd.f32 %v16959_v39, %v16957_v40  ;;  %v17422_v59 = vpop.f32.mrf.mxu0 }
 0x308   : > { %v6916_v15 = vadd.f32 %v17179_v14, %v6843_v34  ;;  %v6920_v63 = vadd.f32 %v17195_v52, %v6847_v47  ;;  %v6861_v40 = vadd.f32 %v16963_v51, %v16961_v37  ;;  %v6863_v34 = vadd.f32 %v16979_v13, %v16977_v38  ;;  %v12608_v13 = vld [vmem:[%s17916_s3 + $0x4c8] ss:$16 sps:$4 sm:$0xff]  }
 0x309   : > { %v6983_v39 = vadd.f32 %v17139_v54, %v6910_v3  ;;  %v6922_v10 = vadd.f32 %v17211_v35, %v6849_v11  ;;  %v6867_v14 = vadd.f32 %v16983_v44, %v16981_v5  ;;  %v6869_v52 = vadd.f32 %v16999_v25, %v16997_v49  ;;  %v12611_v5 = vld [vmem:[%s17916_s3 + $0x6c8] ss:$16 sps:$4 sm:$0xff]   ;;  %v12616_v54 = vld [vmem:[%s17916_s3 + $0x4ac] ss:$16 sps:$4 sm:$0xff]  }
 0x30a   : > { %9186 = vmatpush2.bf16.msra.mxu0 %v12596_v26  ;;  %9229 = vmatpush2.bf16.msra.mxu1 %v12599_v24  ;;  %v6924_v31 = vadd.f32 %v17227_v9, %v6851_v0  ;;  %v6985_v37 = vadd.f32 %v17155_v4, %v6912_v7  ;;  %v6987_v51 = vadd.f32 %v17171_v45, %v6914_v41  ;;  %v12619_v4 = vld [vmem:[%s17916_s3 + $0x6ac] ss:$16 sps:$4 sm:$0xff]   ;;  %v12617_v0 = vld [vmem:[%s17916_s3 + $0x6a8] ss:$16 sps:$4 sm:$0xff]  }
 0x30b   : > { %9241 = vmatprep.subr.bf16.mxu0 %v12604_v55  ;;  %9284 = vmatprep.subr.bf16.mxu1 %v12607_v19  ;;  %v6989_v44 = vadd.f32 %v17187_v17, %v6916_v15  ;;  %v6995_v45 = vadd.f32 %v17213_v46, %v6922_v10  ;;  %v6930_v9 = vadd.f32 %v17259_v1, %v6857_v8  ;;  %v18099_v1 = vld [vmem:[#allocation18_spill] sm:$0xff]  ;;  %v18101_v7 = vld [vmem:[#allocation13_spill] sm:$0xff] }
 0x30c   : > { %v6934_v22 = vadd.f32 %v17291_v33, %v6861_v40  ;;  %v6936_v47 = vadd.f32 %v18099_v1, %v6863_v34  ;;  %v18102_v15 = vld [vmem:[#allocation17_spill] sm:$0xff] }
 0x30d   : > { %v7055_v26 = vpop.f32.mrf.mxu0  ;;  %v7128_v60 = vpop.f32.mrf.mxu1  ;;  %9188 = vmatmul.mubr.bf16.vlgmr.msra.gmra.mxu0 %v16822_v16  ;;  %9231 = vmatmul.mubr.bf16.vlgmr.msra.gmra.mxu1 %v16826_v27  ;;  %v6993_v16 = vadd.f32 %v17197_v56, %v6920_v63  ;;  %v6926_v27 = vadd.f32 %v17243_v18, %v6853_v62  ;;  %v17466_v56 = vadd.f32 %v17229_v57, %v6924_v31  ;;  %v12622_v62 = vld [vmem:[%s17916_s3 + $0x48c] ss:$16 sps:$4 sm:$0xff]  }
 0x30e   : > { %v7056_v38 = vadd.f32 %v7055_v26, %v6983_v39  ;;  %9242 = vmatpush1.bf16.msra.mxu0 %v12602_v21  ;;  %9285 = vmatpush1.bf16.msra.mxu1 %v12605_v61  ;;  %v6932_v18 = vadd.f32 %v17275_v28, %v6859_v2  ;;  %v18100_v28 = vld [vmem:[#allocation22_spill] sm:$0xff]  ;;  %v12625_v2 = vld [vmem:[%s17916_s3 + $0x68c] ss:$16 sps:$4 sm:$0xff]   ;;  %v17492_v63 = vadd.f32 %v18102_v15, %v6930_v9 }
 0x30f   : > { %v7057_v49 = vpop.f32.mrf.mxu0  ;;  %v7130_v25 = vpop.f32.mrf.mxu1  ;;  %9243 = vmatprep.subr.bf16.mxu0 %v12610_v32  ;;  %9286 = vmatprep.subr.bf16.mxu1 %v12613_v20  ;;  %v6940_v3 = vadd.f32 %v18100_v28, %v6867_v14  ;;  %v18103_v32 = vld [vmem:[#allocation20_spill] sm:$0xff]  ;;  %v18104_v40 = vld [vmem:[#allocation21_spill] sm:$0xff] }
 0x310   : > { %v7129_v35 = vadd.f32 %v7128_v60, %v7056_v38  ;;  %v7058_v17 = vadd.f32 %v7057_v49, %v6985_v37  ;;  %9273 = vmatprep.mubr.bf16.mxu0 %v16851_v29  ;;  %9316 = vmatprep.mubr.bf16.mxu1 %v16855_v12  ;;  %v12614_v29 = vld [vmem:[%s17916_s3 + $0x4a8] ss:$16 sps:$4 sm:$0xff]   ;;  %v18098_v12 = vld [vmem:[#allocation16_spill] sm:$0xff]  ;;  %v17495_v20 = vadd.f32 %v18103_v32, %v6932_v18  ;;  %v18106_v37 = vld [vmem:[#allocation2_spill] sm:$0xff] }
 0x311   : > { %v7059_v24 = vpop.f32.mrf.mxu0  ;;  %v7132_v42 = vpop.f32.mrf.mxu1  ;;  %v17476_v57 = vadd.f32 %v18098_v12, %v6926_v27  ;;  %v17498_v34 = vadd.f32 %v18104_v40, %v6934_v22  ;;  %v18105_v39 = vld [vmem:[#allocation9_spill] sm:$0xff]  ;;  %v18108_v27 = vld [vmem:[#allocation23_spill] sm:$0xff] }
 0x312   : > { %v7167_v55 = vadd.f32 %v7129_v35, %v18097_v58  ;;  %v7131_v46 = vadd.f32 %v7130_v25, %v7058_v17  ;;  %v7060_v19 = vadd.f32 %v7059_v24, %v6987_v51  ;;  %9244 = vmatpush1.bf16.msra.mxu0 %v12608_v13  ;;  %9287 = vmatpush1.bf16.msra.mxu1 %v12611_v5  ;;  %v12620_v13 = vld [vmem:[%s17916_s3 + $0x488] ss:$16 sps:$4 sm:$0xff]   ;;  %v12628_v35 = vld [vmem:[%s17916_s3 + $0x46c] ss:$16 sps:$4 sm:$0xff]  }
 0x313   : > { %v7061_v33 = vpop.f32.mrf.mxu0  ;;  %v7134_v11 = vpop.f32.mrf.mxu1  ;;  %9245 = vmatprep.subr.bf16.mxu0 %v12616_v54  ;;  %9288 = vmatprep.subr.bf16.mxu1 %v12619_v4  ;;  %v6942_v10 = vadd.f32 %v18105_v39, %v6869_v52  ;;  %v18107_v5 = vld [vmem:[#allocation19_spill] sm:$0xff]  ;;  %v17513_v52 = vadd.f32 %v18108_v27, %v6940_v3  ;;  %v18113_v40 = vld [vmem:[#allocation5_spill] sm:$0xff] }
 0x314   : > { %v7195_v8 = vmul.f32 %v17382_v30, %v7167_v55  ;;  %v7168_v41 = vadd.f32 %v7131_v46, %v18101_v7  ;;  %v7133_v21 = vadd.f32 %v7132_v42, %v7060_v19  ;;  %v7062_v61 = vadd.f32 %v7061_v33, %v6989_v44  ;;  %v12623_v4 = vld [vmem:[%s17916_s3 + $0x688] ss:$16 sps:$4 sm:$0xff]   ;;  %v12631_v24 = vld [vmem:[%s17916_s3 + $0x66c] ss:$16 sps:$4 sm:$0xff]   ;;  %v18111_v55 = vld [vmem:[#allocation32_spill] sm:$0xff] }
 0x315   : > { %v7065_v14 = vpop.f32.mrf.mxu0  ;;  %v7138_v31 = vpop.f32.mrf.mxu1  ;;  %v17510_v44 = vadd.f32 %v18107_v5, %v6936_v47  ;;  %v18110_v42 = vld [vmem:[#allocation31_spill] sm:$0xff]  ;;  %v17535_v46 = vadd.f32 %v18111_v55, %v6942_v10 }
 0x316   : > { %v17502_v26 = vadd.f32 %v17394_v23, %v7195_v8  ;;  %v7196_v60 = vmul.f32 %v17397_v43, %v7168_v41  ;;  %v7169_v51 = vadd.f32 %v7133_v21, %v18106_v37  ;;  %v7135_v38 = vadd.f32 %v7134_v11, %v7062_v61  ;;  %9246 = vmatpush1.bf16.msra.mxu0 %v12614_v29  ;;  %v18112_v11 = vld [vmem:[#allocation27_spill] sm:$0xff] }
 0x317   : > { %v7066_v49 = vadd.f32 %v7065_v14, %v6993_v16  ;;  %9289 = vmatpush1.bf16.msra.mxu1 %v12617_v0  ;;  %v7067_v25 = vpop.f32.mrf.mxu0  ;;  %v7140_v54 = vpop.f32.mrf.mxu1  ;;  %9247 = vmatprep.subr.bf16.mxu0 %v12622_v62  ;;  %v18109_v16 = vld [vmem:[#allocation3_spill] sm:$0xff]  ;;  %v17532_v58 = vadd.f32 %v17377_v53, %v18110_v42 }
 0x318   : > { %v7239_v17 = vmin.f32 %v17502_v26, 20.0  ;;  %v17523_v9 = vadd.f32 %v17406_v48, %v7196_v60  ;;  %v7197_v18 = vmul.f32 %v17382_v30, %v7169_v51  ;;  %v7170_v22 = vadd.f32 %v7135_v38, %v18109_v16  ;;  %9290 = vmatprep.subr.bf16.mxu1 %v12625_v2  ;;  %v12626_v53 = vld [vmem:[%s17916_s3 + $0x468] ss:$16 sps:$4 sm:$0xff]   ;;  %v12634_v21 = vld [vmem:[%s17916_s3 + $0x44c] ss:$16 sps:$4 sm:$0xff]  }
 0x319   : > { %v7068_v19 = vadd.f32 %v7067_v25, %v6995_v45  ;;  %v7139_v29 = vadd.f32 %v7138_v31, %v7066_v49  ;;  %v7069_v12 = vpop.f32.mrf.mxu0  ;;  %v7142_v1 = vpop.f32.mrf.mxu1  ;;  %v12629_v41 = vld [vmem:[%s17916_s3 + $0x668] ss:$16 sps:$4 sm:$0xff]  }
 0x31a   : > { %v7255_v47 = vmul.f32 1.442695, %v7239_v17  ;;  %v7240_v28 = vmin.f32 %v17523_v9, 20.0  ;;  %v17539_v3 = vadd.f32 %v17394_v23, %v7197_v18  ;;  %v7198_v33 = vmul.f32 %v17397_v43, %v7170_v22  ;;  %9248 = vmatpush1.bf16.msra.mxu0 %v12620_v13  ;;  %v12632_v13 = vld [vmem:[%s17916_s3 + $0x448] ss:$16 sps:$4 sm:$0xff]  }
 0x31b   : > { %v7171_v0 = vadd.f32 %v7139_v29, %v18112_v11  ;;  %v7070_v45 = vadd.f32 %v7069_v12, %v17466_v56  ;;  %v7141_v62 = vadd.f32 %v7140_v54, %v7068_v19  ;;  %9291 = vmatpush1.bf16.msra.mxu1 %v12623_v4  ;;  %v7071_v8 = vpop.f32.mrf.mxu0  ;;  %v7144_v7 = vpop.f32.mrf.mxu1  ;;  %9249 = vmatprep.subr.bf16.mxu0 %v12628_v35  ;;  %v12637_v56 = vld [vmem:[%s17916_s3 + $0x64c] ss:$16 sps:$4 sm:$0xff]   ;;  %v18115_v19 = vld [vmem:[#allocation28_spill] sm:$0xff]  ;;  %v12641_v11 = vld [vmem:[%s17916_s3 + $0x628] ss:$16 sps:$4 sm:$0xff]  }
 0x31c   : > { %12698 = vpow2.f32 %v7255_v47  ;;  %v7257_v61 = vmul.f32 1.442695, %v7240_v28  ;;  %v7241_v2 = vmin.f32 %v17539_v3, 20.0  ;;  %v17555_v15 = vadd.f32 %v17406_v48, %v7198_v33  ;;  %9292 = vmatprep.subr.bf16.mxu1 %v12631_v24  ;;  %v12640_v35 = vld [vmem:[%s17916_s3 + $0x42c] ss:$16 sps:$4 sm:$0xff]  }
 0x31d   : > { %v7199_v32 = vmul.f32 %v17382_v30, %v7171_v0  ;;  %v7172_v39 = vadd.f32 %v7141_v62, %v18113_v40  ;;  %v7072_v10 = vadd.f32 %v7071_v8, %v17476_v57  ;;  %v7143_v14 = vadd.f32 %v7142_v1, %v7070_v45  ;;  %v7075_v31 = vpop.f32.mrf.mxu0  ;;  %v7148_v60 = vpop.f32.mrf.mxu1  ;;  %v18114_v57 = vld [vmem:[#allocation6_spill] sm:$0xff]  ;;  %v12643_v22 = vld [vmem:[%s17916_s3 + $0x62c] ss:$16 sps:$4 sm:$0xff]  }
 0x31e   : > { %12700 = vpow2.f32 %v7257_v61  ;;  %v7259_v37 = vmul.f32 1.442695, %v7241_v2  ;;  %v7242_v51 = vmin.f32 %v17555_v15, 20.0  ;;  %v7076_v38 = vadd.f32 %v7075_v31, %v17492_v63  ;;  %9250 = vmatpush1.bf16.msra.mxu0 %v12626_v53  ;;  %v12635_v63 = vld [vmem:[%s17916_s3 + $0x648] ss:$16 sps:$4 sm:$0xff]   ;;  %v18117_v61 = vld [vmem:[#allocation10_spill] sm:$0xff] }
 0x31f   : > { %v17569_v5 = vadd.f32 %v17394_v23, %v7199_v32  ;;  %v7200_v27 = vmul.f32 %v17397_v43, %v7172_v39  ;;  %v7173_v49 = vadd.f32 %v7143_v14, %v18114_v57  ;;  %v7145_v25 = vadd.f32 %v7144_v7, %v7072_v10  ;;  %9293 = vmatpush1.bf16.msra.mxu1 %v12629_v41  ;;  %v7077_v54 = vpop.f32.mrf.mxu0  ;;  %v7150_v4 = vpop.f32.mrf.mxu1  ;;  %v12638_v53 = vld [vmem:[%s17916_s3 + $0x428] ss:$16 sps:$4 sm:$0xff]   ;;  %v12646_v41 = vld [vmem:[%s17916_s3 + $0x40c] ss:$16 sps:$4 sm:$0xff]  }
 0x320   : > { %12702 = vpow2.f32 %v7259_v37  ;;  %v7261_v17 = vmul.f32 1.442695, %v7242_v51  ;;  %v7078_v18 = vadd.f32 %v7077_v54, %v17495_v20  ;;  %v7149_v16 = vadd.f32 %v7148_v60, %v7076_v38  ;;  %9251 = vmatprep.subr.bf16.mxu0 %v12634_v21  ;;  %9294 = vmatprep.subr.bf16.mxu1 %v12637_v56  ;;  %v18116_v20 = vld [vmem:[#allocation4_spill] sm:$0xff]  ;;  %v12649_v40 = vld [vmem:[%s17916_s3 + $0x60c] ss:$16 sps:$4 sm:$0xff]  }
 0x321   : > { %v7243_v24 = vmin.f32 %v17569_v5, 20.0  ;;  %v17585_v42 = vadd.f32 %v17406_v48, %v7200_v27  ;;  %v7201_v55 = vmul.f32 %v17382_v30, %v7173_v49  ;;  %v7174_v29 = vadd.f32 %v7145_v25, %v18115_v19  ;;  %v7079_v12 = vpop.f32.mrf.mxu0  ;;  %v7152_v1 = vpop.f32.mrf.mxu1  ;;  %v12644_v27 = vld [vmem:[%s17916_s3 + $0x408] ss:$16 sps:$4 sm:$0xff]  }
 0x322   : > { %12704 = vpow2.f32 %v7261_v17  ;;  %v7175_v47 = vadd.f32 %v7149_v16, %v18116_v20  ;;  %v7080_v28 = vadd.f32 %v7079_v12, %v17498_v34  ;;  %v7151_v33 = vadd.f32 %v7150_v4, %v7078_v18  ;;  %9252 = vmatpush1.bf16.msra.mxu0 %v12632_v13  ;;  %v12647_v57 = vld [vmem:[%s17916_s3 + $0x608] ss:$16 sps:$4 sm:$0xff]   ;;  %v12655_v16 = vld [vmem:[%s17916_s3 + $0x7ec] ss:$16 sps:$4 sm:$0xff]  }
 0x323   : > { %v7263_v0 = vmul.f32 1.442695, %v7243_v24  ;;  %v7244_v45 = vmin.f32 %v17585_v42, 20.0  ;;  %v17599_v62 = vadd.f32 %v17394_v23, %v7201_v55  ;;  %v7202_v8 = vmul.f32 %v17397_v43, %v7174_v29  ;;  %9295 = vmatpush1.bf16.msra.mxu1 %v12635_v63  ;;  %v7081_v34 = vpop.f32.mrf.mxu0  ;;  %v7154_v7 = vpop.f32.mrf.mxu1  ;;  %9253 = vmatprep.subr.bf16.mxu0 %v12640_v35  ;;  %v18119_v55 = vld [vmem:[#allocation15_spill] sm:$0xff] }
 0x324   : > { %v7203_v21 = vmul.f32 %v17382_v30, %v7175_v47  ;;  %v7176_v2 = vadd.f32 %v7151_v33, %v18117_v61  ;;  %v7082_v56 = vadd.f32 %v7081_v34, %v17510_v44  ;;  %v7153_v32 = vadd.f32 %v7152_v1, %v7080_v28  ;;  %9296 = vmatprep.subr.bf16.mxu1 %v12643_v22  ;;  %v18118_v44 = vld [vmem:[#allocation11_spill] sm:$0xff]  ;;  %v18120_v33 = vld [vmem:[#allocation25_spill] sm:$0xff] }
 0x325   : > { %12706 = vpow2.f32 %v7263_v0  ;;  %v7265_v39 = vmul.f32 1.442695, %v7244_v45  ;;  %v7245_v10 = vmin.f32 %v17599_v62, 20.0  ;;  %v17613_v14 = vadd.f32 %v17406_v48, %v7202_v8  ;;  %v7085_v31 = vpop.f32.mrf.mxu0  ;;  %v7158_v13 = vpop.f32.mrf.mxu1  ;;  %v18121_v0 = vld [vmem:[#allocation14_spill] sm:$0xff]  ;;  %v12653_v34 = vld [vmem:[%s17916_s3 + $0x7e8] ss:$16 sps:$4 sm:$0xff]  }
 0x326   : > { %v17616_v60 = vadd.f32 %v17394_v23, %v7203_v21  ;;  %v7204_v37 = vmul.f32 %v17397_v43, %v7176_v2  ;;  %v7177_v51 = vadd.f32 %v7153_v32, %v18118_v44  ;;  %v7086_v38 = vadd.f32 %v7085_v31, %v17513_v52  ;;  %9254 = vmatpush1.bf16.msra.mxu0 %v12638_v53  ;;  %v12652_v52 = vld [vmem:[%s17916_s3 + $0x5ec] ss:$16 sps:$4 sm:$0xff]  }
 0x327   : > { %12708 = vpow2.f32 %v7265_v39  ;;  %v7267_v49 = vmul.f32 1.442695, %v7245_v10  ;;  %v7246_v25 = vmin.f32 %v17613_v14, 20.0  ;;  %v7155_v54 = vadd.f32 %v7154_v7, %v7082_v56  ;;  %9297 = vmatpush1.bf16.msra.mxu1 %v12641_v11  ;;  %v7087_v4 = vpop.f32.mrf.mxu0  ;;  %9255 = vmatprep.subr.bf16.mxu0 %v12646_v41  ;;  %v7160_v8 = vpop.f32.mrf.mxu1  ;;  %v12658_v7 = vld [vmem:[%s17916_s3 + $0x5cc] ss:$16 sps:$4 sm:$0xff]  }
 0x328   : > { %v7247_v63 = vmin.f32 %v17616_v60, 20.0  ;;  %v17633_v35 = vadd.f32 %v17406_v48, %v7204_v37  ;;  %v7205_v17 = vmul.f32 %v17382_v30, %v7177_v51  ;;  %v7088_v18 = vadd.f32 %v7087_v4, %v17535_v46  ;;  %9298 = vmatprep.subr.bf16.mxu1 %v12649_v40  ;;  %v12650_v46 = vld [vmem:[%s17916_s3 + $0x5e8] ss:$16 sps:$4 sm:$0xff]   ;;  %v12661_v61 = vld [vmem:[%s17916_s3 + $0x7cc] ss:$16 sps:$4 sm:$0xff]  }
 0x329   : > { %v12699_v22 = vpop.eup %12698  ;;  %12710 = vpow2.f32 %v7267_v49  ;;  %v7269_v24 = vmul.f32 1.442695, %v7246_v25  ;;  %v7178_v19 = vadd.f32 %v7155_v54, %v18119_v55  ;;  %v7159_v29 = vadd.f32 %v7158_v13, %v7086_v38  ;;  %v18122_v56 = vld [vmem:[#allocation33_spill] sm:$0xff]  ;;  %v7089_v31 = vpop.f32.mrf.mxu0 }
 0x32a   : > { %v7287_v12 = vadd.f32 2.0, %v12699_v22  ;;  %v7271_v1 = vmul.f32 1.442695, %v7247_v63  ;;  %v7248_v20 = vmin.f32 %v17633_v35, 20.0  ;;  %v17643_v47 = vadd.f32 %v17394_v23, %v7205_v17  ;;  %9256 = vmatpush1.bf16.msra.mxu0 %v12644_v27  ;;  %v12656_v13 = vld [vmem:[%s17916_s3 + $0x5c8] ss:$16 sps:$4 sm:$0xff]   ;;  %v7162_v54 = vpop.f32.mrf.mxu1 }
 0x32b   : > { %v12701_v28 = vpop.eup %12700  ;;  %v6946_v53 = vadd.f32 %v17422_v59, %v18120_v33  ;;  %12712 = vpow2.f32 %v7269_v24  ;;  %v7206_v11 = vmul.f32 %v17397_v43, %v7178_v19  ;;  %v7179_v45 = vadd.f32 %v7159_v29, %v18121_v0  ;;  %9299 = vmatpush1.bf16.msra.mxu1 %v12647_v57  ;;  %9257 = vmatprep.subr.bf16.mxu0 %v12652_v52  ;;  %v12664_v4 = vld [vmem:[%s17916_s3 + $0x5ac] ss:$16 sps:$4 sm:$0xff]   ;;  %v7091_v55 = vpop.f32.mrf.mxu0 }
 0x32c   : > { %v17658_v41 = vmul.f32 %v12699_v22, %v7287_v12  ;;  %v7288_v21 = vadd.f32 2.0, %v12701_v28  ;;  %12714 = vpow2.f32 %v7271_v1  ;;  %v7273_v59 = vmul.f32 1.442695, %v7248_v20  ;;  %9300 = vmatprep.subr.bf16.mxu1 %v12655_v16  ;;  %v18124_v1 = vld [vmem:[#allocation29_spill] sm:$0xff] }
 0x32d   : > { %v12703_v2 = vpop.eup %12702  ;;  %v7017_v32 = vadd.f32 %v18122_v56, %v17532_v58  ;;  %v7249_v40 = vmin.f32 %v17643_v47, 20.0  ;;  %v17667_v39 = vadd.f32 %v17406_v48, %v7206_v11  ;;  %v7207_v10 = vmul.f32 %v17382_v30, %v7179_v45  ;;  %v12659_v58 = vld [vmem:[%s17916_s3 + $0x7c8] ss:$16 sps:$4 sm:$0xff]   ;;  %v7164_v11 = vpop.f32.mrf.mxu1  ;;  %v12670_v0 = vld [vmem:[%s17916_s3 + $0x58c] ss:$16 sps:$4 sm:$0xff]  }
 0x32e   : > { %v7335_v37 = vadd.f32 2.0, %v17658_v41  ;;  %v17671_v44 = vmul.f32 %v12701_v28, %v7288_v21  ;;  %v7289_v51 = vadd.f32 2.0, %v12703_v2  ;;  %v7161_v38 = vadd.f32 %v7160_v8, %v7088_v18  ;;  %9258 = vmatpush2.bf16.msra.mxu0 %v12650_v46  ;;  %v12667_v18 = vld [vmem:[%s17916_s3 + $0x7ac] ss:$16 sps:$4 sm:$0xff]   ;;  %v12662_v46 = vld [vmem:[%s17916_s3 + $0x5a8] ss:$16 sps:$4 sm:$0xff]  }
 0x32f   : > { %v12705_v27 = vpop.eup %12704  ;;  %12716 = vpow2.f32 %v7273_v59  ;;  %v7275_v57 = vmul.f32 1.442695, %v7249_v40  ;;  %v7250_v49 = vmin.f32 %v17667_v39, 20.0  ;;  %v17682_v25 = vadd.f32 %v17394_v23, %v7207_v10  ;;  %9301 = vmatpush2.bf16.msra.mxu1 %v12653_v34  ;;  %9259 = vmatprep.subr.bf16.mxu0 %v12658_v7  ;;  %v12665_v28 = vld [vmem:[%s17916_s3 + $0x7a8] ss:$16 sps:$4 sm:$0xff]  }
 0x330   : > { %12718 = vrcp.f32 %v7335_v37  ;;  %v7336_v52 = vadd.f32 2.0, %v17671_v44  ;;  %v17688_v63 = vmul.f32 %v12703_v2, %v7289_v51  ;;  %v7090_v17 = vadd.f32 %v7089_v31, %v7017_v32  ;;  %9302 = vmatprep.subr.bf16.mxu1 %v12661_v61  ;;  %v12673_v21 = vld [vmem:[%s17916_s3 + $0x78c] ss:$16 sps:$4 sm:$0xff]   ;;  %v12668_v37 = vld [vmem:[%s17916_s3 + $0x588] ss:$16 sps:$4 sm:$0xff]  }
 0x331   : > { %v7290_v16 = vadd.f32 2.0, %v12705_v27  ;;  %12720 = vpow2.f32 %v7275_v57  ;;  %v7277_v22 = vmul.f32 1.442695, %v7250_v49  ;;  %v7251_v24 = vmin.f32 %v17682_v25, 20.0  ;;  %v18125_v40 = vld [vmem:[#allocation7_spill] sm:$0xff] }
 0x332   : > { %v12707_v19 = vpop.eup %12706  ;;  %v7019_v29 = vadd.f32 %v17424_v6, %v6946_v53  ;;  %12722 = vrcp.f32 %v7336_v52  ;;  %v7337_v12 = vadd.f32 2.0, %v17688_v63  ;;  %v7180_v20 = vadd.f32 %v7161_v38, %v18124_v1  ;;  %9260 = vmatpush2.bf16.msra.mxu0 %v12656_v13  ;;  %v12671_v13 = vld [vmem:[%s17916_s3 + $0x788] ss:$16 sps:$4 sm:$0xff]  }
 0x333   : > { %v17709_v6 = vmul.f32 %v12705_v27, %v7290_v16  ;;  %v7291_v33 = vadd.f32 2.0, %v12707_v19  ;;  %12724 = vpow2.f32 %v7277_v22  ;;  %v7279_v53 = vmul.f32 1.442695, %v7251_v24  ;;  %9303 = vmatpush2.bf16.msra.mxu1 %v12659_v58  ;;  %9261 = vmatprep.subr.bf16.mxu0 %v12664_v4  ;;  %v12676_v58 = vld [vmem:[%s17916_s3 + $0x56c] ss:$16 sps:$4 sm:$0xff]   ;;  %v18126_v4 = vld [vmem:[#allocation30_spill] sm:$0xff] }
 0x334   : > { %v12709_v45 = vpop.eup %12708  ;;  %12726 = vrcp.f32 %v7337_v12  ;;  %v7208_v8 = vmul.f32 %v17397_v43, %v7180_v20  ;;  %v7092_v34 = vadd.f32 %v7091_v55, %v7019_v29  ;;  %v7163_v7 = vadd.f32 %v7162_v54, %v7090_v17  ;;  %9304 = vmatprep.subr.bf16.mxu1 %v12667_v18  ;;  %v12679_v17 = vld [vmem:[%s17916_s3 + $0x76c] ss:$16 sps:$4 sm:$0xff]   ;;  %v12677_v20 = vld [vmem:[%s17916_s3 + $0x768] ss:$16 sps:$4 sm:$0xff]  }
 0x335   : > { %v7338_v59 = vadd.f32 2.0, %v17709_v6  ;;  %v17719_v61 = vmul.f32 %v12707_v19, %v7291_v33  ;;  %v7292_v2 = vadd.f32 2.0, %v12709_v45  ;;  %12728 = vpow2.f32 %v7279_v53 }
 0x336   : > { %v12711_v56 = vpop.eup %12710  ;;  %v17728_v32 = vadd.f32 %v17406_v48, %v7208_v8  ;;  %v7181_v10 = vadd.f32 %v7163_v7, %v18125_v40  ;;  %v7165_v31 = vadd.f32 %v7164_v11, %v7092_v34  ;;  %9262 = vmatpush2.bf16.msra.mxu0 %v12662_v46  ;;  %v7319_v12 = vmul.f32 %v17658_v41, %v17502_v26  ;;  %v12685_v41 = vld [vmem:[%s17916_s3 + $0x74c] ss:$16 sps:$4 sm:$0xff]  }
 0x337   : > { %12730 = vrcp.f32 %v7338_v59  ;;  %v7339_v51 = vadd.f32 2.0, %v17719_v61  ;;  %v17735_v38 = vmul.f32 %v12709_v45, %v7292_v2  ;;  %9305 = vmatpush2.bf16.msra.mxu1 %v12665_v28  ;;  %9263 = vmatprep.subr.bf16.mxu0 %v12670_v0  ;;  %v7293_v57 = vadd.f32 2.0, %v12711_v56  ;;  %v12683_v59 = vld [vmem:[%s17916_s3 + $0x748] ss:$16 sps:$4 sm:$0xff]  }
 0x338   : > { %v12713_v27 = vpop.eup %12712  ;;  %v7252_v49 = vmin.f32 %v17728_v32, 20.0  ;;  %v7209_v54 = vmul.f32 %v17382_v30, %v7181_v10  ;;  %v7182_v52 = vadd.f32 %v7165_v31, %v18126_v4  ;;  %9306 = vmatprep.subr.bf16.mxu1 %v12673_v21  ;;  %v12674_v30 = vld [vmem:[%s17916_s3 + $0x568] ss:$16 sps:$4 sm:$0xff]   ;;  %v7322_v4 = vmul.f32 %v17709_v6, %v17555_v15  ;;  %v12697_v6 = vld [vmem:[%s17916_s3 + $0x70c] ss:$16 sps:$4 sm:$0xff]  }
 0x339   : > { %v12715_v18 = vpop.eup %12714  ;;  %12732 = vrcp.f32 %v7339_v51  ;;  %v7340_v16 = vadd.f32 2.0, %v17735_v38  ;;  %v7294_v22 = vadd.f32 2.0, %v12713_v27  ;;  %v17751_v24 = vmul.f32 %v12711_v56, %v7293_v57  ;;  %v12680_v21 = vld [vmem:[%s17916_s3 + $0x548] ss:$16 sps:$4 sm:$0xff]  }
 0x33a   : > { %v7295_v55 = vadd.f32 2.0, %v12715_v18  ;;  %v7281_v19 = vmul.f32 1.442695, %v7252_v49  ;;  %v17754_v29 = vadd.f32 %v17394_v23, %v7209_v54  ;;  %9264 = vmatpush2.bf16.msra.mxu0 %v12668_v37  ;;  %v12682_v23 = vld [vmem:[%s17916_s3 + $0x54c] ss:$16 sps:$4 sm:$0xff]   ;;  %v7210_v26 = vmul.f32 %v17397_v43, %v7182_v52 }
 0x33b   : > { %12734 = vrcp.f32 %v7340_v16  ;;  %v17761_v1 = vmul.f32 %v12713_v27, %v7294_v22  ;;  %9307 = vmatpush2.bf16.msra.mxu1 %v12671_v13  ;;  %9265 = vmatprep.subr.bf16.mxu0 %v12676_v58  ;;  %v7341_v28 = vadd.f32 2.0, %v17751_v24  ;;  %v7320_v43 = vmul.f32 %v17671_v44, %v17523_v9  ;;  %v12688_v9 = vld [vmem:[%s17916_s3 + $0x52c] ss:$16 sps:$4 sm:$0xff]  }
 0x33c   : > { %v12717_v46 = vpop.eup %12716  ;;  %v17770_v33 = vmul.f32 %v12715_v18, %v7295_v55  ;;  %12736 = vpow2.f32 %v7281_v19  ;;  %9308 = vmatprep.subr.bf16.mxu1 %v12679_v17  ;;  %v7253_v45 = vmin.f32 %v17754_v29, 20.0  ;;  %v7321_v37 = vmul.f32 %v17688_v63, %v17539_v3  ;;  %v12691_v13 = vld [vmem:[%s17916_s3 + $0x72c] ss:$16 sps:$4 sm:$0xff]   ;;  %v12689_v18 = vld [vmem:[%s17916_s3 + $0x728] ss:$16 sps:$4 sm:$0xff]  }
 0x33d   : > { %v12719_v53 = vpop.eup %12718  ;;  %v7342_v11 = vadd.f32 2.0, %v17761_v1  ;;  %v7296_v0 = vadd.f32 2.0, %v12717_v46  ;;  %12738 = vrcp.f32 %v7341_v28  ;;  %v17801_v51 = vadd.f32 %v17406_v48, %v7210_v26  ;;  %v12686_v48 = vld [vmem:[%s17916_s3 + $0x528] ss:$16 sps:$4 sm:$0xff]   ;;  %v12694_v16 = vld [vmem:[%s17916_s3 + $0x50c] ss:$16 sps:$4 sm:$0xff]  }
 0x33e   : > { %v12721_v8 = vpop.eup %12720  ;;  %v7367_v34 = vmul.f32 %v12719_v53, %v7319_v12  ;;  %v7343_v7 = vadd.f32 2.0, %v17770_v33  ;;  %9266 = vmatpush2.bf16.msra.mxu0 %v12674_v30  ;;  %v7283_v10 = vmul.f32 1.442695, %v7253_v45  ;;  %v7323_v30 = vmul.f32 %v17719_v61, %v17569_v5  ;;  %v12695_v5 = vld [vmem:[%s17916_s3 + $0x708] ss:$16 sps:$4 sm:$0xff]  }
 0x33f   : > { %v12723_v2 = vpop.eup %12722  ;;  %12740 = vrcp.f32 %v7342_v11  ;;  %v17792_v56 = vmul.f32 %v12717_v46, %v7296_v0  ;;  %v7297_v40 = vadd.f32 2.0, %v12721_v8  ;;  %9309 = vmatpush2.bf16.msra.mxu1 %v12677_v20  ;;  %9267 = vmatprep.subr.bf16.mxu0 %v12682_v23  ;;  %v7254_v3 = vmin.f32 %v17801_v51, 20.0  ;;  %v12692_v46 = vld [vmem:[%s17916_s3 + $0x508] ss:$16 sps:$4 sm:$0xff]  }
 0x340   : > { %v12725_v44 = vpop.eup %12724  ;;  %7383 = vst [vmem:[%s17779_s28] sm:$0xff] %v7367_v34  ;;  %v7368_v31 = vmul.f32 %v12723_v2, %v7320_v43  ;;  %12742 = vrcp.f32 %v7343_v7  ;;  %9310 = vmatprep.subr.bf16.mxu1 %v12685_v41  ;;  %v7324_v26 = vmul.f32 %v17735_v38, %v17585_v42  ;;  %v7325_v0 = vmul.f32 %v17751_v24, %v17599_v62  ;;  %v18127_v62 = vld [vmem:[#allocation26_spill] sm:$0xff] }
 0x341   : > { %v12727_v58 = vpop.eup %12726  ;;  %v7344_v27 = vadd.f32 2.0, %v17792_v56  ;;  %v17807_v57 = vmul.f32 %v12721_v8, %v7297_v40  ;;  %v7298_v49 = vadd.f32 2.0, %v12725_v44  ;;  %12744 = vpow2.f32 %v7283_v10  ;;  %v18128_v40 = vld [vmem:[#allocation8_spill] sm:$0xff] }
 0x342   : > { %7384 = vst [vmem:[%s17779_s28 + $0x8] sm:$0xff] %v7368_v31  ;;  %v7369_v54 = vmul.f32 %v12727_v58, %v7321_v37  ;;  %9268 = vmatpush2.bf16.msra.mxu0 %v12680_v21  ;;  %v12729_v63 = vpop.eup %12728  ;;  %v7285_v15 = vmul.f32 1.442695, %v7254_v3  ;;  %v7326_v45 = vmul.f32 %v17761_v1, %v17613_v14  ;;  %v7327_v43 = vmul.f32 %v17770_v33, %v17616_v60 }
 0x343   : > { %12746 = vrcp.f32 %v7344_v27  ;;  %v7345_v52 = vadd.f32 2.0, %v17807_v57  ;;  %v17817_v17 = vmul.f32 %v12725_v44, %v7298_v49  ;;  %9311 = vmatpush2.bf16.msra.mxu1 %v12683_v59  ;;  %9269 = vmatprep.subr.bf16.mxu0 %v12688_v9  ;;  %v7299_v55 = vadd.f32 2.0, %v12729_v63 }
 0x344   : > { %v12731_v22 = vpop.eup %12730  ;;  %7385 = vst [vmem:[%s17779_s28 + $0x10] sm:$0xff] %v7369_v54  ;;  %9312 = vmatprep.subr.bf16.mxu1 %v12691_v13  ;;  %v7328_v14 = vmul.f32 %v17792_v56, %v17633_v35  ;;  %v7329_v9 = vmul.f32 %v17807_v57, %v17643_v47 }
 0x345   : > { %v7370_v19 = vmul.f32 %v12731_v22, %v7322_v4  ;;  %12748 = vrcp.f32 %v7345_v52  ;;  %v7346_v12 = vadd.f32 2.0, %v17817_v17  ;;  %v7315_v23 = vmul.f32 %v12729_v63, %v7299_v55 }
 0x346   : > { %v12733_v20 = vpop.eup %12732  ;;  %12750 = vpow2.f32 %v7285_v15  ;;  %9270 = vmatpush2.bf16.msra.mxu0 %v12686_v48  ;;  %v7330_v58 = vmul.f32 %v17817_v17, %v17667_v39 }
 0x347   : > { %7386 = vst [vmem:[%s17779_s28 + $0x18] sm:$0xff] %v7370_v19  ;;  %v7371_v28 = vmul.f32 %v12733_v20, %v7323_v30  ;;  %12752 = vrcp.f32 %v7346_v12  ;;  %9313 = vmatpush2.bf16.msra.mxu1 %v12689_v18  ;;  %9271 = vmatprep.subr.bf16.mxu0 %v12694_v16  ;;  %v7347_v41 = vadd.f32 2.0, %v7315_v23  ;;  %v7331_v54 = vmul.f32 %v7315_v23, %v17682_v25 }
 0x348   : > { %v12735_v61 = vpop.eup %12734  ;;  %9314 = vmatprep.subr.bf16.mxu1 %v12697_v6 }
 0x349   : > { %v12737_v53 = vpop.eup %12736  ;;  %7387 = vst [vmem:[%s17779_s28 + $0x20] sm:$0xff] %v7371_v28  ;;  %v7372_v11 = vmul.f32 %v12735_v61, %v7324_v26  ;;  %12754 = vrcp.f32 %v7347_v41 }
 0x34a   : > { %v7300_v42 = vadd.f32 2.0, %v12737_v53  ;;  %9272 = vmatpush2.bf16.msra.mxu0 %v12692_v46  ;;  %v12739_v38 = vpop.eup %12738 }
 0x34b   : > { %7388 = vst [vmem:[%s17779_s28 + $0x28] sm:$0xff] %v7372_v11  ;;  %9315 = vmatpush2.bf16.msra.mxu1 %v12695_v5  ;;  %v7373_v34 = vmul.f32 %v12739_v38, %v7325_v0 }
 0x34c   : > { %v12741_v8 = vpop.eup %12740  ;;  %v7316_v7 = vmul.f32 %v12737_v53, %v7300_v42 }
 0x34d   : > { %v12743_v21 = vpop.eup %12742  ;;  %v7374_v59 = vmul.f32 %v12741_v8, %v7326_v45  ;;  %9274 = vmatmul.mubr.bf16.vlgmr.msra.gmra.mxu0 %v18127_v62  ;;  %7389 = vst [vmem:[%s17779_s28 + $0x30] sm:$0xff] %v7373_v34  ;;  %v9017_v55 = vpop.f32.mrf.mxu0 }
 0x34e   : > { %v7375_v24 = vmul.f32 %v12743_v21, %v7327_v43  ;;  %v7348_v2 = vadd.f32 2.0, %v7316_v7  ;;  %9317 = vmatmul.mubr.bf16.vlgmr.msra.gmra.mxu1 %v18128_v40  ;;  %v12745_v10 = vpop.eup %12744  ;;  %v7332_v39 = vmul.f32 %v7316_v7, %v17728_v32  ;;  %v9060_v15 = vpop.f32.mrf.mxu1 }
 0x34f   : > { %7390 = vst [vmem:[%s17779_s28 + $0x38] sm:$0xff] %v7374_v59  ;;  %v7301_v60 = vadd.f32 2.0, %v12745_v10  ;;  %v9019_v6 = vpop.f32.mrf.mxu0  ;;  %v9061_v23 = vadd.f32 %v9060_v15, %v9017_v55 }
 0x350   : > { %v12747_v1 = vpop.eup %12746  ;;  %7391 = vst [vmem:[%s17779_s28 + $0x40] sm:$0xff] %v7375_v24  ;;  %12756 = vrcp.f32 %v7348_v2  ;;  %v9062_v19 = vpop.f32.mrf.mxu1 }
 0x351   : > { %v7376_v33 = vmul.f32 %v12747_v1, %v7328_v14  ;;  %v7317_v31 = vmul.f32 %v12745_v10, %v7301_v60  ;;  %v9021_v30 = vpop.f32.mrf.mxu0  ;;  %v9063_v26 = vadd.f32 %v9062_v19, %v9019_v6 }
 0x352   : > { %v12749_v44 = vpop.eup %12748  ;;  %v9064_v12 = vpop.f32.mrf.mxu1 }
 0x353   : > { %v12751_v37 = vpop.eup %12750  ;;  %7392 = vst [vmem:[%s17779_s28 + $0x48] sm:$0xff] %v7376_v33  ;;  %v7377_v13 = vmul.f32 %v12749_v44, %v7329_v9  ;;  %v7349_v56 = vadd.f32 2.0, %v7317_v31  ;;  %v7333_v52 = vmul.f32 %v7317_v31, %v17754_v29  ;;  %v9023_v32 = vpop.f32.mrf.mxu0  ;;  %v17874_v29 = vld [vmem:[%s17919_s6] sm:$0xf]  ;;  %v9065_v0 = vadd.f32 %v9064_v12, %v9021_v30 }
 0x354   : > { %v12753_v35 = vpop.eup %12752  ;;  %v7302_v27 = vadd.f32 2.0, %v12751_v37  ;;  %v9066_v20 = vpop.f32.mrf.mxu1  ;;  %v9332_v61 = vrot.slane %v17874_v29, %v17352_v50  ;;  %v9336_v45 = vrot.slane %v17874_v29, %v17358_v36 }
 0x355   : > { %7393 = vst [vmem:[%s17779_s28 + $0x50] sm:$0xff] %v7377_v13  ;;  %v7378_v49 = vmul.f32 %v12753_v35, %v7330_v58  ;;  %12758 = vrcp.f32 %v7349_v56  ;;  %v9067_v7 = vadd.f32 %v9066_v20, %v9023_v32 }
 0x356   : > { %v7318_v47 = vmul.f32 %v12751_v37, %v7302_v27  ;;  %v12755_v57 = vpop.eup %12754 }
 0x357   : > { %7394 = vst [vmem:[%s17779_s28 + $0x58] sm:$0xff] %v7378_v49  ;;  %v7379_v3 = vmul.f32 %v12755_v57, %v7331_v54 }
 0x358   : > { %v7350_v48 = vadd.f32 2.0, %v7318_v47  ;;  %v7334_v25 = vmul.f32 %v7318_v47, %v17801_v51  ;;  %v17879_v51 = vld [vmem:[%s17920_s7] sm:$0xf] }
 0x359   : > { %7395 = vst [vmem:[%s17779_s28 + $0x60] sm:$0xff] %v7379_v3  ;;  %v9362_v41 = vrot.slane %v17879_v51, %v17352_v50  ;;  %v9366_v8 = vrot.slane %v17879_v51, %v17358_v36 }
 0x35a   : > { %12760 = vrcp.f32 %v7350_v48 }
 0x35d   : > { %v12757_v63 = vpop.eup %12756 }
 0x35e   : > { %v7380_v4 = vmul.f32 %v12757_v63, %v7332_v39 }
 0x360   : > { %7396 = vst [vmem:[%s17779_s28 + $0x68] sm:$0xff] %v7380_v4 }
 0x362   : > { %v12759_v17 = vpop.eup %12758 }
 0x363   : > { %v7381_v18 = vmul.f32 %v12759_v17, %v7333_v52 }
 0x365   : > { %7397 = vst [vmem:[%s17779_s28 + $0x70] sm:$0xff] %v7381_v18 }
 0x367   : > { %v12761_v16 = vpop.eup %12760 }
 0x368   : > { %v7382_v22 = vmul.f32 %v12761_v16, %v7334_v25 }
 0x36a   : > { %7398 = vst [vmem:[%s17779_s28 + $0x78] sm:$0xff] %v7382_v22 }
 0x38d   : > { %v9103_v46 = vpop.f32.mrf.mxu0  ;;  %v9146_v28 = vpop.f32.mrf.mxu1 }
 0x38e   : > { %v9104_v5 = vadd.f32 %v9103_v46, %v9061_v23 }
 0x38f   : > { %v9105_v53 = vpop.f32.mrf.mxu0  ;;  %v9148_v11 = vpop.f32.mrf.mxu1 }
 0x390   : > { %v9147_v42 = vadd.f32 %v9146_v28, %v9104_v5  ;;  %v9106_v38 = vadd.f32 %v9105_v53, %v9063_v26 }
 0x391   : > { %v9107_v34 = vpop.f32.mrf.mxu0  ;;  %v9150_v43 = vpop.f32.mrf.mxu1 }
 0x392   : > { %v9349_v21 = vmul.f32 %v9332_v61, %v9147_v42  ;;  %v9149_v59 = vadd.f32 %v9148_v11, %v9106_v38  ;;  %v9108_v62 = vadd.f32 %v9107_v34, %v9065_v0 }
 0x393   : > { %v9109_v24 = vpop.f32.mrf.mxu0  ;;  %v9152_v14 = vpop.f32.mrf.mxu1 }
 0x394   : > { %v9379_v2 = vadd.f32 %v9362_v41, %v9349_v21  ;;  %v9350_v50 = vmul.f32 %v9336_v45, %v9149_v59  ;;  %v9151_v40 = vadd.f32 %v9150_v43, %v9108_v62  ;;  %v9110_v10 = vadd.f32 %v9109_v24, %v9067_v7 }
 0x396   : > { %v9387_v1 = vmin.f32 %v9379_v2, 20.0  ;;  %v9380_v60 = vadd.f32 %v9366_v8, %v9350_v50  ;;  %v9353_v33 = vmul.f32 %v9332_v61, %v9151_v40  ;;  %v9153_v9 = vadd.f32 %v9152_v14, %v9110_v10 }
 0x398   : > { %v9395_v44 = vmul.f32 1.442695, %v9387_v1  ;;  %v9388_v31 = vmin.f32 %v9380_v60, 20.0  ;;  %v9383_v37 = vadd.f32 %v9362_v41, %v9353_v33  ;;  %v9354_v36 = vmul.f32 %v9336_v45, %v9153_v9  ;;  %v18129_v45 = vld [vmem:[#allocation24_spill] sm:$0xff] }
 0x399   : > { %v9343_v21 = vsub.s32 3, %v18129_v45 }
 0x39a   : > { %12762 = vpow2.f32 %v9395_v44  ;;  %v9397_v13 = vmul.f32 1.442695, %v9388_v31  ;;  %v9391_v58 = vmin.f32 %v9383_v37, 20.0  ;;  %v9384_v35 = vadd.f32 %v9366_v8, %v9354_v36 }
 0x39b   : > { %v9339_v8 = vsub.s32 2, %v18129_v45  ;;  %v9344_v9 = vrot.slane %v17874_v29, %v9343_v21  ;;  %v9374_v44 = vrot.slane %v17879_v51, %v9343_v21 }
 0x39c   : > { %12764 = vpow2.f32 %v9397_v13  ;;  %v9403_v56 = vmul.f32 1.442695, %v9391_v58  ;;  %v9392_v27 = vmin.f32 %v9384_v35, 20.0 }
 0x39d   : > { %v9340_v50 = vrot.slane %v17874_v29, %v9339_v8  ;;  %v9370_v40 = vrot.slane %v17879_v51, %v9339_v8 }
 0x39e   : > { %12766 = vpow2.f32 %v9403_v56  ;;  %v9405_v49 = vmul.f32 1.442695, %v9392_v27 }
 0x3a0   : > { %12768 = vpow2.f32 %v9405_v49 }
 0x3a7   : > { %v12763_v54 = vpop.eup %12762 }
 0x3a8   : > { %v9411_v47 = vadd.f32 2.0, %v12763_v54 }
 0x3a9   : > { %v12765_v57 = vpop.eup %12764 }
 0x3aa   : > { %v9419_v3 = vmul.f32 %v12763_v54, %v9411_v47  ;;  %v9412_v48 = vadd.f32 2.0, %v12765_v57 }
 0x3ab   : > { %v12767_v39 = vpop.eup %12766 }
 0x3ac   : > { %v9435_v63 = vadd.f32 2.0, %v9419_v3  ;;  %v9420_v4 = vmul.f32 %v12765_v57, %v9412_v48  ;;  %v9415_v52 = vadd.f32 2.0, %v12767_v39  ;;  %v9427_v6 = vmul.f32 %v9419_v3, %v9379_v2 }
 0x3ad   : > { %v12769_v17 = vpop.eup %12768 }
 0x3ae   : > { %12770 = vrcp.f32 %v9435_v63  ;;  %v9436_v18 = vadd.f32 2.0, %v9420_v4  ;;  %v9423_v25 = vmul.f32 %v12767_v39, %v9415_v52  ;;  %v9416_v16 = vadd.f32 2.0, %v12769_v17 }
 0x3af   : > { %v9428_v12 = vmul.f32 %v9420_v4, %v9380_v60 }
 0x3b0   : > { %12772 = vrcp.f32 %v9436_v18  ;;  %v9439_v22 = vadd.f32 2.0, %v9423_v25  ;;  %v9424_v55 = vmul.f32 %v12769_v17, %v9416_v16  ;;  %v9431_v23 = vmul.f32 %v9423_v25, %v9383_v37 }
 0x3b2   : > { %12774 = vrcp.f32 %v9439_v22  ;;  %v9440_v15 = vadd.f32 2.0, %v9424_v55  ;;  %v9432_v26 = vmul.f32 %v9424_v55, %v9384_v35 }
 0x3b4   : > { %12776 = vrcp.f32 %v9440_v15 }
 0x3bb   : > { %v12771_v19 = vpop.eup %12770 }
 0x3bc   : > { %v9451_v30 = vmul.f32 %v12771_v19, %v9427_v6 }
 0x3bd   : > { %v12773_v32 = vpop.eup %12772 }
 0x3be   : > { %9459 = vst [vmem:[%s17894_s19] sm:$0xff] %v9451_v30  ;;  %v9452_v20 = vmul.f32 %v12773_v32, %v9428_v12 }
 0x3bf   : > { %v12775_v46 = vpop.eup %12774 }
 0x3c0   : > { %9460 = vst [vmem:[%s17894_s19 + $0x8] sm:$0xff] %v9452_v20  ;;  %v9455_v28 = vmul.f32 %v12775_v46, %v9431_v23 }
 0x3c1   : > { %v12777_v5 = vpop.eup %12776 }
 0x3c2   : > { %9463 = vst [vmem:[%s17894_s19 + $0x20] sm:$0xff] %v9455_v28  ;;  %v9456_v61 = vmul.f32 %v12777_v5, %v9432_v26 }
 0x3c4   : > { %9464 = vst [vmem:[%s17894_s19 + $0x28] sm:$0xff] %v9456_v61 }
 0x3cd   : > { %v9189_v41 = vpop.f32.mrf.mxu0  ;;  %v9232_v53 = vpop.f32.mrf.mxu1 }
 0x3ce   : > { %v9233_v43 = vadd.f32 %v9232_v53, %v9189_v41 }
 0x3cf   : > { %v9191_v11 = vpop.f32.mrf.mxu0  ;;  %v9234_v0 = vpop.f32.mrf.mxu1 }
 0x3d0   : > { %v9235_v62 = vadd.f32 %v9234_v0, %v9191_v11 }
 0x3d1   : > { %v9193_v42 = vpop.f32.mrf.mxu0  ;;  %v9236_v38 = vpop.f32.mrf.mxu1 }
 0x3d2   : > { %v9237_v14 = vadd.f32 %v9236_v38, %v9193_v42 }
 0x3d3   : > { %v9195_v34 = vpop.f32.mrf.mxu0  ;;  %v9238_v7 = vpop.f32.mrf.mxu1 }
 0x3d4   : > { %v9239_v37 = vadd.f32 %v9238_v7, %v9195_v34 }
 0x40d   : > { %v9275_v59 = vpop.f32.mrf.mxu0 }
 0x40e   : > { %v9276_v24 = vadd.f32 %v9275_v59, %v9233_v43  ;;  %v9318_v2 = vpop.f32.mrf.mxu1 }
 0x40f   : > { %v9277_v10 = vpop.f32.mrf.mxu0 }
 0x410   : > { %v9319_v1 = vadd.f32 %v9318_v2, %v9276_v24  ;;  %v9278_v60 = vadd.f32 %v9277_v10, %v9235_v62  ;;  %v9320_v33 = vpop.f32.mrf.mxu1 }
 0x411   : > { %v9279_v31 = vpop.f32.mrf.mxu0 }
 0x412   : > { %v9351_v36 = vmul.f32 %v9340_v50, %v9319_v1  ;;  %v9321_v13 = vadd.f32 %v9320_v33, %v9278_v60  ;;  %v9280_v58 = vadd.f32 %v9279_v31, %v9237_v14  ;;  %v9322_v35 = vpop.f32.mrf.mxu1 }
 0x413   : > { %v9281_v56 = vpop.f32.mrf.mxu0 }
 0x414   : > { %v9381_v27 = vadd.f32 %v9370_v40, %v9351_v36  ;;  %v9352_v49 = vmul.f32 %v9344_v9, %v9321_v13  ;;  %v9323_v54 = vadd.f32 %v9322_v35, %v9280_v58  ;;  %v9282_v47 = vadd.f32 %v9281_v56, %v9239_v37  ;;  %v9324_v57 = vpop.f32.mrf.mxu1 }
 0x416   : > { %v9389_v3 = vmin.f32 %v9381_v27, 20.0  ;;  %v9382_v48 = vadd.f32 %v9374_v44, %v9352_v49  ;;  %v9355_v39 = vmul.f32 %v9340_v50, %v9323_v54  ;;  %v9325_v63 = vadd.f32 %v9324_v57, %v9282_v47 }
 0x418   : > { %v9399_v4 = vmul.f32 1.442695, %v9389_v3  ;;  %v9390_v29 = vmin.f32 %v9382_v48, 20.0  ;;  %v9385_v52 = vadd.f32 %v9370_v40, %v9355_v39  ;;  %v9356_v51 = vmul.f32 %v9344_v9, %v9325_v63 }
 0x41a   : > { %12778 = vpow2.f32 %v9399_v4  ;;  %v9401_v17 = vmul.f32 1.442695, %v9390_v29  ;;  %v9393_v18 = vmin.f32 %v9385_v52, 20.0  ;;  %v9386_v25 = vadd.f32 %v9374_v44, %v9356_v51 }
 0x41c   : > { %12780 = vpow2.f32 %v9401_v17  ;;  %v9407_v16 = vmul.f32 1.442695, %v9393_v18  ;;  %v9394_v22 = vmin.f32 %v9386_v25, 20.0 }
 0x41e   : > { %12782 = vpow2.f32 %v9407_v16  ;;  %v9409_v55 = vmul.f32 1.442695, %v9394_v22 }
 0x420   : > { %12784 = vpow2.f32 %v9409_v55 }
 0x427   : > { %v12779_v15 = vpop.eup %12778 }
 0x428   : > { %v9413_v6 = vadd.f32 2.0, %v12779_v15 }
 0x429   : > { %v12781_v19 = vpop.eup %12780 }
 0x42a   : > { %v9421_v30 = vmul.f32 %v12779_v15, %v9413_v6  ;;  %v9414_v12 = vadd.f32 2.0, %v12781_v19 }
 0x42b   : > { %v12783_v32 = vpop.eup %12782 }
 0x42c   : > { %v9437_v20 = vadd.f32 2.0, %v9421_v30  ;;  %v9422_v23 = vmul.f32 %v12781_v19, %v9414_v12  ;;  %v9417_v46 = vadd.f32 2.0, %v12783_v32  ;;  %v9429_v0 = vmul.f32 %v9421_v30, %v9381_v27 }
 0x42d   : > { %v12785_v28 = vpop.eup %12784 }
 0x42e   : > { %12786 = vrcp.f32 %v9437_v20  ;;  %v9438_v26 = vadd.f32 2.0, %v9422_v23  ;;  %v9425_v5 = vmul.f32 %v12783_v32, %v9417_v46  ;;  %v9418_v61 = vadd.f32 2.0, %v12785_v28 }
 0x42f   : > { %v9430_v45 = vmul.f32 %v9422_v23, %v9382_v48 }
 0x430   : > { %12788 = vrcp.f32 %v9438_v26  ;;  %v9441_v41 = vadd.f32 2.0, %v9425_v5  ;;  %v9426_v53 = vmul.f32 %v12785_v28, %v9418_v61  ;;  %v9433_v43 = vmul.f32 %v9425_v5, %v9385_v52 }
 0x432   : > { %12790 = vrcp.f32 %v9441_v41  ;;  %v9442_v11 = vadd.f32 2.0, %v9426_v53  ;;  %v9434_v59 = vmul.f32 %v9426_v53, %v9386_v25 }
 0x434   : > { %12792 = vrcp.f32 %v9442_v11 }
 0x43b   : > { %v12787_v42 = vpop.eup %12786 }
 0x43c   : > { %v9453_v38 = vmul.f32 %v12787_v42, %v9429_v0 }
 0x43d   : > { %v12789_v8 = vpop.eup %12788 }
 0x43e   : > { %9461 = vst [vmem:[%s17894_s19 + $0x10] sm:$0xff] %v9453_v38  ;;  %v9454_v34 = vmul.f32 %v12789_v8, %v9430_v45 }
 0x43f   : > { %v12791_v7 = vpop.eup %12790 }
 0x440   : > { %9462 = vst [vmem:[%s17894_s19 + $0x18] sm:$0xff] %v9454_v34  ;;  %v9457_v21 = vmul.f32 %v12791_v7, %v9433_v43 }
 0x441   : > { %v12793_v62 = vpop.eup %12792 }
 0x442   : > { %9465 = vst [vmem:[%s17894_s19 + $0x30] sm:$0xff] %v9457_v21  ;;  %v9458_v24 = vmul.f32 %v12793_v62, %v9434_v59 }
 0x444   : > { %9466 = vst [vmem:[%s17894_s19 + $0x38] sm:$0xff] %v9458_v24 }
 0x445 PF: > { %s20_s30 = sadd.s32 1, %s12824_s30  }
 0x446   : > { %p17_p6 = scmp.ge.s32.totalorder %s20_s30, 4  }
 0x448   :  { %19 = sbr.rel (!%p17_p6) target bundleno = 1 (0x1), region = 101 }

</bundles_post_ra>
